<compile_context>
chip_gen: v6e
topology: v6e:2x2x1
jax: 0.10.0
libtpu: 0.0.40
codegen_flags: <defaults>
</compile_context>

<pallas_src>
import functools

import jax
import jax.numpy as jnp
from jax import lax
from jax.experimental import pallas as pl
from jax.experimental.pallas import tpu as pltpu

CONT_DIM = 5
NUM_CATEGORIES = 4
LEAK = 0.2
BN_EPS = 1e-5

# Explicit VMEM budgets (v7x physical VMEM is 64 MiB; leave headroom).
CONV_VMEM_BYTES = 48 * 1024 * 1024
HEADS_VMEM_BYTES = 32 * 1024 * 1024


def _leaky(x):
    # max(x, 0.2*x) == where(x>0, x, 0.2*x) for 0 < LEAK < 1; one fewer VALU op.
    return jnp.maximum(x, LEAK * x)


def _has_bf16_vpu():
    """True on chips with a bf16 VPU (v6e / v7x); False on v5e and older."""
    try:
        kind = jax.devices()[0].device_kind.lower()
    except Exception:
        return True
    return not any(old in kind for old in ("v2", "v3", "v4", "v5"))


# --------------------------------------------------------------------------
# Kernel 1: 1x1-conv (+ folded BN) + LeakyReLU stack.
# Grid: (batch, n_tiles). Each step maps a (3, tile_n) slab of points through
# the channel MLP 3 -> 64 -> 128 -> 256 -> 512 and writes a (512, tile_n)
# bf16 activation slab. Channels on sublanes, points on lanes, so each 1x1
# conv is a (Cout, Cin) @ (Cin, tile_n) MXU matmul.
# --------------------------------------------------------------------------
def conv_stack_kernel(x_ref, w1, b1, w2, t2, w3, t3, w4, t4, h_ref, *, ep_dtype):
    x = x_ref[0]                                       # (3, tile_n) f32

    # conv1 (64 x 3): 3 broadcast multiply-adds on the VPU (frees the MXU,
    # avoids a degenerate K=3 contraction). Always f32 (inputs are f32).
    w1v = w1[...]                                      # (64, 3) f32
    h = (w1v[:, 0:1] * x[0:1, :]
         + w1v[:, 1:2] * x[1:2, :]
         + w1v[:, 2:3] * x[2:3, :]
         + b1[...])                                    # (64, tile_n) f32
    h = _leaky(h).astype(jnp.bfloat16)

    # conv2..4: bf16 MXU matmuls with f32 accumulation. BN scale is already
    # folded into the weight rows; t* is the folded per-channel shift.
    # The shift/LeakyReLU/downcast epilogue runs in ep_dtype (bf16 on v6e/v7x,
    # f32 on v5e and older where there is no bf16 VALU).
    def layer(w_ref, t_ref, h_in):
        y = jnp.dot(w_ref[...], h_in, preferred_element_type=jnp.float32)
        y = y.astype(ep_dtype) + t_ref[...]
        return _leaky(y).astype(jnp.bfloat16)

    h = layer(w2, t2, h)                               # (128, tile_n)
    h = layer(w3, t3, h)                               # (256, tile_n)
    h = layer(w4, t4, h)                               # (512, tile_n)

    h_ref[0] = h


def conv_stack(x, conv_params, *, tile_n, ep_dtype):
    B, _, N = x.shape
    assert N % tile_n == 0
    n_tiles = N // tile_n
    const = lambda b, j: (0, 0)

    in_specs = [pl.BlockSpec((1, 3, tile_n), lambda b, j: (b, 0, j))]
    in_specs += [pl.BlockSpec(p.shape, const) for p in conv_params]

    kernel = functools.partial(conv_stack_kernel, ep_dtype=ep_dtype)
    return pl.pallas_call(
        kernel,
        out_shape=jax.ShapeDtypeStruct((B, 512, N), jnp.bfloat16),
        grid_spec=pltpu.PrefetchScalarGridSpec(
            num_scalar_prefetch=0,
            grid=(B, n_tiles),
            in_specs=in_specs,
            out_specs=pl.BlockSpec((1, 512, tile_n), lambda b, j: (b, 0, j)),
        ),
        compiler_params=pltpu.CompilerParams(
            dimension_semantics=("parallel", "parallel"),
            vmem_limit_bytes=CONV_VMEM_BYTES),
    )(x, *conv_params)


# --------------------------------------------------------------------------
# Kernel 2: fused FC heads. Single concatenated (10, K) bf16 weight kept in
# (out, K) layout (lane-dense, no 128-lane padding of 1/4/5-wide columns),
# streamed in bf16 and reduced over K with one dot_general per step into a
# resident (1, B, 10) f32 output block. Grid (n_split, K/(n_split*tk)): the
# leading axis is a "parallel" split of the K reduction; the tiny (B, 10)
# bias + sigmoid/softmax epilogue runs in plain JAX.
# TODO(synk): on v7x, consider CORE_PARALLEL on the split axis so both
#             TensorCores stream their own half of the HBM-bound weight.
# --------------------------------------------------------------------------
def heads_kernel(x_ref, w_ref, out_ref):
    k = pl.program_id(1)

    @pl.when(k == 0)
    def _():
        out_ref[...] = jnp.zeros_like(out_ref)

    # (B, tk) x (n_out, tk), contracting dim 1 with dim 1 -> (B, n_out).
    # Same "NT" orientation as q @ k.T in flash attention: both operands stay
    # lane-dense and the MXU consumes the transposed rhs without a copy.
    out_ref[0] += lax.dot_general(
        x_ref[...], w_ref[...],
        dimension_numbers=(((1,), (1,)), ((), ())),
        preferred_element_type=jnp.float32)


def fc_heads_partial(h_flat, w_all, *, n_split, tk):
    B, K = h_flat.shape
    n_out = w_all.shape[0]
    assert K % (n_split * tk) == 0
    inner = K // (n_split * tk)
    kmap = lambda s, k: (0, s * inner + k)

    return pl.pallas_call(
        heads_kernel,
        out_shape=jax.ShapeDtypeStruct((n_split, B, n_out), jnp.float32),
        grid_spec=pltpu.PrefetchScalarGridSpec(
            num_scalar_prefetch=0,
            grid=(n_split, inner),
            in_specs=[pl.BlockSpec((B, tk), kmap),
                      pl.BlockSpec((n_out, tk), kmap)],
            out_specs=pl.BlockSpec((1, B, n_out), lambda s, k: (s, 0, 0)),
        ),
        compiler_params=pltpu.CompilerParams(
            dimension_semantics=("parallel", "arbitrary"),
            vmem_limit_bytes=HEADS_VMEM_BYTES),
    )(h_flat, w_all)


# --------------------------------------------------------------------------
# Tiling helpers.
# --------------------------------------------------------------------------
def _pick_tile_n(N):
    # Bigger tiles amortize the ~0.35 us per-grid-step overhead; cap at 2048 so
    # the double-buffered output block + intermediates stay inside 48 MiB.
    for t in (2048, 1024, 512, 256, 128):
        if N % t == 0:
            return t
    return None   # non-128-multiple N: caller rejects (no giant-block fallback)


def _heads_tiling(K):
    for tk in (65536, 32768, 16384, 8192, 4096, 2048, 1024, 512, 256, 128):
        if K % tk == 0:
            n_tiles = K // tk
            return (2 if n_tiles % 2 == 0 else 1), tk
    return None, None


# --------------------------------------------------------------------------
# Parameter init (deterministic, synthetic) + glue.
# --------------------------------------------------------------------------
def init_raw_params(key, num_categories, cont_dim, num_samples):
    ks = iter(jax.random.split(key, 32))
    nrm = lambda shape, scale: scale * jax.random.normal(next(ks), shape, jnp.float32)

    p = {}
    chans = [3, 64, 128, 256, 512]
    for i in range(4):
        cin, cout = chans[i], chans[i + 1]
        p[f"w{i+1}"] = nrm((cout, cin), 1.0 / jnp.sqrt(cin))
        p[f"b{i+1}"] = nrm((cout,), 0.1)
        if i >= 1:  # BatchNorm after conv2/3/4
            p[f"g{i+1}"] = 1.0 + nrm((cout,), 0.1)
            p[f"be{i+1}"] = nrm((cout,), 0.1)
            p[f"m{i+1}"] = nrm((cout,), 0.1)
            p[f"v{i+1}"] = 1.0 + jnp.abs(nrm((cout,), 0.1))

    K = 512 * num_samples
    p["w_rf"] = nrm((1, K), 1.0 / jnp.sqrt(K))
    p["b_rf"] = nrm((1,), 0.1)
    p["w_cat"] = nrm((num_categories, K), 1.0 / jnp.sqrt(K))
    p["b_cat"] = nrm((num_categories,), 0.1)
    p["w_cont"] = nrm((cont_dim, K), 1.0 / jnp.sqrt(K))
    p["b_cont"] = nrm((cont_dim,), 0.1)
    return p


def fold_bn(gamma, beta, mean, var, conv_bias, eps=BN_EPS):
    scale = gamma / jnp.sqrt(var + eps)
    shift = beta + scale * (conv_bias - mean)
    return scale[:, None], shift[:, None]


def discriminator_forward(x, p, num_samples):
    """x: any shape reshapeable to (-1, 3, num_samples), like the torch view."""
    x = x.reshape(-1, 3, num_samples).astype(jnp.float32)
    B = x.shape[0]
    N = num_samples

    tile_n = _pick_tile_n(N)
    n_split, tk = _heads_tiling(512 * N)
    if tile_n is None or tk is None:
        # TODO(synk): pad N (and the head weights) up to a multiple of 128
        # instead of refusing; for now require lane-aligned num_samples.
        raise ValueError("num_samples must be a multiple of 128 for the Pallas path")

    ep_dtype = jnp.bfloat16 if _has_bf16_vpu() else jnp.float32

    # Fold eval-mode BN into the conv weights (scale into rows, shift as add).
    s2, t2 = fold_bn(p["g2"], p["be2"], p["m2"], p["v2"], p["b2"])
    s3, t3 = fold_bn(p["g3"], p["be3"], p["m3"], p["v3"], p["b3"])
    s4, t4 = fold_bn(p["g4"], p["be4"], p["m4"], p["v4"], p["b4"])
    conv_params = (
        p["w1"], p["b1"][:, None],
        (s2 * p["w2"]).astype(jnp.bfloat16), t2.astype(ep_dtype),
        (s3 * p["w3"]).astype(jnp.bfloat16), t3.astype(ep_dtype),
        (s4 * p["w4"]).astype(jnp.bfloat16), t4.astype(ep_dtype),
    )

    h = conv_stack(x, conv_params, tile_n=tile_n, ep_dtype=ep_dtype)  # (B,512,N) bf16
    # Flatten matches torch (index c*N + n). The host-side reshape pays a small
    # sublane-padding relayout at tiny B; acceptable and always correct.
    h_flat = h.reshape(B, 512 * N)

    # Concatenated heads: rows 0 = real/fake, 1..4 = category, 5..9 = cont.
    w_all = jnp.concatenate([p["w_rf"], p["w_cat"], p["w_cont"]],
                            axis=0).astype(jnp.bfloat16)             # (10, K)
    b_all = jnp.concatenate([p["b_rf"], p["b_cat"], p["b_cont"]], axis=0)

    partials = fc_heads_partial(h_flat, w_all, n_split=n_split, tk=tk)
    logits = jnp.sum(partials, axis=0) + b_all[None, :]               # (B, 10) f32

    n_cat = p["w_cat"].shape[0]
    n_cont = p["w_cont"].shape[0]
    rf = jax.nn.sigmoid(logits[:, 0:1])
    cat = jax.nn.softmax(logits[:, 1:1 + n_cat], axis=1)
    cont = logits[:, 1 + n_cat:1 + n_cat + n_cont]
    return rf, cat, cont


# --------------------------------------------------------------------------
# Pure-JAX f32 reference (mirrors the PyTorch module in eval mode).
# --------------------------------------------------------------------------
def reference_forward(x, p, num_samples):
    x = x.reshape(-1, 3, num_samples).astype(jnp.float32)
    B = x.shape[0]
    hi = lax.Precision.HIGHEST

    def conv1x1(h, w, b):
        return jnp.einsum("oc,bcn->bon", w, h, precision=hi) + b[None, :, None]

    def bn(h, g, beta, m, v):
        return (g[None, :, None] * (h - m[None, :, None])
                / jnp.sqrt(v[None, :, None] + BN_EPS) + beta[None, :, None])

    def lk(h):
        return jnp.where(h > 0, h, LEAK * h)

    h = lk(conv1x1(x, p["w1"], p["b1"]))
    h = lk(bn(conv1x1(h, p["w2"], p["b2"]), p["g2"], p["be2"], p["m2"], p["v2"]))
    h = lk(bn(conv1x1(h, p["w3"], p["b3"]), p["g3"], p["be3"], p["m3"], p["v3"]))
    h = lk(bn(conv1x1(h, p["w4"], p["b4"]), p["g4"], p["be4"], p["m4"], p["v4"]))
    flat = h.reshape(B, -1)
    rf = jax.nn.sigmoid(jnp.einsum("bk,ok->bo", flat, p["w_rf"], precision=hi) + p["b_rf"])
    cat = jax.nn.softmax(jnp.einsum("bk,ok->bo", flat, p["w_cat"], precision=hi) + p["b_cat"], axis=1)
    cont = jnp.einsum("bk,ok->bo", flat, p["w_cont"], precision=hi) + p["b_cont"]
    return rf, cat, cont


if __name__ == "__main__":
    num_samples = 256   # small run consistent with the module (default is 1024)
    batch = 2

    key = jax.random.PRNGKey(0)
    k_x, k_p = jax.random.split(key)
    x = jax.random.normal(k_x, (batch, 3, num_samples), jnp.float32)
    params = init_raw_params(k_p, NUM_CATEGORIES, CONT_DIM, num_samples)

    fwd = jax.jit(functools.partial(discriminator_forward, num_samples=num_samples))
    rf, cat, cont = fwd(x, params)
    jax.block_until_ready((rf, cat, cont))

    rf_ref, cat_ref, cont_ref = reference_forward(x, params, num_samples)

    assert rf.shape == (batch, 1)
    assert cat.shape == (batch, NUM_CATEGORIES)
    assert cont.shape == (batch, CONT_DIM)
    # bf16 MXU inputs / bf16 activation handoff with f32 accumulation ->
    # compare at bf16-level tolerance.
    assert jnp.allclose(rf, rf_ref, rtol=4e-2, atol=4e-2)
    assert jnp.allclose(cat, cat_ref, rtol=4e-2, atol=4e-2)
    assert jnp.allclose(cont, cont_ref, rtol=4e-2, atol=4e-2)

    print("KERNEL_OK")
</pallas_src>

<mosaic_0001>
module attributes {stable_mosaic.version = 11 : i64} {
  func.func @conv_stack_kernel(%arg0: i32, %arg1: i32, %arg2: memref<1x3x256xf32, #tpu.memory_space<vmem>>, %arg3: memref<64x3xf32, #tpu.memory_space<vmem>>, %arg4: memref<64x1xf32, #tpu.memory_space<vmem>>, %arg5: memref<128x64xbf16, #tpu.memory_space<vmem>>, %arg6: memref<128x1xbf16, #tpu.memory_space<vmem>>, %arg7: memref<256x128xbf16, #tpu.memory_space<vmem>>, %arg8: memref<256x1xbf16, #tpu.memory_space<vmem>>, %arg9: memref<512x256xbf16, #tpu.memory_space<vmem>>, %arg10: memref<512x1xbf16, #tpu.memory_space<vmem>>, %arg11: memref<1x512x256xbf16, #tpu.memory_space<vmem>>) attributes {dimension_semantics = [#tpu.dimension_semantics<parallel>, #tpu.dimension_semantics<parallel>], iteration_bounds = array<i64: 2, 1>, scalar_prefetch = 0 : i64, scratch_operands = 0 : i64, tpu.core_type = #tpu.core_type<tc>, window_params = [{transform_indices = @transform_0, window_bounds = array<i64: 1, 3, 256>}, {pipeline_mode = #tpu.pipeline_mode<synchronous>, transform_indices = @transform_1, window_bounds = array<i64: 64, 3>}, {pipeline_mode = #tpu.pipeline_mode<synchronous>, transform_indices = @transform_2, window_bounds = array<i64: 64, 1>}, {pipeline_mode = #tpu.pipeline_mode<synchronous>, transform_indices = @transform_3, window_bounds = array<i64: 128, 64>}, {pipeline_mode = #tpu.pipeline_mode<synchronous>, transform_indices = @transform_4, window_bounds = array<i64: 128, 1>}, {pipeline_mode = #tpu.pipeline_mode<synchronous>, transform_indices = @transform_5, window_bounds = array<i64: 256, 128>}, {pipeline_mode = #tpu.pipeline_mode<synchronous>, transform_indices = @transform_6, window_bounds = array<i64: 256, 1>}, {pipeline_mode = #tpu.pipeline_mode<synchronous>, transform_indices = @transform_7, window_bounds = array<i64: 512, 256>}, {pipeline_mode = #tpu.pipeline_mode<synchronous>, transform_indices = @transform_8, window_bounds = array<i64: 512, 1>}, {transform_indices = @transform_9, window_bounds = array<i64: 1, 512, 256>}]} {
    %c0 = arith.constant 0 : index
    %c0_0 = arith.constant 0 : index
    %c0_1 = arith.constant 0 : index
    %0 = vector.load %arg2[%c0, %c0_0, %c0_1] : memref<1x3x256xf32, #tpu.memory_space<vmem>>, vector<1x3x256xf32>
    %1 = vector.shape_cast %0 : vector<1x3x256xf32> to vector<3x256xf32>
    %c0_2 = arith.constant 0 : index
    %c0_3 = arith.constant 0 : index
    %2 = vector.load %arg3[%c0_2, %c0_3] : memref<64x3xf32, #tpu.memory_space<vmem>>, vector<64x3xf32>
    %3 = vector.extract_strided_slice %2 {offsets = [0, 0], sizes = [64, 1], strides = [1, 1]} : vector<64x3xf32> to vector<64x1xf32>
    %4 = vector.extract_strided_slice %1 {offsets = [0, 0], sizes = [1, 256], strides = [1, 1]} : vector<3x256xf32> to vector<1x256xf32>
    %5 = vector.broadcast %3 : vector<64x1xf32> to vector<64x256xf32>
    %6 = vector.broadcast %4 : vector<1x256xf32> to vector<64x256xf32>
    %7 = arith.mulf %5, %6 : vector<64x256xf32>
    %8 = vector.extract_strided_slice %2 {offsets = [0, 1], sizes = [64, 1], strides = [1, 1]} : vector<64x3xf32> to vector<64x1xf32>
    %9 = vector.extract_strided_slice %1 {offsets = [1, 0], sizes = [1, 256], strides = [1, 1]} : vector<3x256xf32> to vector<1x256xf32>
    %10 = vector.broadcast %8 : vector<64x1xf32> to vector<64x256xf32>
    %11 = vector.broadcast %9 : vector<1x256xf32> to vector<64x256xf32>
    %12 = arith.mulf %10, %11 : vector<64x256xf32>
    %13 = arith.addf %7, %12 : vector<64x256xf32>
    %14 = vector.extract_strided_slice %2 {offsets = [0, 2], sizes = [64, 1], strides = [1, 1]} : vector<64x3xf32> to vector<64x1xf32>
    %15 = vector.extract_strided_slice %1 {offsets = [2, 0], sizes = [1, 256], strides = [1, 1]} : vector<3x256xf32> to vector<1x256xf32>
    %16 = vector.broadcast %14 : vector<64x1xf32> to vector<64x256xf32>
    %17 = vector.broadcast %15 : vector<1x256xf32> to vector<64x256xf32>
    %18 = arith.mulf %16, %17 : vector<64x256xf32>
    %19 = arith.addf %13, %18 : vector<64x256xf32>
    %c0_4 = arith.constant 0 : index
    %c0_5 = arith.constant 0 : index
    %20 = vector.load %arg4[%c0_4, %c0_5] : memref<64x1xf32, #tpu.memory_space<vmem>>, vector<64x1xf32>
    %21 = vector.broadcast %20 : vector<64x1xf32> to vector<64x256xf32>
    %22 = arith.addf %19, %21 : vector<64x256xf32>
    %cst = arith.constant 2.000000e-01 : f32
    %23 = vector.broadcast %cst : f32 to vector<64x256xf32>
    %24 = arith.mulf %23, %22 : vector<64x256xf32>
    %25 = arith.maximumf %22, %24 : vector<64x256xf32>
    %26 = arith.truncf %25 : vector<64x256xf32> to vector<64x256xbf16>
    %c0_6 = arith.constant 0 : index
    %c0_7 = arith.constant 0 : index
    %27 = vector.load %arg5[%c0_6, %c0_7] : memref<128x64xbf16, #tpu.memory_space<vmem>>, vector<128x64xbf16>
    %cst_8 = arith.constant dense<0.000000e+00> : vector<128x256xf32>
    %28 = tpu.matmul %27, %26, %cst_8 {dimension_numbers = #tpu.dot_dimension_numbers<[1], [0], [0], [1], [0, 0, 1, 1], [], []>} : vector<128x64xbf16>, vector<64x256xbf16>, vector<128x256xf32> -> vector<128x256xf32>
    %29 = arith.truncf %28 : vector<128x256xf32> to vector<128x256xbf16>
    %c0_9 = arith.constant 0 : index
    %c0_10 = arith.constant 0 : index
    %30 = vector.load %arg6[%c0_9, %c0_10] : memref<128x1xbf16, #tpu.memory_space<vmem>>, vector<128x1xbf16>
    %31 = vector.broadcast %30 : vector<128x1xbf16> to vector<128x256xbf16>
    %32 = arith.addf %29, %31 : vector<128x256xbf16>
    %cst_11 = arith.constant 2.001950e-01 : bf16
    %33 = vector.broadcast %cst_11 : bf16 to vector<128x256xbf16>
    %34 = arith.mulf %33, %32 : vector<128x256xbf16>
    %35 = arith.maximumf %32, %34 : vector<128x256xbf16>
    %c0_12 = arith.constant 0 : index
    %c0_13 = arith.constant 0 : index
    %36 = vector.load %arg7[%c0_12, %c0_13] : memref<256x128xbf16, #tpu.memory_space<vmem>>, vector<256x128xbf16>
    %cst_14 = arith.constant dense<0.000000e+00> : vector<256x256xf32>
    %37 = tpu.matmul %36, %35, %cst_14 {dimension_numbers = #tpu.dot_dimension_numbers<[1], [0], [0], [1], [0, 0, 1, 1], [], []>} : vector<256x128xbf16>, vector<128x256xbf16>, vector<256x256xf32> -> vector<256x256xf32>
    %38 = arith.truncf %37 : vector<256x256xf32> to vector<256x256xbf16>
    %c0_15 = arith.constant 0 : index
    %c0_16 = arith.constant 0 : index
    %39 = vector.load %arg8[%c0_15, %c0_16] : memref<256x1xbf16, #tpu.memory_space<vmem>>, vector<256x1xbf16>
    %40 = vector.broadcast %39 : vector<256x1xbf16> to vector<256x256xbf16>
    %41 = arith.addf %38, %40 : vector<256x256xbf16>
    %cst_17 = arith.constant 2.001950e-01 : bf16
    %42 = vector.broadcast %cst_17 : bf16 to vector<256x256xbf16>
    %43 = arith.mulf %42, %41 : vector<256x256xbf16>
    %44 = arith.maximumf %41, %43 : vector<256x256xbf16>
    %c0_18 = arith.constant 0 : index
    %c0_19 = arith.constant 0 : index
    %45 = vector.load %arg9[%c0_18, %c0_19] : memref<512x256xbf16, #tpu.memory_space<vmem>>, vector<512x256xbf16>
    %cst_20 = arith.constant dense<0.000000e+00> : vector<512x256xf32>
    %46 = tpu.matmul %45, %44, %cst_20 {dimension_numbers = #tpu.dot_dimension_numbers<[1], [0], [0], [1], [0, 0, 1, 1], [], []>} : vector<512x256xbf16>, vector<256x256xbf16>, vector<512x256xf32> -> vector<512x256xf32>
    %47 = arith.truncf %46 : vector<512x256xf32> to vector<512x256xbf16>
    %c0_21 = arith.constant 0 : index
    %c0_22 = arith.constant 0 : index
    %48 = vector.load %arg10[%c0_21, %c0_22] : memref<512x1xbf16, #tpu.memory_space<vmem>>, vector<512x1xbf16>
    %49 = vector.broadcast %48 : vector<512x1xbf16> to vector<512x256xbf16>
    %50 = arith.addf %47, %49 : vector<512x256xbf16>
    %cst_23 = arith.constant 2.001950e-01 : bf16
    %51 = vector.broadcast %cst_23 : bf16 to vector<512x256xbf16>
    %52 = arith.mulf %51, %50 : vector<512x256xbf16>
    %53 = arith.maximumf %50, %52 : vector<512x256xbf16>
    %c0_24 = arith.constant 0 : index
    %c0_25 = arith.constant 0 : index
    %c0_26 = arith.constant 0 : index
    %54 = vector.load %arg11[%c0_24, %c0_25, %c0_26] : memref<1x512x256xbf16, #tpu.memory_space<vmem>>, vector<1x512x256xbf16>
    %55 = vector.shape_cast %54 : vector<1x512x256xbf16> to vector<512x256xbf16>
    %56 = vector.shape_cast %53 : vector<512x256xbf16> to vector<1x512x256xbf16>
    tpu.vector_store %arg11[%c0_24, %c0_25, %c0_26], %56 {strides = array<i32>} : memref<1x512x256xbf16, #tpu.memory_space<vmem>>, vector<1x512x256xbf16>,
    return
  }
  func.func @transform_0(%arg0: i32, %arg1: i32) -> (i32, i32, i32) {
    %c0_i32 = arith.constant 0 : i32
    %c0_i32_0 = arith.constant 0 : i32
    return %arg0, %c0_i32, %arg1 : i32, i32, i32
  }
  func.func @transform_1(%arg0: i32, %arg1: i32) -> (i32, i32) {
    %c0_i32 = arith.constant 0 : i32
    %c0_i32_0 = arith.constant 0 : i32
    %c0_i32_1 = arith.constant 0 : i32
    return %c0_i32, %c0_i32_0 : i32, i32
  }
  func.func @transform_2(%arg0: i32, %arg1: i32) -> (i32, i32) {
    %c0_i32 = arith.constant 0 : i32
    %c0_i32_0 = arith.constant 0 : i32
    %c0_i32_1 = arith.constant 0 : i32
    return %c0_i32, %c0_i32_0 : i32, i32
  }
  func.func @transform_3(%arg0: i32, %arg1: i32) -> (i32, i32) {
    %c0_i32 = arith.constant 0 : i32
    %c0_i32_0 = arith.constant 0 : i32
    %c0_i32_1 = arith.constant 0 : i32
    return %c0_i32, %c0_i32_0 : i32, i32
  }
  func.func @transform_4(%arg0: i32, %arg1: i32) -> (i32, i32) {
    %c0_i32 = arith.constant 0 : i32
    %c0_i32_0 = arith.constant 0 : i32
    %c0_i32_1 = arith.constant 0 : i32
    return %c0_i32, %c0_i32_0 : i32, i32
  }
  func.func @transform_5(%arg0: i32, %arg1: i32) -> (i32, i32) {
    %c0_i32 = arith.constant 0 : i32
    %c0_i32_0 = arith.constant 0 : i32
    %c0_i32_1 = arith.constant 0 : i32
    return %c0_i32, %c0_i32_0 : i32, i32
  }
  func.func @transform_6(%arg0: i32, %arg1: i32) -> (i32, i32) {
    %c0_i32 = arith.constant 0 : i32
    %c0_i32_0 = arith.constant 0 : i32
    %c0_i32_1 = arith.constant 0 : i32
    return %c0_i32, %c0_i32_0 : i32, i32
  }
  func.func @transform_7(%arg0: i32, %arg1: i32) -> (i32, i32) {
    %c0_i32 = arith.constant 0 : i32
    %c0_i32_0 = arith.constant 0 : i32
    %c0_i32_1 = arith.constant 0 : i32
    return %c0_i32, %c0_i32_0 : i32, i32
  }
  func.func @transform_8(%arg0: i32, %arg1: i32) -> (i32, i32) {
    %c0_i32 = arith.constant 0 : i32
    %c0_i32_0 = arith.constant 0 : i32
    %c0_i32_1 = arith.constant 0 : i32
    return %c0_i32, %c0_i32_0 : i32, i32
  }
  func.func @transform_9(%arg0: i32, %arg1: i32) -> (i32, i32, i32) {
    %c0_i32 = arith.constant 0 : i32
    %c0_i32_0 = arith.constant 0 : i32
    return %arg0, %c0_i32, %arg1 : i32, i32, i32
  }
}

module attributes {stable_mosaic.version = 11 : i64} {
  func.func @heads_kernel(%arg0: i32, %arg1: i32, %arg2: memref<2x65536xbf16, #tpu.memory_space<vmem>>, %arg3: memref<10x65536xbf16, #tpu.memory_space<vmem>>, %arg4: memref<1x2x10xf32, #tpu.memory_space<vmem>>) attributes {dimension_semantics = [#tpu.dimension_semantics<parallel>, #tpu.dimension_semantics<arbitrary>], iteration_bounds = array<i64: 2, 1>, scalar_prefetch = 0 : i64, scratch_operands = 0 : i64, tpu.core_type = #tpu.core_type<tc>, window_params = [{transform_indices = @transform_0, window_bounds = array<i64: 2, 65536>}, {transform_indices = @transform_1, window_bounds = array<i64: 10, 65536>}, {transform_indices = @transform_2, window_bounds = array<i64: 1, 2, 10>}]} {
    %c0_i32 = arith.constant 0 : i32
    %0 = arith.cmpi eq, %arg1, %c0_i32 : i32
    %1 = arith.extui %0 : i1 to i32
    %c0_i32_0 = arith.constant 0 : i32
    %2 = arith.cmpi ne, %1, %c0_i32_0 : i32
    scf.if %2 {
      %cst_10 = arith.constant 0.000000e+00 : f32
      %12 = vector.broadcast %cst_10 : f32 to vector<1x2x10xf32>
      %c0_11 = arith.constant 0 : index
      %c0_12 = arith.constant 0 : index
      %c0_13 = arith.constant 0 : index
      %13 = vector.load %arg4[%c0_11, %c0_12, %c0_13] : memref<1x2x10xf32, #tpu.memory_space<vmem>>, vector<1x2x10xf32>
      tpu.vector_store %arg4[%c0_11, %c0_12, %c0_13], %12 {strides = array<i32>} : memref<1x2x10xf32, #tpu.memory_space<vmem>>, vector<1x2x10xf32>,
    } else {
    }
    %c0 = arith.constant 0 : index
    %c0_1 = arith.constant 0 : index
    %c0_2 = arith.constant 0 : index
    %3 = vector.load %arg4[%c0, %c0_1, %c0_2] : memref<1x2x10xf32, #tpu.memory_space<vmem>>, vector<1x2x10xf32>
    %4 = vector.shape_cast %3 : vector<1x2x10xf32> to vector<2x10xf32>
    %c0_3 = arith.constant 0 : index
    %c0_4 = arith.constant 0 : index
    %5 = vector.load %arg2[%c0_3, %c0_4] : memref<2x65536xbf16, #tpu.memory_space<vmem>>, vector<2x65536xbf16>
    %c0_5 = arith.constant 0 : index
    %c0_6 = arith.constant 0 : index
    %6 = vector.load %arg3[%c0_5, %c0_6] : memref<10x65536xbf16, #tpu.memory_space<vmem>>, vector<10x65536xbf16>
    %cst = arith.constant dense<0.000000e+00> : vector<2x10xf32>
    %7 = tpu.matmul %5, %6, %cst {dimension_numbers = #tpu.dot_dimension_numbers<[1], [1], [0], [0], [0, 0, 1, 0], [], []>} : vector<2x65536xbf16>, vector<10x65536xbf16>, vector<2x10xf32> -> vector<2x10xf32>
    %8 = arith.addf %4, %7 : vector<2x10xf32>
    %c0_7 = arith.constant 0 : index
    %c0_8 = arith.constant 0 : index
    %c0_9 = arith.constant 0 : index
    %9 = vector.load %arg4[%c0_7, %c0_8, %c0_9] : memref<1x2x10xf32, #tpu.memory_space<vmem>>, vector<1x2x10xf32>
    %10 = vector.shape_cast %9 : vector<1x2x10xf32> to vector<2x10xf32>
    %11 = vector.shape_cast %8 : vector<2x10xf32> to vector<1x2x10xf32>
    tpu.vector_store %arg4[%c0_7, %c0_8, %c0_9], %11 {strides = array<i32>} : memref<1x2x10xf32, #tpu.memory_space<vmem>>, vector<1x2x10xf32>,
    return
  }
  func.func @transform_0(%arg0: i32, %arg1: i32) -> (i32, i32) {
    %c1_i32 = arith.constant 1 : i32
    %0 = arith.muli %arg0, %c1_i32 : i32
    %1 = arith.addi %0, %arg1 : i32
    %c0_i32 = arith.constant 0 : i32
    %c0_i32_0 = arith.constant 0 : i32
    return %c0_i32, %1 : i32, i32
  }
  func.func @transform_1(%arg0: i32, %arg1: i32) -> (i32, i32) {
    %c1_i32 = arith.constant 1 : i32
    %0 = arith.muli %arg0, %c1_i32 : i32
    %1 = arith.addi %0, %arg1 : i32
    %c0_i32 = arith.constant 0 : i32
    %c0_i32_0 = arith.constant 0 : i32
    return %c0_i32, %1 : i32, i32
  }
  func.func @transform_2(%arg0: i32, %arg1: i32) -> (i32, i32, i32) {
    %c0_i32 = arith.constant 0 : i32
    %c0_i32_0 = arith.constant 0 : i32
    %c0_i32_1 = arith.constant 0 : i32
    return %arg0, %c0_i32, %c0_i32_0 : i32, i32, i32
  }
}

</mosaic_0001>

<bundles_post_ra>
// kernel: discriminator_forward.2
= control target key start
LH: loop header
LB: loop body
LE: loop exit
PB: predicated region body
PF: predicated region fallthrough
CT: control target
= control target key end

     0   :  { %s5191_s30 = smov 0   ;;  %s5193_s10 = smov 0   ;;  %s6661_s0 = inlined_call_operand.vmem [shape: f32[2,3,256], index: 0, kind: input, shape index: {}]   ;;  %s6662_s1 = inlined_call_operand.vmem [shape: f32[64,3], index: 1, kind: input, shape index: {}]   ;;  %s6663_s2 = inlined_call_operand.vmem [shape: f32[64,1], index: 2, kind: input, shape index: {}]   ;;  %s6664_s3 = inlined_call_operand.vmem [shape: bf16[128,64], index: 3, kind: input, shape index: {}]   ;;  %s6665_s4 = inlined_call_operand.vmem [shape: bf16[128,1], index: 4, kind: input, shape index: {}]   ;;  %s6666_s5 = inlined_call_operand.vmem [shape: bf16[256,128], index: 5, kind: input, shape index: {}]   ;;  %s6667_s6 = inlined_call_operand.vmem [shape: bf16[256,1], index: 6, kind: input, shape index: {}]   ;;  %s6668_s7 = inlined_call_operand.vmem [shape: bf16[512,256], index: 7, kind: input, shape index: {}]   ;;  %s6669_s8 = inlined_call_operand.vmem [shape: bf16[512,1], index: 8, kind: input, shape index: {}]   ;;  %s6670_s9 = inlined_call_operand.vmem [shape: bf16[2,512,256], index: 9, kind: output, shape index: {}]  }
   0x1   :  { %s5195_s11 = smov 0  }
   0x2 LB: > { %s31_s12 = sadd.s32 1, %s5131_s10  ;;  %p4693_p0 = scmp.ge.s32.totalorder %s5135_s11, 1  ;;  %s5135_s11 = sphi %s5195_s11, %s19_s11   ;;  %s5131_s10 = sphi %s5193_s10, %s6801_s10   ;;  %s5127_s30 = sphi %s5191_s30, %s6800_s30  }
   0x3   : > { %p33_p1 = scmp.ge.s32.totalorder %s31_s12, 2  ;;  %p308_p2 = scmp.lt.s32.totalorder %s5135_s11, 3 }
   0x5   : > { %s6803_s12 = smov (%p33_p1, %s31_s12), 0  ;;  %p309_p3 = pnand %p4693_p0, %p308_p2 }
   0x7   : > { %312 = sbr.rel (%p309_p3) target bundleno = 1261 (0x4ed), region = 56 }
   0xc   : > { %v381_v0 = vld [vmem:[%s6662_s1 + $0x30] sm:$0xff]  ;;  %v5137_v1 = vmov 2   ;;  %v5138_v2 = vmov 1   ;;  %v382_v3 = vld [vmem:[%s6662_s1 + $0x38] sm:$0xff]  ;;  %v379_v4 = vld [vmem:[%s6662_s1 + $0x20] sm:$0xff]  ;;  %v6671_v5 = vmov 0   ;;  %v424_v54 = vlaneseq }
   0xd   : > { %4979 = vset.pattern.permute.xlu0 %v5137_v1  ;;  %4978 = vset.pattern.permute.xlu1 %v5138_v2  ;;  %v378_v6 = vld [vmem:[%s6662_s1 + $0x18] sm:$0xff]  ;;  %v377_v7 = vld [vmem:[%s6662_s1 + $0x10] sm:$0xff]  ;;  %v376_v8 = vld [vmem:[%s6662_s1 + $0x8] sm:$0xff]  ;;  %p353_p4 = scmp.lt.s32.totalorder %s5127_s30, 1  ;;  %vm782_vm0 = vcmask 523264  }
   0xe   : > { %565 = vperm.xlu0 %4979, %v381_v0   ;;  %483 = vperm.xlu1 %4978, %v381_v0   ;;  %v380_v9 = vld [vmem:[%s6662_s1 + $0x28] sm:$0xff]  ;;  %v628_v10 = vld [vmem:[%s6663_s2 + $0x30] sm:$0xff]  ;;  %v629_v11 = vld [vmem:[%s6663_s2 + $0x38] sm:$0xff]  ;;  %v5388_v58 = vshrl.u32 %v424_v54, 7 }
   0xf   : > { %839 = vmatprep.mubr.bf16.mxu0 %v6671_v5  ;;  %1400 = vmatprep.mubr.bf16.mxu1 %v6671_v5  ;;  %v375_v12 = vld [vmem:[%s6662_s1] sm:$0xff]  ;;  %v624_v13 = vld [vmem:[%s6663_s2 + $0x10] sm:$0xff]  ;;  %v623_v14 = vld [vmem:[%s6663_s2 + $0x8] sm:$0xff]  ;;  %s6805_s30 = smov (!%p353_p4, %s5127_s30), 1 }
  0x10   : > { %v951_v15 = vld [vmem:[%s6665_s4 + $0x3c] sm:$0xf]  ;;  %v949_v16 = vld [vmem:[%s6665_s4 + $0x34] sm:$0xf]  ;;  %v626_v17 = vld [vmem:[%s6663_s2 + $0x20] sm:$0xff]  ;;  %s4916_s24 = sshll.u32 %s6805_s30, 3 }
  0x11   : > { %v947_v18 = vld [vmem:[%s6665_s4 + $0x2c] sm:$0xf]  ;;  %v945_v20 = vld [vmem:[%s6665_s4 + $0x24] sm:$0xf]  ;;  %v943_v21 = vld [vmem:[%s6665_s4 + $0x1c] sm:$0xf]  ;;  %s360_s14 = scalar_lea.vmem %s6661_s0, %s4916_s24 }
  0x12   : > { %487 = vperm.xlu1 %4978, %v382_v3   ;;  %557 = vperm.xlu0 %4979, %v379_v4   ;;  %v627_v19 = vld [vmem:[%s6663_s2 + $0x28] sm:$0xff]  ;;  %v941_v22 = vld [vmem:[%s6665_s4 + $0x14] sm:$0xf]  ;;  %v937_v24 = vld [vmem:[%s6665_s4 + $0x4] sm:$0xf]  ;;  %v492_v62 = vsub.s32 1, %v5388_v58 }
  0x13   : > { %v939_v23 = vld [vmem:[%s6665_s4 + $0xc] sm:$0xf]  ;;  %v1608_v25 = vld [vmem:[%s6667_s6 + $0x3c] sm:$0xf]  ;;  %v1606_v27 = vld [vmem:[%s6667_s6 + $0x34] sm:$0xf] }
  0x14   : > { %v625_v26 = vld [vmem:[%s6663_s2 + $0x18] sm:$0xff]  ;;  %v622_v28 = vld [vmem:[%s6663_s2] sm:$0xff]  ;;  %v1604_v29 = vld [vmem:[%s6667_s6 + $0x2c] sm:$0xf]  ;;  %v496_v63 = vsub.s32 5, %v5388_v58  ;;  %s4917_s24 = sshll.u32 %s6805_s30, 9 }
  0x15   : > { %v950_v30 = vld [vmem:[%s6665_s4 + $0x38] sm:$0xf]  ;;  %v1602_v31 = vld [vmem:[%s6667_s6 + $0x24] sm:$0xf]  ;;  %v948_v32 = vld [vmem:[%s6665_s4 + $0x30] sm:$0xf]  ;;  %s6528_s27 = scalar_lea.vmem %s6670_s9, %s4917_s24 }
  0x16   : > { %4980 = vset.pattern.permute.xlu1 %v5137_v1  ;;  %553 = vperm.xlu0 %4979, %v378_v6   ;;  %v1600_v33 = vld [vmem:[%s6667_s6 + $0x1c] sm:$0xf]  ;;  %v946_v34 = vld [vmem:[%s6665_s4 + $0x28] sm:$0xf]  ;;  %v1598_v35 = vld [vmem:[%s6667_s6 + $0x14] sm:$0xf] }
  0x17   : > { %569 = vperm.xlu1 %4980, %v382_v3   ;;  %v944_v36 = vld [vmem:[%s6665_s4 + $0x20] sm:$0xf]  ;;  %v1596_v37 = vld [vmem:[%s6667_s6 + $0xc] sm:$0xf]  ;;  %v942_v38 = vld [vmem:[%s6665_s4 + $0x18] sm:$0xf] }
  0x18   : > { %v1594_v39 = vld [vmem:[%s6667_s6 + $0x4] sm:$0xf]  ;;  %v940_v40 = vld [vmem:[%s6665_s4 + $0x10] sm:$0xf]  ;;  %v1624_v41 = vld [vmem:[%s6667_s6 + $0x7c] sm:$0xf] }
  0x19   : > { %v938_v42 = vld [vmem:[%s6665_s4 + $0x8] sm:$0xf]  ;;  %v1622_v43 = vld [vmem:[%s6667_s6 + $0x74] sm:$0xf]  ;;  %v936_v44 = vld [vmem:[%s6665_s4] sm:$0xf] }
  0x1a   : > { %4987 = vset.pattern.permute.xlu0 %v5138_v2  ;;  %v1620_v45 = vld [vmem:[%s6667_s6 + $0x6c] sm:$0xf]  ;;  %v1607_v46 = vld [vmem:[%s6667_s6 + $0x38] sm:$0xf]  ;;  %v1618_v49 = vld [vmem:[%s6667_s6 + $0x64] sm:$0xf] }
  0x1b   : > { %4981 = vset.pattern.permute.xlu1 %v6671_v5  ;;  %467 = vperm.xlu0 %4987, %v377_v7   ;;  %v1605_v50 = vld [vmem:[%s6667_s6 + $0x30] sm:$0xf]  ;;  %v1616_v53 = vld [vmem:[%s6667_s6 + $0x5c] sm:$0xf]  ;;  %v1603_v55 = vld [vmem:[%s6667_s6 + $0x28] sm:$0xf] }
  0x1c   : > { %405 = vperm.xlu1 %4981, %v379_v4   ;;  %v1614_v57 = vld [vmem:[%s6667_s6 + $0x54] sm:$0xf]  ;;  %v1601_v60 = vld [vmem:[%s6667_s6 + $0x20] sm:$0xf]  ;;  %v1612_v61 = vld [vmem:[%s6667_s6 + $0x4c] sm:$0xf] }
  0x1f   : > { %463 = vperm.xlu0 %4987, %v376_v8  }
  0x20   : > { %4982 = vset.pattern.permute.xlu1 %v5138_v2 }
  0x21   : > { %475 = vperm.xlu1 %4982, %v379_v4   ;;  %v430_v4 = vsub.s32 4, %v5388_v58 }
  0x23   : > { %4990 = vset.pattern.permute.xlu0 %v6671_v5 }
  0x24   : > { %415 = vperm.xlu0 %4990, %v381_v0  }
  0x25   : > { %479 = vperm.xlu1 %4982, %v380_v9  }
  0x28   : > { %420 = vperm.xlu0 %4990, %v382_v3   ;;  %v426_v3 = vsub.s32 0, %v5388_v58 }
  0x29   : > { %4983 = vset.pattern.permute.xlu1 %v5137_v1 }
  0x2a   : > { %561 = vperm.xlu1 %4983, %v380_v9  }
  0x2c   : > { %410 = vperm.xlu0 %4990, %v380_v9  }
  0x2e   : > { %4984 = vset.pattern.permute.xlu1 %v6671_v5 }
  0x2f   : > { %662 = vperm.xlu1 %4984, %v628_v10  }
  0x30   : > { %667 = vperm.xlu0 %4990, %v629_v11   ;;  %v1597_v11 = vld [vmem:[%s6667_s6 + $0x10] sm:$0xf] }
  0x33   : > { %395 = vperm.xlu1 %4984, %v377_v7  }
  0x34   : > { %385 = vperm.xlu0 %4990, %v375_v12  }
  0x37   : > { %400 = vperm.xlu1 %4984, %v378_v6  }
  0x38   : > { %642 = vperm.xlu0 %4990, %v624_v13   ;;  %v578_v13 = vsub.s32 6, %v5388_v58 }
  0x3b   : > { %4985 = vset.pattern.permute.xlu1 %v5138_v2 }
  0x3c   : > { %471 = vperm.xlu1 %4985, %v378_v6   ;;  %637 = vperm.xlu0 %4990, %v623_v14  }
  0x40   : > { %4986 = vset.pattern.permute.xlu1 %v5137_v1  ;;  %1134 = vperm.xlu0 %4990, %v951_v15  }
  0x41   : > { %549 = vperm.xlu1 %4986, %v377_v7   ;;  %v1610_v7 = vld [vmem:[%s6667_s6 + $0x44] sm:$0xf] }
  0x44   : > { %1110 = vperm.xlu0 %4990, %v949_v16  }
  0x45   : > { %4988 = vset.pattern.permute.xlu1 %v6671_v5 }
  0x46   : > { %652 = vperm.xlu1 %4988, %v626_v17   ;;  %v3003_v17 = vld [vmem:[%s6669_s8 + $0x4] sm:$0xf] }
  0x48   : > { %1086 = vperm.xlu0 %4990, %v947_v18  }
  0x4a   : > { %657 = vperm.xlu1 %4988, %v627_v19  }
  0x4c   : > { %1062 = vperm.xlu0 %4990, %v945_v20   ;;  %v1595_v20 = vld [vmem:[%s6667_s6 + $0x8] sm:$0xf] }
  0x4e   : > { %390 = vperm.xlu1 %4988, %v376_v8  }
  0x50   : > { %1038 = vperm.xlu0 %4990, %v943_v21  }
  0x52   : > { %4989 = vset.pattern.permute.xlu1 %v5138_v2  ;;  %v374_v2 = vld [vmem:[%s360_s14] sm:$0x77] }
  0x53   : > { %459 = vperm.xlu1 %4989, %v375_v12   ;;  %v497_v9 = vrot.slane %v374_v2, %v496_v63  ;;  %v427_v14 = vrot.slane %v374_v2, %v426_v3  ;;  %v431_v15 = vrot.slane %v374_v2, %v430_v4  ;;  %v3011_v4 = vld [vmem:[%s6669_s8 + $0x24] sm:$0xf] }
  0x54   : > { %1014 = vperm.xlu0 %4990, %v941_v22   ;;  %v579_v22 = vrot.slane %v374_v2, %v578_v13 }
  0x55   : > { %v5429_v19 = vrot.slane %v497_v9, %v492_v62 }
  0x57   : > { %4991 = vset.pattern.permute.xlu1 %v5137_v1  ;;  %v1599_v1 = vld [vmem:[%s6667_s6 + $0x18] sm:$0xf] }
  0x58   : > { %990 = vperm.xlu0 %4990, %v939_v23   ;;  %541 = vperm.xlu1 %4991, %v375_v12   ;;  %v574_v12 = vsub.s32 2, %v5388_v58  ;;  %v5434_v23 = vrot.slane %v427_v14, %v426_v3 }
  0x5a   : > { %v575_v21 = vrot.slane %v374_v2, %v574_v12 }
  0x5c   : > { %966 = vperm.xlu0 %4990, %v937_v24   ;;  %545 = vperm.xlu1 %4991, %v376_v8   ;;  %v493_v8 = vrot.slane %v374_v2, %v492_v62  ;;  %v5436_v24 = vrot.slane %v431_v15, %v426_v3 }
  0x5e   : > { %v5427_v18 = vrot.slane %v493_v8, %v492_v62  ;;  %v1621_v62 = vld [vmem:[%s6667_s6 + $0x70] sm:$0xf] }
  0x60   : > { %1807 = vperm.xlu0 %4990, %v1608_v25   ;;  %4992 = vset.pattern.permute.xlu1 %v6671_v5 }
  0x61   : > { %647 = vperm.xlu1 %4992, %v625_v26  }
  0x64   : > { %1783 = vperm.xlu0 %4990, %v1606_v27  }
  0x65   : > { %632 = vperm.xlu1 %4992, %v622_v28  }
  0x68   : > { %1759 = vperm.xlu0 %4990, %v1604_v29   ;;  %v3005_v29 = vld [vmem:[%s6669_s8 + $0xc] sm:$0xf] }
  0x69   : > { %1122 = vperm.xlu1 %4992, %v950_v30   ;;  %v1593_v30 = vld [vmem:[%s6667_s6] sm:$0xf] }
  0x6c   : > { %1735 = vperm.xlu0 %4990, %v1602_v31  }
  0x6d   : > { %1098 = vperm.xlu1 %4992, %v948_v32  }
  0x70   : > { %1711 = vperm.xlu0 %4990, %v1600_v33   ;;  %v5452_v33 = vrot.slane %v575_v21, %v574_v12 }
  0x71   : > { %1074 = vperm.xlu1 %4992, %v946_v34   ;;  %v5454_v34 = vrot.slane %v579_v22, %v574_v12  ;;  %v3013_v22 = vld [vmem:[%s6669_s8 + $0x2c] sm:$0xf] }
  0x74   : > { %1687 = vperm.xlu0 %4990, %v1598_v35  }
  0x75   : > { %1050 = vperm.xlu1 %4992, %v944_v36  }
  0x78   : > { %1663 = vperm.xlu0 %4990, %v1596_v37  }
  0x79   : > { %1026 = vperm.xlu1 %4992, %v942_v38  }
  0x7c   : > { %1639 = vperm.xlu0 %4990, %v1594_v39  }
  0x7d   : > { %1002 = vperm.xlu1 %4992, %v940_v40  }
  0x80   : > { %1999 = vperm.xlu0 %4990, %v1624_v41  }
  0x81   : > { %978 = vperm.xlu1 %4992, %v938_v42  }
  0x84   : > { %1975 = vperm.xlu0 %4990, %v1622_v43  }
  0x85   : > { %954 = vperm.xlu1 %4992, %v936_v44  }
  0x88   : > { %1951 = vperm.xlu0 %4990, %v1620_v45   ;;  %v3007_v45 = vld [vmem:[%s6669_s8 + $0x14] sm:$0xf] }
  0x89   : > { %v5360_v47 = vpop.permute.xlu1 %483  ;;  %1795 = vperm.xlu1 %4992, %v1607_v46   ;;  %v5363_v48 = vpop.permute.xlu0 %565 }
  0x8a   : > { %v520_v31 = vmul.f32 %v5427_v18, %v5360_v47  ;;  %v521_v32 = vmul.f32 %v5429_v19, %v5360_v47  ;;  %v602_v40 = vmul.f32 %v5452_v33, %v5363_v48  ;;  %v603_v41 = vmul.f32 %v5454_v34, %v5363_v48 }
  0x8c   : > { %1927 = vperm.xlu0 %4990, %v1618_v49   ;;  %v1623_v49 = vld [vmem:[%s6667_s6 + $0x78] sm:$0xf] }
  0x8d   : > { %v488_v51 = vpop.permute.xlu1 %487  ;;  %1771 = vperm.xlu1 %4992, %v1605_v50   ;;  %v5374_v52 = vpop.permute.xlu0 %557 }
  0x8e   : > { %v522_v36 = vmul.f32 %v5427_v18, %v488_v51  ;;  %v523_v37 = vmul.f32 %v5429_v19, %v488_v51 }
  0x90   : > { %1903 = vperm.xlu0 %4990, %v1616_v53  }
  0x91   : > { %1747 = vperm.xlu1 %4992, %v1603_v55   ;;  %v5383_v56 = vpop.permute.xlu0 %553  ;;  %v3009_v55 = vld [vmem:[%s6669_s8 + $0x1c] sm:$0xf] }
  0x92   : > { %v5390_v59 = vpop.permute.xlu1 %569 }
  0x93   : > { %v604_v51 = vmul.f32 %v5452_v33, %v5390_v59  ;;  %v605_v48 = vmul.f32 %v5454_v34, %v5390_v59 }
  0x94   : > { %1879 = vperm.xlu0 %4990, %v1614_v57  }
  0x95   : > { %1723 = vperm.xlu1 %4992, %v1601_v60  }
  0x96   : > { %v5403_v0 = vpop.permute.xlu0 %467 }
  0x97   : > { %v5410_v6 = vpop.permute.xlu1 %405 }
  0x98   : > { %1855 = vperm.xlu0 %4990, %v1612_v61  }
  0x99   : > { %1699 = vperm.xlu1 %4992, %v1599_v1  }
  0x9a   : > { %v5415_v10 = vpop.permute.xlu0 %463 }
  0x9c   : > { %v5422_v16 = vpop.permute.xlu1 %475  ;;  %1831 = vperm.xlu0 %4990, %v1610_v7  }
  0x9d   : > { %1675 = vperm.xlu1 %4992, %v1597_v11   ;;  %v1619_v11 = vld [vmem:[%s6667_s6 + $0x68] sm:$0xf] }
  0x9f   : > { %v416_v25 = vpop.permute.xlu0 %415 }
  0xa0   : > { %v5438_v26 = vpop.permute.xlu1 %479  ;;  %3080 = vperm.xlu0 %4990, %v3003_v17   ;;  %v454_v27 = vmul.f32 %v5434_v23, %v416_v25  ;;  %v455_v28 = vmul.f32 %v5436_v24, %v416_v25 }
  0xa1   : > { %1651 = vperm.xlu1 %4992, %v1595_v20  }
  0xa2   : > { %v536_v42 = vadd.f32 %v520_v31, %v454_v27  ;;  %v537_v43 = vadd.f32 %v521_v32, %v455_v28  ;;  %v1617_v28 = vld [vmem:[%s6667_s6 + $0x60] sm:$0xf]  ;;  %v3015_v31 = vld [vmem:[%s6669_s8 + $0x34] sm:$0xf]  ;;  %v1615_v32 = vld [vmem:[%s6667_s6 + $0x58] sm:$0xf] }
  0xa3   : > { %v421_v35 = vpop.permute.xlu0 %420 }
  0xa4   : > { %v456_v38 = vmul.f32 %v5434_v23, %v421_v35  ;;  %v457_v39 = vmul.f32 %v5436_v24, %v421_v35  ;;  %3104 = vperm.xlu0 %4990, %v3005_v29   ;;  %v618_v53 = vadd.f32 %v602_v40, %v536_v42  ;;  %v619_v54 = vadd.f32 %v603_v41, %v537_v43  ;;  %v1613_v41 = vld [vmem:[%s6667_s6 + $0x50] sm:$0xf] }
  0xa5   : > { %v5464_v44 = vpop.permute.xlu1 %561  ;;  %1627 = vperm.xlu1 %4992, %v1593_v30   ;;  %v451_v40 = vmul.f32 %v5436_v24, %v5410_v6  ;;  %v450_v42 = vmul.f32 %v5434_v23, %v5410_v6  ;;  %v3019_v6 = vld [vmem:[%s6669_s8 + $0x44] sm:$0xf] }
  0xa6   : > { %v538_v46 = vadd.f32 %v522_v36, %v456_v38  ;;  %v539_v47 = vadd.f32 %v523_v37, %v457_v39  ;;  %v517_v37 = vmul.f32 %v5429_v19, %v5422_v16  ;;  %v516_v38 = vmul.f32 %v5427_v18, %v5422_v16  ;;  %v3017_v39 = vld [vmem:[%s6669_s8 + $0x3c] sm:$0xf] }
  0xa7   : > { %v411_v50 = vpop.permute.xlu0 %410  ;;  %v599_v16 = vmul.f32 %v5454_v34, %v5374_v52 }
  0xa8   : > { %3128 = vperm.xlu0 %4990, %v3007_v45   ;;  %v620_v60 = vadd.f32 %v604_v51, %v538_v46  ;;  %v621_v61 = vadd.f32 %v605_v48, %v539_v47  ;;  %v533_v45 = vadd.f32 %v517_v37, %v451_v40  ;;  %v452_v46 = vmul.f32 %v5434_v23, %v411_v50 }
  0xa9   : > { %1987 = vperm.xlu1 %4992, %v1623_v49   ;;  %v453_v47 = vmul.f32 %v5436_v24, %v411_v50  ;;  %v598_v51 = vmul.f32 %v5452_v33, %v5374_v52  ;;  %v532_v48 = vadd.f32 %v516_v38, %v450_v42  ;;  %v1611_v50 = vld [vmem:[%s6667_s6 + $0x48] sm:$0xf] }
  0xaa   : > { %v663_v57 = vpop.permute.xlu1 %662  ;;  %v3004_v38 = vld [vmem:[%s6669_s8 + $0x8] sm:$0xf] }
  0xab   : > { %v682_v63 = vadd.f32 %v663_v57, %v618_v53  ;;  %v683_v1 = vadd.f32 %v663_v57, %v619_v54  ;;  %v668_v2 = vpop.permute.xlu0 %667  ;;  %v518_v53 = vmul.f32 %v5427_v18, %v5438_v26  ;;  %v519_v54 = vmul.f32 %v5429_v19, %v5438_v26 }
  0xac   : > { %v684_v3 = vadd.f32 %v668_v2, %v620_v60  ;;  %v685_v59 = vadd.f32 %v668_v2, %v621_v61  ;;  %3152 = vperm.xlu0 %4990, %v3009_v55   ;;  %v615_v60 = vadd.f32 %v599_v16, %v533_v45  ;;  %v600_v26 = vmul.f32 %v5452_v33, %v5464_v44 }
  0xad   : > { %1963 = vperm.xlu1 %4992, %v1621_v62   ;;  %v699_v7 = vmul.f32 0.2, %v683_v1  ;;  %v698_v8 = vmul.f32 0.2, %v682_v63  ;;  %v534_v57 = vadd.f32 %v518_v53, %v452_v46  ;;  %v535_v52 = vadd.f32 %v519_v54, %v453_v47 }
  0xae   : > { %v5485_v9 = vpop.permute.xlu1 %395  ;;  %v701_v12 = vmul.f32 0.2, %v685_v59  ;;  %v700_v13 = vmul.f32 0.2, %v684_v3  ;;  %v614_v62 = vadd.f32 %v598_v51, %v532_v48  ;;  %v513_v16 = vmul.f32 %v5429_v19, %v5403_v0  ;;  %v3027_v51 = vld [vmem:[%s6669_s8 + $0x64] sm:$0xf] }
  0xaf   : > { %v5490_v14 = vpop.permute.xlu0 %385  ;;  %v715_v15 = vmax.f32 %v683_v1, %v699_v7  ;;  %v714_v17 = vmax.f32 %v682_v63, %v698_v8  ;;  %v3021_v63 = vld [vmem:[%s6669_s8 + $0x4c] sm:$0xf]  ;;  %v601_v1 = vmul.f32 %v5454_v34, %v5464_v44  ;;  %v616_v7 = vadd.f32 %v600_v26, %v534_v57 }
  0xb0   : > { %3176 = vperm.xlu0 %4990, %v3011_v4   ;;  %v717_v20 = vmax.f32 %v685_v59, %v701_v12  ;;  %v716_v21 = vmax.f32 %v684_v3, %v700_v13  ;;  %v1609_v3 = vld [vmem:[%s6667_s6 + $0x40] sm:$0xf]  ;;  %v3023_v12 = vld [vmem:[%s6669_s8 + $0x54] sm:$0xf]  ;;  %v446_v45 = vmul.f32 %v5434_v23, %v5485_v9  ;;  %v447_v46 = vmul.f32 %v5436_v24, %v5485_v9  ;;  %v3029_v57 = vld [vmem:[%s6669_s8 + $0x6c] sm:$0xf] }
  0xb1   : > { %1939 = vperm.xlu1 %4992, %v1619_v11   ;;  %v617_v8 = vadd.f32 %v601_v1, %v535_v52  ;;  %v3008_v52 = vld [vmem:[%s6669_s8 + $0x18] sm:$0xf] }
  0xb2   : > { %v5495_v25 = vpop.permute.xlu1 %400  ;;  %v725_v27 = vpack.c.bf16 %v717_v20, %v715_v15  ;;  %v724_v29 = vpack.c.bf16 %v716_v21, %v714_v17  ;;  %v3002_v17 = vld [vmem:[%s6669_s8] sm:$0xf] }
  0xb3   : > { %v5500_v30 = vpop.permute.xlu0 %642 }
  0xb4   : > { %3200 = vperm.xlu0 %4990, %v3013_v22   ;;  %815 = vmatprep.subr.bf16.mxu0 %v725_v27 }
  0xb5   : > { %1915 = vperm.xlu1 %4992, %v1617_v28   ;;  %816 = vmatpush1.bf16.msra.mxu0 %v724_v29  ;;  %v3025_v29 = vld [vmem:[%s6669_s8 + $0x5c] sm:$0xf] }
  0xb7   : > { %v5508_v35 = vpop.permute.xlu1 %471  ;;  %v5510_v36 = vpop.permute.xlu0 %637 }
  0xb8   : > { %3224 = vperm.xlu0 %4990, %v3015_v31  }
  0xb9   : > { %1891 = vperm.xlu1 %4992, %v1615_v32  }
  0xbb   : > { %v5526_v43 = vpop.permute.xlu0 %1134 }
  0xbc   : > { %v550_v49 = vpop.permute.xlu1 %549  ;;  %3248 = vperm.xlu0 %4990, %v3017_v39  }
  0xbd   : > { %1867 = vperm.xlu1 %4992, %v1613_v41   ;;  %v512_v41 = vmul.f32 %v5427_v18, %v5403_v0  ;;  %v594_v0 = vmul.f32 %v5452_v33, %v550_v49  ;;  %v595_v53 = vmul.f32 %v5454_v34, %v550_v49  ;;  %v515_v49 = vmul.f32 %v5429_v19, %v5508_v35 }
  0xbf   : > { %v5544_v55 = vpop.permute.xlu0 %1110  ;;  %v528_v9 = vadd.f32 %v512_v41, %v446_v45 }
  0xc0   : > { %3272 = vperm.xlu0 %4990, %v3019_v6   ;;  %v3006_v6 = vld [vmem:[%s6669_s8 + $0x10] sm:$0xf] }
  0xc1   : > { %v653_v61 = vpop.permute.xlu1 %652  ;;  %1843 = vperm.xlu1 %4992, %v1611_v50   ;;  %v529_v50 = vadd.f32 %v513_v16, %v447_v46 }
  0xc2   : > { %v679_v2 = vadd.f32 %v653_v61, %v615_v60  ;;  %v678_v59 = vadd.f32 %v653_v61, %v614_v62  ;;  %v514_v60 = vmul.f32 %v5427_v18, %v5508_v35  ;;  %v610_v61 = vadd.f32 %v594_v0, %v528_v9  ;;  %v3031_v35 = vld [vmem:[%s6669_s8 + $0x74] sm:$0xf] }
  0xc3   : > { %v5556_v4 = vpop.permute.xlu0 %1086  ;;  %v611_v62 = vadd.f32 %v595_v53, %v529_v50 }
  0xc4   : > { %3296 = vperm.xlu0 %4990, %v3021_v63   ;;  %v695_v13 = vmul.f32 0.2, %v679_v2  ;;  %v694_v20 = vmul.f32 0.2, %v678_v59 }
  0xc5   : > { %v658_v11 = vpop.permute.xlu1 %657  ;;  %1819 = vperm.xlu1 %4992, %v1609_v3   ;;  %v448_v3 = vmul.f32 %v5434_v23, %v5495_v25 }
  0xc6   : > { %v680_v15 = vadd.f32 %v658_v11, %v616_v7  ;;  %v681_v44 = vadd.f32 %v658_v11, %v617_v8  ;;  %v711_v31 = vmax.f32 %v679_v2, %v695_v13  ;;  %v710_v39 = vmax.f32 %v678_v59, %v694_v20  ;;  %v3010_v11 = vld [vmem:[%s6669_s8 + $0x20] sm:$0xf] }
  0xc7   : > { %v5564_v21 = vpop.permute.xlu0 %1062  ;;  %v449_v59 = vmul.f32 %v5436_v24, %v5495_v25  ;;  %v510_v7 = vmul.f32 %v5427_v18, %v5415_v10  ;;  %v511_v8 = vmul.f32 %v5429_v19, %v5415_v10  ;;  %v675_v25 = vadd.f32 %v5500_v30, %v611_v62 }
  0xc8   : > { %v696_v22 = vmul.f32 0.2, %v680_v15  ;;  %v697_v27 = vmul.f32 0.2, %v681_v44  ;;  %3320 = vperm.xlu0 %4990, %v3023_v12   ;;  %v530_v12 = vadd.f32 %v514_v60, %v448_v3  ;;  %v596_v10 = vmul.f32 %v5452_v33, %v5383_v56 }
  0xc9   : > { %v391_v28 = vpop.permute.xlu1 %390  ;;  %3068 = vperm.xlu1 %4992, %v3002_v17   ;;  %v531_v13 = vadd.f32 %v515_v49, %v449_v59  ;;  %v3037_v59 = vld [vmem:[%s6669_s8 + $0x8c] sm:$0xf] }
  0xca   : > { %v712_v32 = vmax.f32 %v680_v15, %v696_v22  ;;  %v713_v37 = vmax.f32 %v681_v44, %v697_v27  ;;  %v444_v1 = vmul.f32 %v5434_v23, %v391_v28  ;;  %v445_v2 = vmul.f32 %v5436_v24, %v391_v28 }
  0xcb   : > { %v5572_v40 = vpop.permute.xlu0 %1038  ;;  %v674_v15 = vadd.f32 %v5500_v30, %v610_v61  ;;  %v612_v16 = vadd.f32 %v596_v10, %v530_v12 }
  0xcc   : > { %3344 = vperm.xlu0 %4990, %v3025_v29   ;;  %v723_v42 = vpack.c.bf16 %v713_v37, %v711_v31  ;;  %v722_v47 = vpack.c.bf16 %v712_v32, %v710_v39  ;;  %v526_v20 = vadd.f32 %v510_v7, %v444_v1  ;;  %v527_v22 = vadd.f32 %v511_v8, %v445_v2  ;;  %v3033_v32 = vld [vmem:[%s6669_s8 + $0x7c] sm:$0xf] }
  0xcd   : > { %3092 = vperm.xlu1 %4992, %v3004_v38   ;;  %v597_v29 = vmul.f32 %v5454_v34, %v5383_v56  ;;  %v442_v37 = vmul.f32 %v5434_v23, %v5490_v14  ;;  %v443_v38 = vmul.f32 %v5436_v24, %v5490_v14  ;;  %v3012_v56 = vld [vmem:[%s6669_s8 + $0x28] sm:$0xf]  ;;  %v691_v14 = vmul.f32 0.2, %v675_v25 }
  0xce   : > { %v460_v48 = vpop.permute.xlu1 %459  ;;  %817 = vmatprep.subr.bf16.mxu0 %v723_v42 }
  0xcf   : > { %v5590_v54 = vpop.permute.xlu0 %1014  ;;  %818 = vmatpush1.bf16.msra.mxu0 %v722_v47  ;;  %v508_v31 = vmul.f32 %v5427_v18, %v460_v48  ;;  %v509_v30 = vmul.f32 %v5429_v19, %v460_v48  ;;  %v613_v45 = vadd.f32 %v597_v29, %v531_v13  ;;  %v690_v47 = vmul.f32 0.2, %v674_v15 }
  0xd0   : > { %3368 = vperm.xlu0 %4990, %v3027_v51   ;;  %v707_v60 = vmax.f32 %v675_v25, %v691_v14 }
  0xd1   : > { %3116 = vperm.xlu1 %4992, %v3006_v6   ;;  %v524_v51 = vadd.f32 %v508_v31, %v442_v37  ;;  %v525_v48 = vadd.f32 %v509_v30, %v443_v38  ;;  %v706_v49 = vmax.f32 %v674_v15, %v690_v47  ;;  %v4993_v37 = vld [vmem:[%s6664_s3] sm:$0xff]   ;;  %v3020_v38 = vld [vmem:[%s6669_s8 + $0x48] sm:$0xf]  ;;  %v3047_v47 = vld [vmem:[%s6669_s8 + $0xb4] sm:$0xf] }
  0xd3   : > { %v5602_v63 = vpop.permute.xlu0 %990  ;;  %v542_v26 = vpop.permute.xlu1 %541 }
  0xd4   : > { %3392 = vperm.xlu0 %4990, %v3029_v57   ;;  %v590_v18 = vmul.f32 %v5452_v33, %v542_v26  ;;  %v591_v19 = vmul.f32 %v5454_v34, %v542_v26 }
  0xd5   : > { %3140 = vperm.xlu1 %4992, %v3008_v52  }
  0xd6   : > { %v606_v50 = vadd.f32 %v590_v18, %v524_v51  ;;  %v607_v57 = vadd.f32 %v591_v19, %v525_v48  ;;  %v3022_v18 = vld [vmem:[%s6669_s8 + $0x50] sm:$0xf]  ;;  %v3026_v51 = vld [vmem:[%s6669_s8 + $0x60] sm:$0xf] }
  0xd7   : > { %v5622_v44 = vpop.permute.xlu0 %966  ;;  %v546_v17 = vpop.permute.xlu1 %545 }
  0xd8   : > { %v592_v27 = vmul.f32 %v5452_v33, %v546_v17  ;;  %v593_v28 = vmul.f32 %v5454_v34, %v546_v17  ;;  %3416 = vperm.xlu0 %4990, %v3031_v35   ;;  %v3035_v33 = vld [vmem:[%s6669_s8 + $0x84] sm:$0xf]  ;;  %v3014_v34 = vld [vmem:[%s6669_s8 + $0x30] sm:$0xf]  ;;  %v3016_v35 = vld [vmem:[%s6669_s8 + $0x38] sm:$0xf] }
  0xd9   : > { %3164 = vperm.xlu1 %4992, %v3010_v11  }
  0xda   : > { %v608_v39 = vadd.f32 %v592_v27, %v526_v20  ;;  %v609_v41 = vadd.f32 %v593_v28, %v527_v22  ;;  %v3039_v22 = vld [vmem:[%s6669_s8 + $0x94] sm:$0xf]  ;;  %v3018_v28 = vld [vmem:[%s6669_s8 + $0x40] sm:$0xf] }
  0xdb   : > { %v5644_v42 = vpop.permute.xlu0 %1807 }
  0xdc   : > { %6694 = vst [vmem:[#allocation2_spill] sm:$0xff] %v5644_v42  ;;  %v672_v46 = vadd.f32 %v5510_v36, %v608_v39  ;;  %v673_v23 = vadd.f32 %v5510_v36, %v609_v41  ;;  %3440 = vperm.xlu0 %4990, %v3033_v32   ;;  %v648_v24 = vpop.permute.xlu1 %647  ;;  %v3041_v32 = vld [vmem:[%s6669_s8 + $0x9c] sm:$0xf] }
  0xdd   : > { %v676_v6 = vadd.f32 %v648_v24, %v612_v16  ;;  %v677_v0 = vadd.f32 %v648_v24, %v613_v45  ;;  %3188 = vperm.xlu1 %4992, %v3012_v56   ;;  %v3043_v56 = vld [vmem:[%s6669_s8 + $0xa4] sm:$0xf]  ;;  %v3045_v45 = vld [vmem:[%s6669_s8 + $0xac] sm:$0xf] }
  0xde   : > { %v689_v61 = vmul.f32 0.2, %v673_v23  ;;  %v688_v62 = vmul.f32 0.2, %v672_v46 }
  0xdf   : > { %v692_v53 = vmul.f32 0.2, %v676_v6  ;;  %v693_v9 = vmul.f32 0.2, %v677_v0  ;;  %v5654_v36 = vpop.permute.xlu0 %1783 }
  0xe0   : > { %6695 = vst [vmem:[#allocation3_spill] sm:$0xff] %v5654_v36  ;;  %3464 = vperm.xlu0 %4990, %v3035_v33   ;;  %v633_v52 = vpop.permute.xlu1 %632  ;;  %v705_v25 = vmax.f32 %v673_v23, %v689_v61  ;;  %v704_v27 = vmax.f32 %v672_v46, %v688_v62  ;;  %v4994_v46 = vld [vmem:[%s6664_s3 + $0x8] sm:$0xff]   ;;  %v3024_v23 = vld [vmem:[%s6669_s8 + $0x58] sm:$0xf]  ;;  %v4995_v33 = vld [vmem:[%s6664_s3 + $0x10] sm:$0xff]  }
  0xe1   : > { %v708_v26 = vmax.f32 %v676_v6, %v692_v53  ;;  %v709_v1 = vmax.f32 %v677_v0, %v693_v9  ;;  %v670_v2 = vadd.f32 %v633_v52, %v606_v50  ;;  %v671_v3 = vadd.f32 %v633_v52, %v607_v57  ;;  %3212 = vperm.xlu1 %4992, %v3014_v34   ;;  %v3049_v0 = vld [vmem:[%s6669_s8 + $0xbc] sm:$0xf]  ;;  %v3028_v34 = vld [vmem:[%s6669_s8 + $0x68] sm:$0xf]  ;;  %v3051_v50 = vld [vmem:[%s6669_s8 + $0xc4] sm:$0xf] }
  0xe2   : > { %v3030_v57 = vld [vmem:[%s6669_s8 + $0x70] sm:$0xf]  ;;  %v4996_v61 = vld [vmem:[%s6664_s3 + $0x18] sm:$0xff]  }
  0xe3   : > { %v686_v7 = vmul.f32 0.2, %v670_v2  ;;  %v687_v8 = vmul.f32 0.2, %v671_v3  ;;  %v5662_v11 = vpop.permute.xlu0 %1759  ;;  %v721_v12 = vpack.c.bf16 %v709_v1, %v707_v60  ;;  %v720_v13 = vpack.c.bf16 %v708_v26, %v706_v49  ;;  %v3053_v49 = vld [vmem:[%s6669_s8 + $0xcc] sm:$0xf] }
  0xe4   : > { %6696 = vst [vmem:[#allocation4_spill] sm:$0xff] %v5662_v11  ;;  %3488 = vperm.xlu0 %4990, %v3037_v59   ;;  %v5664_v15 = vpop.permute.xlu1 %1122  ;;  %v3032_v62 = vld [vmem:[%s6669_s8 + $0x78] sm:$0xf] }
  0xe5   : > { %v702_v17 = vmax.f32 %v670_v2, %v686_v7  ;;  %v703_v20 = vmax.f32 %v671_v3, %v687_v8  ;;  %3236 = vperm.xlu1 %4992, %v3016_v35   ;;  %819 = vmatprep.subr.bf16.mxu0 %v721_v12  ;;  %v3055_v2 = vld [vmem:[%s6669_s8 + $0xd4] sm:$0xf]  ;;  %v3034_v3 = vld [vmem:[%s6669_s8 + $0x80] sm:$0xf]  ;;  %v3057_v7 = vld [vmem:[%s6669_s8 + $0xdc] sm:$0xf] }
  0xe6   : > { %820 = vmatpush1.bf16.msra.mxu0 %v720_v13  ;;  %v4997_v8 = vld [vmem:[%s6664_s3 + $0x20] sm:$0xff]   ;;  %v3036_v12 = vld [vmem:[%s6669_s8 + $0x88] sm:$0xf] }
  0xe7   : > { %v5672_v10 = vpop.permute.xlu0 %1735  ;;  %v719_v29 = vpack.c.bf16 %v705_v25, %v703_v20  ;;  %v718_v31 = vpack.c.bf16 %v704_v27, %v702_v17  ;;  %v3059_v17 = vld [vmem:[%s6669_s8 + $0xe4] sm:$0xf]  ;;  %v3038_v20 = vld [vmem:[%s6669_s8 + $0x90] sm:$0xf] }
  0xe8   : > { %6697 = vst [vmem:[#allocation5_spill] sm:$0xff] %v5672_v10  ;;  %3512 = vperm.xlu0 %4990, %v3039_v22   ;;  %v5674_v30 = vpop.permute.xlu1 %1098 }
  0xe9   : > { %3260 = vperm.xlu1 %4992, %v3018_v28   ;;  %821 = vmatprep.subr.bf16.mxu0 %v719_v29  ;;  %v3061_v28 = vld [vmem:[%s6669_s8 + $0xec] sm:$0xf] }
  0xea   : > { %822 = vmatpush1.bf16.msra.mxu0 %v718_v31  ;;  %v4998_v29 = vld [vmem:[%s6664_s3 + $0x28] sm:$0xff]   ;;  %v3040_v31 = vld [vmem:[%s6669_s8 + $0x98] sm:$0xf] }
  0xeb   : > { %v5685_v39 = vpop.permute.xlu0 %1711 }
  0xec   : > { %6698 = vst [vmem:[#allocation6_spill] sm:$0xff] %v5685_v39  ;;  %3536 = vperm.xlu0 %4990, %v3041_v32   ;;  %v5687_v41 = vpop.permute.xlu1 %1074 }
  0xed   : > { %3284 = vperm.xlu1 %4992, %v3020_v38   ;;  %4706 = vmatmul.mubr.msk.bf16.vlgmr.msra.gmra.mxu0 %vm782_vm0, %v4993_v37  ;;  %v3063_v38 = vld [vmem:[%s6669_s8 + $0xf4] sm:$0xf] }
  0xee   : > { %849 = vmatprep.mubr.bf16.mxu0 %v6671_v5 }
  0xef   : > { %v5697_v19 = vpop.permute.xlu0 %1687 }
  0xf0   : > { %6699 = vst [vmem:[#allocation7_spill] sm:$0xff] %v5697_v19  ;;  %3560 = vperm.xlu0 %4990, %v3043_v56   ;;  %v5699_v16 = vpop.permute.xlu1 %1050  ;;  %v3042_v56 = vld [vmem:[%s6669_s8 + $0xa0] sm:$0xf] }
  0xf1   : > { %3308 = vperm.xlu1 %4992, %v3022_v18  }
  0xf3   : > { %v5710_v24 = vpop.permute.xlu0 %1663 }
  0xf4   : > { %6700 = vst [vmem:[#allocation8_spill] sm:$0xff] %v5710_v24  ;;  %3584 = vperm.xlu0 %4990, %v3045_v45   ;;  %v5712_v14 = vpop.permute.xlu1 %1026 }
  0xf5   : > { %3332 = vperm.xlu1 %4992, %v3024_v23   ;;  %4707 = vmatmul.mubr.msk.bf16.gmra.mxu0 %vm782_vm0, %v4994_v46  ;;  %v3065_v46 = vld [vmem:[%s6669_s8 + $0xfc] sm:$0xf]  ;;  %v4999_v23 = vld [vmem:[%s6664_s3 + $0x30] sm:$0xff]  }
  0xf6   : > { %859 = vmatprep.mubr.bf16.mxu0 %v6671_v5 }
  0xf7   : > { %v5722_v48 = vpop.permute.xlu0 %1639 }
  0xf8   : > { %6701 = vst [vmem:[#allocation9_spill] sm:$0xff] %v5722_v48  ;;  %3608 = vperm.xlu0 %4990, %v3047_v47   ;;  %v5724_v6 = vpop.permute.xlu1 %1002  ;;  %v3044_v47 = vld [vmem:[%s6669_s8 + $0xa8] sm:$0xf] }
  0xf9   : > { %3356 = vperm.xlu1 %4992, %v3026_v51  }
  0xfb   : > { %v5735_v53 = vpop.permute.xlu0 %1999 }
  0xfc   : > { %6702 = vst [vmem:[#allocation10_spill] sm:$0xff] %v5735_v53  ;;  %3632 = vperm.xlu0 %4990, %v3049_v0   ;;  %v5737_v9 = vpop.permute.xlu1 %978 }
  0xfd   : > { %3380 = vperm.xlu1 %4992, %v3028_v34   ;;  %4708 = vmatmul.mubr.msk.bf16.gmra.mxu0 %vm782_vm0, %v4995_v33  ;;  %v3046_v33 = vld [vmem:[%s6669_s8 + $0xb0] sm:$0xf] }
  0xfe   : > { %869 = vmatprep.mubr.bf16.mxu0 %v6671_v5 }
  0xff   : > { %v5747_v52 = vpop.permute.xlu0 %1975 }
 0x100   : > { %6703 = vst [vmem:[#allocation11_spill] sm:$0xff] %v5747_v52  ;;  %3656 = vperm.xlu0 %4990, %v3051_v50   ;;  %v5749_v60 = vpop.permute.xlu1 %954 }
 0x101   : > { %3404 = vperm.xlu1 %4992, %v3030_v57   ;;  %v5000_v57 = vld [vmem:[%s6664_s3 + $0x38] sm:$0xff]  }
 0x103   : > { %v5760_v26 = vpop.permute.xlu0 %1951 }
 0x104   : > { %6704 = vst [vmem:[#allocation12_spill] sm:$0xff] %v5760_v26  ;;  %3680 = vperm.xlu0 %4990, %v3053_v49   ;;  %v5762_v1 = vpop.permute.xlu1 %1795  ;;  %v3048_v49 = vld [vmem:[%s6669_s8 + $0xb8] sm:$0xf] }
 0x105   : > { %3428 = vperm.xlu1 %4992, %v3032_v62   ;;  %4709 = vmatmul.mubr.msk.bf16.gmra.mxu0 %vm782_vm0, %v4996_v61 }
 0x106   : > { %879 = vmatprep.mubr.bf16.mxu0 %v6671_v5 }
 0x107   : > { %v5772_v59 = vpop.permute.xlu0 %1927 }
 0x108   : > { %6705 = vst [vmem:[#allocation13_spill] sm:$0xff] %v5772_v59  ;;  %3704 = vperm.xlu0 %4990, %v3055_v2   ;;  %v5774_v35 = vpop.permute.xlu1 %1771  ;;  %v3050_v2 = vld [vmem:[%s6669_s8 + $0xc0] sm:$0xf] }
 0x109   : > { %3452 = vperm.xlu1 %4992, %v3034_v3  }
 0x10b   : > { %v5785_v13 = vpop.permute.xlu0 %1903 }
 0x10c   : > { %6706 = vst [vmem:[#allocation14_spill] sm:$0xff] %v5785_v13  ;;  %3728 = vperm.xlu0 %4990, %v3057_v7   ;;  %v5787_v25 = vpop.permute.xlu1 %1747  ;;  %v3052_v7 = vld [vmem:[%s6669_s8 + $0xc8] sm:$0xf] }
 0x10d   : > { %6707 = vst [vmem:[#allocation15_spill] sm:$0xff] %v5787_v25  ;;  %3476 = vperm.xlu1 %4992, %v3036_v12   ;;  %4710 = vmatmul.mubr.msk.bf16.gmra.mxu0 %vm782_vm0, %v4997_v8 }
 0x10e   : > { %889 = vmatprep.mubr.bf16.mxu0 %v6671_v5 }
 0x10f   : > { %v5797_v22 = vpop.permute.xlu0 %1879 }
 0x110   : > { %6708 = vst [vmem:[#allocation16_spill] sm:$0xff] %v5797_v22  ;;  %3752 = vperm.xlu0 %4990, %v3059_v17   ;;  %v5799_v27 = vpop.permute.xlu1 %1723  ;;  %v3054_v17 = vld [vmem:[%s6669_s8 + $0xd0] sm:$0xf] }
 0x111   : > { %6709 = vst [vmem:[#allocation17_spill] sm:$0xff] %v5799_v27  ;;  %3500 = vperm.xlu1 %4992, %v3038_v20  }
 0x113   : > { %v5810_v32 = vpop.permute.xlu0 %1855 }
 0x114   : > { %6710 = vst [vmem:[#allocation18_spill] sm:$0xff] %v5810_v32  ;;  %3776 = vperm.xlu0 %4990, %v3061_v28   ;;  %v5812_v37 = vpop.permute.xlu1 %1699 }
 0x115   : > { %6711 = vst [vmem:[#allocation19_spill] sm:$0xff] %v5812_v37  ;;  %3524 = vperm.xlu1 %4992, %v3040_v31   ;;  %4711 = vmatmul.mubr.msk.bf16.gmra.mxu0 %vm782_vm0, %v4998_v29  ;;  %v3056_v29 = vld [vmem:[%s6669_s8 + $0xd8] sm:$0xf] }
 0x116   : > { %899 = vmatprep.mubr.bf16.mxu0 %v6671_v5 }
 0x117   : > { %v5822_v18 = vpop.permute.xlu0 %1831 }
 0x118   : > { %6712 = vst [vmem:[#allocation20_spill] sm:$0xff] %v5822_v18  ;;  %3800 = vperm.xlu0 %4990, %v3063_v38   ;;  %v5824_v45 = vpop.permute.xlu1 %1675  ;;  %v3058_v38 = vld [vmem:[%s6669_s8 + $0xe0] sm:$0xf] }
 0x119   : > { %6713 = vst [vmem:[#allocation21_spill] sm:$0xff] %v5824_v45  ;;  %3548 = vperm.xlu1 %4992, %v3042_v56  }
 0x11b   : > { %v3081_v51 = vpop.permute.xlu0 %3080 }
 0x11c   : > { %3824 = vperm.xlu0 %4990, %v3065_v46   ;;  %v5835_v0 = vpop.permute.xlu1 %1651 }
 0x11d   : > { %6714 = vst [vmem:[#allocation22_spill] sm:$0xff] %v5835_v0  ;;  %3572 = vperm.xlu1 %4992, %v3044_v47   ;;  %4712 = vmatmul.mubr.msk.bf16.gmra.mxu0 %vm782_vm0, %v4999_v23  ;;  %v3060_v23 = vld [vmem:[%s6669_s8 + $0xe8] sm:$0xf]  ;;  %v5140_v47 = vmov 839922192  }
 0x11e   : > { %909 = vmatprep.mubr.bf16.mxu0 %v6671_v5 }
 0x11f   : > { %v3105_v34 = vpop.permute.xlu0 %3104 }
 0x120   : > { %v5842_v50 = vpop.permute.xlu1 %1627 }
 0x121   : > { %6715 = vst [vmem:[#allocation23_spill] sm:$0xff] %v5842_v50  ;;  %3596 = vperm.xlu1 %4992, %v3046_v33   ;;  %v958_v33 = vunpack.c.l.s4 %v5140_v47 }
 0x123   : > { %v3129_v62 = vpop.permute.xlu0 %3128 }
 0x124   : > { %v5850_v61 = vpop.permute.xlu1 %1987 }
 0x125   : > { %6716 = vst [vmem:[#allocation24_spill] sm:$0xff] %v5850_v61  ;;  %3620 = vperm.xlu1 %4992, %v3048_v49   ;;  %4713 = vmatmul.mubr.msk.bf16.gmra.mxu0 %vm782_vm0, %v5000_v57 }
 0x127   : > { %v3153_v8 = vpop.permute.xlu0 %3152 }
 0x128   : > { %v5856_v3 = vpop.permute.xlu1 %1963 }
 0x129   : > { %6717 = vst [vmem:[#allocation25_spill] sm:$0xff] %v5856_v3  ;;  %3644 = vperm.xlu1 %4992, %v3050_v2   ;;  %v3062_v2 = vld [vmem:[%s6669_s8 + $0xf0] sm:$0xf] }
 0x12b   : > { %v3177_v28 = vpop.permute.xlu0 %3176 }
 0x12c   : > { %v5861_v12 = vpop.permute.xlu1 %1939 }
 0x12d   : > { %6718 = vst [vmem:[#allocation26_spill] sm:$0xff] %v5861_v12  ;;  %3668 = vperm.xlu1 %4992, %v3052_v7   ;;  %v959_v7 = vunpack.c.0.s8 %v958_v33 }
 0x12f   : > { %v3201_v56 = vpop.permute.xlu0 %3200 }
 0x130   : > { %v5866_v20 = vpop.permute.xlu1 %1915 }
 0x131   : > { %6719 = vst [vmem:[#allocation27_spill] sm:$0xff] %v5866_v20  ;;  %3692 = vperm.xlu1 %4992, %v3054_v17  }
 0x133   : > { %v3225_v49 = vpop.permute.xlu0 %3224 }
 0x134   : > { %v5871_v31 = vpop.permute.xlu1 %1891 }
 0x135   : > { %6720 = vst [vmem:[#allocation28_spill] sm:$0xff] %v5871_v31  ;;  %3716 = vperm.xlu1 %4992, %v3056_v29   ;;  %v3064_v29 = vld [vmem:[%s6669_s8 + $0xf8] sm:$0xf] }
 0x137   : > { %v3249_v47 = vpop.permute.xlu0 %3248 }
 0x138   : > { %v5876_v46 = vpop.permute.xlu1 %1867 }
 0x139   : > { %6721 = vst [vmem:[#allocation29_spill] sm:$0xff] %v5876_v46  ;;  %3740 = vperm.xlu1 %4992, %v3058_v38   ;;  %v5892_v38 = vsub.s32 %v959_v7, %v5388_v58 }
 0x13b   : > { %v3137_v58 = vrot.slane %v3129_v62, %v5892_v38  ;;  %v1131_v3 = vrot.slane %v5664_v15, %v5892_v38  ;;  %v1107_v61 = vrot.slane %v5674_v30, %v5892_v38  ;;  %v1143_v50 = vrot.slane %v5526_v43, %v5892_v38 }
 0x13c   : > { %v5881_v57 = vpop.permute.xlu1 %1843  ;;  %v1119_v0 = vrot.slane %v5544_v55, %v5892_v38  ;;  %v1083_v39 = vrot.slane %v5687_v41, %v5892_v38  ;;  %v1095_v15 = vrot.slane %v5556_v4, %v5892_v38  ;;  %v1059_v55 = vrot.slane %v5699_v16, %v5892_v38 }
 0x13d   : > { %6722 = vst [vmem:[#allocation30_spill] sm:$0xff] %v5881_v57  ;;  %3764 = vperm.xlu1 %4992, %v3060_v23   ;;  %v3089_v23 = vrot.slane %v3081_v51, %v5892_v38  ;;  %v3273_v57 = vpop.permute.xlu0 %3272  ;;  %v4721_v19 = vcombine.low %v1131_v3, %v1143_v50 }
 0x13e   : > { %v4720_v37 = vcombine.low %v1107_v61, %v1119_v0  ;;  %v4719_v42 = vcombine.low %v1083_v39, %v1095_v15  ;;  %v1035_v39 = vrot.slane %v5712_v14, %v5892_v38  ;;  %v1011_v14 = vrot.slane %v5724_v6, %v5892_v38 }
 0x13f   : > { %v963_v15 = vrot.slane %v5749_v60, %v5892_v38 }
 0x140   : > { %v5886_v17 = vpop.permute.xlu1 %1819 }
 0x141   : > { %6723 = vst [vmem:[#allocation31_spill] sm:$0xff] %v5886_v17  ;;  %3788 = vperm.xlu1 %4992, %v3062_v2   ;;  %v3113_v17 = vrot.slane %v3105_v34, %v5892_v38  ;;  %v3297_v51 = vpop.permute.xlu0 %3296 }
 0x144   : > { %v3069_v5 = vpop.permute.xlu1 %3068 }
 0x145   : > { %v3077_v18 = vrot.slane %v3069_v5, %v5892_v38  ;;  %3812 = vperm.xlu1 %4992, %v3064_v29  }
 0x147   : > { %v5896_v32 = vcombine.low %v3077_v18, %v3089_v23  ;;  %v3161_v18 = vrot.slane %v3153_v8, %v5892_v38 }
 0x148   : > { %v3093_v33 = vpop.permute.xlu1 %3092 }
 0x149   : > { %6724 = vst [vmem:[#allocation32_spill] sm:$0xff] %v5896_v32  ;;  %v3101_v2 = vrot.slane %v3093_v33, %v5892_v38  ;;  %v3185_v33 = vrot.slane %v3177_v28, %v5892_v38 }
 0x14b   : > { %v5900_v46 = vcombine.low %v3101_v2, %v3113_v17  ;;  %v3321_v2 = vpop.permute.xlu0 %3320 }
 0x14c   : > { %v3117_v22 = vpop.permute.xlu1 %3116 }
 0x14d   : > { %6725 = vst [vmem:[#allocation33_spill] sm:$0xff] %v5900_v46  ;;  %v3125_v7 = vrot.slane %v3117_v22, %v5892_v38  ;;  %v3209_v22 = vrot.slane %v3201_v56, %v5892_v38 }
 0x14f   : > { %v5904_v31 = vcombine.low %v3125_v7, %v3137_v58  ;;  %v3345_v8 = vpop.permute.xlu0 %3344 }
 0x150   : > { %v3141_v5 = vpop.permute.xlu1 %3140 }
 0x151   : > { %6726 = vst [vmem:[#allocation34_spill] sm:$0xff] %v5904_v31  ;;  %v3149_v29 = vrot.slane %v3141_v5, %v5892_v38  ;;  %v3233_v5 = vrot.slane %v3225_v49, %v5892_v38 }
 0x153   : > { %v5908_v23 = vcombine.low %v3149_v29, %v3161_v18 }
 0x154   : > { %v3165_v34 = vpop.permute.xlu1 %3164 }
 0x155   : > { %6727 = vst [vmem:[#allocation35_spill] sm:$0xff] %v5908_v23  ;;  %v3173_v17 = vrot.slane %v3165_v34, %v5892_v38  ;;  %v3257_v34 = vrot.slane %v3249_v47, %v5892_v38 }
 0x157   : > { %v5912_v46 = vcombine.low %v3173_v17, %v3185_v33  ;;  %v3369_v17 = vpop.permute.xlu0 %3368 }
 0x158   : > { %v3189_v62 = vpop.permute.xlu1 %3188 }
 0x159   : > { %6728 = vst [vmem:[#allocation36_spill] sm:$0xff] %v5912_v46  ;;  %v3197_v58 = vrot.slane %v3189_v62, %v5892_v38  ;;  %v3281_v62 = vrot.slane %v3273_v57, %v5892_v38 }
 0x15b   : > { %v5916_v7 = vcombine.low %v3197_v58, %v3209_v22  ;;  %v3393_v49 = vpop.permute.xlu0 %3392 }
 0x15c   : > { %v3213_v31 = vpop.permute.xlu1 %3212 }
 0x15d   : > { %6729 = vst [vmem:[#allocation37_spill] sm:$0xff] %v5916_v7  ;;  %v3221_v18 = vrot.slane %v3213_v31, %v5892_v38  ;;  %v3305_v31 = vrot.slane %v3297_v51, %v5892_v38 }
 0x15f   : > { %v5920_v29 = vcombine.low %v3221_v18, %v3233_v5 }
 0x160   : > { %v3237_v28 = vpop.permute.xlu1 %3236 }
 0x161   : > { %6730 = vst [vmem:[#allocation38_spill] sm:$0xff] %v5920_v29  ;;  %v3245_v33 = vrot.slane %v3237_v28, %v5892_v38  ;;  %v3329_v28 = vrot.slane %v3321_v2, %v5892_v38 }
 0x163   : > { %v5924_v46 = vcombine.low %v3245_v33, %v3257_v34  ;;  %v3417_v33 = vpop.permute.xlu0 %3416 }
 0x164   : > { %v3261_v56 = vpop.permute.xlu1 %3260 }
 0x165   : > { %6731 = vst [vmem:[#allocation39_spill] sm:$0xff] %v5924_v46  ;;  %v3269_v22 = vrot.slane %v3261_v56, %v5892_v38  ;;  %v3353_v56 = vrot.slane %v3345_v8, %v5892_v38 }
 0x167   : > { %v5928_v58 = vcombine.low %v3269_v22, %v3281_v62  ;;  %v3441_v51 = vpop.permute.xlu0 %3440 }
 0x168   : > { %v3285_v7 = vpop.permute.xlu1 %3284 }
 0x169   : > { %6732 = vst [vmem:[#allocation40_spill] sm:$0xff] %v5928_v58  ;;  %v3293_v5 = vrot.slane %v3285_v7, %v5892_v38  ;;  %v3377_v7 = vrot.slane %v3369_v17, %v5892_v38 }
 0x16b   : > { %v5932_v18 = vcombine.low %v3293_v5, %v3305_v31 }
 0x16c   : > { %v3309_v47 = vpop.permute.xlu1 %3308 }
 0x16d   : > { %6733 = vst [vmem:[#allocation41_spill] sm:$0xff] %v5932_v18  ;;  %v3317_v34 = vrot.slane %v3309_v47, %v5892_v38  ;;  %v3401_v47 = vrot.slane %v3393_v49, %v5892_v38 }
 0x16f   : > { %v5936_v46 = vcombine.low %v3317_v34, %v3329_v28  ;;  %v3465_v34 = vpop.permute.xlu0 %3464 }
 0x170   : > { %v3333_v57 = vpop.permute.xlu1 %3332 }
 0x171   : > { %6734 = vst [vmem:[#allocation42_spill] sm:$0xff] %v5936_v46  ;;  %v3341_v62 = vrot.slane %v3333_v57, %v5892_v38  ;;  %v3425_v57 = vrot.slane %v3417_v33, %v5892_v38 }
 0x173   : > { %v5940_v22 = vcombine.low %v3341_v62, %v3353_v56  ;;  %v3489_v17 = vpop.permute.xlu0 %3488 }
 0x174   : > { %v3357_v58 = vpop.permute.xlu1 %3356 }
 0x175   : > { %6735 = vst [vmem:[#allocation43_spill] sm:$0xff] %v5940_v22  ;;  %v3365_v31 = vrot.slane %v3357_v58, %v5892_v38  ;;  %v3449_v58 = vrot.slane %v3441_v51, %v5892_v38 }
 0x177   : > { %v5944_v5 = vcombine.low %v3365_v31, %v3377_v7 }
 0x178   : > { %v3381_v2 = vpop.permute.xlu1 %3380 }
 0x179   : > { %6736 = vst [vmem:[#allocation44_spill] sm:$0xff] %v5944_v5  ;;  %v3389_v28 = vrot.slane %v3381_v2, %v5892_v38  ;;  %v3473_v2 = vrot.slane %v3465_v34, %v5892_v38 }
 0x17b   : > { %v5948_v46 = vcombine.low %v3389_v28, %v3401_v47  ;;  %v3513_v28 = vpop.permute.xlu0 %3512 }
 0x17c   : > { %v3405_v8 = vpop.permute.xlu1 %3404 }
 0x17d   : > { %6737 = vst [vmem:[#allocation45_spill] sm:$0xff] %v5948_v46  ;;  %v3413_v56 = vrot.slane %v3405_v8, %v5892_v38  ;;  %v3497_v8 = vrot.slane %v3489_v17, %v5892_v38 }
 0x17f   : > { %v5952_v62 = vcombine.low %v3413_v56, %v3425_v57  ;;  %v3537_v51 = vpop.permute.xlu0 %3536 }
 0x180   : > { %v3429_v22 = vpop.permute.xlu1 %3428 }
 0x181   : > { %6738 = vst [vmem:[#allocation46_spill] sm:$0xff] %v5952_v62  ;;  %v3437_v7 = vrot.slane %v3429_v22, %v5892_v38  ;;  %v3521_v22 = vrot.slane %v3513_v28, %v5892_v38 }
 0x183   : > { %v5956_v31 = vcombine.low %v3437_v7, %v3449_v58 }
 0x184   : > { %v3453_v49 = vpop.permute.xlu1 %3452 }
 0x185   : > { %6739 = vst [vmem:[#allocation47_spill] sm:$0xff] %v5956_v31  ;;  %v3461_v47 = vrot.slane %v3453_v49, %v5892_v38  ;;  %v3545_v49 = vrot.slane %v3537_v51, %v5892_v38 }
 0x187   : > { %v5960_v46 = vcombine.low %v3461_v47, %v3473_v2  ;;  %v3561_v47 = vpop.permute.xlu0 %3560 }
 0x188   : > { %v3477_v33 = vpop.permute.xlu1 %3476 }
 0x189   : > { %6740 = vst [vmem:[#allocation48_spill] sm:$0xff] %v5960_v46  ;;  %v3485_v57 = vrot.slane %v3477_v33, %v5892_v38  ;;  %v3569_v33 = vrot.slane %v3561_v47, %v5892_v38 }
 0x18b   : > { %v5964_v56 = vcombine.low %v3485_v57, %v3497_v8 }
 0x18c   : > { %v3501_v62 = vpop.permute.xlu1 %3500 }
 0x18d   : > { %6741 = vst [vmem:[#allocation49_spill] sm:$0xff] %v5964_v56  ;;  %v3509_v58 = vrot.slane %v3501_v62, %v5892_v38 }
 0x18f   : > { %v5968_v7 = vcombine.low %v3509_v58, %v3521_v22 }
 0x190   : > { %v3525_v34 = vpop.permute.xlu1 %3524 }
 0x191   : > { %6742 = vst [vmem:[#allocation50_spill] sm:$0xff] %v5968_v7  ;;  %v3533_v2 = vrot.slane %v3525_v34, %v5892_v38 }
 0x193   : > { %v5972_v46 = vcombine.low %v3533_v2, %v3545_v49 }
 0x194   : > { %v3549_v17 = vpop.permute.xlu1 %3548 }
 0x195   : > { %6743 = vst [vmem:[#allocation51_spill] sm:$0xff] %v5972_v46  ;;  %v3557_v8 = vrot.slane %v3549_v17, %v5892_v38 }
 0x197   : > { %v5976_v57 = vcombine.low %v3557_v8, %v3569_v33 }
 0x199   : > { %6744 = vst [vmem:[#allocation52_spill] sm:$0xff] %v5976_v57 }
 0x1ad   : > { %v5978_v28 = vpop.f32.mrf.mxu0 }
 0x1af   : > { %v5980_v62 = vpop.f32.mrf.mxu0 }
 0x1b1   : > { %v5982_v22 = vpop.f32.mrf.mxu0 }
 0x1b3   : > { %v5986_v58 = vpop.f32.mrf.mxu0 }
 0x1b5   : > { %v5988_v34 = vpop.f32.mrf.mxu0 }
 0x1b7   : > { %v5990_v49 = vpop.f32.mrf.mxu0 }
 0x1b9   : > { %v5992_v2 = vpop.f32.mrf.mxu0 }
 0x1ba   : > { %v6746_v60 = vpack.c.bf16 %v5992_v2, %v5988_v34 }
 0x1bb   : > { %v5996_v17 = vpop.f32.mrf.mxu0 }
 0x1bd   : > { %v6000_v8 = vpop.f32.mrf.mxu0 }
 0x1bf   : > { %v6002_v57 = vpop.f32.mrf.mxu0 }
 0x1c1   : > { %v6004_v51 = vpop.f32.mrf.mxu0 }
 0x1c2   : > { %v924_v6 = vpack.c.bf16 %v6004_v51, %v6000_v8 }
 0x1c3   : > { %v6006_v46 = vpop.f32.mrf.mxu0 }
 0x1c5   : > { %v6008_v7 = vpop.f32.mrf.mxu0 }
 0x1c7   : > { %v6010_v56 = vpop.f32.mrf.mxu0 }
 0x1c9   : > { %v6012_v31 = vpop.f32.mrf.mxu0 }
 0x1cb   : > { %v6014_v47 = vpop.f32.mrf.mxu0 }
 0x1cd   : > { %v881_v5 = vpop.f32.mrf.mxu0 }
 0x1cf   : > { %v883_v18 = vpop.f32.mrf.mxu0 }
 0x1d1   : > { %v885_v29 = vpop.f32.mrf.mxu0 }
 0x1d2   : > { %v928_v16 = vpack.c.bf16 %v885_v29, %v881_v5 }
 0x1d3   : > { %v887_v33 = vpop.f32.mrf.mxu0 }
 0x1d5   : > { %v891_v23 = vpop.f32.mrf.mxu0 }
 0x1d7   : > { %v893_v32 = vpop.f32.mrf.mxu0 }
 0x1d9   : > { %v895_v13 = vpop.f32.mrf.mxu0 }
 0x1da   : > { %v930_v0 = vpack.c.bf16 %v895_v13, %v891_v23 }
 0x1db   : > { %v897_v59 = vpop.f32.mrf.mxu0 }
 0x1dc   : > { %v931_v11 = vpack.c.bf16 %v897_v59, %v893_v32 }
 0x1dd   : > { %v901_v20 = vpop.f32.mrf.mxu0 }
 0x1de   : > { %v1203_v50 = vadd.bf16 %v4719_v42, %v931_v11 }
 0x1df   : > { %v903_v26 = vpop.f32.mrf.mxu0 }
 0x1e1   : > { %v905_v12 = vpop.f32.mrf.mxu0 }
 0x1e2   : > { %v932_v27 = vpack.c.bf16 %v905_v12, %v901_v20  ;;  %v925_v20 = vpack.c.bf16 %v6006_v46, %v6002_v57 }
 0x1e3   : > { %v907_v52 = vpop.f32.mrf.mxu0 }
 0x1e4   : > { %v933_v24 = vpack.c.bf16 %v907_v52, %v903_v26  ;;  %v1071_v26 = vrot.slane %v5564_v21, %v5892_v38  ;;  %v1204_v41 = vadd.bf16 %v4720_v37, %v932_v27  ;;  %v927_v21 = vpack.c.bf16 %v6014_v47, %v6010_v56 }
 0x1e5   : > { %v911_v53 = vpop.f32.mrf.mxu0  ;;  %v1219_v27 = vmul.bf16 1045249613, %v1203_v50 }
 0x1e6   : > { %v1205_v25 = vadd.bf16 %v4720_v37, %v933_v24  ;;  %v1047_v24 = vrot.slane %v5572_v40, %v5892_v38  ;;  %v1220_v59 = vmul.bf16 1045249613, %v1204_v41  ;;  %v1023_v40 = vrot.slane %v5590_v54, %v5892_v38 }
 0x1e7   : > { %v913_v48 = vpop.f32.mrf.mxu0  ;;  %v1235_v29 = vmax.bf16 %v1219_v27, %v1203_v50  ;;  %v987_v54 = vrot.slane %v5737_v9, %v5892_v38  ;;  %v975_v9 = vrot.slane %v5622_v44, %v5892_v38  ;;  %v5009_v27 = vld [vmem:[%s6666_s5 + $0x40] sm:$0xff]  }
 0x1e8   : > { %v1221_v4 = vmul.bf16 1045249613, %v1205_v25  ;;  %v4717_v37 = vcombine.low %v1035_v39, %v1047_v24  ;;  %v1236_v12 = vmax.bf16 %v1220_v59, %v1204_v41  ;;  %v5005_v59 = vld [vmem:[%s6666_s5 + $0x20] sm:$0xff]  }
 0x1e9   : > { %v915_v45 = vpop.f32.mrf.mxu0 }
 0x1ea   : > { %v934_v10 = vpack.c.bf16 %v915_v45, %v911_v53  ;;  %v929_v45 = vpack.c.bf16 %v887_v33, %v883_v18  ;;  %v1237_v11 = vmax.bf16 %v1221_v4, %v1205_v25  ;;  %v1199_v23 = vadd.bf16 %v4717_v37, %v927_v21  ;;  %v5007_v21 = vld [vmem:[%s6666_s5 + $0x30] sm:$0xff]  }
 0x1eb   : > { %v917_v30 = vpop.f32.mrf.mxu0  ;;  %v4716_v18 = vcombine.low %v1011_v14, %v1023_v40  ;;  %v5011_v40 = vld [vmem:[%s6666_s5 + $0x50] sm:$0xff]   ;;  %v5013_v14 = vld [vmem:[%s6666_s5 + $0x60] sm:$0xff]  }
 0x1ec   : > { %v1206_v36 = vadd.bf16 %v4721_v19, %v934_v10  ;;  %v935_v43 = vpack.c.bf16 %v917_v30, %v913_v48  ;;  %v4718_v10 = vcombine.low %v1059_v55, %v1071_v26  ;;  %v1215_v46 = vmul.bf16 1045249613, %v1199_v23 }
 0x1ed   : > { %v1197_v47 = vadd.bf16 %v4716_v18, %v925_v20  ;;  %v1196_v30 = vadd.bf16 %v4716_v18, %v924_v6 }
 0x1ee   : > { %v1207_v52 = vadd.bf16 %v4721_v19, %v935_v43  ;;  %v1222_v53 = vmul.bf16 1045249613, %v1206_v36  ;;  %v1202_v19 = vadd.bf16 %v4719_v42, %v930_v0  ;;  %v1201_v13 = vadd.bf16 %v4718_v10, %v929_v45 }
 0x1ef   : > { %v926_v42 = vpack.c.bf16 %v6012_v31, %v6008_v7  ;;  %v999_v7 = vrot.slane %v5602_v63, %v5892_v38  ;;  %v921_v43 = vpack.c.bf16 %v5986_v58, %v5980_v62  ;;  %v6745_v63 = vpack.c.bf16 %v5996_v17, %v5990_v49 }
 0x1f0   : > { %v1223_v61 = vmul.bf16 1045249613, %v1207_v52  ;;  %v1238_v32 = vmax.bf16 %v1222_v53, %v1206_v36  ;;  %v1200_v36 = vadd.bf16 %v4718_v10, %v928_v16  ;;  %v1218_v3 = vmul.bf16 1045249613, %v1202_v19  ;;  %v5003_v16 = vld [vmem:[%s6666_s5 + $0x10] sm:$0xff]  }
 0x1f1   : > { %v1217_v25 = vmul.bf16 1045249613, %v1201_v13  ;;  %v1198_v5 = vadd.bf16 %v4717_v37, %v926_v42  ;;  %v4715_v33 = vcombine.low %v987_v54, %v999_v7  ;;  %v1231_v26 = vmax.bf16 %v1215_v46, %v1199_v23  ;;  %v5012_v37 = vld [vmem:[%s6666_s5 + $0x58] sm:$0xff]   ;;  %v5014_v42 = vld [vmem:[%s6666_s5 + $0x68] sm:$0xff]  }
 0x1f2   : > { %v1239_v48 = vmax.bf16 %v1223_v61, %v1207_v52  ;;  %v1216_v31 = vmul.bf16 1045249613, %v1200_v36  ;;  %v1234_v56 = vmax.bf16 %v1218_v3, %v1202_v19  ;;  %v1213_v52 = vmul.bf16 1045249613, %v1197_v47  ;;  %v5004_v19 = vld [vmem:[%s6666_s5 + $0x18] sm:$0xff]  }
 0x1f3   : > { %v1233_v57 = vmax.bf16 %v1217_v25, %v1201_v13  ;;  %v1214_v51 = vmul.bf16 1045249613, %v1198_v5  ;;  %v1195_v55 = vadd.bf16 %v4715_v33, %v6745_v63  ;;  %v4714_v0 = vcombine.low %v963_v15, %v975_v9  ;;  %v5008_v13 = vld [vmem:[%s6666_s5 + $0x38] sm:$0xff]  }
 0x1f4   : > { %1368 = vmatprep.subr.bf16.mxu1 %v1239_v48  ;;  %v1232_v8 = vmax.bf16 %v1216_v31, %v1200_v36  ;;  %v1194_v41 = vadd.bf16 %v4715_v33, %v6746_v60  ;;  %v1212_v44 = vmul.bf16 1045249613, %v1196_v30  ;;  %v1229_v4 = vmax.bf16 %v1213_v52, %v1197_v47  ;;  %v5001_v48 = vld [vmem:[%s6666_s5] sm:$0xff]   ;;  %v5015_v36 = vld [vmem:[%s6666_s5 + $0x70] sm:$0xff]   ;;  %v5016_v3 = vld [vmem:[%s6666_s5 + $0x78] sm:$0xff]  }
 0x1f5   : > { %1369 = vmatpush1.bf16.msra.mxu1 %v1238_v32  ;;  %v1230_v53 = vmax.bf16 %v1214_v51, %v1198_v5  ;;  %v1193_v45 = vadd.bf16 %v4714_v0, %v921_v43  ;;  %v1211_v50 = vmul.bf16 1045249613, %v1195_v55  ;;  %v6747_v62 = vpack.c.bf16 %v5982_v22, %v5978_v28  ;;  %v5002_v22 = vld [vmem:[%s6666_s5 + $0x8] sm:$0xff]   ;;  %v5022_v52 = vld [vmem:[%s6668_s7 + $0x154] ss:$8 sps:$4 sm:$0xff]  }
 0x1f6   : > { %1370 = vmatprep.subr.bf16.mxu1 %v1237_v11  ;;  %v1210_v49 = vmul.bf16 1045249613, %v1194_v41  ;;  %v1228_v17 = vmax.bf16 %v1212_v44, %v1196_v30  ;;  %v6748_v28 = vmov 0   ;;  %v5006_v32 = vld [vmem:[%s6666_s5 + $0x28] sm:$0xff]  }
 0x1f7   : > { %v1192_v58 = vadd.bf16 %v4714_v0, %v6747_v62  ;;  %v1209_v61 = vmul.bf16 1045249613, %v1193_v45  ;;  %v1227_v24 = vmax.bf16 %v1211_v50, %v1195_v55  ;;  %v5010_v11 = vld [vmem:[%s6666_s5 + $0x48] sm:$0xff]  }
 0x1f8   : > { %v1226_v34 = vmax.bf16 %v1210_v49, %v1194_v41  ;;  %v5019_v55 = vld [vmem:[%s6668_s7 + $0x4] ss:$8 sps:$4 sm:$0xff]   ;;  %v1780_v49 = vrot.slane %v5774_v35, %v5892_v38 }
 0x1f9   : > { %1371 = vmatpush1.bf16.msra.mxu1 %v1236_v12  ;;  %v1208_v10 = vmul.bf16 1045249613, %v1192_v58  ;;  %v1225_v2 = vmax.bf16 %v1209_v61, %v1193_v45  ;;  %2617 = vmatprep.mubr.bf16.mxu0 %v5019_v55  ;;  %v6749_v61 = vld [vmem:[#allocation2_spill] sm:$0xff] }
 0x1fa   : > { %1372 = vmatprep.subr.bf16.mxu1 %v1235_v29 }
 0x1fb   : > { %v1224_v39 = vmax.bf16 %v1208_v10, %v1192_v58  ;;  %v1804_v58 = vrot.slane %v5762_v1, %v5892_v38  ;;  %v6750_v10 = vld [vmem:[#allocation3_spill] sm:$0xff]  ;;  %v6752_v1 = vld [vmem:[#allocation4_spill] sm:$0xff] }
 0x1fd   : > { %1373 = vmatpush1.bf16.msra.mxu1 %v1234_v56 }
 0x1fe   : > { %1374 = vmatprep.subr.bf16.mxu1 %v1233_v57 }
 0x201   : > { %1375 = vmatpush1.bf16.msra.mxu1 %v1232_v8 }
 0x202   : > { %1376 = vmatprep.subr.bf16.mxu1 %v1231_v26 }
 0x205   : > { %1377 = vmatpush1.bf16.msra.mxu1 %v1230_v53 }
 0x206   : > { %1378 = vmatprep.subr.bf16.mxu1 %v1229_v4 }
 0x209   : > { %1379 = vmatpush1.bf16.msra.mxu1 %v1228_v17 }
 0x20a   : > { %1380 = vmatprep.subr.bf16.mxu1 %v1227_v24  ;;  %v1816_v24 = vrot.slane %v6749_v61, %v5892_v38 }
 0x20d   : > { %1381 = vmatpush1.bf16.msra.mxu1 %v1226_v34  ;;  %v1792_v34 = vrot.slane %v6750_v10, %v5892_v38 }
 0x20e   : > { %1382 = vmatprep.subr.bf16.mxu1 %v1225_v2 }
 0x211   : > { %1383 = vmatpush1.bf16.msra.mxu1 %v1224_v39 }
 0x214   : > { %1401 = vmatmul.mubr.bf16.vlgmr.msra.gmra.mxu1 %v5001_v48  ;;  %v4745_v48 = vcombine.low %v1804_v58, %v1816_v24  ;;  %v6755_v58 = vld [vmem:[#allocation6_spill] sm:$0xff]  ;;  %v6756_v24 = vld [vmem:[#allocation19_spill] sm:$0xff] }
 0x215   : > { %1410 = vmatprep.mubr.bf16.mxu1 %v6748_v28  ;;  %v1708_v10 = vrot.slane %v6756_v24, %v5892_v38 }
 0x21c   : > { %1411 = vmatmul.mubr.bf16.gmra.mxu1 %v5002_v22  ;;  %v6751_v22 = vld [vmem:[#allocation15_spill] sm:$0xff] }
 0x21d   : > { %1420 = vmatprep.mubr.bf16.mxu1 %v6748_v28 }
 0x224   : > { %1421 = vmatmul.mubr.bf16.gmra.mxu1 %v5003_v16  ;;  %v1756_v16 = vrot.slane %v6751_v22, %v5892_v38 }
 0x225   : > { %1430 = vmatprep.mubr.bf16.mxu1 %v6748_v28 }
 0x22c   : > { %1431 = vmatmul.mubr.bf16.gmra.mxu1 %v5004_v19 }
 0x22d   : > { %1440 = vmatprep.mubr.bf16.mxu1 %v6748_v28 }
 0x234   : > { %1441 = vmatmul.mubr.bf16.gmra.mxu1 %v5005_v59  ;;  %v1768_v59 = vrot.slane %v6752_v1, %v5892_v38  ;;  %v6758_v1 = vld [vmem:[#allocation21_spill] sm:$0xff] }
 0x235   : > { %1450 = vmatprep.mubr.bf16.mxu1 %v6748_v28 }
 0x23c   : > { %1451 = vmatmul.mubr.bf16.gmra.mxu1 %v5006_v32 }
 0x23d   : > { %1460 = vmatprep.mubr.bf16.mxu1 %v6748_v28 }
 0x244   : > { %1461 = vmatmul.mubr.bf16.gmra.mxu1 %v5007_v21 }
 0x245   : > { %1470 = vmatprep.mubr.bf16.mxu1 %v6748_v28 }
 0x24c   : > { %1471 = vmatmul.mubr.bf16.gmra.mxu1 %v5008_v13 }
 0x24d   : > { %1480 = vmatprep.mubr.bf16.mxu1 %v6748_v28 }
 0x254   : > { %1481 = vmatmul.mubr.bf16.gmra.mxu1 %v5009_v27 }
 0x255   : > { %1490 = vmatprep.mubr.bf16.mxu1 %v6748_v28 }
 0x25c   : > { %1491 = vmatmul.mubr.bf16.gmra.mxu1 %v5010_v11 }
 0x25d   : > { %1500 = vmatprep.mubr.bf16.mxu1 %v6748_v28 }
 0x264   : > { %1501 = vmatmul.mubr.bf16.gmra.mxu1 %v5011_v40  ;;  %v6753_v40 = vld [vmem:[#allocation17_spill] sm:$0xff] }
 0x265   : > { %1510 = vmatprep.mubr.bf16.mxu1 %v6748_v28 }
 0x26c   : > { %1511 = vmatmul.mubr.bf16.gmra.mxu1 %v5012_v37  ;;  %v1732_v37 = vrot.slane %v6753_v40, %v5892_v38 }
 0x26d   : > { %1520 = vmatprep.mubr.bf16.mxu1 %v6748_v28 }
 0x274   : > { %1521 = vmatmul.mubr.bf16.gmra.mxu1 %v5013_v14 }
 0x275   : > { %1530 = vmatprep.mubr.bf16.mxu1 %v6748_v28 }
 0x27c   : > { %1531 = vmatmul.mubr.bf16.gmra.mxu1 %v5014_v42  ;;  %v4743_v42 = vcombine.low %v1756_v16, %v1768_v59  ;;  %v1684_v59 = vrot.slane %v6758_v1, %v5892_v38 }
 0x27d   : > { %1540 = vmatprep.mubr.bf16.mxu1 %v6748_v28 }
 0x284   : > { %1541 = vmatmul.mubr.bf16.gmra.mxu1 %v5015_v36 }
 0x285   : > { %1550 = vmatprep.mubr.bf16.mxu1 %v6748_v28  ;;  %v4744_v28 = vcombine.low %v1780_v49, %v1792_v34  ;;  %v1720_v49 = vrot.slane %v6755_v58, %v5892_v38 }
 0x28c   : > { %1551 = vmatmul.mubr.bf16.gmra.mxu1 %v5016_v3  ;;  %v6754_v3 = vld [vmem:[#allocation5_spill] sm:$0xff] }
 0x28d   : > { %2827 = vmatprep.mubr.bf16.mxu1 %v5022_v52  ;;  %v1744_v55 = vrot.slane %v6754_v3, %v5892_v38 }
 0x2d4   : > { %v6130_v12 = vpop.f32.mrf.mxu1 }
 0x2d6   : > { %v6132_v20 = vpop.f32.mrf.mxu1 }
 0x2d8   : > { %v6134_v23 = vpop.f32.mrf.mxu1 }
 0x2d9   : > { %v1561_v25 = vpack.c.bf16 %v6134_v23, %v6130_v12 }
 0x2da   : > { %v6138_v29 = vpop.f32.mrf.mxu1 }
 0x2db   : > { %v1562_v18 = vpack.c.bf16 %v6138_v29, %v6132_v20 }
 0x2dc   : > { %v6142_v54 = vpop.f32.mrf.mxu1 }
 0x2de   : > { %v6144_v6 = vpop.f32.mrf.mxu1 }
 0x2e0   : > { %v6146_v5 = vpop.f32.mrf.mxu1 }
 0x2e1   : > { %v1563_v31 = vpack.c.bf16 %v6146_v5, %v6142_v54 }
 0x2e2   : > { %v6150_v56 = vpop.f32.mrf.mxu1 }
 0x2e3   : > { %v1564_v7 = vpack.c.bf16 %v6150_v56, %v6144_v6 }
 0x2e4   : > { %v6154_v47 = vpop.f32.mrf.mxu1 }
 0x2e6   : > { %v6156_v46 = vpop.f32.mrf.mxu1 }
 0x2e8   : > { %v6158_v57 = vpop.f32.mrf.mxu1 }
 0x2ea   : > { %v6160_v33 = vpop.f32.mrf.mxu1 }
 0x2ec   : > { %v6162_v15 = vpop.f32.mrf.mxu1 }
 0x2ee   : > { %v6164_v9 = vpop.f32.mrf.mxu1 }
 0x2f0   : > { %v6166_v30 = vpop.f32.mrf.mxu1 }
 0x2f2   : > { %v6168_v51 = vpop.f32.mrf.mxu1 }
 0x2f4   : > { %v6170_v8 = vpop.f32.mrf.mxu1 }
 0x2f6   : > { %v1444_v43 = vpop.f32.mrf.mxu1 }
 0x2f8   : > { %v6172_v63 = vpop.f32.mrf.mxu1 }
 0x2fa   : > { %v1448_v26 = vpop.f32.mrf.mxu1 }
 0x2fc   : > { %v1452_v0 = vpop.f32.mrf.mxu1 }
 0x2fe   : > { %v1454_v60 = vpop.f32.mrf.mxu1 }
 0x300   : > { %v1456_v41 = vpop.f32.mrf.mxu1 }
 0x301   : > { %v1571_v52 = vpack.c.bf16 %v1456_v41, %v1452_v0  ;;  %v1568_v0 = vpack.c.bf16 %v6168_v51, %v6164_v9 }
 0x302   : > { %v1458_v44 = vpop.f32.mrf.mxu1 }
 0x303   : > { %v1572_v21 = vpack.c.bf16 %v1458_v44, %v1454_v60 }
 0x304   : > { %v1462_v53 = vpop.f32.mrf.mxu1 }
 0x305   : > { %v2116_v60 = vadd.bf16 %v4743_v42, %v1572_v21 }
 0x306   : > { %v1464_v45 = vpop.f32.mrf.mxu1 }
 0x307   : > { %v2148_v22 = vmul.bf16 1045249613, %v2116_v60 }
 0x308   : > { %v1466_v50 = vpop.f32.mrf.mxu1 }
 0x309   : > { %v1573_v32 = vpack.c.bf16 %v1466_v50, %v1462_v53  ;;  %v1570_v53 = vpack.c.bf16 %v1448_v26, %v1444_v43  ;;  %v1569_v43 = vpack.c.bf16 %v6172_v63, %v6170_v8  ;;  %v2115_v26 = vadd.bf16 %v4743_v42, %v1571_v52 }
 0x30a   : > { %v1468_v4 = vpop.f32.mrf.mxu1  ;;  %v4741_v63 = vcombine.low %v1708_v10, %v1720_v49  ;;  %v2180_v42 = vmax.bf16 %v2148_v22, %v2116_v60  ;;  %v6761_v10 = vld [vmem:[#allocation23_spill] sm:$0xff] }
 0x30b   : > { %v1574_v2 = vpack.c.bf16 %v1468_v4, %v1464_v45  ;;  %v2117_v45 = vadd.bf16 %v4744_v28, %v1573_v32  ;;  %v1567_v32 = vpack.c.bf16 %v6166_v30, %v6162_v15  ;;  %v2147_v21 = vmul.bf16 1045249613, %v2115_v26  ;;  %v6760_v15 = vld [vmem:[#allocation22_spill] sm:$0xff] }
 0x30c   : > { %v1472_v62 = vpop.f32.mrf.mxu1  ;;  %v2112_v40 = vadd.bf16 %v4741_v63, %v1568_v0  ;;  %v1660_v30 = vrot.slane %v6760_v15, %v5892_v38  ;;  %v1636_v0 = vrot.slane %v6761_v10, %v5892_v38 }
 0x30d   : > { %v2118_v13 = vadd.bf16 %v4744_v28, %v1574_v2  ;;  %v2149_v2 = vmul.bf16 1045249613, %v2117_v45 }
 0x30e   : > { %v1474_v17 = vpop.f32.mrf.mxu1 }
 0x30f   : > { %v2150_v44 = vmul.bf16 1045249613, %v2118_v13 }
 0x310   : > { %v1476_v39 = vpop.f32.mrf.mxu1 }
 0x311   : > { %v1575_v19 = vpack.c.bf16 %v1476_v39, %v1472_v62  ;;  %v2182_v9 = vmax.bf16 %v2150_v44, %v2118_v13 }
 0x312   : > { %v1478_v35 = vpop.f32.mrf.mxu1 }
 0x313   : > { %v2119_v27 = vadd.bf16 %v4745_v48, %v1575_v19  ;;  %v1576_v11 = vpack.c.bf16 %v1478_v35, %v1474_v17  ;;  %v4742_v17 = vcombine.low %v1732_v37, %v1744_v55  ;;  %v6757_v19 = vld [vmem:[#allocation7_spill] sm:$0xff] }
 0x314   : > { %v6194_v14 = vpop.f32.mrf.mxu1  ;;  %v1696_v8 = vrot.slane %v6757_v19, %v5892_v38 }
 0x315   : > { %v2120_v36 = vadd.bf16 %v4745_v48, %v1576_v11  ;;  %v2151_v4 = vmul.bf16 1045249613, %v2119_v27  ;;  %v2114_v28 = vadd.bf16 %v4742_v17, %v1570_v53  ;;  %v2113_v35 = vadd.bf16 %v4742_v17, %v1569_v43 }
 0x316   : > { %v6198_v62 = vpop.f32.mrf.mxu1  ;;  %v1566_v11 = vpack.c.bf16 %v6160_v33, %v6156_v46  ;;  %v4740_v52 = vcombine.low %v1684_v59, %v1696_v8  ;;  %v1565_v46 = vpack.c.bf16 %v6158_v57, %v6154_v47  ;;  %v2111_v33 = vadd.bf16 %v4741_v63, %v1567_v32 }
 0x317   : > { %v2152_v50 = vmul.bf16 1045249613, %v2120_v36  ;;  %v2183_v39 = vmax.bf16 %v2151_v4, %v2119_v27  ;;  %v2181_v27 = vmax.bf16 %v2149_v2, %v2117_v45  ;;  %v2146_v37 = vmul.bf16 1045249613, %v2114_v28 }
 0x318   : > { %v6202_v61 = vpop.f32.mrf.mxu1  ;;  %v2145_v4 = vmul.bf16 1045249613, %v2113_v35  ;;  %v2179_v53 = vmax.bf16 %v2147_v21, %v2115_v26  ;;  %v2110_v44 = vadd.bf16 %v4740_v52, %v1566_v11  ;;  %v2109_v47 = vadd.bf16 %v4740_v52, %v1565_v46  ;;  %v6762_v26 = vld [vmem:[#allocation9_spill] sm:$0xff] }
 0x319   : > { %v1577_v41 = vpack.c.bf16 %v6202_v61, %v6194_v14  ;;  %v2184_v34 = vmax.bf16 %v2152_v50, %v2120_v36  ;;  %v6759_v36 = vld [vmem:[#allocation8_spill] sm:$0xff]  ;;  %v2144_v50 = vmul.bf16 1045249613, %v2112_v40  ;;  %v2178_v49 = vmax.bf16 %v2146_v37, %v2114_v28  ;;  %v5017_v14 = vld [vmem:[%s6668_s7] ss:$8 sps:$4 sm:$0xff]  }
 0x31a   : > { %v6212_v48 = vpop.f32.mrf.mxu1  ;;  %v1672_v3 = vrot.slane %v6759_v36, %v5892_v38  ;;  %v2143_v57 = vmul.bf16 1045249613, %v2111_v33  ;;  %v1648_v2 = vrot.slane %v6762_v26, %v5892_v38  ;;  %v2142_v28 = vmul.bf16 1045249613, %v2110_v44  ;;  %v5020_v61 = vld [vmem:[%s6668_s7 + $0x150] ss:$8 sps:$4 sm:$0xff]  }
 0x31b   : > { %v1578_v16 = vpack.c.bf16 %v6212_v48, %v6198_v62  ;;  %2585 = vmatprep.subr.bf16.mxu0 %v2184_v34  ;;  %4918 = vmatprep.subr.bf16.mxu1 %v2184_v34  ;;  %v2177_v34 = vmax.bf16 %v2145_v4, %v2113_v35  ;;  %v2176_v22 = vmax.bf16 %v2144_v50, %v2112_v40  ;;  %v2141_v63 = vmul.bf16 1045249613, %v2109_v47 }
 0x31c   : > { %v6216_v51 = vpop.f32.mrf.mxu1  ;;  %2586 = vmatpush1.bf16.msra.mxu0 %v2183_v39  ;;  %4934 = vmatpush1.bf16.msra.mxu1 %v2183_v39  ;;  %v4739_v24 = vcombine.low %v1660_v30, %v1672_v3  ;;  %v4738_v19 = vcombine.low %v1636_v0, %v1648_v2  ;;  %v2175_v1 = vmax.bf16 %v2143_v57, %v2111_v33  ;;  %v6765_v0 = vld [vmem:[#allocation10_spill] sm:$0xff]  ;;  %v6766_v57 = vld [vmem:[#allocation11_spill] sm:$0xff] }
 0x31d   : > { %2587 = vmatprep.subr.bf16.mxu0 %v2182_v9  ;;  %4919 = vmatprep.subr.bf16.mxu1 %v2182_v9 }
 0x31e   : > { %v6224_v13 = vpop.f32.mrf.mxu1  ;;  %v2108_v39 = vadd.bf16 %v4739_v24, %v1564_v7  ;;  %v2107_v8 = vadd.bf16 %v4739_v24, %v1563_v31  ;;  %v2106_v6 = vadd.bf16 %v4738_v19, %v1562_v18  ;;  %v2174_v7 = vmax.bf16 %v2142_v28, %v2110_v44  ;;  %v6763_v44 = vld [vmem:[#allocation24_spill] sm:$0xff] }
 0x31f   : > { %v2105_v54 = vadd.bf16 %v4738_v19, %v1561_v25  ;;  %v2173_v31 = vmax.bf16 %v2141_v63, %v2109_v47  ;;  %v1996_v50 = vrot.slane %v6763_v44, %v5892_v38  ;;  %v2008_v47 = vrot.slane %v6765_v0, %v5892_v38  ;;  %v6768_v63 = vld [vmem:[#allocation12_spill] sm:$0xff] }
 0x320   : > { %v6230_v55 = vpop.f32.mrf.mxu1  ;;  %2588 = vmatpush1.bf16.msra.mxu0 %v2181_v27  ;;  %4935 = vmatpush1.bf16.msra.mxu1 %v2181_v27  ;;  %v2140_v56 = vmul.bf16 1045249613, %v2108_v39  ;;  %v2139_v5 = vmul.bf16 1045249613, %v2107_v8  ;;  %v2138_v21 = vmul.bf16 1045249613, %v2106_v6 }
 0x321   : > { %v1579_v45 = vpack.c.bf16 %v6230_v55, %v6216_v51  ;;  %2589 = vmatprep.subr.bf16.mxu0 %v2180_v42  ;;  %4920 = vmatprep.subr.bf16.mxu1 %v2180_v42  ;;  %v2137_v29 = vmul.bf16 1045249613, %v2105_v54 }
 0x322   : > { %v6238_v60 = vpop.f32.mrf.mxu1  ;;  %v2172_v27 = vmax.bf16 %v2140_v56, %v2108_v39  ;;  %v2171_v18 = vmax.bf16 %v2139_v5, %v2107_v8  ;;  %v2170_v40 = vmax.bf16 %v2138_v21, %v2106_v6  ;;  %v4753_v39 = vcombine.low %v1996_v50, %v2008_v47 }
 0x323   : > { %v1580_v58 = vpack.c.bf16 %v6238_v60, %v6224_v13  ;;  %v2169_v12 = vmax.bf16 %v2137_v29, %v2105_v54 }
 0x324   : > { %v6242_v17 = vpop.f32.mrf.mxu1  ;;  %2590 = vmatpush1.bf16.msra.mxu0 %v2179_v53  ;;  %4936 = vmatpush1.bf16.msra.mxu1 %v2179_v53 }
 0x325   : > { %2591 = vmatprep.subr.bf16.mxu0 %v2178_v49  ;;  %4921 = vmatprep.subr.bf16.mxu1 %v2178_v49  ;;  %v6764_v49 = vld [vmem:[#allocation25_spill] sm:$0xff] }
 0x326   : > { %v6246_v43 = vpop.f32.mrf.mxu1  ;;  %v1972_v24 = vrot.slane %v6764_v49, %v5892_v38 }
 0x328   : > { %v6253_v9 = vpop.f32.mrf.mxu1  ;;  %2592 = vmatpush1.bf16.msra.mxu0 %v2177_v34  ;;  %4937 = vmatpush1.bf16.msra.mxu1 %v2177_v34  ;;  %v1984_v34 = vrot.slane %v6766_v57, %v5892_v38 }
 0x329   : > { %2593 = vmatprep.subr.bf16.mxu0 %v2176_v22  ;;  %4922 = vmatprep.subr.bf16.mxu1 %v2176_v22  ;;  %v6767_v22 = vld [vmem:[#allocation26_spill] sm:$0xff] }
 0x32a   : > { %v6258_v59 = vpop.f32.mrf.mxu1  ;;  %v4752_v28 = vcombine.low %v1972_v24, %v1984_v34  ;;  %v1948_v19 = vrot.slane %v6767_v22, %v5892_v38  ;;  %v6772_v24 = vld [vmem:[#allocation28_spill] sm:$0xff]  ;;  %v6774_v22 = vld [vmem:[#allocation29_spill] sm:$0xff] }
 0x32c   : > { %v6263_v32 = vpop.f32.mrf.mxu1  ;;  %2594 = vmatpush1.bf16.msra.mxu0 %v2175_v1  ;;  %4938 = vmatpush1.bf16.msra.mxu1 %v2175_v1  ;;  %v1960_v1 = vrot.slane %v6768_v63, %v5892_v38 }
 0x32d   : > { %2595 = vmatprep.subr.bf16.mxu0 %v2174_v7  ;;  %4923 = vmatprep.subr.bf16.mxu1 %v2174_v7 }
 0x32e   : > { %v6268_v35 = vpop.f32.mrf.mxu1  ;;  %v4751_v21 = vcombine.low %v1948_v19, %v1960_v1 }
 0x330   : > { %v6270_v20 = vpop.f32.mrf.mxu1  ;;  %2596 = vmatpush1.bf16.msra.mxu0 %v2173_v31  ;;  %4939 = vmatpush1.bf16.msra.mxu1 %v2173_v31 }
 0x331   : > { %2597 = vmatprep.subr.bf16.mxu0 %v2172_v27  ;;  %4924 = vmatprep.subr.bf16.mxu1 %v2172_v27  ;;  %v6769_v27 = vld [vmem:[#allocation27_spill] sm:$0xff] }
 0x332   : > { %v6272_v11 = vpop.f32.mrf.mxu1  ;;  %v1924_v29 = vrot.slane %v6769_v27, %v5892_v38 }
 0x334   : > { %v6274_v37 = vpop.f32.mrf.mxu1  ;;  %2598 = vmatpush1.bf16.msra.mxu0 %v2171_v18  ;;  %4940 = vmatpush1.bf16.msra.mxu1 %v2171_v18 }
 0x335   : > { %2599 = vmatprep.subr.bf16.mxu0 %v2170_v40  ;;  %4925 = vmatprep.subr.bf16.mxu1 %v2170_v40  ;;  %v6770_v40 = vld [vmem:[#allocation13_spill] sm:$0xff] }
 0x336   : > { %v1524_v23 = vpop.f32.mrf.mxu1 }
 0x338   : > { %v6276_v25 = vpop.f32.mrf.mxu1  ;;  %2600 = vmatpush1.bf16.msra.mxu0 %v2169_v12  ;;  %4941 = vmatpush1.bf16.msra.mxu1 %v2169_v12  ;;  %v1936_v12 = vrot.slane %v6770_v40, %v5892_v38  ;;  %v6777_v40 = vld [vmem:[#allocation31_spill] sm:$0xff] }
 0x339   : > { %v1585_v47 = vpack.c.bf16 %v6276_v25, %v6274_v37  ;;  %v1876_v37 = vrot.slane %v6774_v22, %v5892_v38  ;;  %v1583_v25 = vpack.c.bf16 %v6270_v20, %v6263_v32  ;;  %v1581_v32 = vpack.c.bf16 %v6253_v9, %v6242_v17  ;;  %v6778_v9 = vld [vmem:[#allocation20_spill] sm:$0xff]  ;;  %v5041_v22 = vld [vmem:[%s6668_s7 + $0x44] ss:$8 sps:$4 sm:$0xff]  }
 0x33a   : > { %v1528_v42 = vpop.f32.mrf.mxu1 }
 0x33b   : > { %v1586_v44 = vpack.c.bf16 %v1528_v42, %v1524_v23  ;;  %v1584_v23 = vpack.c.bf16 %v6272_v11, %v6268_v35 }
 0x33c   : > { %v1532_v36 = vpop.f32.mrf.mxu1 }
 0x33e   : > { %v1534_v3 = vpop.f32.mrf.mxu1 }
 0x340   : > { %v1536_v52 = vpop.f32.mrf.mxu1 }
 0x342   : > { %v1538_v15 = vpop.f32.mrf.mxu1 }
 0x343   : > { %v1588_v7 = vpack.c.bf16 %v1538_v15, %v1534_v3  ;;  %v6771_v3 = vld [vmem:[#allocation14_spill] sm:$0xff] }
 0x344   : > { %v1542_v30 = vpop.f32.mrf.mxu1  ;;  %v1912_v15 = vrot.slane %v6771_v3, %v5892_v38 }
 0x345   : > { %v2132_v50 = vadd.bf16 %v4751_v21, %v1588_v7  ;;  %v6775_v7 = vld [vmem:[#allocation30_spill] sm:$0xff] }
 0x346   : > { %v1544_v46 = vpop.f32.mrf.mxu1 }
 0x348   : > { %v1546_v33 = vpop.f32.mrf.mxu1 }
 0x349   : > { %v1589_v6 = vpack.c.bf16 %v1546_v33, %v1542_v30  ;;  %v4750_v33 = vcombine.low %v1924_v29, %v1936_v12  ;;  %v1828_v12 = vrot.slane %v6777_v40, %v5892_v38  ;;  %v5076_v40 = vld [vmem:[%s6668_s7 + $0x1e0] ss:$8 sps:$4 sm:$0xff]  }
 0x34a   : > { %v1548_v4 = vpop.f32.mrf.mxu1 }
 0x34b   : > { %v1590_v26 = vpack.c.bf16 %v1548_v4, %v1544_v46  ;;  %v1587_v46 = vpack.c.bf16 %v1536_v52, %v1532_v36  ;;  %v2133_v4 = vadd.bf16 %v4752_v28, %v1589_v6  ;;  %v2130_v42 = vadd.bf16 %v4750_v33, %v1586_v44 }
 0x34c   : > { %v1552_v53 = vpop.f32.mrf.mxu1  ;;  %v2164_v52 = vmul.bf16 1045249613, %v2132_v50  ;;  %v2129_v35 = vadd.bf16 %v4750_v33, %v1585_v47  ;;  %v5025_v47 = vld [vmem:[%s6668_s7 + $0x164] ss:$8 sps:$4 sm:$0xff]  }
 0x34d   : > { %v2134_v54 = vadd.bf16 %v4752_v28, %v1590_v26  ;;  %v2131_v57 = vadd.bf16 %v4751_v21, %v1587_v46  ;;  %v2165_v34 = vmul.bf16 1045249613, %v2133_v4  ;;  %v2162_v1 = vmul.bf16 1045249613, %v2130_v42  ;;  %v6776_v21 = vld [vmem:[#allocation18_spill] sm:$0xff] }
 0x34e   : > { %v1554_v10 = vpop.f32.mrf.mxu1  ;;  %v2196_v6 = vmax.bf16 %v2164_v52, %v2132_v50  ;;  %v5034_v52 = vld [vmem:[%s6668_s7 + $0x170] ss:$8 sps:$4 sm:$0xff]  }
 0x34f   : > { %v2166_v49 = vmul.bf16 1045249613, %v2134_v54  ;;  %v2163_v11 = vmul.bf16 1045249613, %v2131_v57  ;;  %v2197_v19 = vmax.bf16 %v2165_v34, %v2133_v4  ;;  %v2194_v29 = vmax.bf16 %v2162_v1, %v2130_v42  ;;  %v5028_v34 = vld [vmem:[%s6668_s7 + $0x160] ss:$8 sps:$4 sm:$0xff]  }
 0x350   : > { %v1556_v2 = vpop.f32.mrf.mxu1  ;;  %v5033_v42 = vld [vmem:[%s6668_s7 + $0x20] ss:$8 sps:$4 sm:$0xff]   ;;  %v5053_v1 = vld [vmem:[%s6668_s7 + $0x64] ss:$8 sps:$4 sm:$0xff]  }
 0x351   : > { %v1591_v8 = vpack.c.bf16 %v1556_v2, %v1552_v53  ;;  %v2198_v26 = vmax.bf16 %v2166_v49, %v2134_v54  ;;  %v6773_v2 = vld [vmem:[#allocation16_spill] sm:$0xff]  ;;  %v1852_v54 = vrot.slane %v6775_v7, %v5892_v38 }
 0x352   : > { %v1558_v56 = vpop.f32.mrf.mxu1  ;;  %v5058_v7 = vld [vmem:[%s6668_s7 + $0x1b0] ss:$8 sps:$4 sm:$0xff]  }
 0x353   : > { %v2135_v5 = vadd.bf16 %v4753_v39, %v1591_v8  ;;  %v1592_v31 = vpack.c.bf16 %v1558_v56, %v1554_v10  ;;  %v1900_v10 = vrot.slane %v6772_v24, %v5892_v38  ;;  %v1582_v8 = vpack.c.bf16 %v6258_v59, %v6246_v43 }
 0x354   : > { %v1864_v43 = vrot.slane %v6776_v21, %v5892_v38  ;;  %v5067_v21 = vld [vmem:[%s6668_s7 + $0x1d4] ss:$8 sps:$4 sm:$0xff]  }
 0x355   : > { %v2136_v18 = vadd.bf16 %v4753_v39, %v1592_v31  ;;  %v2167_v53 = vmul.bf16 1045249613, %v2135_v5  ;;  %v1888_v39 = vrot.slane %v6773_v2, %v5892_v38  ;;  %v4749_v28 = vcombine.low %v1900_v10, %v1912_v15  ;;  %v5037_v2 = vld [vmem:[%s6668_s7 + $0x184] ss:$8 sps:$4 sm:$0xff]  }
 0x356   : > { %v2195_v31 = vmax.bf16 %v2163_v11, %v2131_v57  ;;  %v5027_v57 = vld [vmem:[%s6668_s7 + $0x10] ss:$8 sps:$4 sm:$0xff]   ;;  %v5047_v11 = vld [vmem:[%s6668_s7 + $0x54] ss:$8 sps:$4 sm:$0xff]  }
 0x357   : > { %v2168_v30 = vmul.bf16 1045249613, %v2136_v18  ;;  %v2199_v36 = vmax.bf16 %v2167_v53, %v2135_v5  ;;  %v2128_v63 = vadd.bf16 %v4749_v28, %v1584_v23  ;;  %v4748_v56 = vcombine.low %v1876_v37, %v1888_v39  ;;  %v5031_v23 = vld [vmem:[%s6668_s7 + $0x174] ss:$8 sps:$4 sm:$0xff]   ;;  %v5039_v39 = vld [vmem:[%s6668_s7 + $0x30] ss:$8 sps:$4 sm:$0xff]  }
 0x358   : > { %v2127_v20 = vadd.bf16 %v4749_v28, %v1583_v25  ;;  %v2161_v5 = vmul.bf16 1045249613, %v2129_v35  ;;  %v1840_v53 = vrot.slane %v6778_v9, %v5892_v38  ;;  %v5040_v28 = vld [vmem:[%s6668_s7 + $0x180] ss:$8 sps:$4 sm:$0xff]   ;;  %v5043_v37 = vld [vmem:[%s6668_s7 + $0x194] ss:$8 sps:$4 sm:$0xff]  }
 0x359   : > { %v2200_v0 = vmax.bf16 %v2168_v30, %v2136_v18  ;;  %v2126_v59 = vadd.bf16 %v4748_v56, %v1582_v8  ;;  %v2160_v27 = vmul.bf16 1045249613, %v2128_v63  ;;  %v4747_v18 = vcombine.low %v1852_v54, %v1864_v43  ;;  %v5045_v25 = vld [vmem:[%s6668_s7 + $0x40] ss:$8 sps:$4 sm:$0xff]   ;;  %v5051_v8 = vld [vmem:[%s6668_s7 + $0x50] ss:$8 sps:$4 sm:$0xff]  }
 0x35a   : > { %v2125_v46 = vadd.bf16 %v4748_v56, %v1581_v32  ;;  %v2159_v4 = vmul.bf16 1045249613, %v2127_v20  ;;  %v2193_v17 = vmax.bf16 %v2161_v5, %v2129_v35  ;;  %v4746_v30 = vcombine.low %v1828_v12, %v1840_v53  ;;  %v5046_v35 = vld [vmem:[%s6668_s7 + $0x190] ss:$8 sps:$4 sm:$0xff]   ;;  %v5057_v56 = vld [vmem:[%s6668_s7 + $0x60] ss:$8 sps:$4 sm:$0xff]  }
 0x35b   : > { %2601 = vmatprep.subr.bf16.mxu0 %v2200_v0  ;;  %4926 = vmatprep.subr.bf16.mxu1 %v2200_v0  ;;  %v2124_v44 = vadd.bf16 %v4747_v18, %v1580_v58  ;;  %v2158_v50 = vmul.bf16 1045249613, %v2126_v59  ;;  %v2192_v49 = vmax.bf16 %v2160_v27, %v2128_v63  ;;  %v2123_v3 = vadd.bf16 %v4747_v18, %v1579_v45  ;;  %v5052_v63 = vld [vmem:[%s6668_s7 + $0x1a0] ss:$8 sps:$4 sm:$0xff]   ;;  %v5059_v54 = vld [vmem:[%s6668_s7 + $0x74] ss:$8 sps:$4 sm:$0xff]  }
 0x35c   : > { %2602 = vmatpush2.bf16.msra.mxu0 %v2199_v36  ;;  %4942 = vmatpush2.bf16.msra.mxu1 %v2199_v36  ;;  %v2157_v15 = vmul.bf16 1045249613, %v2125_v46  ;;  %v2191_v33 = vmax.bf16 %v2159_v4, %v2127_v20  ;;  %v2122_v24 = vadd.bf16 %v4746_v30, %v1578_v16  ;;  %v2121_v60 = vadd.bf16 %v4746_v30, %v1577_v41  ;;  %v5023_v41 = vld [vmem:[%s6668_s7 + $0x14] ss:$8 sps:$4 sm:$0xff]   ;;  %v5029_v36 = vld [vmem:[%s6668_s7 + $0x24] ss:$8 sps:$4 sm:$0xff]  }
 0x35d   : > { %2603 = vmatprep.subr.bf16.mxu0 %v2198_v26  ;;  %4927 = vmatprep.subr.bf16.mxu1 %v2198_v26  ;;  %v2156_v10 = vmul.bf16 1045249613, %v2124_v44  ;;  %v2190_v13 = vmax.bf16 %v2158_v50, %v2126_v59  ;;  %v2155_v58 = vmul.bf16 1045249613, %v2123_v3  ;;  %v5035_v26 = vld [vmem:[%s6668_s7 + $0x34] ss:$8 sps:$4 sm:$0xff]  }
 0x35e   : > { %v2189_v0 = vmax.bf16 %v2157_v15, %v2125_v46  ;;  %v2154_v51 = vmul.bf16 1045249613, %v2122_v24  ;;  %v2153_v62 = vmul.bf16 1045249613, %v2121_v60  ;;  %v5061_v32 = vld [vmem:[%s6668_s7 + $0x1c4] ss:$8 sps:$4 sm:$0xff]  }
 0x35f   : > { %v2188_v55 = vmax.bf16 %v2156_v10, %v2124_v44  ;;  %v2187_v48 = vmax.bf16 %v2155_v58, %v2123_v3  ;;  %v5063_v20 = vld [vmem:[%s6668_s7 + $0x70] ss:$8 sps:$4 sm:$0xff]   ;;  %v5064_v5 = vld [vmem:[%s6668_s7 + $0x1c0] ss:$8 sps:$4 sm:$0xff]   ;;  %v5071_v27 = vld [vmem:[%s6668_s7 + $0x94] ss:$8 sps:$4 sm:$0xff]  }
 0x360   : > { %2604 = vmatpush2.bf16.msra.mxu0 %v2197_v19  ;;  %4943 = vmatpush2.bf16.msra.mxu1 %v2197_v19  ;;  %v2186_v16 = vmax.bf16 %v2154_v51, %v2122_v24  ;;  %v2185_v45 = vmax.bf16 %v2153_v62, %v2121_v60  ;;  %v5049_v19 = vld [vmem:[%s6668_s7 + $0x1a4] ss:$8 sps:$4 sm:$0xff]   ;;  %v5069_v43 = vld [vmem:[%s6668_s7 + $0x80] ss:$8 sps:$4 sm:$0xff]   ;;  %v5070_v59 = vld [vmem:[%s6668_s7 + $0x1d0] ss:$8 sps:$4 sm:$0xff]  }
 0x361   : > { %2605 = vmatprep.subr.bf16.mxu0 %v2196_v6  ;;  %4928 = vmatprep.subr.bf16.mxu1 %v2196_v6  ;;  %v5055_v6 = vld [vmem:[%s6668_s7 + $0x1b4] ss:$8 sps:$4 sm:$0xff]   ;;  %v5075_v18 = vld [vmem:[%s6668_s7 + $0x90] ss:$8 sps:$4 sm:$0xff]   ;;  %v5077_v12 = vld [vmem:[%s6668_s7 + $0xa4] ss:$8 sps:$4 sm:$0xff]  }
 0x362   : > { %v5079_v46 = vld [vmem:[%s6668_s7 + $0x1f4] ss:$8 sps:$4 sm:$0xff]   ;;  %v5081_v4 = vld [vmem:[%s6668_s7 + $0xa0] ss:$8 sps:$4 sm:$0xff]   ;;  %v5085_v53 = vld [vmem:[%s6668_s7 + $0xb0] ss:$8 sps:$4 sm:$0xff]  }
 0x363   : > { %v5083_v9 = vld [vmem:[%s6668_s7 + $0xb4] ss:$8 sps:$4 sm:$0xff]   ;;  %v5086_v44 = vld [vmem:[%s6668_s7 + $0xc4] ss:$8 sps:$4 sm:$0xff]   ;;  %v5088_v50 = vld [vmem:[%s6668_s7 + $0xc0] ss:$8 sps:$4 sm:$0xff]  }
 0x364   : > { %2606 = vmatpush2.bf16.msra.mxu0 %v2195_v31  ;;  %4944 = vmatpush2.bf16.msra.mxu1 %v2195_v31  ;;  %v5065_v31 = vld [vmem:[%s6668_s7 + $0x84] ss:$8 sps:$4 sm:$0xff]   ;;  %v5091_v30 = vld [vmem:[%s6668_s7 + $0xd0] ss:$8 sps:$4 sm:$0xff]   ;;  %v5094_v15 = vld [vmem:[%s6668_s7 + $0xe0] ss:$8 sps:$4 sm:$0xff]  }
 0x365   : > { %2607 = vmatprep.subr.bf16.mxu0 %v2194_v29  ;;  %4929 = vmatprep.subr.bf16.mxu1 %v2194_v29  ;;  %v5073_v29 = vld [vmem:[%s6668_s7 + $0x1e4] ss:$8 sps:$4 sm:$0xff]   ;;  %v5097_v24 = vld [vmem:[%s6668_s7 + $0xf0] ss:$8 sps:$4 sm:$0xff]   ;;  %v5101_v60 = vld [vmem:[%s6668_s7 + $0x114] ss:$8 sps:$4 sm:$0xff]  }
 0x366   : > { %v5092_v3 = vld [vmem:[%s6668_s7 + $0xe4] ss:$8 sps:$4 sm:$0xff]   ;;  %v5103_v58 = vld [vmem:[%s6668_s7 + $0x110] ss:$8 sps:$4 sm:$0xff]   ;;  %v5106_v51 = vld [vmem:[%s6668_s7 + $0x120] ss:$8 sps:$4 sm:$0xff]  }
 0x367   : > { %v5098_v10 = vld [vmem:[%s6668_s7 + $0x104] ss:$8 sps:$4 sm:$0xff]   ;;  %v5109_v62 = vld [vmem:[%s6668_s7 + $0x130] ss:$8 sps:$4 sm:$0xff]  }
 0x368   : > { %2608 = vmatpush2.bf16.msra.mxu0 %v2193_v17  ;;  %4945 = vmatpush2.bf16.msra.mxu1 %v2193_v17  ;;  %v5082_v17 = vld [vmem:[%s6668_s7 + $0x1f0] ss:$8 sps:$4 sm:$0xff]  }
 0x369   : > { %2609 = vmatprep.subr.bf16.mxu0 %v2192_v49  ;;  %4930 = vmatprep.subr.bf16.mxu1 %v2192_v49  ;;  %v5089_v49 = vld [vmem:[%s6668_s7 + $0xd4] ss:$8 sps:$4 sm:$0xff]  }
 0x36c   : > { %2610 = vmatpush2.bf16.msra.mxu0 %v2191_v33  ;;  %4946 = vmatpush2.bf16.msra.mxu1 %v2191_v33  ;;  %v5095_v33 = vld [vmem:[%s6668_s7 + $0xf4] ss:$8 sps:$4 sm:$0xff]  }
 0x36d   : > { %2611 = vmatprep.subr.bf16.mxu0 %v2190_v13  ;;  %4931 = vmatprep.subr.bf16.mxu1 %v2190_v13  ;;  %v5100_v13 = vld [vmem:[%s6668_s7 + $0x100] ss:$8 sps:$4 sm:$0xff]  }
 0x370   : > { %2612 = vmatpush2.bf16.msra.mxu0 %v2189_v0  ;;  %4947 = vmatpush2.bf16.msra.mxu1 %v2189_v0  ;;  %v5104_v0 = vld [vmem:[%s6668_s7 + $0x124] ss:$8 sps:$4 sm:$0xff]  }
 0x371   : > { %2613 = vmatprep.subr.bf16.mxu0 %v2188_v55  ;;  %4932 = vmatprep.subr.bf16.mxu1 %v2188_v55  ;;  %v5107_v55 = vld [vmem:[%s6668_s7 + $0x134] ss:$8 sps:$4 sm:$0xff]  }
 0x374   : > { %2614 = vmatpush2.bf16.msra.mxu0 %v2187_v48  ;;  %4948 = vmatpush2.bf16.msra.mxu1 %v2187_v48  ;;  %v5112_v48 = vld [vmem:[%s6668_s7 + $0x144] ss:$8 sps:$4 sm:$0xff]  }
 0x375   : > { %2615 = vmatprep.subr.bf16.mxu0 %v2186_v16  ;;  %4933 = vmatprep.subr.bf16.mxu1 %v2186_v16  ;;  %v5110_v16 = vld [vmem:[%s6668_s7 + $0x140] ss:$8 sps:$4 sm:$0xff]  }
 0x378   : > { %2616 = vmatpush2.bf16.msra.mxu0 %v2185_v45  ;;  %4949 = vmatpush2.bf16.msra.mxu1 %v2185_v45  ;;  %v3573_v45 = vpop.permute.xlu1 %3572 }
 0x37b   : > { %2618 = vmatmul.mubr.bf16.vlgmr.msra.gmra.mxu0 %v5017_v14  ;;  %2828 = vmatmul.mubr.bf16.vlgmr.msra.gmra.mxu1 %v5020_v61  ;;  %v3585_v14 = vpop.permute.xlu0 %3584 }
 0x37c   : > { %2627 = vmatprep.mubr.bf16.mxu0 %v5023_v41  ;;  %2837 = vmatprep.mubr.bf16.mxu1 %v5025_v47  ;;  %v3581_v47 = vrot.slane %v3573_v45, %v5892_v38 }
 0x383   : > { %2628 = vmatmul.mubr.bf16.gmra.mxu0 %v5027_v57  ;;  %2838 = vmatmul.mubr.bf16.gmra.mxu1 %v5028_v34 }
 0x384   : > { %2637 = vmatprep.mubr.bf16.mxu0 %v5029_v36  ;;  %2847 = vmatprep.mubr.bf16.mxu1 %v5031_v23  ;;  %v3593_v36 = vrot.slane %v3585_v14, %v5892_v38 }
 0x38b   : > { %2638 = vmatmul.mubr.bf16.gmra.mxu0 %v5033_v42  ;;  %2848 = vmatmul.mubr.bf16.gmra.mxu1 %v5034_v52  ;;  %v4839_v52 = vcombine.low %v3581_v47, %v3593_v36 }
 0x38c   : > { %2647 = vmatprep.mubr.bf16.mxu0 %v5035_v26  ;;  %2857 = vmatprep.mubr.bf16.mxu1 %v5037_v2 }
 0x393   : > { %2648 = vmatmul.mubr.bf16.gmra.mxu0 %v5039_v39  ;;  %2858 = vmatmul.mubr.bf16.gmra.mxu1 %v5040_v28 }
 0x394   : > { %2657 = vmatprep.mubr.bf16.mxu0 %v5041_v22  ;;  %2867 = vmatprep.mubr.bf16.mxu1 %v5043_v37  ;;  %v3597_v22 = vpop.permute.xlu1 %3596  ;;  %v6779_v37 = vld [vmem:[#allocation32_spill] sm:$0xff] }
 0x39b   : > { %2658 = vmatmul.mubr.bf16.gmra.mxu0 %v5045_v25  ;;  %2868 = vmatmul.mubr.bf16.gmra.mxu1 %v5046_v35 }
 0x39c   : > { %2667 = vmatprep.mubr.bf16.mxu0 %v5047_v11  ;;  %2877 = vmatprep.mubr.bf16.mxu1 %v5049_v19 }
 0x3a3   : > { %2668 = vmatmul.mubr.bf16.gmra.mxu0 %v5051_v8  ;;  %2878 = vmatmul.mubr.bf16.gmra.mxu1 %v5052_v63 }
 0x3a4   : > { %2677 = vmatprep.mubr.bf16.mxu0 %v5053_v1  ;;  %2887 = vmatprep.mubr.bf16.mxu1 %v5055_v6  ;;  %v3609_v1 = vpop.permute.xlu0 %3608 }
 0x3ab   : > { %2678 = vmatmul.mubr.bf16.gmra.mxu0 %v5057_v56  ;;  %2888 = vmatmul.mubr.bf16.gmra.mxu1 %v5058_v7 }
 0x3ac   : > { %2687 = vmatprep.mubr.bf16.mxu0 %v5059_v54  ;;  %2897 = vmatprep.mubr.bf16.mxu1 %v5061_v32  ;;  %v3605_v32 = vrot.slane %v3597_v22, %v5892_v38 }
 0x3b3   : > { %2688 = vmatmul.mubr.bf16.gmra.mxu0 %v5063_v20  ;;  %2898 = vmatmul.mubr.bf16.gmra.mxu1 %v5064_v5 }
 0x3b4   : > { %2697 = vmatprep.mubr.bf16.mxu0 %v5065_v31  ;;  %2907 = vmatprep.mubr.bf16.mxu1 %v5067_v21 }
 0x3bb   : > { %2698 = vmatmul.mubr.bf16.gmra.mxu0 %v5069_v43  ;;  %2908 = vmatmul.mubr.bf16.gmra.mxu1 %v5070_v59  ;;  %v3617_v43 = vrot.slane %v3609_v1, %v5892_v38 }
 0x3bc   : > { %2707 = vmatprep.mubr.bf16.mxu0 %v5071_v27  ;;  %2917 = vmatprep.mubr.bf16.mxu1 %v5073_v29 }
 0x3c3   : > { %2708 = vmatmul.mubr.bf16.gmra.mxu0 %v5075_v18  ;;  %2918 = vmatmul.mubr.bf16.gmra.mxu1 %v5076_v40  ;;  %v3621_v40 = vpop.permute.xlu1 %3620 }
 0x3c4   : > { %2717 = vmatprep.mubr.bf16.mxu0 %v5077_v12  ;;  %2927 = vmatprep.mubr.bf16.mxu1 %v5079_v46 }
 0x3cb   : > { %2718 = vmatmul.mubr.bf16.gmra.mxu0 %v5081_v4  ;;  %2928 = vmatmul.mubr.bf16.gmra.mxu1 %v5082_v17 }
 0x3cc   : > { %2727 = vmatprep.mubr.bf16.mxu0 %v5083_v9  ;;  %v4840_v9 = vcombine.low %v3605_v32, %v3617_v43 }
 0x3d3   : > { %2728 = vmatmul.mubr.bf16.gmra.mxu0 %v5085_v53 }
 0x3d4   : > { %2737 = vmatprep.mubr.bf16.mxu0 %v5086_v44 }
 0x3db   : > { %2738 = vmatmul.mubr.bf16.gmra.mxu0 %v5088_v50  ;;  %v3633_v50 = vpop.permute.xlu0 %3632 }
 0x3dc   : > { %2747 = vmatprep.mubr.bf16.mxu0 %v5089_v49 }
 0x3df   : > { %v3657_v32 = vpop.permute.xlu0 %3656 }
 0x3e3   : > { %2748 = vmatmul.mubr.bf16.gmra.mxu0 %v5091_v30 }
 0x3e4   : > { %2757 = vmatprep.mubr.bf16.mxu0 %v5092_v3 }
 0x3eb   : > { %2758 = vmatmul.mubr.bf16.gmra.mxu0 %v5094_v15 }
 0x3ec   : > { %2767 = vmatprep.mubr.bf16.mxu0 %v5095_v33  ;;  %v6780_v33 = vld [vmem:[#allocation33_spill] sm:$0xff] }
 0x3f3   : > { %2768 = vmatmul.mubr.bf16.gmra.mxu0 %v5097_v24 }
 0x3f4   : > { %2777 = vmatprep.mubr.bf16.mxu0 %v5098_v10 }
 0x3fb   : > { %2778 = vmatmul.mubr.bf16.gmra.mxu0 %v5100_v13 }
 0x3fc   : > { %2787 = vmatprep.mubr.bf16.mxu0 %v5101_v60 }
 0x403   : > { %2788 = vmatmul.mubr.bf16.gmra.mxu0 %v5103_v58 }
 0x404   : > { %2797 = vmatprep.mubr.bf16.mxu0 %v5104_v0 }
 0x40b   : > { %2798 = vmatmul.mubr.bf16.gmra.mxu0 %v5106_v51  ;;  %v3629_v51 = vrot.slane %v3621_v40, %v5892_v38  ;;  %v3665_v40 = vrot.slane %v3657_v32, %v5892_v38 }
 0x40c   : > { %2807 = vmatprep.mubr.bf16.mxu0 %v5107_v55 }
 0x413   : > { %2808 = vmatmul.mubr.bf16.gmra.mxu0 %v5109_v62 }
 0x414   : > { %2817 = vmatprep.mubr.bf16.mxu0 %v5112_v48 }
 0x41b   : > { %2818 = vmatmul.mubr.bf16.gmra.mxu0 %v5110_v16 }
 0x43b   : > { %v2619_v61 = vpop.f32.mrf.mxu0  ;;  %v2829_v41 = vpop.f32.mrf.mxu1 }
 0x43d   : > { %v2621_v57 = vpop.f32.mrf.mxu0  ;;  %v2831_v34 = vpop.f32.mrf.mxu1 }
 0x43f   : > { %v2623_v23 = vpop.f32.mrf.mxu0  ;;  %v2833_v42 = vpop.f32.mrf.mxu1 }
 0x440   : > { %v2938_v26 = vpack.c.bf16 %v2623_v23, %v2619_v61  ;;  %v2980_v2 = vpack.c.bf16 %v2833_v42, %v2829_v41  ;;  %v3641_v61 = vrot.slane %v3633_v50, %v5892_v38 }
 0x441   : > { %v2625_v39 = vpop.f32.mrf.mxu0  ;;  %v2835_v28 = vpop.f32.mrf.mxu1 }
 0x442   : > { %v4026_v25 = vadd.bf16 %v6779_v37, %v2938_v26  ;;  %v4068_v35 = vadd.bf16 %v4839_v52, %v2980_v2  ;;  %v2939_v11 = vpack.c.bf16 %v2625_v39, %v2621_v57  ;;  %v2981_v19 = vpack.c.bf16 %v2835_v28, %v2831_v34 }
 0x443   : > { %v2629_v8 = vpop.f32.mrf.mxu0  ;;  %v2839_v63 = vpop.f32.mrf.mxu1  ;;  %v4841_v36 = vcombine.low %v3629_v51, %v3641_v61 }
 0x444   : > { %v4090_v6 = vmul.bf16 1045249613, %v4026_v25  ;;  %v4132_v56 = vmul.bf16 1045249613, %v4068_v35  ;;  %v4027_v7 = vadd.bf16 %v6779_v37, %v2939_v11  ;;  %v4069_v54 = vadd.bf16 %v4839_v52, %v2981_v19  ;;  %v3645_v37 = vpop.permute.xlu1 %3644 }
 0x445   : > { %v2631_v20 = vpop.f32.mrf.mxu0  ;;  %v2841_v5 = vpop.f32.mrf.mxu1  ;;  %v3653_v43 = vrot.slane %v3645_v37, %v5892_v38 }
 0x446   : > { %v4091_v31 = vmul.bf16 1045249613, %v4027_v7  ;;  %v4133_v21 = vmul.bf16 1045249613, %v4069_v54  ;;  %v4154_v59 = vmax.bf16 %v4090_v6, %v4026_v25  ;;  %v4196_v27 = vmax.bf16 %v4132_v56, %v4068_v35  ;;  %v6781_v25 = vld [vmem:[#allocation34_spill] sm:$0xff] }
 0x447   : > { %v2633_v29 = vpop.f32.mrf.mxu0  ;;  %v2843_v18 = vpop.f32.mrf.mxu1 }
 0x448   : > { %v4155_v12 = vmax.bf16 %v4091_v31, %v4027_v7  ;;  %v4197_v46 = vmax.bf16 %v4133_v21, %v4069_v54  ;;  %v2940_v4 = vpack.c.bf16 %v2633_v29, %v2629_v8  ;;  %v2982_v17 = vpack.c.bf16 %v2843_v18, %v2839_v63 }
 0x449   : > { %v2635_v53 = vpop.f32.mrf.mxu0  ;;  %v2845_v44 = vpop.f32.mrf.mxu1 }
 0x44a   : > { %v4850_v49 = vcombine.low %v4154_v59, %v4155_v12  ;;  %v4851_v30 = vcombine.high %v4154_v59, %v4155_v12  ;;  %v4892_v3 = vcombine.low %v4196_v27, %v4197_v46  ;;  %v4893_v15 = vcombine.high %v4196_v27, %v4197_v46 }
 0x44b   : > { %v4028_v24 = vadd.bf16 %v6780_v33, %v2940_v4  ;;  %v4070_v10 = vadd.bf16 %v4840_v9, %v2982_v17  ;;  %v2941_v13 = vpack.c.bf16 %v2635_v53, %v2631_v20  ;;  %v2983_v60 = vpack.c.bf16 %v2845_v44, %v2841_v5  ;;  %v2639_v58 = vpop.f32.mrf.mxu0  ;;  %v2849_v0 = vpop.f32.mrf.mxu1 }
 0x44c   : > { %4538 = vst [vmem:[%s6528_s27] sm:$0xff] %v4850_v49  ;;  %4539 = vst [vmem:[%s6528_s27 + $0x8] sm:$0xff] %v4851_v30  ;;  %v4842_v30 = vcombine.low %v3653_v43, %v3665_v40 }
 0x44d   : > { %4580 = vst [vmem:[%s6528_s27 + $0x150] sm:$0xff] %v4892_v3  ;;  %4581 = vst [vmem:[%s6528_s27 + $0x158] sm:$0xff] %v4893_v15  ;;  %v4092_v55 = vmul.bf16 1045249613, %v4028_v24  ;;  %v4134_v62 = vmul.bf16 1045249613, %v4070_v10  ;;  %v4029_v48 = vadd.bf16 %v6780_v33, %v2941_v13  ;;  %v4071_v16 = vadd.bf16 %v4840_v9, %v2983_v60  ;;  %v2641_v45 = vpop.f32.mrf.mxu0  ;;  %v2851_v14 = vpop.f32.mrf.mxu1 }
 0x44e   : > { %v3669_v9 = vpop.permute.xlu1 %3668  ;;  %v3681_v33 = vpop.permute.xlu0 %3680 }
 0x44f   : > { %v4093_v41 = vmul.bf16 1045249613, %v4029_v48  ;;  %v4135_v47 = vmul.bf16 1045249613, %v4071_v16  ;;  %v2643_v57 = vpop.f32.mrf.mxu0  ;;  %v2853_v34 = vpop.f32.mrf.mxu1  ;;  %v4156_v52 = vmax.bf16 %v4092_v55, %v4028_v24  ;;  %v4198_v26 = vmax.bf16 %v4134_v62, %v4070_v10 }
 0x450   : > { %v2942_v23 = vpack.c.bf16 %v2643_v57, %v2639_v58  ;;  %v2984_v42 = vpack.c.bf16 %v2853_v34, %v2849_v0  ;;  %v6782_v58 = vld [vmem:[#allocation35_spill] sm:$0xff] }
 0x451   : > { %v4157_v2 = vmax.bf16 %v4093_v41, %v4029_v48  ;;  %v4199_v39 = vmax.bf16 %v4135_v47, %v4071_v16  ;;  %v2645_v28 = vpop.f32.mrf.mxu0  ;;  %v2855_v22 = vpop.f32.mrf.mxu1 }
 0x452   : > { %v4030_v35 = vadd.bf16 %v6781_v25, %v2942_v23  ;;  %v4072_v11 = vadd.bf16 %v4841_v36, %v2984_v42  ;;  %v2943_v19 = vpack.c.bf16 %v2645_v28, %v2641_v45  ;;  %v2985_v8 = vpack.c.bf16 %v2855_v22, %v2851_v14  ;;  %v3705_v43 = vpop.permute.xlu0 %3704 }
 0x453   : > { %v4852_v63 = vcombine.low %v4156_v52, %v4157_v2  ;;  %v4853_v1 = vcombine.high %v4156_v52, %v4157_v2  ;;  %v4894_v6 = vcombine.low %v4198_v26, %v4199_v39  ;;  %v4895_v56 = vcombine.high %v4198_v26, %v4199_v39  ;;  %v2649_v7 = vpop.f32.mrf.mxu0  ;;  %v2859_v54 = vpop.f32.mrf.mxu1 }
 0x454   : > { %v4094_v20 = vmul.bf16 1045249613, %v4030_v35  ;;  %v4136_v5 = vmul.bf16 1045249613, %v4072_v11  ;;  %v4031_v31 = vadd.bf16 %v6781_v25, %v2943_v19  ;;  %v4073_v21 = vadd.bf16 %v4841_v36, %v2985_v8  ;;  %v3693_v8 = vpop.permute.xlu1 %3692 }
 0x455   : > { %4540 = vst [vmem:[%s6528_s27 + $0x10] sm:$0xff] %v4852_v63  ;;  %4541 = vst [vmem:[%s6528_s27 + $0x18] sm:$0xff] %v4853_v1  ;;  %v2651_v59 = vpop.f32.mrf.mxu0  ;;  %v2861_v27 = vpop.f32.mrf.mxu1  ;;  %v3677_v45 = vrot.slane %v3669_v9, %v5892_v38  ;;  %v3689_v36 = vrot.slane %v3681_v33, %v5892_v38  ;;  %v6783_v63 = vld [vmem:[#allocation36_spill] sm:$0xff]  ;;  %v3701_v40 = vrot.slane %v3693_v8, %v5892_v38 }
 0x456   : > { %4582 = vst [vmem:[%s6528_s27 + $0x160] sm:$0xff] %v4894_v6  ;;  %4583 = vst [vmem:[%s6528_s27 + $0x168] sm:$0xff] %v4895_v56  ;;  %v4095_v29 = vmul.bf16 1045249613, %v4031_v31  ;;  %v4137_v18 = vmul.bf16 1045249613, %v4073_v21  ;;  %v4158_v12 = vmax.bf16 %v4094_v20, %v4030_v35  ;;  %v4200_v46 = vmax.bf16 %v4136_v5, %v4072_v11 }
 0x457   : > { %v2653_v4 = vpop.f32.mrf.mxu0  ;;  %v2863_v17 = vpop.f32.mrf.mxu1  ;;  %v4843_v2 = vcombine.low %v3677_v45, %v3689_v36  ;;  %v3713_v9 = vrot.slane %v3705_v43, %v5892_v38 }
 0x458   : > { %v4159_v53 = vmax.bf16 %v4095_v29, %v4031_v31  ;;  %v4201_v44 = vmax.bf16 %v4137_v18, %v4073_v21  ;;  %v2944_v50 = vpack.c.bf16 %v2653_v4, %v2649_v7  ;;  %v2986_v49 = vpack.c.bf16 %v2863_v17, %v2859_v54 }
 0x459   : > { %v2655_v3 = vpop.f32.mrf.mxu0  ;;  %v2865_v15 = vpop.f32.mrf.mxu1 }
 0x45a   : > { %v4854_v24 = vcombine.low %v4158_v12, %v4159_v53  ;;  %v4855_v10 = vcombine.high %v4158_v12, %v4159_v53  ;;  %v4896_v13 = vcombine.low %v4200_v46, %v4201_v44  ;;  %v4897_v60 = vcombine.high %v4200_v46, %v4201_v44 }
 0x45b   : > { %v4032_v0 = vadd.bf16 %v6782_v58, %v2944_v50  ;;  %v4074_v51 = vadd.bf16 %v4842_v30, %v2986_v49  ;;  %v2945_v55 = vpack.c.bf16 %v2655_v3, %v2651_v59  ;;  %v2987_v62 = vpack.c.bf16 %v2865_v15, %v2861_v27  ;;  %v2659_v48 = vpop.f32.mrf.mxu0  ;;  %v2869_v16 = vpop.f32.mrf.mxu1 }
 0x45c   : > { %4542 = vst [vmem:[%s6528_s27 + $0x20] sm:$0xff] %v4854_v24  ;;  %4543 = vst [vmem:[%s6528_s27 + $0x28] sm:$0xff] %v4855_v10  ;;  %v4844_v10 = vcombine.low %v3701_v40, %v3713_v9 }
 0x45d   : > { %4584 = vst [vmem:[%s6528_s27 + $0x170] sm:$0xff] %v4896_v13  ;;  %4585 = vst [vmem:[%s6528_s27 + $0x178] sm:$0xff] %v4897_v60  ;;  %v4096_v14 = vmul.bf16 1045249613, %v4032_v0  ;;  %v4138_v61 = vmul.bf16 1045249613, %v4074_v51  ;;  %v4033_v41 = vadd.bf16 %v6782_v58, %v2945_v55  ;;  %v4075_v47 = vadd.bf16 %v4842_v30, %v2987_v62  ;;  %v2661_v57 = vpop.f32.mrf.mxu0  ;;  %v2871_v34 = vpop.f32.mrf.mxu1 }
 0x45e   : > { %v3717_v30 = vpop.permute.xlu1 %3716  ;;  %v3729_v58 = vpop.permute.xlu0 %3728 }
 0x45f   : > { %v4097_v23 = vmul.bf16 1045249613, %v4033_v41  ;;  %v4139_v42 = vmul.bf16 1045249613, %v4075_v47  ;;  %v2663_v52 = vpop.f32.mrf.mxu0  ;;  %v2873_v26 = vpop.f32.mrf.mxu1  ;;  %v4160_v22 = vmax.bf16 %v4096_v14, %v4032_v0  ;;  %v4202_v37 = vmax.bf16 %v4138_v61, %v4074_v51 }
 0x460   : > { %v2946_v39 = vpack.c.bf16 %v2663_v52, %v2659_v48  ;;  %v2988_v28 = vpack.c.bf16 %v2873_v26, %v2869_v16  ;;  %v6784_v48 = vld [vmem:[#allocation37_spill] sm:$0xff] }
 0x461   : > { %v4161_v25 = vmax.bf16 %v4097_v23, %v4033_v41  ;;  %v4203_v35 = vmax.bf16 %v4139_v42, %v4075_v47  ;;  %v2665_v11 = vpop.f32.mrf.mxu0  ;;  %v2875_v19 = vpop.f32.mrf.mxu1 }
 0x462   : > { %v4034_v1 = vadd.bf16 %v6783_v63, %v2946_v39  ;;  %v4076_v6 = vadd.bf16 %v4843_v2, %v2988_v28  ;;  %v2947_v56 = vpack.c.bf16 %v2665_v11, %v2661_v57  ;;  %v2989_v7 = vpack.c.bf16 %v2875_v19, %v2871_v34  ;;  %v3753_v40 = vpop.permute.xlu0 %3752 }
 0x463   : > { %v4856_v54 = vcombine.low %v4160_v22, %v4161_v25  ;;  %v4857_v32 = vcombine.high %v4160_v22, %v4161_v25  ;;  %v4898_v20 = vcombine.low %v4202_v37, %v4203_v35  ;;  %v4899_v5 = vcombine.high %v4202_v37, %v4203_v35  ;;  %v2669_v31 = vpop.f32.mrf.mxu0  ;;  %v2879_v21 = vpop.f32.mrf.mxu1 }
 0x464   : > { %v4098_v59 = vmul.bf16 1045249613, %v4034_v1  ;;  %v4140_v27 = vmul.bf16 1045249613, %v4076_v6  ;;  %v4035_v29 = vadd.bf16 %v6783_v63, %v2947_v56  ;;  %v4077_v18 = vadd.bf16 %v4843_v2, %v2989_v7  ;;  %v3741_v7 = vpop.permute.xlu1 %3740 }
 0x465   : > { %4544 = vst [vmem:[%s6528_s27 + $0x30] sm:$0xff] %v4856_v54  ;;  %4545 = vst [vmem:[%s6528_s27 + $0x38] sm:$0xff] %v4857_v32  ;;  %v2671_v12 = vpop.f32.mrf.mxu0  ;;  %v2881_v46 = vpop.f32.mrf.mxu1  ;;  %v3725_v57 = vrot.slane %v3717_v30, %v5892_v38  ;;  %v3737_v2 = vrot.slane %v3729_v58, %v5892_v38  ;;  %v6785_v54 = vld [vmem:[#allocation38_spill] sm:$0xff]  ;;  %v3749_v9 = vrot.slane %v3741_v7, %v5892_v38 }
 0x466   : > { %4586 = vst [vmem:[%s6528_s27 + $0x180] sm:$0xff] %v4898_v20  ;;  %4587 = vst [vmem:[%s6528_s27 + $0x188] sm:$0xff] %v4899_v5  ;;  %v4099_v4 = vmul.bf16 1045249613, %v4035_v29  ;;  %v4141_v17 = vmul.bf16 1045249613, %v4077_v18  ;;  %v4162_v53 = vmax.bf16 %v4098_v59, %v4034_v1  ;;  %v4204_v44 = vmax.bf16 %v4140_v27, %v4076_v6 }
 0x467   : > { %v2673_v50 = vpop.f32.mrf.mxu0  ;;  %v2883_v49 = vpop.f32.mrf.mxu1  ;;  %v4845_v25 = vcombine.low %v3725_v57, %v3737_v2  ;;  %v3761_v30 = vrot.slane %v3753_v40, %v5892_v38 }
 0x468   : > { %v4163_v3 = vmax.bf16 %v4099_v4, %v4035_v29  ;;  %v4205_v15 = vmax.bf16 %v4141_v17, %v4077_v18  ;;  %v2948_v33 = vpack.c.bf16 %v2673_v50, %v2669_v31  ;;  %v2990_v24 = vpack.c.bf16 %v2883_v49, %v2879_v21 }
 0x469   : > { %v2675_v13 = vpop.f32.mrf.mxu0  ;;  %v2885_v60 = vpop.f32.mrf.mxu1 }
 0x46a   : > { %v4858_v0 = vcombine.low %v4162_v53, %v4163_v3  ;;  %v4859_v51 = vcombine.high %v4162_v53, %v4163_v3  ;;  %v4900_v55 = vcombine.low %v4204_v44, %v4205_v15  ;;  %v4901_v62 = vcombine.high %v4204_v44, %v4205_v15 }
 0x46b   : > { %v4036_v16 = vadd.bf16 %v6784_v48, %v2948_v33  ;;  %v4078_v45 = vadd.bf16 %v4844_v10, %v2990_v24  ;;  %v2949_v14 = vpack.c.bf16 %v2675_v13, %v2671_v12  ;;  %v2991_v61 = vpack.c.bf16 %v2885_v60, %v2881_v46  ;;  %v2679_v41 = vpop.f32.mrf.mxu0  ;;  %v2889_v47 = vpop.f32.mrf.mxu1 }
 0x46c   : > { %4546 = vst [vmem:[%s6528_s27 + $0x40] sm:$0xff] %v4858_v0  ;;  %4547 = vst [vmem:[%s6528_s27 + $0x48] sm:$0xff] %v4859_v51  ;;  %v4846_v51 = vcombine.low %v3749_v9, %v3761_v30 }
 0x46d   : > { %4588 = vst [vmem:[%s6528_s27 + $0x190] sm:$0xff] %v4900_v55  ;;  %4589 = vst [vmem:[%s6528_s27 + $0x198] sm:$0xff] %v4901_v62  ;;  %v4100_v34 = vmul.bf16 1045249613, %v4036_v16  ;;  %v4142_v36 = vmul.bf16 1045249613, %v4078_v45  ;;  %v4037_v23 = vadd.bf16 %v6784_v48, %v2949_v14  ;;  %v4079_v42 = vadd.bf16 %v4844_v10, %v2991_v61  ;;  %v2681_v52 = vpop.f32.mrf.mxu0  ;;  %v2891_v26 = vpop.f32.mrf.mxu1 }
 0x46e   : > { %v3765_v10 = vpop.permute.xlu1 %3764  ;;  %v3777_v48 = vpop.permute.xlu0 %3776 }
 0x46f   : > { %v4101_v39 = vmul.bf16 1045249613, %v4037_v23  ;;  %v4143_v28 = vmul.bf16 1045249613, %v4079_v42  ;;  %v2683_v22 = vpop.f32.mrf.mxu0  ;;  %v2893_v37 = vpop.f32.mrf.mxu1  ;;  %v4164_v19 = vmax.bf16 %v4100_v34, %v4036_v16  ;;  %v4206_v8 = vmax.bf16 %v4142_v36, %v4078_v45 }
 0x470   : > { %v2950_v35 = vpack.c.bf16 %v2683_v22, %v2679_v41  ;;  %v2992_v11 = vpack.c.bf16 %v2893_v37, %v2889_v47  ;;  %v6786_v41 = vld [vmem:[#allocation39_spill] sm:$0xff] }
 0x471   : > { %v4165_v63 = vmax.bf16 %v4101_v39, %v4037_v23  ;;  %v4207_v1 = vmax.bf16 %v4143_v28, %v4079_v42  ;;  %v2685_v6 = vpop.f32.mrf.mxu0  ;;  %v2895_v56 = vpop.f32.mrf.mxu1 }
 0x472   : > { %v4038_v32 = vadd.bf16 %v6785_v54, %v2950_v35  ;;  %v4080_v20 = vadd.bf16 %v4845_v25, %v2992_v11  ;;  %v2951_v5 = vpack.c.bf16 %v2685_v6, %v2681_v52  ;;  %v2993_v31 = vpack.c.bf16 %v2895_v56, %v2891_v26  ;;  %v3801_v9 = vpop.permute.xlu0 %3800 }
 0x473   : > { %v4860_v21 = vcombine.low %v4164_v19, %v4165_v63  ;;  %v4861_v43 = vcombine.high %v4164_v19, %v4165_v63  ;;  %v4902_v59 = vcombine.low %v4206_v8, %v4207_v1  ;;  %v4903_v27 = vcombine.high %v4206_v8, %v4207_v1  ;;  %v2689_v29 = vpop.f32.mrf.mxu0  ;;  %v2899_v18 = vpop.f32.mrf.mxu1 }
 0x474   : > { %v4102_v12 = vmul.bf16 1045249613, %v4038_v32  ;;  %v4144_v46 = vmul.bf16 1045249613, %v4080_v20  ;;  %v4039_v4 = vadd.bf16 %v6785_v54, %v2951_v5  ;;  %v4081_v17 = vadd.bf16 %v4845_v25, %v2993_v31  ;;  %v3789_v31 = vpop.permute.xlu1 %3788 }
 0x475   : > { %4548 = vst [vmem:[%s6528_s27 + $0x50] sm:$0xff] %v4860_v21  ;;  %4549 = vst [vmem:[%s6528_s27 + $0x58] sm:$0xff] %v4861_v43  ;;  %v2691_v53 = vpop.f32.mrf.mxu0  ;;  %v2901_v44 = vpop.f32.mrf.mxu1  ;;  %v3773_v52 = vrot.slane %v3765_v10, %v5892_v38  ;;  %v3785_v25 = vrot.slane %v3777_v48, %v5892_v38  ;;  %v6787_v21 = vld [vmem:[#allocation40_spill] sm:$0xff]  ;;  %v3797_v30 = vrot.slane %v3789_v31, %v5892_v38 }
 0x476   : > { %4590 = vst [vmem:[%s6528_s27 + $0x1a0] sm:$0xff] %v4902_v59  ;;  %4591 = vst [vmem:[%s6528_s27 + $0x1a8] sm:$0xff] %v4903_v27  ;;  %v4103_v50 = vmul.bf16 1045249613, %v4039_v4  ;;  %v4145_v49 = vmul.bf16 1045249613, %v4081_v17  ;;  %v4166_v3 = vmax.bf16 %v4102_v12, %v4038_v32  ;;  %v4208_v15 = vmax.bf16 %v4144_v46, %v4080_v20 }
 0x477   : > { %v2693_v33 = vpop.f32.mrf.mxu0  ;;  %v2903_v24 = vpop.f32.mrf.mxu1  ;;  %v4847_v63 = vcombine.low %v3773_v52, %v3785_v25  ;;  %v3809_v10 = vrot.slane %v3801_v9, %v5892_v38 }
 0x478   : > { %v4167_v13 = vmax.bf16 %v4103_v50, %v4039_v4  ;;  %v4209_v60 = vmax.bf16 %v4145_v49, %v4081_v17  ;;  %v2952_v58 = vpack.c.bf16 %v2693_v33, %v2689_v29  ;;  %v2994_v0 = vpack.c.bf16 %v2903_v24, %v2899_v18 }
 0x479   : > { %v2695_v55 = vpop.f32.mrf.mxu0  ;;  %v2905_v62 = vpop.f32.mrf.mxu1 }
 0x47a   : > { %v4862_v16 = vcombine.low %v4166_v3, %v4167_v13  ;;  %v4863_v45 = vcombine.high %v4166_v3, %v4167_v13  ;;  %v4904_v14 = vcombine.low %v4208_v15, %v4209_v60  ;;  %v4905_v61 = vcombine.high %v4208_v15, %v4209_v60 }
 0x47b   : > { %v4040_v47 = vadd.bf16 %v6786_v41, %v2952_v58  ;;  %v4082_v57 = vadd.bf16 %v4846_v51, %v2994_v0  ;;  %v2953_v34 = vpack.c.bf16 %v2695_v55, %v2691_v53  ;;  %v2995_v36 = vpack.c.bf16 %v2905_v62, %v2901_v44  ;;  %v2699_v23 = vpop.f32.mrf.mxu0  ;;  %v2909_v42 = vpop.f32.mrf.mxu1 }
 0x47c   : > { %4550 = vst [vmem:[%s6528_s27 + $0x60] sm:$0xff] %v4862_v16  ;;  %4551 = vst [vmem:[%s6528_s27 + $0x68] sm:$0xff] %v4863_v45  ;;  %v4848_v45 = vcombine.low %v3797_v30, %v3809_v10 }
 0x47d   : > { %4592 = vst [vmem:[%s6528_s27 + $0x1b0] sm:$0xff] %v4904_v14  ;;  %4593 = vst [vmem:[%s6528_s27 + $0x1b8] sm:$0xff] %v4905_v61  ;;  %v4104_v26 = vmul.bf16 1045249613, %v4040_v47  ;;  %v4146_v2 = vmul.bf16 1045249613, %v4082_v57  ;;  %v4041_v39 = vadd.bf16 %v6786_v41, %v2953_v34  ;;  %v4083_v28 = vadd.bf16 %v4846_v51, %v2995_v36  ;;  %v2701_v22 = vpop.f32.mrf.mxu0  ;;  %v2911_v37 = vpop.f32.mrf.mxu1 }
 0x47e   : > { %v3813_v51 = vpop.permute.xlu1 %3812  ;;  %v3825_v41 = vpop.permute.xlu0 %3824 }
 0x47f   : > { %v4105_v35 = vmul.bf16 1045249613, %v4041_v39  ;;  %v4147_v11 = vmul.bf16 1045249613, %v4083_v28  ;;  %v2703_v19 = vpop.f32.mrf.mxu0  ;;  %v2913_v8 = vpop.f32.mrf.mxu1  ;;  %v4168_v56 = vmax.bf16 %v4104_v26, %v4040_v47  ;;  %v4210_v7 = vmax.bf16 %v4146_v2, %v4082_v57 }
 0x480   : > { %v2954_v1 = vpack.c.bf16 %v2703_v19, %v2699_v23  ;;  %v2996_v6 = vpack.c.bf16 %v2913_v8, %v2909_v42  ;;  %v6788_v23 = vld [vmem:[#allocation41_spill] sm:$0xff] }
 0x481   : > { %v4169_v54 = vmax.bf16 %v4105_v35, %v4041_v39  ;;  %v4211_v32 = vmax.bf16 %v4147_v11, %v4083_v28  ;;  %v2705_v20 = vpop.f32.mrf.mxu0  ;;  %v2915_v5 = vpop.f32.mrf.mxu1 }
 0x482   : > { %v4042_v43 = vadd.bf16 %v6787_v21, %v2954_v1  ;;  %v4084_v59 = vadd.bf16 %v4847_v63, %v2996_v6  ;;  %v2955_v27 = vpack.c.bf16 %v2705_v20, %v2701_v22  ;;  %v2997_v29 = vpack.c.bf16 %v2915_v5, %v2911_v37 }
 0x483   : > { %v4864_v18 = vcombine.low %v4168_v56, %v4169_v54  ;;  %v4865_v40 = vcombine.high %v4168_v56, %v4169_v54  ;;  %v4906_v12 = vcombine.low %v4210_v7, %v4211_v32  ;;  %v4907_v46 = vcombine.high %v4210_v7, %v4211_v32  ;;  %v2709_v4 = vpop.f32.mrf.mxu0  ;;  %v2919_v17 = vpop.f32.mrf.mxu1 }
 0x484   : > { %v4106_v53 = vmul.bf16 1045249613, %v4042_v43  ;;  %v4148_v44 = vmul.bf16 1045249613, %v4084_v59  ;;  %v4043_v50 = vadd.bf16 %v6787_v21, %v2955_v27  ;;  %v4085_v49 = vadd.bf16 %v4847_v63, %v2997_v29  ;;  %v6789_v29 = vld [vmem:[#allocation42_spill] sm:$0xff] }
 0x485   : > { %4552 = vst [vmem:[%s6528_s27 + $0x70] sm:$0xff] %v4864_v18  ;;  %4553 = vst [vmem:[%s6528_s27 + $0x78] sm:$0xff] %v4865_v40  ;;  %v2711_v3 = vpop.f32.mrf.mxu0  ;;  %v2921_v15 = vpop.f32.mrf.mxu1  ;;  %v3821_v22 = vrot.slane %v3813_v51, %v5892_v38  ;;  %v3833_v63 = vrot.slane %v3825_v41, %v5892_v38 }
 0x486   : > { %4594 = vst [vmem:[%s6528_s27 + $0x1c0] sm:$0xff] %v4906_v12  ;;  %4595 = vst [vmem:[%s6528_s27 + $0x1c8] sm:$0xff] %v4907_v46  ;;  %v4107_v33 = vmul.bf16 1045249613, %v4043_v50  ;;  %v4149_v24 = vmul.bf16 1045249613, %v4085_v49  ;;  %v4170_v13 = vmax.bf16 %v4106_v53, %v4042_v43  ;;  %v4212_v60 = vmax.bf16 %v4148_v44, %v4084_v59 }
 0x487   : > { %v2713_v58 = vpop.f32.mrf.mxu0  ;;  %v2923_v0 = vpop.f32.mrf.mxu1  ;;  %v4849_v54 = vcombine.low %v3821_v22, %v3833_v63 }
 0x488   : > { %v4171_v55 = vmax.bf16 %v4107_v33, %v4043_v50  ;;  %v4213_v62 = vmax.bf16 %v4149_v24, %v4085_v49  ;;  %v2956_v48 = vpack.c.bf16 %v2713_v58, %v2709_v4  ;;  %v2998_v16 = vpack.c.bf16 %v2923_v0, %v2919_v17 }
 0x489   : > { %v2715_v14 = vpop.f32.mrf.mxu0  ;;  %v2925_v61 = vpop.f32.mrf.mxu1 }
 0x48a   : > { %v4866_v47 = vcombine.low %v4170_v13, %v4171_v55  ;;  %v4867_v57 = vcombine.high %v4170_v13, %v4171_v55  ;;  %v4908_v34 = vcombine.low %v4212_v60, %v4213_v62  ;;  %v4909_v36 = vcombine.high %v4212_v60, %v4213_v62 }
 0x48b   : > { %v4044_v42 = vadd.bf16 %v6788_v23, %v2956_v48  ;;  %v4086_v52 = vadd.bf16 %v4848_v45, %v2998_v16  ;;  %v2957_v26 = vpack.c.bf16 %v2715_v14, %v2711_v3  ;;  %v2999_v2 = vpack.c.bf16 %v2925_v61, %v2921_v15  ;;  %v2719_v39 = vpop.f32.mrf.mxu0  ;;  %v2929_v28 = vpop.f32.mrf.mxu1 }
 0x48c   : > { %4554 = vst [vmem:[%s6528_s27 + $0x80] sm:$0xff] %v4866_v47  ;;  %4555 = vst [vmem:[%s6528_s27 + $0x88] sm:$0xff] %v4867_v57 }
 0x48d   : > { %4596 = vst [vmem:[%s6528_s27 + $0x1d0] sm:$0xff] %v4908_v34  ;;  %4597 = vst [vmem:[%s6528_s27 + $0x1d8] sm:$0xff] %v4909_v36  ;;  %v4108_v37 = vmul.bf16 1045249613, %v4044_v42  ;;  %v4150_v25 = vmul.bf16 1045249613, %v4086_v52  ;;  %v4045_v35 = vadd.bf16 %v6788_v23, %v2957_v26  ;;  %v4087_v11 = vadd.bf16 %v4848_v45, %v2999_v2  ;;  %v2721_v19 = vpop.f32.mrf.mxu0  ;;  %v2931_v8 = vpop.f32.mrf.mxu1 }
 0x48e   : > { %v6790_v45 = vld [vmem:[#allocation43_spill] sm:$0xff] }
 0x48f   : > { %v4109_v1 = vmul.bf16 1045249613, %v4045_v35  ;;  %v4151_v6 = vmul.bf16 1045249613, %v4087_v11  ;;  %v2723_v56 = vpop.f32.mrf.mxu0  ;;  %v2933_v7 = vpop.f32.mrf.mxu1  ;;  %v4172_v5 = vmax.bf16 %v4108_v37, %v4044_v42  ;;  %v4214_v31 = vmax.bf16 %v4150_v25, %v4086_v52 }
 0x490   : > { %v2958_v32 = vpack.c.bf16 %v2723_v56, %v2719_v39  ;;  %v3000_v20 = vpack.c.bf16 %v2933_v7, %v2929_v28  ;;  %v6791_v39 = vld [vmem:[#allocation44_spill] sm:$0xff] }
 0x491   : > { %v4173_v21 = vmax.bf16 %v4109_v1, %v4045_v35  ;;  %v4215_v43 = vmax.bf16 %v4151_v6, %v4087_v11  ;;  %v2725_v59 = vpop.f32.mrf.mxu0  ;;  %v2935_v27 = vpop.f32.mrf.mxu1 }
 0x492   : > { %v4046_v18 = vadd.bf16 %v6789_v29, %v2958_v32  ;;  %v4088_v38 = vadd.bf16 %v4849_v54, %v3000_v20  ;;  %v2959_v40 = vpack.c.bf16 %v2725_v59, %v2721_v19  ;;  %v3001_v12 = vpack.c.bf16 %v2935_v27, %v2931_v8 }
 0x493   : > { %v4868_v46 = vcombine.low %v4172_v5, %v4173_v21  ;;  %v4869_v4 = vcombine.high %v4172_v5, %v4173_v21  ;;  %v4910_v17 = vcombine.low %v4214_v31, %v4215_v43  ;;  %v4911_v9 = vcombine.high %v4214_v31, %v4215_v43  ;;  %v2729_v53 = vpop.f32.mrf.mxu0  ;;  %v6792_v5 = vld [vmem:[#allocation45_spill] sm:$0xff] }
 0x494   : > { %v4110_v44 = vmul.bf16 1045249613, %v4046_v18  ;;  %v4152_v50 = vmul.bf16 1045249613, %v4088_v38  ;;  %v4047_v49 = vadd.bf16 %v6789_v29, %v2959_v40  ;;  %v4089_v30 = vadd.bf16 %v4849_v54, %v3001_v12 }
 0x495   : > { %4556 = vst [vmem:[%s6528_s27 + $0x90] sm:$0xff] %v4868_v46  ;;  %4557 = vst [vmem:[%s6528_s27 + $0x98] sm:$0xff] %v4869_v4  ;;  %v2731_v3 = vpop.f32.mrf.mxu0 }
 0x496   : > { %4598 = vst [vmem:[%s6528_s27 + $0x1e0] sm:$0xff] %v4910_v17  ;;  %4599 = vst [vmem:[%s6528_s27 + $0x1e8] sm:$0xff] %v4911_v9  ;;  %v4111_v15 = vmul.bf16 1045249613, %v4047_v49  ;;  %v4153_v33 = vmul.bf16 1045249613, %v4089_v30  ;;  %v4174_v24 = vmax.bf16 %v4110_v44, %v4046_v18  ;;  %v4216_v13 = vmax.bf16 %v4152_v50, %v4088_v38 }
 0x497   : > { %v2733_v10 = vpop.f32.mrf.mxu0 }
 0x498   : > { %v4175_v60 = vmax.bf16 %v4111_v15, %v4047_v49  ;;  %v4217_v58 = vmax.bf16 %v4153_v33, %v4089_v30  ;;  %v2960_v0 = vpack.c.bf16 %v2733_v10, %v2729_v53  ;;  %v6793_v53 = vld [vmem:[#allocation46_spill] sm:$0xff] }
 0x499   : > { %v2735_v51 = vpop.f32.mrf.mxu0 }
 0x49a   : > { %v4870_v55 = vcombine.low %v4174_v24, %v4175_v60  ;;  %v4871_v62 = vcombine.high %v4174_v24, %v4175_v60  ;;  %v4912_v48 = vcombine.low %v4216_v13, %v4217_v58  ;;  %v4913_v16 = vcombine.high %v4216_v13, %v4217_v58 }
 0x49b   : > { %v4048_v14 = vadd.bf16 %v6790_v45, %v2960_v0  ;;  %v2961_v61 = vpack.c.bf16 %v2735_v51, %v2731_v3  ;;  %v2739_v41 = vpop.f32.mrf.mxu0 }
 0x49c   : > { %4558 = vst [vmem:[%s6528_s27 + $0xa0] sm:$0xff] %v4870_v55  ;;  %4559 = vst [vmem:[%s6528_s27 + $0xa8] sm:$0xff] %v4871_v62  ;;  %v6794_v55 = vld [vmem:[#allocation47_spill] sm:$0xff] }
 0x49d   : > { %4600 = vst [vmem:[%s6528_s27 + $0x1f0] sm:$0xff] %v4912_v48  ;;  %4601 = vst [vmem:[%s6528_s27 + $0x1f8] sm:$0xff] %v4913_v16  ;;  %v4112_v47 = vmul.bf16 1045249613, %v4048_v14  ;;  %v4049_v57 = vadd.bf16 %v6790_v45, %v2961_v61  ;;  %v2741_v34 = vpop.f32.mrf.mxu0 }
 0x49f   : > { %v4113_v36 = vmul.bf16 1045249613, %v4049_v57  ;;  %v2743_v23 = vpop.f32.mrf.mxu0  ;;  %v4176_v52 = vmax.bf16 %v4112_v47, %v4048_v14 }
 0x4a0   : > { %v2962_v42 = vpack.c.bf16 %v2743_v23, %v2739_v41 }
 0x4a1   : > { %v4177_v26 = vmax.bf16 %v4113_v36, %v4049_v57  ;;  %v2745_v2 = vpop.f32.mrf.mxu0 }
 0x4a2   : > { %v4050_v28 = vadd.bf16 %v6791_v39, %v2962_v42  ;;  %v2963_v22 = vpack.c.bf16 %v2745_v2, %v2741_v34 }
 0x4a3   : > { %v4872_v37 = vcombine.low %v4176_v52, %v4177_v26  ;;  %v4873_v25 = vcombine.high %v4176_v52, %v4177_v26  ;;  %v2749_v35 = vpop.f32.mrf.mxu0  ;;  %v6795_v26 = vld [vmem:[#allocation48_spill] sm:$0xff] }
 0x4a4   : > { %v4114_v11 = vmul.bf16 1045249613, %v4050_v28  ;;  %v4051_v19 = vadd.bf16 %v6791_v39, %v2963_v22 }
 0x4a5   : > { %4560 = vst [vmem:[%s6528_s27 + $0xb0] sm:$0xff] %v4872_v37  ;;  %4561 = vst [vmem:[%s6528_s27 + $0xb8] sm:$0xff] %v4873_v25  ;;  %v2751_v8 = vpop.f32.mrf.mxu0 }
 0x4a6   : > { %v4115_v63 = vmul.bf16 1045249613, %v4051_v19  ;;  %v4178_v6 = vmax.bf16 %v4114_v11, %v4050_v28 }
 0x4a7   : > { %v2753_v1 = vpop.f32.mrf.mxu0 }
 0x4a8   : > { %v4179_v56 = vmax.bf16 %v4115_v63, %v4051_v19  ;;  %v2964_v7 = vpack.c.bf16 %v2753_v1, %v2749_v35 }
 0x4a9   : > { %v2755_v54 = vpop.f32.mrf.mxu0 }
 0x4aa   : > { %v4874_v32 = vcombine.low %v4178_v6, %v4179_v56  ;;  %v4875_v20 = vcombine.high %v4178_v6, %v4179_v56  ;;  %v4052_v31 = vadd.bf16 %v6792_v5, %v2964_v7  ;;  %v2965_v21 = vpack.c.bf16 %v2755_v54, %v2751_v8  ;;  %v6796_v7 = vld [vmem:[#allocation49_spill] sm:$0xff] }
 0x4ab   : > { %v2759_v43 = vpop.f32.mrf.mxu0 }
 0x4ac   : > { %4562 = vst [vmem:[%s6528_s27 + $0xc0] sm:$0xff] %v4874_v32  ;;  %4563 = vst [vmem:[%s6528_s27 + $0xc8] sm:$0xff] %v4875_v20  ;;  %v4116_v59 = vmul.bf16 1045249613, %v4052_v31  ;;  %v4053_v27 = vadd.bf16 %v6792_v5, %v2965_v21 }
 0x4ad   : > { %v2761_v29 = vpop.f32.mrf.mxu0 }
 0x4ae   : > { %v4117_v18 = vmul.bf16 1045249613, %v4053_v27  ;;  %v4180_v40 = vmax.bf16 %v4116_v59, %v4052_v31 }
 0x4af   : > { %v2763_v38 = vpop.f32.mrf.mxu0 }
 0x4b0   : > { %v4181_v12 = vmax.bf16 %v4117_v18, %v4053_v27  ;;  %v2966_v46 = vpack.c.bf16 %v2763_v38, %v2759_v43 }
 0x4b1   : > { %v2765_v4 = vpop.f32.mrf.mxu0 }
 0x4b2   : > { %v4876_v17 = vcombine.low %v4180_v40, %v4181_v12  ;;  %v4877_v9 = vcombine.high %v4180_v40, %v4181_v12  ;;  %v4054_v44 = vadd.bf16 %v6793_v53, %v2966_v46  ;;  %v2967_v50 = vpack.c.bf16 %v2765_v4, %v2761_v29  ;;  %v6797_v46 = vld [vmem:[#allocation50_spill] sm:$0xff] }
 0x4b3   : > { %v2769_v49 = vpop.f32.mrf.mxu0 }
 0x4b4   : > { %4564 = vst [vmem:[%s6528_s27 + $0xd0] sm:$0xff] %v4876_v17  ;;  %4565 = vst [vmem:[%s6528_s27 + $0xd8] sm:$0xff] %v4877_v9  ;;  %v4118_v30 = vmul.bf16 1045249613, %v4054_v44  ;;  %v4055_v3 = vadd.bf16 %v6793_v53, %v2967_v50 }
 0x4b5   : > { %v2771_v15 = vpop.f32.mrf.mxu0 }
 0x4b6   : > { %v4119_v33 = vmul.bf16 1045249613, %v4055_v3  ;;  %v4182_v10 = vmax.bf16 %v4118_v30, %v4054_v44 }
 0x4b7   : > { %v2773_v24 = vpop.f32.mrf.mxu0 }
 0x4b8   : > { %v4183_v13 = vmax.bf16 %v4119_v33, %v4055_v3  ;;  %v2968_v60 = vpack.c.bf16 %v2773_v24, %v2769_v49 }
 0x4b9   : > { %v2775_v58 = vpop.f32.mrf.mxu0 }
 0x4ba   : > { %v4878_v0 = vcombine.low %v4182_v10, %v4183_v13  ;;  %v4879_v51 = vcombine.high %v4182_v10, %v4183_v13  ;;  %v4056_v62 = vadd.bf16 %v6794_v55, %v2968_v60  ;;  %v2969_v48 = vpack.c.bf16 %v2775_v58, %v2771_v15  ;;  %v6798_v60 = vld [vmem:[#allocation51_spill] sm:$0xff] }
 0x4bb   : > { %v2779_v16 = vpop.f32.mrf.mxu0 }
 0x4bc   : > { %4566 = vst [vmem:[%s6528_s27 + $0xe0] sm:$0xff] %v4878_v0  ;;  %4567 = vst [vmem:[%s6528_s27 + $0xe8] sm:$0xff] %v4879_v51  ;;  %v4120_v45 = vmul.bf16 1045249613, %v4056_v62  ;;  %v4057_v14 = vadd.bf16 %v6794_v55, %v2969_v48 }
 0x4bd   : > { %v2781_v61 = vpop.f32.mrf.mxu0 }
 0x4be   : > { %v4121_v41 = vmul.bf16 1045249613, %v4057_v14  ;;  %v4184_v57 = vmax.bf16 %v4120_v45, %v4056_v62 }
 0x4bf   : > { %v2783_v47 = vpop.f32.mrf.mxu0 }
 0x4c0   : > { %v4185_v34 = vmax.bf16 %v4121_v41, %v4057_v14  ;;  %v2970_v36 = vpack.c.bf16 %v2783_v47, %v2779_v16 }
 0x4c1   : > { %v2785_v23 = vpop.f32.mrf.mxu0 }
 0x4c2   : > { %v4880_v42 = vcombine.low %v4184_v57, %v4185_v34  ;;  %v4881_v52 = vcombine.high %v4184_v57, %v4185_v34  ;;  %v4058_v2 = vadd.bf16 %v6795_v26, %v2970_v36  ;;  %v2971_v39 = vpack.c.bf16 %v2785_v23, %v2781_v61  ;;  %v6799_v36 = vld [vmem:[#allocation52_spill] sm:$0xff] }
 0x4c3   : > { %v2789_v28 = vpop.f32.mrf.mxu0 }
 0x4c4   : > { %4568 = vst [vmem:[%s6528_s27 + $0xf0] sm:$0xff] %v4880_v42  ;;  %4569 = vst [vmem:[%s6528_s27 + $0xf8] sm:$0xff] %v4881_v52  ;;  %v4122_v22 = vmul.bf16 1045249613, %v4058_v2  ;;  %v4059_v37 = vadd.bf16 %v6795_v26, %v2971_v39 }
 0x4c5   : > { %v2791_v25 = vpop.f32.mrf.mxu0 }
 0x4c6   : > { %v4123_v35 = vmul.bf16 1045249613, %v4059_v37  ;;  %v4186_v19 = vmax.bf16 %v4122_v22, %v4058_v2 }
 0x4c7   : > { %v2793_v11 = vpop.f32.mrf.mxu0 }
 0x4c8   : > { %v4187_v8 = vmax.bf16 %v4123_v35, %v4059_v37  ;;  %v2972_v63 = vpack.c.bf16 %v2793_v11, %v2789_v28 }
 0x4c9   : > { %v2795_v1 = vpop.f32.mrf.mxu0 }
 0x4ca   : > { %v4882_v6 = vcombine.low %v4186_v19, %v4187_v8  ;;  %v4883_v56 = vcombine.high %v4186_v19, %v4187_v8  ;;  %v4060_v54 = vadd.bf16 %v6796_v7, %v2972_v63  ;;  %v2973_v32 = vpack.c.bf16 %v2795_v1, %v2791_v25 }
 0x4cb   : > { %v2799_v20 = vpop.f32.mrf.mxu0 }
 0x4cc   : > { %4570 = vst [vmem:[%s6528_s27 + $0x100] sm:$0xff] %v4882_v6  ;;  %4571 = vst [vmem:[%s6528_s27 + $0x108] sm:$0xff] %v4883_v56  ;;  %v4124_v5 = vmul.bf16 1045249613, %v4060_v54  ;;  %v4061_v31 = vadd.bf16 %v6796_v7, %v2973_v32 }
 0x4cd   : > { %v2801_v21 = vpop.f32.mrf.mxu0 }
 0x4ce   : > { %v4125_v43 = vmul.bf16 1045249613, %v4061_v31  ;;  %v4188_v27 = vmax.bf16 %v4124_v5, %v4060_v54 }
 0x4cf   : > { %v2803_v59 = vpop.f32.mrf.mxu0 }
 0x4d0   : > { %v4189_v29 = vmax.bf16 %v4125_v43, %v4061_v31  ;;  %v2974_v18 = vpack.c.bf16 %v2803_v59, %v2799_v20 }
 0x4d1   : > { %v2805_v38 = vpop.f32.mrf.mxu0 }
 0x4d2   : > { %v4884_v40 = vcombine.low %v4188_v27, %v4189_v29  ;;  %v4885_v12 = vcombine.high %v4188_v27, %v4189_v29  ;;  %v4062_v4 = vadd.bf16 %v6797_v46, %v2974_v18  ;;  %v2975_v17 = vpack.c.bf16 %v2805_v38, %v2801_v21 }
 0x4d3   : > { %v2809_v9 = vpop.f32.mrf.mxu0 }
 0x4d4   : > { %4572 = vst [vmem:[%s6528_s27 + $0x110] sm:$0xff] %v4884_v40  ;;  %4573 = vst [vmem:[%s6528_s27 + $0x118] sm:$0xff] %v4885_v12  ;;  %v4126_v53 = vmul.bf16 1045249613, %v4062_v4  ;;  %v4063_v44 = vadd.bf16 %v6797_v46, %v2975_v17 }
 0x4d5   : > { %v2811_v50 = vpop.f32.mrf.mxu0 }
 0x4d6   : > { %v4127_v49 = vmul.bf16 1045249613, %v4063_v44  ;;  %v4190_v3 = vmax.bf16 %v4126_v53, %v4062_v4 }
 0x4d7   : > { %v2813_v30 = vpop.f32.mrf.mxu0 }
 0x4d8   : > { %v4191_v15 = vmax.bf16 %v4127_v49, %v4063_v44  ;;  %v2976_v33 = vpack.c.bf16 %v2813_v30, %v2809_v9 }
 0x4d9   : > { %v2815_v24 = vpop.f32.mrf.mxu0 }
 0x4da   : > { %v4886_v10 = vcombine.low %v4190_v3, %v4191_v15  ;;  %v4887_v13 = vcombine.high %v4190_v3, %v4191_v15  ;;  %v4064_v58 = vadd.bf16 %v6798_v60, %v2976_v33  ;;  %v2977_v0 = vpack.c.bf16 %v2815_v24, %v2811_v50 }
 0x4db   : > { %v2819_v51 = vpop.f32.mrf.mxu0 }
 0x4dc   : > { %4574 = vst [vmem:[%s6528_s27 + $0x120] sm:$0xff] %v4886_v10  ;;  %4575 = vst [vmem:[%s6528_s27 + $0x128] sm:$0xff] %v4887_v13  ;;  %v4128_v55 = vmul.bf16 1045249613, %v4064_v58  ;;  %v4065_v62 = vadd.bf16 %v6798_v60, %v2977_v0 }
 0x4dd   : > { %v2821_v48 = vpop.f32.mrf.mxu0 }
 0x4de   : > { %v4129_v16 = vmul.bf16 1045249613, %v4065_v62  ;;  %v4192_v14 = vmax.bf16 %v4128_v55, %v4064_v58 }
 0x4df   : > { %v2823_v45 = vpop.f32.mrf.mxu0 }
 0x4e0   : > { %v4193_v61 = vmax.bf16 %v4129_v16, %v4065_v62  ;;  %v2978_v41 = vpack.c.bf16 %v2823_v45, %v2819_v51 }
 0x4e1   : > { %v2825_v47 = vpop.f32.mrf.mxu0 }
 0x4e2   : > { %v4888_v57 = vcombine.low %v4192_v14, %v4193_v61  ;;  %v4889_v34 = vcombine.high %v4192_v14, %v4193_v61  ;;  %v4066_v23 = vadd.bf16 %v6799_v36, %v2978_v41  ;;  %v2979_v42 = vpack.c.bf16 %v2825_v47, %v2821_v48 }
 0x4e4   : > { %4576 = vst [vmem:[%s6528_s27 + $0x130] sm:$0xff] %v4888_v57  ;;  %4577 = vst [vmem:[%s6528_s27 + $0x138] sm:$0xff] %v4889_v34  ;;  %v4130_v52 = vmul.bf16 1045249613, %v4066_v23  ;;  %v4067_v26 = vadd.bf16 %v6799_v36, %v2979_v42 }
 0x4e6   : > { %v4131_v2 = vmul.bf16 1045249613, %v4067_v26  ;;  %v4194_v39 = vmax.bf16 %v4130_v52, %v4066_v23 }
 0x4e8   : > { %v4195_v28 = vmax.bf16 %v4131_v2, %v4067_v26 }
 0x4ea   : > { %v4890_v22 = vcombine.low %v4194_v39, %v4195_v28  ;;  %v4891_v37 = vcombine.high %v4194_v39, %v4195_v28 }
 0x4ec   : > { %4578 = vst [vmem:[%s6528_s27 + $0x140] sm:$0xff] %v4890_v22  ;;  %4579 = vst [vmem:[%s6528_s27 + $0x148] sm:$0xff] %v4891_v37 }
 0x4ed PF: > { %s19_s11 = sadd.s32 1, %s5135_s11   ;;  %s6800_s30 = smov %s5131_s10 }
 0x4ee   : > { %p16_p5 = scmp.ge.s32.totalorder %s19_s11, 4   ;;  %s6801_s10 = smov %s6803_s12 }
 0x4f0   :  { %18 = sbr.rel (!%p16_p5) target bundleno = 2 (0x2), region = 86 }

// kernel: discriminator_forward.3
= control target key start
LH: loop header
LB: loop body
LE: loop exit
PB: predicated region body
PF: predicated region fallthrough
CT: control target
= control target key end

     0   :  { %s19092_s9 = smov 0   ;;  %s19094_s10 = smov 0   ;;  %s21163_s0 = inlined_call_operand.vmem [shape: bf16[2,131072], index: 0, kind: input, shape index: {}]   ;;  %s21164_s1 = inlined_call_operand.vmem [shape: bf16[10,131072], index: 1, kind: input, shape index: {}]   ;;  %s21165_s2 = inlined_call_operand.vmem [shape: f32[2,2,10], index: 2, kind: output, shape index: {}]  }
   0x1   :  { %s19096_s11 = smov 0   ;;  %s19098_s12 = smov 0  }
   0x2   :  { %s19100_s13 = smov 0  }
   0x3 LB: > { %s24_s14 = sadd.s32 1, %s19069_s12  ;;  %p68_p1 = scmp.ne.s32.totalorder %s19061_s10, %s19057_s9  ;;  %s19073_s13 = sphi %s19100_s13, %s12_s13   ;;  %s19069_s12 = sphi %s19098_s12, %s21169_s12   ;;  %s19065_s11 = sphi %s19096_s11, %s21168_s11   ;;  %s19061_s10 = sphi %s19094_s10, %s21167_s10   ;;  %s19057_s9 = sphi %s19092_s9, %s21166_s9  }
   0x4   : > { %p26_p0 = scmp.ge.s32.totalorder %s24_s14, 2  ;;  %p69_p2 = scmp.eq.s32.totalorder %s19073_s13, 0 }
   0x5   : > { %s61_s16 = sadd.s32 1, %s19061_s10  ;;  %p18406_p5 = scmp.ge.s32.totalorder %s19073_s13, 2 }
   0x6   : > { %s21171_s14 = smov (%p26_p0, %s24_s14), 0  ;;  %p70_p3 = por %p69_p2, %p68_p1 }
   0x7   : > { %s58_s15 = ssub.s32 %s19069_s12, %s21171_s14  ;;  %120 = sbr.rel (%p18406_p5) target bundleno = 272 (0x110), region = 16 }
   0x8   : > { %p59_p4 = scmp.eq.s32.totalorder %s58_s15, 0 }
   0xa   : > { %s19127_s17 = scalar_select %p59_p4, %s19061_s10, %s61_s16  }
   0xc   : > { %133 = sbr.rel (!%p70_p3) target bundleno = 272 (0x110), region = 24  ;;  %s135_s18 = sand.u32 (%p70_p3), 1, %s19061_s10  }
   0xd   : > { %s18928_s19 = sshll.u32 (%p70_p3), %s19069_s12, 11  ;;  %s18407_s20 = sshll.u32 (%p70_p3), %s135_s18, 12 }
   0xe   : > { %s19135_s23 = scalar_lea.vmem (%p70_p3), %s21164_s1, %s18928_s19  ;;  %s19140_s24 = scalar_lea.vmem (%p70_p3), [#allocation2], %s18407_s20 }
   0xf   : > { %v154_v0 = vld [vmem:[%s19135_s23] sm:$0xff] (%p70_p3)  ;;  %v156_v1 = vld [vmem:[%s19135_s23 + $0x8] sm:$0xff] (%p70_p3)  ;;  %v158_v2 = vld [vmem:[%s19135_s23 + $0x10] sm:$0xff] (%p70_p3) }
  0x10   : > { %155 = vst [vmem:[%s19140_s24] sm:$0xff] (%p70_p3), %v154_v0  ;;  %157 = vst [vmem:[%s19140_s24 + $0x8] sm:$0xff] (%p70_p3), %v156_v1  ;;  %v160_v3 = vld [vmem:[%s19135_s23 + $0x18] sm:$0xff] (%p70_p3)  ;;  %v162_v4 = vld [vmem:[%s19135_s23 + $0x20] sm:$0xff] (%p70_p3) }
  0x11   : > { %159 = vst [vmem:[%s19140_s24 + $0x10] sm:$0xff] %v158_v2  ;;  %v164_v5 = vld [vmem:[%s19135_s23 + $0x28] sm:$0xff]  ;;  %161 = vst [vmem:[%s19140_s24 + $0x18] sm:$0xff] %v160_v3  ;;  %v166_v6 = vld [vmem:[%s19135_s23 + $0x30] sm:$0xff] }
  0x12   : > { %163 = vst [vmem:[%s19140_s24 + $0x20] sm:$0xff] %v162_v4  ;;  %165 = vst [vmem:[%s19140_s24 + $0x28] sm:$0xff] %v164_v5  ;;  %v168_v7 = vld [vmem:[%s19135_s23 + $0x38] sm:$0xff]  ;;  %v170_v8 = vld [vmem:[%s19135_s23 + $0x40] sm:$0xff] }
  0x13   : > { %167 = vst [vmem:[%s19140_s24 + $0x30] sm:$0xff] %v166_v6  ;;  %169 = vst [vmem:[%s19140_s24 + $0x38] sm:$0xff] %v168_v7  ;;  %v172_v9 = vld [vmem:[%s19135_s23 + $0x48] sm:$0xff]  ;;  %v174_v10 = vld [vmem:[%s19135_s23 + $0x50] sm:$0xff] }
  0x14   : > { %171 = vst [vmem:[%s19140_s24 + $0x40] sm:$0xff] %v170_v8  ;;  %v176_v11 = vld [vmem:[%s19135_s23 + $0x58] sm:$0xff]  ;;  %173 = vst [vmem:[%s19140_s24 + $0x48] sm:$0xff] %v172_v9  ;;  %v178_v12 = vld [vmem:[%s19135_s23 + $0x60] sm:$0xff] }
  0x15   : > { %175 = vst [vmem:[%s19140_s24 + $0x50] sm:$0xff] %v174_v10  ;;  %177 = vst [vmem:[%s19140_s24 + $0x58] sm:$0xff] %v176_v11  ;;  %v180_v13 = vld [vmem:[%s19135_s23 + $0x68] sm:$0xff]  ;;  %v182_v14 = vld [vmem:[%s19135_s23 + $0x70] sm:$0xff] }
  0x16   : > { %179 = vst [vmem:[%s19140_s24 + $0x60] sm:$0xff] %v178_v12  ;;  %181 = vst [vmem:[%s19140_s24 + $0x68] sm:$0xff] %v180_v13  ;;  %v184_v15 = vld [vmem:[%s19135_s23 + $0x78] sm:$0xff]  ;;  %v186_v16 = vld [vmem:[%s19135_s23 + $0x80] sm:$0xff] }
  0x17   : > { %183 = vst [vmem:[%s19140_s24 + $0x70] sm:$0xff] %v182_v14  ;;  %v188_v17 = vld [vmem:[%s19135_s23 + $0x88] sm:$0xff]  ;;  %185 = vst [vmem:[%s19140_s24 + $0x78] sm:$0xff] %v184_v15  ;;  %v190_v18 = vld [vmem:[%s19135_s23 + $0x90] sm:$0xff] }
  0x18   : > { %187 = vst [vmem:[%s19140_s24 + $0x80] sm:$0xff] %v186_v16  ;;  %189 = vst [vmem:[%s19140_s24 + $0x88] sm:$0xff] %v188_v17  ;;  %v192_v19 = vld [vmem:[%s19135_s23 + $0x98] sm:$0xff]  ;;  %v194_v20 = vld [vmem:[%s19135_s23 + $0xa0] sm:$0xff] }
  0x19   : > { %191 = vst [vmem:[%s19140_s24 + $0x90] sm:$0xff] %v190_v18  ;;  %193 = vst [vmem:[%s19140_s24 + $0x98] sm:$0xff] %v192_v19  ;;  %v196_v21 = vld [vmem:[%s19135_s23 + $0xa8] sm:$0xff]  ;;  %v198_v22 = vld [vmem:[%s19135_s23 + $0xb0] sm:$0xff] }
  0x1a   : > { %195 = vst [vmem:[%s19140_s24 + $0xa0] sm:$0xff] %v194_v20  ;;  %v200_v23 = vld [vmem:[%s19135_s23 + $0xb8] sm:$0xff]  ;;  %197 = vst [vmem:[%s19140_s24 + $0xa8] sm:$0xff] %v196_v21  ;;  %v202_v24 = vld [vmem:[%s19135_s23 + $0xc0] sm:$0xff] }
  0x1b   : > { %199 = vst [vmem:[%s19140_s24 + $0xb0] sm:$0xff] %v198_v22  ;;  %201 = vst [vmem:[%s19140_s24 + $0xb8] sm:$0xff] %v200_v23  ;;  %v204_v25 = vld [vmem:[%s19135_s23 + $0xc8] sm:$0xff]  ;;  %v206_v26 = vld [vmem:[%s19135_s23 + $0xd0] sm:$0xff] }
  0x1c   : > { %203 = vst [vmem:[%s19140_s24 + $0xc0] sm:$0xff] %v202_v24  ;;  %205 = vst [vmem:[%s19140_s24 + $0xc8] sm:$0xff] %v204_v25  ;;  %v208_v27 = vld [vmem:[%s19135_s23 + $0xd8] sm:$0xff]  ;;  %v210_v28 = vld [vmem:[%s19135_s23 + $0xe0] sm:$0xff] }
  0x1d   : > { %207 = vst [vmem:[%s19140_s24 + $0xd0] sm:$0xff] %v206_v26  ;;  %v212_v29 = vld [vmem:[%s19135_s23 + $0xe8] sm:$0xff]  ;;  %209 = vst [vmem:[%s19140_s24 + $0xd8] sm:$0xff] %v208_v27  ;;  %v214_v30 = vld [vmem:[%s19135_s23 + $0xf0] sm:$0xff] }
  0x1e   : > { %211 = vst [vmem:[%s19140_s24 + $0xe0] sm:$0xff] %v210_v28  ;;  %213 = vst [vmem:[%s19140_s24 + $0xe8] sm:$0xff] %v212_v29  ;;  %v216_v31 = vld [vmem:[%s19135_s23 + $0xf8] sm:$0xff]  ;;  %v218_v32 = vld [vmem:[%s19135_s23 + $0x100] sm:$0xff] }
  0x1f   : > { %215 = vst [vmem:[%s19140_s24 + $0xf0] sm:$0xff] %v214_v30  ;;  %217 = vst [vmem:[%s19140_s24 + $0xf8] sm:$0xff] %v216_v31  ;;  %v220_v33 = vld [vmem:[%s19135_s23 + $0x108] sm:$0xff]  ;;  %v222_v34 = vld [vmem:[%s19135_s23 + $0x110] sm:$0xff] }
  0x20   : > { %219 = vst [vmem:[%s19140_s24 + $0x100] sm:$0xff] %v218_v32  ;;  %v224_v35 = vld [vmem:[%s19135_s23 + $0x118] sm:$0xff]  ;;  %221 = vst [vmem:[%s19140_s24 + $0x108] sm:$0xff] %v220_v33  ;;  %v226_v36 = vld [vmem:[%s19135_s23 + $0x120] sm:$0xff] }
  0x21   : > { %223 = vst [vmem:[%s19140_s24 + $0x110] sm:$0xff] %v222_v34  ;;  %225 = vst [vmem:[%s19140_s24 + $0x118] sm:$0xff] %v224_v35  ;;  %v228_v37 = vld [vmem:[%s19135_s23 + $0x128] sm:$0xff]  ;;  %v230_v38 = vld [vmem:[%s19135_s23 + $0x130] sm:$0xff] }
  0x22   : > { %227 = vst [vmem:[%s19140_s24 + $0x120] sm:$0xff] %v226_v36  ;;  %229 = vst [vmem:[%s19140_s24 + $0x128] sm:$0xff] %v228_v37  ;;  %v232_v39 = vld [vmem:[%s19135_s23 + $0x138] sm:$0xff]  ;;  %v234_v40 = vld [vmem:[%s19135_s23 + $0x140] sm:$0xff] }
  0x23   : > { %231 = vst [vmem:[%s19140_s24 + $0x130] sm:$0xff] %v230_v38  ;;  %v236_v41 = vld [vmem:[%s19135_s23 + $0x148] sm:$0xff]  ;;  %233 = vst [vmem:[%s19140_s24 + $0x138] sm:$0xff] %v232_v39  ;;  %v238_v42 = vld [vmem:[%s19135_s23 + $0x150] sm:$0xff] }
  0x24   : > { %235 = vst [vmem:[%s19140_s24 + $0x140] sm:$0xff] %v234_v40  ;;  %237 = vst [vmem:[%s19140_s24 + $0x148] sm:$0xff] %v236_v41  ;;  %v240_v43 = vld [vmem:[%s19135_s23 + $0x158] sm:$0xff]  ;;  %v242_v44 = vld [vmem:[%s19135_s23 + $0x160] sm:$0xff] }
  0x25   : > { %239 = vst [vmem:[%s19140_s24 + $0x150] sm:$0xff] %v238_v42  ;;  %241 = vst [vmem:[%s19140_s24 + $0x158] sm:$0xff] %v240_v43  ;;  %v244_v45 = vld [vmem:[%s19135_s23 + $0x168] sm:$0xff]  ;;  %v246_v46 = vld [vmem:[%s19135_s23 + $0x170] sm:$0xff] }
  0x26   : > { %243 = vst [vmem:[%s19140_s24 + $0x160] sm:$0xff] %v242_v44  ;;  %v248_v47 = vld [vmem:[%s19135_s23 + $0x178] sm:$0xff]  ;;  %245 = vst [vmem:[%s19140_s24 + $0x168] sm:$0xff] %v244_v45  ;;  %v250_v48 = vld [vmem:[%s19135_s23 + $0x180] sm:$0xff] }
  0x27   : > { %247 = vst [vmem:[%s19140_s24 + $0x170] sm:$0xff] %v246_v46  ;;  %249 = vst [vmem:[%s19140_s24 + $0x178] sm:$0xff] %v248_v47  ;;  %v252_v49 = vld [vmem:[%s19135_s23 + $0x188] sm:$0xff]  ;;  %v254_v50 = vld [vmem:[%s19135_s23 + $0x190] sm:$0xff] }
  0x28   : > { %251 = vst [vmem:[%s19140_s24 + $0x180] sm:$0xff] %v250_v48  ;;  %253 = vst [vmem:[%s19140_s24 + $0x188] sm:$0xff] %v252_v49  ;;  %v256_v51 = vld [vmem:[%s19135_s23 + $0x198] sm:$0xff]  ;;  %v258_v52 = vld [vmem:[%s19135_s23 + $0x1a0] sm:$0xff] }
  0x29   : > { %255 = vst [vmem:[%s19140_s24 + $0x190] sm:$0xff] %v254_v50  ;;  %v260_v53 = vld [vmem:[%s19135_s23 + $0x1a8] sm:$0xff]  ;;  %257 = vst [vmem:[%s19140_s24 + $0x198] sm:$0xff] %v256_v51  ;;  %v262_v54 = vld [vmem:[%s19135_s23 + $0x1b0] sm:$0xff] }
  0x2a   : > { %259 = vst [vmem:[%s19140_s24 + $0x1a0] sm:$0xff] %v258_v52  ;;  %261 = vst [vmem:[%s19140_s24 + $0x1a8] sm:$0xff] %v260_v53  ;;  %v264_v55 = vld [vmem:[%s19135_s23 + $0x1b8] sm:$0xff]  ;;  %v266_v56 = vld [vmem:[%s19135_s23 + $0x1c0] sm:$0xff] }
  0x2b   : > { %263 = vst [vmem:[%s19140_s24 + $0x1b0] sm:$0xff] %v262_v54  ;;  %265 = vst [vmem:[%s19140_s24 + $0x1b8] sm:$0xff] %v264_v55  ;;  %v268_v57 = vld [vmem:[%s19135_s23 + $0x1c8] sm:$0xff]  ;;  %v270_v58 = vld [vmem:[%s19135_s23 + $0x1d0] sm:$0xff] }
  0x2c   : > { %267 = vst [vmem:[%s19140_s24 + $0x1c0] sm:$0xff] %v266_v56  ;;  %v272_v59 = vld [vmem:[%s19135_s23 + $0x1d8] sm:$0xff]  ;;  %269 = vst [vmem:[%s19140_s24 + $0x1c8] sm:$0xff] %v268_v57  ;;  %v274_v60 = vld [vmem:[%s19135_s23 + $0x1e0] sm:$0xff] }
  0x2d   : > { %271 = vst [vmem:[%s19140_s24 + $0x1d0] sm:$0xff] %v270_v58  ;;  %273 = vst [vmem:[%s19140_s24 + $0x1d8] sm:$0xff] %v272_v59  ;;  %v276_v61 = vld [vmem:[%s19135_s23 + $0x1e8] sm:$0xff]  ;;  %v278_v62 = vld [vmem:[%s19135_s23 + $0x1f0] sm:$0xff] }
  0x2e   : > { %275 = vst [vmem:[%s19140_s24 + $0x1e0] sm:$0xff] %v274_v60  ;;  %277 = vst [vmem:[%s19140_s24 + $0x1e8] sm:$0xff] %v276_v61  ;;  %v280_v63 = vld [vmem:[%s19135_s23 + $0x1f8] sm:$0xff]  ;;  %v282_v0 = vld [vmem:[%s19135_s23 + $0x200] sm:$0xff] }
  0x2f   : > { %279 = vst [vmem:[%s19140_s24 + $0x1f0] sm:$0xff] %v278_v62  ;;  %v284_v1 = vld [vmem:[%s19135_s23 + $0x208] sm:$0xff]  ;;  %281 = vst [vmem:[%s19140_s24 + $0x1f8] sm:$0xff] %v280_v63  ;;  %v286_v2 = vld [vmem:[%s19135_s23 + $0x210] sm:$0xff] }
  0x30   : > { %283 = vst [vmem:[%s19140_s24 + $0x200] sm:$0xff] %v282_v0  ;;  %285 = vst [vmem:[%s19140_s24 + $0x208] sm:$0xff] %v284_v1  ;;  %v288_v3 = vld [vmem:[%s19135_s23 + $0x218] sm:$0xff]  ;;  %v290_v4 = vld [vmem:[%s19135_s23 + $0x220] sm:$0xff] }
  0x31   : > { %287 = vst [vmem:[%s19140_s24 + $0x210] sm:$0xff] %v286_v2  ;;  %289 = vst [vmem:[%s19140_s24 + $0x218] sm:$0xff] %v288_v3  ;;  %v292_v5 = vld [vmem:[%s19135_s23 + $0x228] sm:$0xff]  ;;  %v294_v6 = vld [vmem:[%s19135_s23 + $0x230] sm:$0xff] }
  0x32   : > { %291 = vst [vmem:[%s19140_s24 + $0x220] sm:$0xff] %v290_v4  ;;  %v296_v7 = vld [vmem:[%s19135_s23 + $0x238] sm:$0xff]  ;;  %293 = vst [vmem:[%s19140_s24 + $0x228] sm:$0xff] %v292_v5  ;;  %v298_v8 = vld [vmem:[%s19135_s23 + $0x240] sm:$0xff] }
  0x33   : > { %295 = vst [vmem:[%s19140_s24 + $0x230] sm:$0xff] %v294_v6  ;;  %297 = vst [vmem:[%s19140_s24 + $0x238] sm:$0xff] %v296_v7  ;;  %v300_v9 = vld [vmem:[%s19135_s23 + $0x248] sm:$0xff]  ;;  %v302_v10 = vld [vmem:[%s19135_s23 + $0x250] sm:$0xff] }
  0x34   : > { %299 = vst [vmem:[%s19140_s24 + $0x240] sm:$0xff] %v298_v8  ;;  %301 = vst [vmem:[%s19140_s24 + $0x248] sm:$0xff] %v300_v9  ;;  %v304_v11 = vld [vmem:[%s19135_s23 + $0x258] sm:$0xff]  ;;  %v306_v12 = vld [vmem:[%s19135_s23 + $0x260] sm:$0xff] }
  0x35   : > { %303 = vst [vmem:[%s19140_s24 + $0x250] sm:$0xff] %v302_v10  ;;  %v308_v13 = vld [vmem:[%s19135_s23 + $0x268] sm:$0xff]  ;;  %305 = vst [vmem:[%s19140_s24 + $0x258] sm:$0xff] %v304_v11  ;;  %v310_v14 = vld [vmem:[%s19135_s23 + $0x270] sm:$0xff] }
  0x36   : > { %307 = vst [vmem:[%s19140_s24 + $0x260] sm:$0xff] %v306_v12  ;;  %309 = vst [vmem:[%s19140_s24 + $0x268] sm:$0xff] %v308_v13  ;;  %v312_v15 = vld [vmem:[%s19135_s23 + $0x278] sm:$0xff]  ;;  %v314_v16 = vld [vmem:[%s19135_s23 + $0x280] sm:$0xff] }
  0x37   : > { %311 = vst [vmem:[%s19140_s24 + $0x270] sm:$0xff] %v310_v14  ;;  %313 = vst [vmem:[%s19140_s24 + $0x278] sm:$0xff] %v312_v15  ;;  %v316_v17 = vld [vmem:[%s19135_s23 + $0x288] sm:$0xff]  ;;  %v318_v18 = vld [vmem:[%s19135_s23 + $0x290] sm:$0xff] }
  0x38   : > { %315 = vst [vmem:[%s19140_s24 + $0x280] sm:$0xff] %v314_v16  ;;  %v320_v19 = vld [vmem:[%s19135_s23 + $0x298] sm:$0xff]  ;;  %317 = vst [vmem:[%s19140_s24 + $0x288] sm:$0xff] %v316_v17  ;;  %v322_v20 = vld [vmem:[%s19135_s23 + $0x2a0] sm:$0xff] }
  0x39   : > { %319 = vst [vmem:[%s19140_s24 + $0x290] sm:$0xff] %v318_v18  ;;  %321 = vst [vmem:[%s19140_s24 + $0x298] sm:$0xff] %v320_v19  ;;  %v324_v21 = vld [vmem:[%s19135_s23 + $0x2a8] sm:$0xff]  ;;  %v326_v22 = vld [vmem:[%s19135_s23 + $0x2b0] sm:$0xff] }
  0x3a   : > { %323 = vst [vmem:[%s19140_s24 + $0x2a0] sm:$0xff] %v322_v20  ;;  %325 = vst [vmem:[%s19140_s24 + $0x2a8] sm:$0xff] %v324_v21  ;;  %v328_v23 = vld [vmem:[%s19135_s23 + $0x2b8] sm:$0xff]  ;;  %v330_v24 = vld [vmem:[%s19135_s23 + $0x2c0] sm:$0xff] }
  0x3b   : > { %327 = vst [vmem:[%s19140_s24 + $0x2b0] sm:$0xff] %v326_v22  ;;  %v332_v25 = vld [vmem:[%s19135_s23 + $0x2c8] sm:$0xff]  ;;  %329 = vst [vmem:[%s19140_s24 + $0x2b8] sm:$0xff] %v328_v23  ;;  %v334_v26 = vld [vmem:[%s19135_s23 + $0x2d0] sm:$0xff] }
  0x3c   : > { %331 = vst [vmem:[%s19140_s24 + $0x2c0] sm:$0xff] %v330_v24  ;;  %333 = vst [vmem:[%s19140_s24 + $0x2c8] sm:$0xff] %v332_v25  ;;  %v336_v27 = vld [vmem:[%s19135_s23 + $0x2d8] sm:$0xff]  ;;  %v338_v28 = vld [vmem:[%s19135_s23 + $0x2e0] sm:$0xff] }
  0x3d   : > { %335 = vst [vmem:[%s19140_s24 + $0x2d0] sm:$0xff] %v334_v26  ;;  %337 = vst [vmem:[%s19140_s24 + $0x2d8] sm:$0xff] %v336_v27  ;;  %v340_v29 = vld [vmem:[%s19135_s23 + $0x2e8] sm:$0xff]  ;;  %v342_v30 = vld [vmem:[%s19135_s23 + $0x2f0] sm:$0xff] }
  0x3e   : > { %339 = vst [vmem:[%s19140_s24 + $0x2e0] sm:$0xff] %v338_v28  ;;  %v344_v31 = vld [vmem:[%s19135_s23 + $0x2f8] sm:$0xff]  ;;  %341 = vst [vmem:[%s19140_s24 + $0x2e8] sm:$0xff] %v340_v29  ;;  %v346_v32 = vld [vmem:[%s19135_s23 + $0x300] sm:$0xff] }
  0x3f   : > { %343 = vst [vmem:[%s19140_s24 + $0x2f0] sm:$0xff] %v342_v30  ;;  %345 = vst [vmem:[%s19140_s24 + $0x2f8] sm:$0xff] %v344_v31  ;;  %v348_v33 = vld [vmem:[%s19135_s23 + $0x308] sm:$0xff]  ;;  %v350_v34 = vld [vmem:[%s19135_s23 + $0x310] sm:$0xff] }
  0x40   : > { %347 = vst [vmem:[%s19140_s24 + $0x300] sm:$0xff] %v346_v32  ;;  %349 = vst [vmem:[%s19140_s24 + $0x308] sm:$0xff] %v348_v33  ;;  %v352_v35 = vld [vmem:[%s19135_s23 + $0x318] sm:$0xff]  ;;  %v354_v36 = vld [vmem:[%s19135_s23 + $0x320] sm:$0xff] }
  0x41   : > { %351 = vst [vmem:[%s19140_s24 + $0x310] sm:$0xff] %v350_v34  ;;  %v356_v37 = vld [vmem:[%s19135_s23 + $0x328] sm:$0xff]  ;;  %353 = vst [vmem:[%s19140_s24 + $0x318] sm:$0xff] %v352_v35  ;;  %v358_v38 = vld [vmem:[%s19135_s23 + $0x330] sm:$0xff] }
  0x42   : > { %355 = vst [vmem:[%s19140_s24 + $0x320] sm:$0xff] %v354_v36  ;;  %357 = vst [vmem:[%s19140_s24 + $0x328] sm:$0xff] %v356_v37  ;;  %v360_v39 = vld [vmem:[%s19135_s23 + $0x338] sm:$0xff]  ;;  %v362_v40 = vld [vmem:[%s19135_s23 + $0x340] sm:$0xff] }
  0x43   : > { %359 = vst [vmem:[%s19140_s24 + $0x330] sm:$0xff] %v358_v38  ;;  %361 = vst [vmem:[%s19140_s24 + $0x338] sm:$0xff] %v360_v39  ;;  %v364_v41 = vld [vmem:[%s19135_s23 + $0x348] sm:$0xff]  ;;  %v366_v42 = vld [vmem:[%s19135_s23 + $0x350] sm:$0xff] }
  0x44   : > { %363 = vst [vmem:[%s19140_s24 + $0x340] sm:$0xff] %v362_v40  ;;  %v368_v43 = vld [vmem:[%s19135_s23 + $0x358] sm:$0xff]  ;;  %365 = vst [vmem:[%s19140_s24 + $0x348] sm:$0xff] %v364_v41  ;;  %v370_v44 = vld [vmem:[%s19135_s23 + $0x360] sm:$0xff] }
  0x45   : > { %367 = vst [vmem:[%s19140_s24 + $0x350] sm:$0xff] %v366_v42  ;;  %369 = vst [vmem:[%s19140_s24 + $0x358] sm:$0xff] %v368_v43  ;;  %v372_v45 = vld [vmem:[%s19135_s23 + $0x368] sm:$0xff]  ;;  %v374_v46 = vld [vmem:[%s19135_s23 + $0x370] sm:$0xff] }
  0x46   : > { %371 = vst [vmem:[%s19140_s24 + $0x360] sm:$0xff] %v370_v44  ;;  %373 = vst [vmem:[%s19140_s24 + $0x368] sm:$0xff] %v372_v45  ;;  %v376_v47 = vld [vmem:[%s19135_s23 + $0x378] sm:$0xff]  ;;  %v378_v48 = vld [vmem:[%s19135_s23 + $0x380] sm:$0xff] }
  0x47   : > { %375 = vst [vmem:[%s19140_s24 + $0x370] sm:$0xff] %v374_v46  ;;  %v380_v49 = vld [vmem:[%s19135_s23 + $0x388] sm:$0xff]  ;;  %377 = vst [vmem:[%s19140_s24 + $0x378] sm:$0xff] %v376_v47  ;;  %v382_v50 = vld [vmem:[%s19135_s23 + $0x390] sm:$0xff] }
  0x48   : > { %379 = vst [vmem:[%s19140_s24 + $0x380] sm:$0xff] %v378_v48  ;;  %381 = vst [vmem:[%s19140_s24 + $0x388] sm:$0xff] %v380_v49  ;;  %v384_v51 = vld [vmem:[%s19135_s23 + $0x398] sm:$0xff]  ;;  %v386_v52 = vld [vmem:[%s19135_s23 + $0x3a0] sm:$0xff] }
  0x49   : > { %383 = vst [vmem:[%s19140_s24 + $0x390] sm:$0xff] %v382_v50  ;;  %385 = vst [vmem:[%s19140_s24 + $0x398] sm:$0xff] %v384_v51  ;;  %v388_v53 = vld [vmem:[%s19135_s23 + $0x3a8] sm:$0xff]  ;;  %v390_v54 = vld [vmem:[%s19135_s23 + $0x3b0] sm:$0xff] }
  0x4a   : > { %387 = vst [vmem:[%s19140_s24 + $0x3a0] sm:$0xff] %v386_v52  ;;  %v392_v55 = vld [vmem:[%s19135_s23 + $0x3b8] sm:$0xff]  ;;  %389 = vst [vmem:[%s19140_s24 + $0x3a8] sm:$0xff] %v388_v53  ;;  %v394_v56 = vld [vmem:[%s19135_s23 + $0x3c0] sm:$0xff] }
  0x4b   : > { %391 = vst [vmem:[%s19140_s24 + $0x3b0] sm:$0xff] %v390_v54  ;;  %393 = vst [vmem:[%s19140_s24 + $0x3b8] sm:$0xff] %v392_v55  ;;  %v396_v57 = vld [vmem:[%s19135_s23 + $0x3c8] sm:$0xff]  ;;  %v398_v58 = vld [vmem:[%s19135_s23 + $0x3d0] sm:$0xff] }
  0x4c   : > { %395 = vst [vmem:[%s19140_s24 + $0x3c0] sm:$0xff] %v394_v56  ;;  %397 = vst [vmem:[%s19140_s24 + $0x3c8] sm:$0xff] %v396_v57  ;;  %v400_v59 = vld [vmem:[%s19135_s23 + $0x3d8] sm:$0xff]  ;;  %v402_v60 = vld [vmem:[%s19135_s23 + $0x3e0] sm:$0xff] }
  0x4d   : > { %399 = vst [vmem:[%s19140_s24 + $0x3d0] sm:$0xff] %v398_v58  ;;  %v404_v61 = vld [vmem:[%s19135_s23 + $0x3e8] sm:$0xff]  ;;  %401 = vst [vmem:[%s19140_s24 + $0x3d8] sm:$0xff] %v400_v59  ;;  %v406_v62 = vld [vmem:[%s19135_s23 + $0x3f0] sm:$0xff] }
  0x4e   : > { %403 = vst [vmem:[%s19140_s24 + $0x3e0] sm:$0xff] %v402_v60  ;;  %405 = vst [vmem:[%s19140_s24 + $0x3e8] sm:$0xff] %v404_v61  ;;  %v408_v63 = vld [vmem:[%s19135_s23 + $0x3f8] sm:$0xff]  ;;  %v410_v0 = vld [vmem:[%s19135_s23 + $0x400] sm:$0xff] }
  0x4f   : > { %407 = vst [vmem:[%s19140_s24 + $0x3f0] sm:$0xff] %v406_v62  ;;  %409 = vst [vmem:[%s19140_s24 + $0x3f8] sm:$0xff] %v408_v63  ;;  %v412_v1 = vld [vmem:[%s19135_s23 + $0x408] sm:$0xff]  ;;  %v414_v2 = vld [vmem:[%s19135_s23 + $0x410] sm:$0xff] }
  0x50   : > { %411 = vst [vmem:[%s19140_s24 + $0x400] sm:$0xff] %v410_v0  ;;  %v416_v3 = vld [vmem:[%s19135_s23 + $0x418] sm:$0xff]  ;;  %413 = vst [vmem:[%s19140_s24 + $0x408] sm:$0xff] %v412_v1  ;;  %v418_v4 = vld [vmem:[%s19135_s23 + $0x420] sm:$0xff] }
  0x51   : > { %415 = vst [vmem:[%s19140_s24 + $0x410] sm:$0xff] %v414_v2  ;;  %417 = vst [vmem:[%s19140_s24 + $0x418] sm:$0xff] %v416_v3  ;;  %v420_v5 = vld [vmem:[%s19135_s23 + $0x428] sm:$0xff]  ;;  %v422_v6 = vld [vmem:[%s19135_s23 + $0x430] sm:$0xff] }
  0x52   : > { %419 = vst [vmem:[%s19140_s24 + $0x420] sm:$0xff] %v418_v4  ;;  %421 = vst [vmem:[%s19140_s24 + $0x428] sm:$0xff] %v420_v5  ;;  %v424_v7 = vld [vmem:[%s19135_s23 + $0x438] sm:$0xff]  ;;  %v426_v8 = vld [vmem:[%s19135_s23 + $0x440] sm:$0xff] }
  0x53   : > { %423 = vst [vmem:[%s19140_s24 + $0x430] sm:$0xff] %v422_v6  ;;  %v428_v9 = vld [vmem:[%s19135_s23 + $0x448] sm:$0xff]  ;;  %425 = vst [vmem:[%s19140_s24 + $0x438] sm:$0xff] %v424_v7  ;;  %v430_v10 = vld [vmem:[%s19135_s23 + $0x450] sm:$0xff] }
  0x54   : > { %427 = vst [vmem:[%s19140_s24 + $0x440] sm:$0xff] %v426_v8  ;;  %429 = vst [vmem:[%s19140_s24 + $0x448] sm:$0xff] %v428_v9  ;;  %v432_v11 = vld [vmem:[%s19135_s23 + $0x458] sm:$0xff]  ;;  %v434_v12 = vld [vmem:[%s19135_s23 + $0x460] sm:$0xff] }
  0x55   : > { %431 = vst [vmem:[%s19140_s24 + $0x450] sm:$0xff] %v430_v10  ;;  %433 = vst [vmem:[%s19140_s24 + $0x458] sm:$0xff] %v432_v11  ;;  %v436_v13 = vld [vmem:[%s19135_s23 + $0x468] sm:$0xff]  ;;  %v438_v14 = vld [vmem:[%s19135_s23 + $0x470] sm:$0xff] }
  0x56   : > { %435 = vst [vmem:[%s19140_s24 + $0x460] sm:$0xff] %v434_v12  ;;  %v440_v15 = vld [vmem:[%s19135_s23 + $0x478] sm:$0xff]  ;;  %437 = vst [vmem:[%s19140_s24 + $0x468] sm:$0xff] %v436_v13  ;;  %v442_v16 = vld [vmem:[%s19135_s23 + $0x480] sm:$0xff] }
  0x57   : > { %439 = vst [vmem:[%s19140_s24 + $0x470] sm:$0xff] %v438_v14  ;;  %441 = vst [vmem:[%s19140_s24 + $0x478] sm:$0xff] %v440_v15  ;;  %v444_v17 = vld [vmem:[%s19135_s23 + $0x488] sm:$0xff]  ;;  %v446_v18 = vld [vmem:[%s19135_s23 + $0x490] sm:$0xff] }
  0x58   : > { %443 = vst [vmem:[%s19140_s24 + $0x480] sm:$0xff] %v442_v16  ;;  %445 = vst [vmem:[%s19140_s24 + $0x488] sm:$0xff] %v444_v17  ;;  %v448_v19 = vld [vmem:[%s19135_s23 + $0x498] sm:$0xff]  ;;  %v450_v20 = vld [vmem:[%s19135_s23 + $0x4a0] sm:$0xff] }
  0x59   : > { %447 = vst [vmem:[%s19140_s24 + $0x490] sm:$0xff] %v446_v18  ;;  %v452_v21 = vld [vmem:[%s19135_s23 + $0x4a8] sm:$0xff]  ;;  %449 = vst [vmem:[%s19140_s24 + $0x498] sm:$0xff] %v448_v19  ;;  %v454_v22 = vld [vmem:[%s19135_s23 + $0x4b0] sm:$0xff] }
  0x5a   : > { %451 = vst [vmem:[%s19140_s24 + $0x4a0] sm:$0xff] %v450_v20  ;;  %453 = vst [vmem:[%s19140_s24 + $0x4a8] sm:$0xff] %v452_v21  ;;  %v456_v23 = vld [vmem:[%s19135_s23 + $0x4b8] sm:$0xff]  ;;  %v458_v24 = vld [vmem:[%s19135_s23 + $0x4c0] sm:$0xff] }
  0x5b   : > { %455 = vst [vmem:[%s19140_s24 + $0x4b0] sm:$0xff] %v454_v22  ;;  %457 = vst [vmem:[%s19140_s24 + $0x4b8] sm:$0xff] %v456_v23  ;;  %v460_v25 = vld [vmem:[%s19135_s23 + $0x4c8] sm:$0xff]  ;;  %v462_v26 = vld [vmem:[%s19135_s23 + $0x4d0] sm:$0xff] }
  0x5c   : > { %459 = vst [vmem:[%s19140_s24 + $0x4c0] sm:$0xff] %v458_v24  ;;  %v464_v27 = vld [vmem:[%s19135_s23 + $0x4d8] sm:$0xff]  ;;  %461 = vst [vmem:[%s19140_s24 + $0x4c8] sm:$0xff] %v460_v25  ;;  %v466_v28 = vld [vmem:[%s19135_s23 + $0x4e0] sm:$0xff] }
  0x5d   : > { %463 = vst [vmem:[%s19140_s24 + $0x4d0] sm:$0xff] %v462_v26  ;;  %465 = vst [vmem:[%s19140_s24 + $0x4d8] sm:$0xff] %v464_v27  ;;  %v468_v29 = vld [vmem:[%s19135_s23 + $0x4e8] sm:$0xff]  ;;  %v470_v30 = vld [vmem:[%s19135_s23 + $0x4f0] sm:$0xff] }
  0x5e   : > { %467 = vst [vmem:[%s19140_s24 + $0x4e0] sm:$0xff] %v466_v28  ;;  %469 = vst [vmem:[%s19140_s24 + $0x4e8] sm:$0xff] %v468_v29  ;;  %v472_v31 = vld [vmem:[%s19135_s23 + $0x4f8] sm:$0xff]  ;;  %v474_v32 = vld [vmem:[%s19135_s23 + $0x500] sm:$0xff] }
  0x5f   : > { %471 = vst [vmem:[%s19140_s24 + $0x4f0] sm:$0xff] %v470_v30  ;;  %v476_v33 = vld [vmem:[%s19135_s23 + $0x508] sm:$0xff]  ;;  %473 = vst [vmem:[%s19140_s24 + $0x4f8] sm:$0xff] %v472_v31  ;;  %v478_v34 = vld [vmem:[%s19135_s23 + $0x510] sm:$0xff] }
  0x60   : > { %475 = vst [vmem:[%s19140_s24 + $0x500] sm:$0xff] %v474_v32  ;;  %477 = vst [vmem:[%s19140_s24 + $0x508] sm:$0xff] %v476_v33  ;;  %v480_v35 = vld [vmem:[%s19135_s23 + $0x518] sm:$0xff]  ;;  %v482_v36 = vld [vmem:[%s19135_s23 + $0x520] sm:$0xff] }
  0x61   : > { %479 = vst [vmem:[%s19140_s24 + $0x510] sm:$0xff] %v478_v34  ;;  %481 = vst [vmem:[%s19140_s24 + $0x518] sm:$0xff] %v480_v35  ;;  %v484_v37 = vld [vmem:[%s19135_s23 + $0x528] sm:$0xff]  ;;  %v486_v38 = vld [vmem:[%s19135_s23 + $0x530] sm:$0xff] }
  0x62   : > { %483 = vst [vmem:[%s19140_s24 + $0x520] sm:$0xff] %v482_v36  ;;  %v488_v39 = vld [vmem:[%s19135_s23 + $0x538] sm:$0xff]  ;;  %485 = vst [vmem:[%s19140_s24 + $0x528] sm:$0xff] %v484_v37  ;;  %v490_v40 = vld [vmem:[%s19135_s23 + $0x540] sm:$0xff] }
  0x63   : > { %487 = vst [vmem:[%s19140_s24 + $0x530] sm:$0xff] %v486_v38  ;;  %489 = vst [vmem:[%s19140_s24 + $0x538] sm:$0xff] %v488_v39  ;;  %v492_v41 = vld [vmem:[%s19135_s23 + $0x548] sm:$0xff]  ;;  %v494_v42 = vld [vmem:[%s19135_s23 + $0x550] sm:$0xff] }
  0x64   : > { %491 = vst [vmem:[%s19140_s24 + $0x540] sm:$0xff] %v490_v40  ;;  %493 = vst [vmem:[%s19140_s24 + $0x548] sm:$0xff] %v492_v41  ;;  %v496_v43 = vld [vmem:[%s19135_s23 + $0x558] sm:$0xff]  ;;  %v498_v44 = vld [vmem:[%s19135_s23 + $0x560] sm:$0xff] }
  0x65   : > { %495 = vst [vmem:[%s19140_s24 + $0x550] sm:$0xff] %v494_v42  ;;  %v500_v45 = vld [vmem:[%s19135_s23 + $0x568] sm:$0xff]  ;;  %497 = vst [vmem:[%s19140_s24 + $0x558] sm:$0xff] %v496_v43  ;;  %v502_v46 = vld [vmem:[%s19135_s23 + $0x570] sm:$0xff] }
  0x66   : > { %499 = vst [vmem:[%s19140_s24 + $0x560] sm:$0xff] %v498_v44  ;;  %501 = vst [vmem:[%s19140_s24 + $0x568] sm:$0xff] %v500_v45  ;;  %v504_v47 = vld [vmem:[%s19135_s23 + $0x578] sm:$0xff]  ;;  %v506_v48 = vld [vmem:[%s19135_s23 + $0x580] sm:$0xff] }
  0x67   : > { %503 = vst [vmem:[%s19140_s24 + $0x570] sm:$0xff] %v502_v46  ;;  %505 = vst [vmem:[%s19140_s24 + $0x578] sm:$0xff] %v504_v47  ;;  %v508_v49 = vld [vmem:[%s19135_s23 + $0x588] sm:$0xff]  ;;  %v510_v50 = vld [vmem:[%s19135_s23 + $0x590] sm:$0xff] }
  0x68   : > { %507 = vst [vmem:[%s19140_s24 + $0x580] sm:$0xff] %v506_v48  ;;  %v512_v51 = vld [vmem:[%s19135_s23 + $0x598] sm:$0xff]  ;;  %509 = vst [vmem:[%s19140_s24 + $0x588] sm:$0xff] %v508_v49  ;;  %v514_v52 = vld [vmem:[%s19135_s23 + $0x5a0] sm:$0xff] }
  0x69   : > { %511 = vst [vmem:[%s19140_s24 + $0x590] sm:$0xff] %v510_v50  ;;  %513 = vst [vmem:[%s19140_s24 + $0x598] sm:$0xff] %v512_v51  ;;  %v516_v53 = vld [vmem:[%s19135_s23 + $0x5a8] sm:$0xff]  ;;  %v518_v54 = vld [vmem:[%s19135_s23 + $0x5b0] sm:$0xff] }
  0x6a   : > { %515 = vst [vmem:[%s19140_s24 + $0x5a0] sm:$0xff] %v514_v52  ;;  %517 = vst [vmem:[%s19140_s24 + $0x5a8] sm:$0xff] %v516_v53  ;;  %v520_v55 = vld [vmem:[%s19135_s23 + $0x5b8] sm:$0xff]  ;;  %v522_v56 = vld [vmem:[%s19135_s23 + $0x5c0] sm:$0xff] }
  0x6b   : > { %519 = vst [vmem:[%s19140_s24 + $0x5b0] sm:$0xff] %v518_v54  ;;  %v524_v57 = vld [vmem:[%s19135_s23 + $0x5c8] sm:$0xff]  ;;  %521 = vst [vmem:[%s19140_s24 + $0x5b8] sm:$0xff] %v520_v55  ;;  %v526_v58 = vld [vmem:[%s19135_s23 + $0x5d0] sm:$0xff] }
  0x6c   : > { %523 = vst [vmem:[%s19140_s24 + $0x5c0] sm:$0xff] %v522_v56  ;;  %525 = vst [vmem:[%s19140_s24 + $0x5c8] sm:$0xff] %v524_v57  ;;  %v528_v59 = vld [vmem:[%s19135_s23 + $0x5d8] sm:$0xff]  ;;  %v530_v60 = vld [vmem:[%s19135_s23 + $0x5e0] sm:$0xff] }
  0x6d   : > { %527 = vst [vmem:[%s19140_s24 + $0x5d0] sm:$0xff] %v526_v58  ;;  %529 = vst [vmem:[%s19140_s24 + $0x5d8] sm:$0xff] %v528_v59  ;;  %v532_v61 = vld [vmem:[%s19135_s23 + $0x5e8] sm:$0xff]  ;;  %v534_v62 = vld [vmem:[%s19135_s23 + $0x5f0] sm:$0xff] }
  0x6e   : > { %531 = vst [vmem:[%s19140_s24 + $0x5e0] sm:$0xff] %v530_v60  ;;  %v536_v63 = vld [vmem:[%s19135_s23 + $0x5f8] sm:$0xff]  ;;  %533 = vst [vmem:[%s19140_s24 + $0x5e8] sm:$0xff] %v532_v61  ;;  %v538_v0 = vld [vmem:[%s19135_s23 + $0x600] sm:$0xff] }
  0x6f   : > { %535 = vst [vmem:[%s19140_s24 + $0x5f0] sm:$0xff] %v534_v62  ;;  %537 = vst [vmem:[%s19140_s24 + $0x5f8] sm:$0xff] %v536_v63  ;;  %v540_v1 = vld [vmem:[%s19135_s23 + $0x608] sm:$0xff]  ;;  %v542_v2 = vld [vmem:[%s19135_s23 + $0x610] sm:$0xff] }
  0x70   : > { %539 = vst [vmem:[%s19140_s24 + $0x600] sm:$0xff] %v538_v0  ;;  %541 = vst [vmem:[%s19140_s24 + $0x608] sm:$0xff] %v540_v1  ;;  %v544_v3 = vld [vmem:[%s19135_s23 + $0x618] sm:$0xff]  ;;  %v546_v4 = vld [vmem:[%s19135_s23 + $0x620] sm:$0xff] }
  0x71   : > { %543 = vst [vmem:[%s19140_s24 + $0x610] sm:$0xff] %v542_v2  ;;  %v548_v5 = vld [vmem:[%s19135_s23 + $0x628] sm:$0xff]  ;;  %545 = vst [vmem:[%s19140_s24 + $0x618] sm:$0xff] %v544_v3  ;;  %v550_v6 = vld [vmem:[%s19135_s23 + $0x630] sm:$0xff] }
  0x72   : > { %547 = vst [vmem:[%s19140_s24 + $0x620] sm:$0xff] %v546_v4  ;;  %549 = vst [vmem:[%s19140_s24 + $0x628] sm:$0xff] %v548_v5  ;;  %v552_v7 = vld [vmem:[%s19135_s23 + $0x638] sm:$0xff]  ;;  %v554_v8 = vld [vmem:[%s19135_s23 + $0x640] sm:$0xff] }
  0x73   : > { %551 = vst [vmem:[%s19140_s24 + $0x630] sm:$0xff] %v550_v6  ;;  %553 = vst [vmem:[%s19140_s24 + $0x638] sm:$0xff] %v552_v7  ;;  %v556_v9 = vld [vmem:[%s19135_s23 + $0x648] sm:$0xff]  ;;  %v558_v10 = vld [vmem:[%s19135_s23 + $0x650] sm:$0xff] }
  0x74   : > { %555 = vst [vmem:[%s19140_s24 + $0x640] sm:$0xff] %v554_v8  ;;  %v560_v11 = vld [vmem:[%s19135_s23 + $0x658] sm:$0xff]  ;;  %557 = vst [vmem:[%s19140_s24 + $0x648] sm:$0xff] %v556_v9  ;;  %v562_v12 = vld [vmem:[%s19135_s23 + $0x660] sm:$0xff] }
  0x75   : > { %559 = vst [vmem:[%s19140_s24 + $0x650] sm:$0xff] %v558_v10  ;;  %561 = vst [vmem:[%s19140_s24 + $0x658] sm:$0xff] %v560_v11  ;;  %v564_v13 = vld [vmem:[%s19135_s23 + $0x668] sm:$0xff]  ;;  %v566_v14 = vld [vmem:[%s19135_s23 + $0x670] sm:$0xff] }
  0x76   : > { %563 = vst [vmem:[%s19140_s24 + $0x660] sm:$0xff] %v562_v12  ;;  %565 = vst [vmem:[%s19140_s24 + $0x668] sm:$0xff] %v564_v13  ;;  %v568_v15 = vld [vmem:[%s19135_s23 + $0x678] sm:$0xff]  ;;  %v570_v16 = vld [vmem:[%s19135_s23 + $0x680] sm:$0xff] }
  0x77   : > { %567 = vst [vmem:[%s19140_s24 + $0x670] sm:$0xff] %v566_v14  ;;  %v572_v17 = vld [vmem:[%s19135_s23 + $0x688] sm:$0xff]  ;;  %569 = vst [vmem:[%s19140_s24 + $0x678] sm:$0xff] %v568_v15  ;;  %v574_v18 = vld [vmem:[%s19135_s23 + $0x690] sm:$0xff] }
  0x78   : > { %571 = vst [vmem:[%s19140_s24 + $0x680] sm:$0xff] %v570_v16  ;;  %573 = vst [vmem:[%s19140_s24 + $0x688] sm:$0xff] %v572_v17  ;;  %v576_v19 = vld [vmem:[%s19135_s23 + $0x698] sm:$0xff]  ;;  %v578_v20 = vld [vmem:[%s19135_s23 + $0x6a0] sm:$0xff] }
  0x79   : > { %575 = vst [vmem:[%s19140_s24 + $0x690] sm:$0xff] %v574_v18  ;;  %577 = vst [vmem:[%s19140_s24 + $0x698] sm:$0xff] %v576_v19  ;;  %v580_v21 = vld [vmem:[%s19135_s23 + $0x6a8] sm:$0xff]  ;;  %v582_v22 = vld [vmem:[%s19135_s23 + $0x6b0] sm:$0xff] }
  0x7a   : > { %579 = vst [vmem:[%s19140_s24 + $0x6a0] sm:$0xff] %v578_v20  ;;  %v584_v23 = vld [vmem:[%s19135_s23 + $0x6b8] sm:$0xff]  ;;  %581 = vst [vmem:[%s19140_s24 + $0x6a8] sm:$0xff] %v580_v21  ;;  %v586_v24 = vld [vmem:[%s19135_s23 + $0x6c0] sm:$0xff] }
  0x7b   : > { %583 = vst [vmem:[%s19140_s24 + $0x6b0] sm:$0xff] %v582_v22  ;;  %585 = vst [vmem:[%s19140_s24 + $0x6b8] sm:$0xff] %v584_v23  ;;  %v588_v25 = vld [vmem:[%s19135_s23 + $0x6c8] sm:$0xff]  ;;  %v590_v26 = vld [vmem:[%s19135_s23 + $0x6d0] sm:$0xff] }
  0x7c   : > { %587 = vst [vmem:[%s19140_s24 + $0x6c0] sm:$0xff] %v586_v24  ;;  %589 = vst [vmem:[%s19140_s24 + $0x6c8] sm:$0xff] %v588_v25  ;;  %v592_v27 = vld [vmem:[%s19135_s23 + $0x6d8] sm:$0xff]  ;;  %v594_v28 = vld [vmem:[%s19135_s23 + $0x6e0] sm:$0xff] }
  0x7d   : > { %591 = vst [vmem:[%s19140_s24 + $0x6d0] sm:$0xff] %v590_v26  ;;  %v596_v29 = vld [vmem:[%s19135_s23 + $0x6e8] sm:$0xff]  ;;  %593 = vst [vmem:[%s19140_s24 + $0x6d8] sm:$0xff] %v592_v27  ;;  %v598_v30 = vld [vmem:[%s19135_s23 + $0x6f0] sm:$0xff] }
  0x7e   : > { %595 = vst [vmem:[%s19140_s24 + $0x6e0] sm:$0xff] %v594_v28  ;;  %597 = vst [vmem:[%s19140_s24 + $0x6e8] sm:$0xff] %v596_v29  ;;  %v600_v31 = vld [vmem:[%s19135_s23 + $0x6f8] sm:$0xff]  ;;  %v602_v32 = vld [vmem:[%s19135_s23 + $0x700] sm:$0xff] }
  0x7f   : > { %599 = vst [vmem:[%s19140_s24 + $0x6f0] sm:$0xff] %v598_v30  ;;  %601 = vst [vmem:[%s19140_s24 + $0x6f8] sm:$0xff] %v600_v31  ;;  %v604_v33 = vld [vmem:[%s19135_s23 + $0x708] sm:$0xff]  ;;  %v606_v34 = vld [vmem:[%s19135_s23 + $0x710] sm:$0xff] }
  0x80   : > { %603 = vst [vmem:[%s19140_s24 + $0x700] sm:$0xff] %v602_v32  ;;  %v608_v35 = vld [vmem:[%s19135_s23 + $0x718] sm:$0xff]  ;;  %605 = vst [vmem:[%s19140_s24 + $0x708] sm:$0xff] %v604_v33  ;;  %v610_v36 = vld [vmem:[%s19135_s23 + $0x720] sm:$0xff] }
  0x81   : > { %607 = vst [vmem:[%s19140_s24 + $0x710] sm:$0xff] %v606_v34  ;;  %609 = vst [vmem:[%s19140_s24 + $0x718] sm:$0xff] %v608_v35  ;;  %v612_v37 = vld [vmem:[%s19135_s23 + $0x728] sm:$0xff]  ;;  %v614_v38 = vld [vmem:[%s19135_s23 + $0x730] sm:$0xff] }
  0x82   : > { %611 = vst [vmem:[%s19140_s24 + $0x720] sm:$0xff] %v610_v36  ;;  %613 = vst [vmem:[%s19140_s24 + $0x728] sm:$0xff] %v612_v37  ;;  %v616_v39 = vld [vmem:[%s19135_s23 + $0x738] sm:$0xff]  ;;  %v618_v40 = vld [vmem:[%s19135_s23 + $0x740] sm:$0xff] }
  0x83   : > { %615 = vst [vmem:[%s19140_s24 + $0x730] sm:$0xff] %v614_v38  ;;  %v620_v41 = vld [vmem:[%s19135_s23 + $0x748] sm:$0xff]  ;;  %617 = vst [vmem:[%s19140_s24 + $0x738] sm:$0xff] %v616_v39  ;;  %v622_v42 = vld [vmem:[%s19135_s23 + $0x750] sm:$0xff] }
  0x84   : > { %619 = vst [vmem:[%s19140_s24 + $0x740] sm:$0xff] %v618_v40  ;;  %621 = vst [vmem:[%s19140_s24 + $0x748] sm:$0xff] %v620_v41  ;;  %v624_v43 = vld [vmem:[%s19135_s23 + $0x758] sm:$0xff]  ;;  %v626_v44 = vld [vmem:[%s19135_s23 + $0x760] sm:$0xff] }
  0x85   : > { %623 = vst [vmem:[%s19140_s24 + $0x750] sm:$0xff] %v622_v42  ;;  %625 = vst [vmem:[%s19140_s24 + $0x758] sm:$0xff] %v624_v43  ;;  %v628_v45 = vld [vmem:[%s19135_s23 + $0x768] sm:$0xff]  ;;  %v630_v46 = vld [vmem:[%s19135_s23 + $0x770] sm:$0xff] }
  0x86   : > { %627 = vst [vmem:[%s19140_s24 + $0x760] sm:$0xff] %v626_v44  ;;  %v632_v47 = vld [vmem:[%s19135_s23 + $0x778] sm:$0xff]  ;;  %629 = vst [vmem:[%s19140_s24 + $0x768] sm:$0xff] %v628_v45  ;;  %v634_v48 = vld [vmem:[%s19135_s23 + $0x780] sm:$0xff] }
  0x87   : > { %631 = vst [vmem:[%s19140_s24 + $0x770] sm:$0xff] %v630_v46  ;;  %633 = vst [vmem:[%s19140_s24 + $0x778] sm:$0xff] %v632_v47  ;;  %v636_v49 = vld [vmem:[%s19135_s23 + $0x788] sm:$0xff]  ;;  %v638_v50 = vld [vmem:[%s19135_s23 + $0x790] sm:$0xff] }
  0x88   : > { %635 = vst [vmem:[%s19140_s24 + $0x780] sm:$0xff] %v634_v48  ;;  %637 = vst [vmem:[%s19140_s24 + $0x788] sm:$0xff] %v636_v49  ;;  %v640_v51 = vld [vmem:[%s19135_s23 + $0x798] sm:$0xff]  ;;  %v642_v52 = vld [vmem:[%s19135_s23 + $0x7a0] sm:$0xff] }
  0x89   : > { %639 = vst [vmem:[%s19140_s24 + $0x790] sm:$0xff] %v638_v50  ;;  %v644_v53 = vld [vmem:[%s19135_s23 + $0x7a8] sm:$0xff]  ;;  %641 = vst [vmem:[%s19140_s24 + $0x798] sm:$0xff] %v640_v51  ;;  %v646_v54 = vld [vmem:[%s19135_s23 + $0x7b0] sm:$0xff] }
  0x8a   : > { %643 = vst [vmem:[%s19140_s24 + $0x7a0] sm:$0xff] %v642_v52  ;;  %645 = vst [vmem:[%s19140_s24 + $0x7a8] sm:$0xff] %v644_v53  ;;  %v648_v55 = vld [vmem:[%s19135_s23 + $0x7b8] sm:$0xff]  ;;  %v650_v56 = vld [vmem:[%s19135_s23 + $0x7c0] sm:$0xff] }
  0x8b   : > { %647 = vst [vmem:[%s19140_s24 + $0x7b0] sm:$0xff] %v646_v54  ;;  %649 = vst [vmem:[%s19140_s24 + $0x7b8] sm:$0xff] %v648_v55  ;;  %v652_v57 = vld [vmem:[%s19135_s23 + $0x7c8] sm:$0xff]  ;;  %v654_v58 = vld [vmem:[%s19135_s23 + $0x7d0] sm:$0xff] }
  0x8c   : > { %651 = vst [vmem:[%s19140_s24 + $0x7c0] sm:$0xff] %v650_v56  ;;  %v656_v59 = vld [vmem:[%s19135_s23 + $0x7d8] sm:$0xff]  ;;  %653 = vst [vmem:[%s19140_s24 + $0x7c8] sm:$0xff] %v652_v57  ;;  %v658_v60 = vld [vmem:[%s19135_s23 + $0x7e0] sm:$0xff] }
  0x8d   : > { %655 = vst [vmem:[%s19140_s24 + $0x7d0] sm:$0xff] %v654_v58  ;;  %657 = vst [vmem:[%s19140_s24 + $0x7d8] sm:$0xff] %v656_v59  ;;  %v660_v61 = vld [vmem:[%s19135_s23 + $0x7e8] sm:$0xff]  ;;  %v662_v62 = vld [vmem:[%s19135_s23 + $0x7f0] sm:$0xff] }
  0x8e   : > { %659 = vst [vmem:[%s19140_s24 + $0x7e0] sm:$0xff] %v658_v60  ;;  %661 = vst [vmem:[%s19140_s24 + $0x7e8] sm:$0xff] %v660_v61  ;;  %v664_v63 = vld [vmem:[%s19135_s23 + $0x7f8] sm:$0xff]  ;;  %v666_v0 = vld [vmem:[%s19135_s23 + $0x1000] sm:$0xff] }
  0x8f   : > { %663 = vst [vmem:[%s19140_s24 + $0x7f0] sm:$0xff] %v662_v62  ;;  %v668_v1 = vld [vmem:[%s19135_s23 + $0x1008] sm:$0xff]  ;;  %665 = vst [vmem:[%s19140_s24 + $0x7f8] sm:$0xff] %v664_v63  ;;  %v670_v2 = vld [vmem:[%s19135_s23 + $0x1010] sm:$0xff] }
  0x90   : > { %667 = vst [vmem:[%s19140_s24 + $0x800] sm:$0xff] %v666_v0  ;;  %669 = vst [vmem:[%s19140_s24 + $0x808] sm:$0xff] %v668_v1  ;;  %v672_v3 = vld [vmem:[%s19135_s23 + $0x1018] sm:$0xff]  ;;  %v674_v4 = vld [vmem:[%s19135_s23 + $0x1020] sm:$0xff] }
  0x91   : > { %671 = vst [vmem:[%s19140_s24 + $0x810] sm:$0xff] %v670_v2  ;;  %673 = vst [vmem:[%s19140_s24 + $0x818] sm:$0xff] %v672_v3  ;;  %v676_v5 = vld [vmem:[%s19135_s23 + $0x1028] sm:$0xff]  ;;  %v678_v6 = vld [vmem:[%s19135_s23 + $0x1030] sm:$0xff] }
  0x92   : > { %675 = vst [vmem:[%s19140_s24 + $0x820] sm:$0xff] %v674_v4  ;;  %v680_v7 = vld [vmem:[%s19135_s23 + $0x1038] sm:$0xff]  ;;  %677 = vst [vmem:[%s19140_s24 + $0x828] sm:$0xff] %v676_v5  ;;  %v682_v8 = vld [vmem:[%s19135_s23 + $0x1040] sm:$0xff] }
  0x93   : > { %679 = vst [vmem:[%s19140_s24 + $0x830] sm:$0xff] %v678_v6  ;;  %681 = vst [vmem:[%s19140_s24 + $0x838] sm:$0xff] %v680_v7  ;;  %v684_v9 = vld [vmem:[%s19135_s23 + $0x1048] sm:$0xff]  ;;  %v686_v10 = vld [vmem:[%s19135_s23 + $0x1050] sm:$0xff] }
  0x94   : > { %683 = vst [vmem:[%s19140_s24 + $0x840] sm:$0xff] %v682_v8  ;;  %685 = vst [vmem:[%s19140_s24 + $0x848] sm:$0xff] %v684_v9  ;;  %v688_v11 = vld [vmem:[%s19135_s23 + $0x1058] sm:$0xff]  ;;  %v690_v12 = vld [vmem:[%s19135_s23 + $0x1060] sm:$0xff] }
  0x95   : > { %687 = vst [vmem:[%s19140_s24 + $0x850] sm:$0xff] %v686_v10  ;;  %v692_v13 = vld [vmem:[%s19135_s23 + $0x1068] sm:$0xff]  ;;  %689 = vst [vmem:[%s19140_s24 + $0x858] sm:$0xff] %v688_v11  ;;  %v694_v14 = vld [vmem:[%s19135_s23 + $0x1070] sm:$0xff] }
  0x96   : > { %691 = vst [vmem:[%s19140_s24 + $0x860] sm:$0xff] %v690_v12  ;;  %693 = vst [vmem:[%s19140_s24 + $0x868] sm:$0xff] %v692_v13  ;;  %v696_v15 = vld [vmem:[%s19135_s23 + $0x1078] sm:$0xff]  ;;  %v698_v16 = vld [vmem:[%s19135_s23 + $0x1080] sm:$0xff] }
  0x97   : > { %695 = vst [vmem:[%s19140_s24 + $0x870] sm:$0xff] %v694_v14  ;;  %697 = vst [vmem:[%s19140_s24 + $0x878] sm:$0xff] %v696_v15  ;;  %v700_v17 = vld [vmem:[%s19135_s23 + $0x1088] sm:$0xff]  ;;  %v702_v18 = vld [vmem:[%s19135_s23 + $0x1090] sm:$0xff] }
  0x98   : > { %699 = vst [vmem:[%s19140_s24 + $0x880] sm:$0xff] %v698_v16  ;;  %v704_v19 = vld [vmem:[%s19135_s23 + $0x1098] sm:$0xff]  ;;  %701 = vst [vmem:[%s19140_s24 + $0x888] sm:$0xff] %v700_v17  ;;  %v706_v20 = vld [vmem:[%s19135_s23 + $0x10a0] sm:$0xff] }
  0x99   : > { %703 = vst [vmem:[%s19140_s24 + $0x890] sm:$0xff] %v702_v18  ;;  %705 = vst [vmem:[%s19140_s24 + $0x898] sm:$0xff] %v704_v19  ;;  %v708_v21 = vld [vmem:[%s19135_s23 + $0x10a8] sm:$0xff]  ;;  %v710_v22 = vld [vmem:[%s19135_s23 + $0x10b0] sm:$0xff] }
  0x9a   : > { %707 = vst [vmem:[%s19140_s24 + $0x8a0] sm:$0xff] %v706_v20  ;;  %709 = vst [vmem:[%s19140_s24 + $0x8a8] sm:$0xff] %v708_v21  ;;  %v712_v23 = vld [vmem:[%s19135_s23 + $0x10b8] sm:$0xff]  ;;  %v714_v24 = vld [vmem:[%s19135_s23 + $0x10c0] sm:$0xff] }
  0x9b   : > { %711 = vst [vmem:[%s19140_s24 + $0x8b0] sm:$0xff] %v710_v22  ;;  %v716_v25 = vld [vmem:[%s19135_s23 + $0x10c8] sm:$0xff]  ;;  %713 = vst [vmem:[%s19140_s24 + $0x8b8] sm:$0xff] %v712_v23  ;;  %v718_v26 = vld [vmem:[%s19135_s23 + $0x10d0] sm:$0xff] }
  0x9c   : > { %715 = vst [vmem:[%s19140_s24 + $0x8c0] sm:$0xff] %v714_v24  ;;  %717 = vst [vmem:[%s19140_s24 + $0x8c8] sm:$0xff] %v716_v25  ;;  %v720_v27 = vld [vmem:[%s19135_s23 + $0x10d8] sm:$0xff]  ;;  %v722_v28 = vld [vmem:[%s19135_s23 + $0x10e0] sm:$0xff] }
  0x9d   : > { %719 = vst [vmem:[%s19140_s24 + $0x8d0] sm:$0xff] %v718_v26  ;;  %721 = vst [vmem:[%s19140_s24 + $0x8d8] sm:$0xff] %v720_v27  ;;  %v724_v29 = vld [vmem:[%s19135_s23 + $0x10e8] sm:$0xff]  ;;  %v726_v30 = vld [vmem:[%s19135_s23 + $0x10f0] sm:$0xff] }
  0x9e   : > { %723 = vst [vmem:[%s19140_s24 + $0x8e0] sm:$0xff] %v722_v28  ;;  %v728_v31 = vld [vmem:[%s19135_s23 + $0x10f8] sm:$0xff]  ;;  %725 = vst [vmem:[%s19140_s24 + $0x8e8] sm:$0xff] %v724_v29  ;;  %v730_v32 = vld [vmem:[%s19135_s23 + $0x1100] sm:$0xff] }
  0x9f   : > { %727 = vst [vmem:[%s19140_s24 + $0x8f0] sm:$0xff] %v726_v30  ;;  %729 = vst [vmem:[%s19140_s24 + $0x8f8] sm:$0xff] %v728_v31  ;;  %v732_v33 = vld [vmem:[%s19135_s23 + $0x1108] sm:$0xff]  ;;  %v734_v34 = vld [vmem:[%s19135_s23 + $0x1110] sm:$0xff] }
  0xa0   : > { %731 = vst [vmem:[%s19140_s24 + $0x900] sm:$0xff] %v730_v32  ;;  %733 = vst [vmem:[%s19140_s24 + $0x908] sm:$0xff] %v732_v33  ;;  %v736_v35 = vld [vmem:[%s19135_s23 + $0x1118] sm:$0xff]  ;;  %v738_v36 = vld [vmem:[%s19135_s23 + $0x1120] sm:$0xff] }
  0xa1   : > { %735 = vst [vmem:[%s19140_s24 + $0x910] sm:$0xff] %v734_v34  ;;  %v740_v37 = vld [vmem:[%s19135_s23 + $0x1128] sm:$0xff]  ;;  %737 = vst [vmem:[%s19140_s24 + $0x918] sm:$0xff] %v736_v35  ;;  %v742_v38 = vld [vmem:[%s19135_s23 + $0x1130] sm:$0xff] }
  0xa2   : > { %739 = vst [vmem:[%s19140_s24 + $0x920] sm:$0xff] %v738_v36  ;;  %741 = vst [vmem:[%s19140_s24 + $0x928] sm:$0xff] %v740_v37  ;;  %v744_v39 = vld [vmem:[%s19135_s23 + $0x1138] sm:$0xff]  ;;  %v746_v40 = vld [vmem:[%s19135_s23 + $0x1140] sm:$0xff] }
  0xa3   : > { %743 = vst [vmem:[%s19140_s24 + $0x930] sm:$0xff] %v742_v38  ;;  %745 = vst [vmem:[%s19140_s24 + $0x938] sm:$0xff] %v744_v39  ;;  %v748_v41 = vld [vmem:[%s19135_s23 + $0x1148] sm:$0xff]  ;;  %v750_v42 = vld [vmem:[%s19135_s23 + $0x1150] sm:$0xff] }
  0xa4   : > { %747 = vst [vmem:[%s19140_s24 + $0x940] sm:$0xff] %v746_v40  ;;  %v752_v43 = vld [vmem:[%s19135_s23 + $0x1158] sm:$0xff]  ;;  %749 = vst [vmem:[%s19140_s24 + $0x948] sm:$0xff] %v748_v41  ;;  %v754_v44 = vld [vmem:[%s19135_s23 + $0x1160] sm:$0xff] }
  0xa5   : > { %751 = vst [vmem:[%s19140_s24 + $0x950] sm:$0xff] %v750_v42  ;;  %753 = vst [vmem:[%s19140_s24 + $0x958] sm:$0xff] %v752_v43  ;;  %v756_v45 = vld [vmem:[%s19135_s23 + $0x1168] sm:$0xff]  ;;  %v758_v46 = vld [vmem:[%s19135_s23 + $0x1170] sm:$0xff] }
  0xa6   : > { %755 = vst [vmem:[%s19140_s24 + $0x960] sm:$0xff] %v754_v44  ;;  %757 = vst [vmem:[%s19140_s24 + $0x968] sm:$0xff] %v756_v45  ;;  %v760_v47 = vld [vmem:[%s19135_s23 + $0x1178] sm:$0xff]  ;;  %v762_v48 = vld [vmem:[%s19135_s23 + $0x1180] sm:$0xff] }
  0xa7   : > { %759 = vst [vmem:[%s19140_s24 + $0x970] sm:$0xff] %v758_v46  ;;  %v764_v49 = vld [vmem:[%s19135_s23 + $0x1188] sm:$0xff]  ;;  %761 = vst [vmem:[%s19140_s24 + $0x978] sm:$0xff] %v760_v47  ;;  %v766_v50 = vld [vmem:[%s19135_s23 + $0x1190] sm:$0xff] }
  0xa8   : > { %763 = vst [vmem:[%s19140_s24 + $0x980] sm:$0xff] %v762_v48  ;;  %765 = vst [vmem:[%s19140_s24 + $0x988] sm:$0xff] %v764_v49  ;;  %v768_v51 = vld [vmem:[%s19135_s23 + $0x1198] sm:$0xff]  ;;  %v770_v52 = vld [vmem:[%s19135_s23 + $0x11a0] sm:$0xff] }
  0xa9   : > { %767 = vst [vmem:[%s19140_s24 + $0x990] sm:$0xff] %v766_v50  ;;  %769 = vst [vmem:[%s19140_s24 + $0x998] sm:$0xff] %v768_v51  ;;  %v772_v53 = vld [vmem:[%s19135_s23 + $0x11a8] sm:$0xff]  ;;  %v774_v54 = vld [vmem:[%s19135_s23 + $0x11b0] sm:$0xff] }
  0xaa   : > { %771 = vst [vmem:[%s19140_s24 + $0x9a0] sm:$0xff] %v770_v52  ;;  %v776_v55 = vld [vmem:[%s19135_s23 + $0x11b8] sm:$0xff]  ;;  %773 = vst [vmem:[%s19140_s24 + $0x9a8] sm:$0xff] %v772_v53  ;;  %v778_v56 = vld [vmem:[%s19135_s23 + $0x11c0] sm:$0xff] }
  0xab   : > { %775 = vst [vmem:[%s19140_s24 + $0x9b0] sm:$0xff] %v774_v54  ;;  %777 = vst [vmem:[%s19140_s24 + $0x9b8] sm:$0xff] %v776_v55  ;;  %v780_v57 = vld [vmem:[%s19135_s23 + $0x11c8] sm:$0xff]  ;;  %v782_v58 = vld [vmem:[%s19135_s23 + $0x11d0] sm:$0xff] }
  0xac   : > { %779 = vst [vmem:[%s19140_s24 + $0x9c0] sm:$0xff] %v778_v56  ;;  %781 = vst [vmem:[%s19140_s24 + $0x9c8] sm:$0xff] %v780_v57  ;;  %v784_v59 = vld [vmem:[%s19135_s23 + $0x11d8] sm:$0xff]  ;;  %v786_v60 = vld [vmem:[%s19135_s23 + $0x11e0] sm:$0xff] }
  0xad   : > { %783 = vst [vmem:[%s19140_s24 + $0x9d0] sm:$0xff] %v782_v58  ;;  %v788_v61 = vld [vmem:[%s19135_s23 + $0x11e8] sm:$0xff]  ;;  %785 = vst [vmem:[%s19140_s24 + $0x9d8] sm:$0xff] %v784_v59  ;;  %v790_v62 = vld [vmem:[%s19135_s23 + $0x11f0] sm:$0xff] }
  0xae   : > { %787 = vst [vmem:[%s19140_s24 + $0x9e0] sm:$0xff] %v786_v60  ;;  %789 = vst [vmem:[%s19140_s24 + $0x9e8] sm:$0xff] %v788_v61  ;;  %v792_v63 = vld [vmem:[%s19135_s23 + $0x11f8] sm:$0xff]  ;;  %v794_v0 = vld [vmem:[%s19135_s23 + $0x1200] sm:$0xff] }
  0xaf   : > { %791 = vst [vmem:[%s19140_s24 + $0x9f0] sm:$0xff] %v790_v62  ;;  %793 = vst [vmem:[%s19140_s24 + $0x9f8] sm:$0xff] %v792_v63  ;;  %v796_v1 = vld [vmem:[%s19135_s23 + $0x1208] sm:$0xff]  ;;  %v798_v2 = vld [vmem:[%s19135_s23 + $0x1210] sm:$0xff] }
  0xb0   : > { %795 = vst [vmem:[%s19140_s24 + $0xa00] sm:$0xff] %v794_v0  ;;  %v800_v3 = vld [vmem:[%s19135_s23 + $0x1218] sm:$0xff]  ;;  %797 = vst [vmem:[%s19140_s24 + $0xa08] sm:$0xff] %v796_v1  ;;  %v802_v4 = vld [vmem:[%s19135_s23 + $0x1220] sm:$0xff] }
  0xb1   : > { %799 = vst [vmem:[%s19140_s24 + $0xa10] sm:$0xff] %v798_v2  ;;  %801 = vst [vmem:[%s19140_s24 + $0xa18] sm:$0xff] %v800_v3  ;;  %v804_v5 = vld [vmem:[%s19135_s23 + $0x1228] sm:$0xff]  ;;  %v806_v6 = vld [vmem:[%s19135_s23 + $0x1230] sm:$0xff] }
  0xb2   : > { %803 = vst [vmem:[%s19140_s24 + $0xa20] sm:$0xff] %v802_v4  ;;  %805 = vst [vmem:[%s19140_s24 + $0xa28] sm:$0xff] %v804_v5  ;;  %v808_v7 = vld [vmem:[%s19135_s23 + $0x1238] sm:$0xff]  ;;  %v810_v8 = vld [vmem:[%s19135_s23 + $0x1240] sm:$0xff] }
  0xb3   : > { %807 = vst [vmem:[%s19140_s24 + $0xa30] sm:$0xff] %v806_v6  ;;  %v812_v9 = vld [vmem:[%s19135_s23 + $0x1248] sm:$0xff]  ;;  %809 = vst [vmem:[%s19140_s24 + $0xa38] sm:$0xff] %v808_v7  ;;  %v814_v10 = vld [vmem:[%s19135_s23 + $0x1250] sm:$0xff] }
  0xb4   : > { %811 = vst [vmem:[%s19140_s24 + $0xa40] sm:$0xff] %v810_v8  ;;  %813 = vst [vmem:[%s19140_s24 + $0xa48] sm:$0xff] %v812_v9  ;;  %v816_v11 = vld [vmem:[%s19135_s23 + $0x1258] sm:$0xff]  ;;  %v818_v12 = vld [vmem:[%s19135_s23 + $0x1260] sm:$0xff] }
  0xb5   : > { %815 = vst [vmem:[%s19140_s24 + $0xa50] sm:$0xff] %v814_v10  ;;  %817 = vst [vmem:[%s19140_s24 + $0xa58] sm:$0xff] %v816_v11  ;;  %v820_v13 = vld [vmem:[%s19135_s23 + $0x1268] sm:$0xff]  ;;  %v822_v14 = vld [vmem:[%s19135_s23 + $0x1270] sm:$0xff] }
  0xb6   : > { %819 = vst [vmem:[%s19140_s24 + $0xa60] sm:$0xff] %v818_v12  ;;  %v824_v15 = vld [vmem:[%s19135_s23 + $0x1278] sm:$0xff]  ;;  %821 = vst [vmem:[%s19140_s24 + $0xa68] sm:$0xff] %v820_v13  ;;  %v826_v16 = vld [vmem:[%s19135_s23 + $0x1280] sm:$0xff] }
  0xb7   : > { %823 = vst [vmem:[%s19140_s24 + $0xa70] sm:$0xff] %v822_v14  ;;  %825 = vst [vmem:[%s19140_s24 + $0xa78] sm:$0xff] %v824_v15  ;;  %v828_v17 = vld [vmem:[%s19135_s23 + $0x1288] sm:$0xff]  ;;  %v830_v18 = vld [vmem:[%s19135_s23 + $0x1290] sm:$0xff] }
  0xb8   : > { %827 = vst [vmem:[%s19140_s24 + $0xa80] sm:$0xff] %v826_v16  ;;  %829 = vst [vmem:[%s19140_s24 + $0xa88] sm:$0xff] %v828_v17  ;;  %v832_v19 = vld [vmem:[%s19135_s23 + $0x1298] sm:$0xff]  ;;  %v834_v20 = vld [vmem:[%s19135_s23 + $0x12a0] sm:$0xff] }
  0xb9   : > { %831 = vst [vmem:[%s19140_s24 + $0xa90] sm:$0xff] %v830_v18  ;;  %v836_v21 = vld [vmem:[%s19135_s23 + $0x12a8] sm:$0xff]  ;;  %833 = vst [vmem:[%s19140_s24 + $0xa98] sm:$0xff] %v832_v19  ;;  %v838_v22 = vld [vmem:[%s19135_s23 + $0x12b0] sm:$0xff] }
  0xba   : > { %835 = vst [vmem:[%s19140_s24 + $0xaa0] sm:$0xff] %v834_v20  ;;  %837 = vst [vmem:[%s19140_s24 + $0xaa8] sm:$0xff] %v836_v21  ;;  %v840_v23 = vld [vmem:[%s19135_s23 + $0x12b8] sm:$0xff]  ;;  %v842_v24 = vld [vmem:[%s19135_s23 + $0x12c0] sm:$0xff] }
  0xbb   : > { %839 = vst [vmem:[%s19140_s24 + $0xab0] sm:$0xff] %v838_v22  ;;  %841 = vst [vmem:[%s19140_s24 + $0xab8] sm:$0xff] %v840_v23  ;;  %v844_v25 = vld [vmem:[%s19135_s23 + $0x12c8] sm:$0xff]  ;;  %v846_v26 = vld [vmem:[%s19135_s23 + $0x12d0] sm:$0xff] }
  0xbc   : > { %843 = vst [vmem:[%s19140_s24 + $0xac0] sm:$0xff] %v842_v24  ;;  %v848_v27 = vld [vmem:[%s19135_s23 + $0x12d8] sm:$0xff]  ;;  %845 = vst [vmem:[%s19140_s24 + $0xac8] sm:$0xff] %v844_v25  ;;  %v850_v28 = vld [vmem:[%s19135_s23 + $0x12e0] sm:$0xff] }
  0xbd   : > { %847 = vst [vmem:[%s19140_s24 + $0xad0] sm:$0xff] %v846_v26  ;;  %849 = vst [vmem:[%s19140_s24 + $0xad8] sm:$0xff] %v848_v27  ;;  %v852_v29 = vld [vmem:[%s19135_s23 + $0x12e8] sm:$0xff]  ;;  %v854_v30 = vld [vmem:[%s19135_s23 + $0x12f0] sm:$0xff] }
  0xbe   : > { %851 = vst [vmem:[%s19140_s24 + $0xae0] sm:$0xff] %v850_v28  ;;  %853 = vst [vmem:[%s19140_s24 + $0xae8] sm:$0xff] %v852_v29  ;;  %v856_v31 = vld [vmem:[%s19135_s23 + $0x12f8] sm:$0xff]  ;;  %v858_v32 = vld [vmem:[%s19135_s23 + $0x1300] sm:$0xff] }
  0xbf   : > { %855 = vst [vmem:[%s19140_s24 + $0xaf0] sm:$0xff] %v854_v30  ;;  %v860_v33 = vld [vmem:[%s19135_s23 + $0x1308] sm:$0xff]  ;;  %857 = vst [vmem:[%s19140_s24 + $0xaf8] sm:$0xff] %v856_v31  ;;  %v862_v34 = vld [vmem:[%s19135_s23 + $0x1310] sm:$0xff] }
  0xc0   : > { %859 = vst [vmem:[%s19140_s24 + $0xb00] sm:$0xff] %v858_v32  ;;  %861 = vst [vmem:[%s19140_s24 + $0xb08] sm:$0xff] %v860_v33  ;;  %v864_v35 = vld [vmem:[%s19135_s23 + $0x1318] sm:$0xff]  ;;  %v866_v36 = vld [vmem:[%s19135_s23 + $0x1320] sm:$0xff] }
  0xc1   : > { %863 = vst [vmem:[%s19140_s24 + $0xb10] sm:$0xff] %v862_v34  ;;  %865 = vst [vmem:[%s19140_s24 + $0xb18] sm:$0xff] %v864_v35  ;;  %v868_v37 = vld [vmem:[%s19135_s23 + $0x1328] sm:$0xff]  ;;  %v870_v38 = vld [vmem:[%s19135_s23 + $0x1330] sm:$0xff] }
  0xc2   : > { %867 = vst [vmem:[%s19140_s24 + $0xb20] sm:$0xff] %v866_v36  ;;  %v872_v39 = vld [vmem:[%s19135_s23 + $0x1338] sm:$0xff]  ;;  %869 = vst [vmem:[%s19140_s24 + $0xb28] sm:$0xff] %v868_v37  ;;  %v874_v40 = vld [vmem:[%s19135_s23 + $0x1340] sm:$0xff] }
  0xc3   : > { %871 = vst [vmem:[%s19140_s24 + $0xb30] sm:$0xff] %v870_v38  ;;  %873 = vst [vmem:[%s19140_s24 + $0xb38] sm:$0xff] %v872_v39  ;;  %v876_v41 = vld [vmem:[%s19135_s23 + $0x1348] sm:$0xff]  ;;  %v878_v42 = vld [vmem:[%s19135_s23 + $0x1350] sm:$0xff] }
  0xc4   : > { %875 = vst [vmem:[%s19140_s24 + $0xb40] sm:$0xff] %v874_v40  ;;  %877 = vst [vmem:[%s19140_s24 + $0xb48] sm:$0xff] %v876_v41  ;;  %v880_v43 = vld [vmem:[%s19135_s23 + $0x1358] sm:$0xff]  ;;  %v882_v44 = vld [vmem:[%s19135_s23 + $0x1360] sm:$0xff] }
  0xc5   : > { %879 = vst [vmem:[%s19140_s24 + $0xb50] sm:$0xff] %v878_v42  ;;  %v884_v45 = vld [vmem:[%s19135_s23 + $0x1368] sm:$0xff]  ;;  %881 = vst [vmem:[%s19140_s24 + $0xb58] sm:$0xff] %v880_v43  ;;  %v886_v46 = vld [vmem:[%s19135_s23 + $0x1370] sm:$0xff] }
  0xc6   : > { %883 = vst [vmem:[%s19140_s24 + $0xb60] sm:$0xff] %v882_v44  ;;  %885 = vst [vmem:[%s19140_s24 + $0xb68] sm:$0xff] %v884_v45  ;;  %v888_v47 = vld [vmem:[%s19135_s23 + $0x1378] sm:$0xff]  ;;  %v890_v48 = vld [vmem:[%s19135_s23 + $0x1380] sm:$0xff] }
  0xc7   : > { %887 = vst [vmem:[%s19140_s24 + $0xb70] sm:$0xff] %v886_v46  ;;  %889 = vst [vmem:[%s19140_s24 + $0xb78] sm:$0xff] %v888_v47  ;;  %v892_v49 = vld [vmem:[%s19135_s23 + $0x1388] sm:$0xff]  ;;  %v894_v50 = vld [vmem:[%s19135_s23 + $0x1390] sm:$0xff] }
  0xc8   : > { %891 = vst [vmem:[%s19140_s24 + $0xb80] sm:$0xff] %v890_v48  ;;  %v896_v51 = vld [vmem:[%s19135_s23 + $0x1398] sm:$0xff]  ;;  %893 = vst [vmem:[%s19140_s24 + $0xb88] sm:$0xff] %v892_v49  ;;  %v898_v52 = vld [vmem:[%s19135_s23 + $0x13a0] sm:$0xff] }
  0xc9   : > { %895 = vst [vmem:[%s19140_s24 + $0xb90] sm:$0xff] %v894_v50  ;;  %897 = vst [vmem:[%s19140_s24 + $0xb98] sm:$0xff] %v896_v51  ;;  %v900_v53 = vld [vmem:[%s19135_s23 + $0x13a8] sm:$0xff]  ;;  %v902_v54 = vld [vmem:[%s19135_s23 + $0x13b0] sm:$0xff] }
  0xca   : > { %899 = vst [vmem:[%s19140_s24 + $0xba0] sm:$0xff] %v898_v52  ;;  %901 = vst [vmem:[%s19140_s24 + $0xba8] sm:$0xff] %v900_v53  ;;  %v904_v55 = vld [vmem:[%s19135_s23 + $0x13b8] sm:$0xff]  ;;  %v906_v56 = vld [vmem:[%s19135_s23 + $0x13c0] sm:$0xff] }
  0xcb   : > { %903 = vst [vmem:[%s19140_s24 + $0xbb0] sm:$0xff] %v902_v54  ;;  %v908_v57 = vld [vmem:[%s19135_s23 + $0x13c8] sm:$0xff]  ;;  %905 = vst [vmem:[%s19140_s24 + $0xbb8] sm:$0xff] %v904_v55  ;;  %v910_v58 = vld [vmem:[%s19135_s23 + $0x13d0] sm:$0xff] }
  0xcc   : > { %907 = vst [vmem:[%s19140_s24 + $0xbc0] sm:$0xff] %v906_v56  ;;  %909 = vst [vmem:[%s19140_s24 + $0xbc8] sm:$0xff] %v908_v57  ;;  %v912_v59 = vld [vmem:[%s19135_s23 + $0x13d8] sm:$0xff]  ;;  %v914_v60 = vld [vmem:[%s19135_s23 + $0x13e0] sm:$0xff] }
  0xcd   : > { %911 = vst [vmem:[%s19140_s24 + $0xbd0] sm:$0xff] %v910_v58  ;;  %913 = vst [vmem:[%s19140_s24 + $0xbd8] sm:$0xff] %v912_v59  ;;  %v916_v61 = vld [vmem:[%s19135_s23 + $0x13e8] sm:$0xff]  ;;  %v918_v62 = vld [vmem:[%s19135_s23 + $0x13f0] sm:$0xff] }
  0xce   : > { %915 = vst [vmem:[%s19140_s24 + $0xbe0] sm:$0xff] %v914_v60  ;;  %v920_v63 = vld [vmem:[%s19135_s23 + $0x13f8] sm:$0xff]  ;;  %917 = vst [vmem:[%s19140_s24 + $0xbe8] sm:$0xff] %v916_v61  ;;  %v922_v0 = vld [vmem:[%s19135_s23 + $0x1400] sm:$0xff] }
  0xcf   : > { %919 = vst [vmem:[%s19140_s24 + $0xbf0] sm:$0xff] %v918_v62  ;;  %921 = vst [vmem:[%s19140_s24 + $0xbf8] sm:$0xff] %v920_v63  ;;  %v924_v1 = vld [vmem:[%s19135_s23 + $0x1408] sm:$0xff]  ;;  %v926_v2 = vld [vmem:[%s19135_s23 + $0x1410] sm:$0xff] }
  0xd0   : > { %923 = vst [vmem:[%s19140_s24 + $0xc00] sm:$0xff] %v922_v0  ;;  %925 = vst [vmem:[%s19140_s24 + $0xc08] sm:$0xff] %v924_v1  ;;  %v928_v3 = vld [vmem:[%s19135_s23 + $0x1418] sm:$0xff]  ;;  %v930_v4 = vld [vmem:[%s19135_s23 + $0x1420] sm:$0xff] }
  0xd1   : > { %927 = vst [vmem:[%s19140_s24 + $0xc10] sm:$0xff] %v926_v2  ;;  %v932_v5 = vld [vmem:[%s19135_s23 + $0x1428] sm:$0xff]  ;;  %929 = vst [vmem:[%s19140_s24 + $0xc18] sm:$0xff] %v928_v3  ;;  %v934_v6 = vld [vmem:[%s19135_s23 + $0x1430] sm:$0xff] }
  0xd2   : > { %931 = vst [vmem:[%s19140_s24 + $0xc20] sm:$0xff] %v930_v4  ;;  %933 = vst [vmem:[%s19140_s24 + $0xc28] sm:$0xff] %v932_v5  ;;  %v936_v7 = vld [vmem:[%s19135_s23 + $0x1438] sm:$0xff]  ;;  %v938_v8 = vld [vmem:[%s19135_s23 + $0x1440] sm:$0xff] }
  0xd3   : > { %935 = vst [vmem:[%s19140_s24 + $0xc30] sm:$0xff] %v934_v6  ;;  %937 = vst [vmem:[%s19140_s24 + $0xc38] sm:$0xff] %v936_v7  ;;  %v940_v9 = vld [vmem:[%s19135_s23 + $0x1448] sm:$0xff]  ;;  %v942_v10 = vld [vmem:[%s19135_s23 + $0x1450] sm:$0xff] }
  0xd4   : > { %939 = vst [vmem:[%s19140_s24 + $0xc40] sm:$0xff] %v938_v8  ;;  %v944_v11 = vld [vmem:[%s19135_s23 + $0x1458] sm:$0xff]  ;;  %941 = vst [vmem:[%s19140_s24 + $0xc48] sm:$0xff] %v940_v9  ;;  %v946_v12 = vld [vmem:[%s19135_s23 + $0x1460] sm:$0xff] }
  0xd5   : > { %943 = vst [vmem:[%s19140_s24 + $0xc50] sm:$0xff] %v942_v10  ;;  %945 = vst [vmem:[%s19140_s24 + $0xc58] sm:$0xff] %v944_v11  ;;  %v948_v13 = vld [vmem:[%s19135_s23 + $0x1468] sm:$0xff]  ;;  %v950_v14 = vld [vmem:[%s19135_s23 + $0x1470] sm:$0xff] }
  0xd6   : > { %947 = vst [vmem:[%s19140_s24 + $0xc60] sm:$0xff] %v946_v12  ;;  %949 = vst [vmem:[%s19140_s24 + $0xc68] sm:$0xff] %v948_v13  ;;  %v952_v15 = vld [vmem:[%s19135_s23 + $0x1478] sm:$0xff]  ;;  %v954_v16 = vld [vmem:[%s19135_s23 + $0x1480] sm:$0xff] }
  0xd7   : > { %951 = vst [vmem:[%s19140_s24 + $0xc70] sm:$0xff] %v950_v14  ;;  %v956_v17 = vld [vmem:[%s19135_s23 + $0x1488] sm:$0xff]  ;;  %953 = vst [vmem:[%s19140_s24 + $0xc78] sm:$0xff] %v952_v15  ;;  %v958_v18 = vld [vmem:[%s19135_s23 + $0x1490] sm:$0xff] }
  0xd8   : > { %955 = vst [vmem:[%s19140_s24 + $0xc80] sm:$0xff] %v954_v16  ;;  %957 = vst [vmem:[%s19140_s24 + $0xc88] sm:$0xff] %v956_v17  ;;  %v960_v19 = vld [vmem:[%s19135_s23 + $0x1498] sm:$0xff]  ;;  %v962_v20 = vld [vmem:[%s19135_s23 + $0x14a0] sm:$0xff] }
  0xd9   : > { %959 = vst [vmem:[%s19140_s24 + $0xc90] sm:$0xff] %v958_v18  ;;  %961 = vst [vmem:[%s19140_s24 + $0xc98] sm:$0xff] %v960_v19  ;;  %v964_v21 = vld [vmem:[%s19135_s23 + $0x14a8] sm:$0xff]  ;;  %v966_v22 = vld [vmem:[%s19135_s23 + $0x14b0] sm:$0xff] }
  0xda   : > { %963 = vst [vmem:[%s19140_s24 + $0xca0] sm:$0xff] %v962_v20  ;;  %v968_v23 = vld [vmem:[%s19135_s23 + $0x14b8] sm:$0xff]  ;;  %965 = vst [vmem:[%s19140_s24 + $0xca8] sm:$0xff] %v964_v21  ;;  %v970_v24 = vld [vmem:[%s19135_s23 + $0x14c0] sm:$0xff] }
  0xdb   : > { %967 = vst [vmem:[%s19140_s24 + $0xcb0] sm:$0xff] %v966_v22  ;;  %969 = vst [vmem:[%s19140_s24 + $0xcb8] sm:$0xff] %v968_v23  ;;  %v972_v25 = vld [vmem:[%s19135_s23 + $0x14c8] sm:$0xff]  ;;  %v974_v26 = vld [vmem:[%s19135_s23 + $0x14d0] sm:$0xff] }
  0xdc   : > { %971 = vst [vmem:[%s19140_s24 + $0xcc0] sm:$0xff] %v970_v24  ;;  %973 = vst [vmem:[%s19140_s24 + $0xcc8] sm:$0xff] %v972_v25  ;;  %v976_v27 = vld [vmem:[%s19135_s23 + $0x14d8] sm:$0xff]  ;;  %v978_v28 = vld [vmem:[%s19135_s23 + $0x14e0] sm:$0xff] }
  0xdd   : > { %975 = vst [vmem:[%s19140_s24 + $0xcd0] sm:$0xff] %v974_v26  ;;  %v980_v29 = vld [vmem:[%s19135_s23 + $0x14e8] sm:$0xff]  ;;  %977 = vst [vmem:[%s19140_s24 + $0xcd8] sm:$0xff] %v976_v27  ;;  %v982_v30 = vld [vmem:[%s19135_s23 + $0x14f0] sm:$0xff] }
  0xde   : > { %979 = vst [vmem:[%s19140_s24 + $0xce0] sm:$0xff] %v978_v28  ;;  %981 = vst [vmem:[%s19140_s24 + $0xce8] sm:$0xff] %v980_v29  ;;  %v984_v31 = vld [vmem:[%s19135_s23 + $0x14f8] sm:$0xff]  ;;  %v986_v32 = vld [vmem:[%s19135_s23 + $0x1500] sm:$0xff] }
  0xdf   : > { %983 = vst [vmem:[%s19140_s24 + $0xcf0] sm:$0xff] %v982_v30  ;;  %985 = vst [vmem:[%s19140_s24 + $0xcf8] sm:$0xff] %v984_v31  ;;  %v988_v33 = vld [vmem:[%s19135_s23 + $0x1508] sm:$0xff]  ;;  %v990_v34 = vld [vmem:[%s19135_s23 + $0x1510] sm:$0xff] }
  0xe0   : > { %987 = vst [vmem:[%s19140_s24 + $0xd00] sm:$0xff] %v986_v32  ;;  %v992_v35 = vld [vmem:[%s19135_s23 + $0x1518] sm:$0xff]  ;;  %989 = vst [vmem:[%s19140_s24 + $0xd08] sm:$0xff] %v988_v33  ;;  %v994_v36 = vld [vmem:[%s19135_s23 + $0x1520] sm:$0xff] }
  0xe1   : > { %991 = vst [vmem:[%s19140_s24 + $0xd10] sm:$0xff] %v990_v34  ;;  %993 = vst [vmem:[%s19140_s24 + $0xd18] sm:$0xff] %v992_v35  ;;  %v996_v37 = vld [vmem:[%s19135_s23 + $0x1528] sm:$0xff]  ;;  %v998_v38 = vld [vmem:[%s19135_s23 + $0x1530] sm:$0xff] }
  0xe2   : > { %995 = vst [vmem:[%s19140_s24 + $0xd20] sm:$0xff] %v994_v36  ;;  %997 = vst [vmem:[%s19140_s24 + $0xd28] sm:$0xff] %v996_v37  ;;  %v1000_v39 = vld [vmem:[%s19135_s23 + $0x1538] sm:$0xff]  ;;  %v1002_v40 = vld [vmem:[%s19135_s23 + $0x1540] sm:$0xff] }
  0xe3   : > { %999 = vst [vmem:[%s19140_s24 + $0xd30] sm:$0xff] %v998_v38  ;;  %v1004_v41 = vld [vmem:[%s19135_s23 + $0x1548] sm:$0xff]  ;;  %1001 = vst [vmem:[%s19140_s24 + $0xd38] sm:$0xff] %v1000_v39  ;;  %v1006_v42 = vld [vmem:[%s19135_s23 + $0x1550] sm:$0xff] }
  0xe4   : > { %1003 = vst [vmem:[%s19140_s24 + $0xd40] sm:$0xff] %v1002_v40  ;;  %1005 = vst [vmem:[%s19140_s24 + $0xd48] sm:$0xff] %v1004_v41  ;;  %v1008_v43 = vld [vmem:[%s19135_s23 + $0x1558] sm:$0xff]  ;;  %v1010_v44 = vld [vmem:[%s19135_s23 + $0x1560] sm:$0xff] }
  0xe5   : > { %1007 = vst [vmem:[%s19140_s24 + $0xd50] sm:$0xff] %v1006_v42  ;;  %1009 = vst [vmem:[%s19140_s24 + $0xd58] sm:$0xff] %v1008_v43  ;;  %v1012_v45 = vld [vmem:[%s19135_s23 + $0x1568] sm:$0xff]  ;;  %v1014_v46 = vld [vmem:[%s19135_s23 + $0x1570] sm:$0xff] }
  0xe6   : > { %1011 = vst [vmem:[%s19140_s24 + $0xd60] sm:$0xff] %v1010_v44  ;;  %v1016_v47 = vld [vmem:[%s19135_s23 + $0x1578] sm:$0xff]  ;;  %1013 = vst [vmem:[%s19140_s24 + $0xd68] sm:$0xff] %v1012_v45  ;;  %v1018_v48 = vld [vmem:[%s19135_s23 + $0x1580] sm:$0xff] }
  0xe7   : > { %1015 = vst [vmem:[%s19140_s24 + $0xd70] sm:$0xff] %v1014_v46  ;;  %1017 = vst [vmem:[%s19140_s24 + $0xd78] sm:$0xff] %v1016_v47  ;;  %v1020_v49 = vld [vmem:[%s19135_s23 + $0x1588] sm:$0xff]  ;;  %v1022_v50 = vld [vmem:[%s19135_s23 + $0x1590] sm:$0xff] }
  0xe8   : > { %1019 = vst [vmem:[%s19140_s24 + $0xd80] sm:$0xff] %v1018_v48  ;;  %1021 = vst [vmem:[%s19140_s24 + $0xd88] sm:$0xff] %v1020_v49  ;;  %v1024_v51 = vld [vmem:[%s19135_s23 + $0x1598] sm:$0xff]  ;;  %v1026_v52 = vld [vmem:[%s19135_s23 + $0x15a0] sm:$0xff] }
  0xe9   : > { %1023 = vst [vmem:[%s19140_s24 + $0xd90] sm:$0xff] %v1022_v50  ;;  %v1028_v53 = vld [vmem:[%s19135_s23 + $0x15a8] sm:$0xff]  ;;  %1025 = vst [vmem:[%s19140_s24 + $0xd98] sm:$0xff] %v1024_v51  ;;  %v1030_v54 = vld [vmem:[%s19135_s23 + $0x15b0] sm:$0xff] }
  0xea   : > { %1027 = vst [vmem:[%s19140_s24 + $0xda0] sm:$0xff] %v1026_v52  ;;  %1029 = vst [vmem:[%s19140_s24 + $0xda8] sm:$0xff] %v1028_v53  ;;  %v1032_v55 = vld [vmem:[%s19135_s23 + $0x15b8] sm:$0xff]  ;;  %v1034_v56 = vld [vmem:[%s19135_s23 + $0x15c0] sm:$0xff] }
  0xeb   : > { %1031 = vst [vmem:[%s19140_s24 + $0xdb0] sm:$0xff] %v1030_v54  ;;  %1033 = vst [vmem:[%s19140_s24 + $0xdb8] sm:$0xff] %v1032_v55  ;;  %v1036_v57 = vld [vmem:[%s19135_s23 + $0x15c8] sm:$0xff]  ;;  %v1038_v58 = vld [vmem:[%s19135_s23 + $0x15d0] sm:$0xff] }
  0xec   : > { %1035 = vst [vmem:[%s19140_s24 + $0xdc0] sm:$0xff] %v1034_v56  ;;  %v1040_v59 = vld [vmem:[%s19135_s23 + $0x15d8] sm:$0xff]  ;;  %1037 = vst [vmem:[%s19140_s24 + $0xdc8] sm:$0xff] %v1036_v57  ;;  %v1042_v60 = vld [vmem:[%s19135_s23 + $0x15e0] sm:$0xff] }
  0xed   : > { %1039 = vst [vmem:[%s19140_s24 + $0xdd0] sm:$0xff] %v1038_v58  ;;  %1041 = vst [vmem:[%s19140_s24 + $0xdd8] sm:$0xff] %v1040_v59  ;;  %v1044_v61 = vld [vmem:[%s19135_s23 + $0x15e8] sm:$0xff]  ;;  %v1046_v62 = vld [vmem:[%s19135_s23 + $0x15f0] sm:$0xff] }
  0xee   : > { %1043 = vst [vmem:[%s19140_s24 + $0xde0] sm:$0xff] %v1042_v60  ;;  %1045 = vst [vmem:[%s19140_s24 + $0xde8] sm:$0xff] %v1044_v61  ;;  %v1048_v63 = vld [vmem:[%s19135_s23 + $0x15f8] sm:$0xff]  ;;  %v1050_v0 = vld [vmem:[%s19135_s23 + $0x1600] sm:$0xff] }
  0xef   : > { %1047 = vst [vmem:[%s19140_s24 + $0xdf0] sm:$0xff] %v1046_v62  ;;  %v1052_v1 = vld [vmem:[%s19135_s23 + $0x1608] sm:$0xff]  ;;  %1049 = vst [vmem:[%s19140_s24 + $0xdf8] sm:$0xff] %v1048_v63  ;;  %v1054_v2 = vld [vmem:[%s19135_s23 + $0x1610] sm:$0xff] }
  0xf0   : > { %1051 = vst [vmem:[%s19140_s24 + $0xe00] sm:$0xff] %v1050_v0  ;;  %1053 = vst [vmem:[%s19140_s24 + $0xe08] sm:$0xff] %v1052_v1  ;;  %v1056_v3 = vld [vmem:[%s19135_s23 + $0x1618] sm:$0xff]  ;;  %v1058_v4 = vld [vmem:[%s19135_s23 + $0x1620] sm:$0xff] }
  0xf1   : > { %1055 = vst [vmem:[%s19140_s24 + $0xe10] sm:$0xff] %v1054_v2  ;;  %1057 = vst [vmem:[%s19140_s24 + $0xe18] sm:$0xff] %v1056_v3  ;;  %v1060_v5 = vld [vmem:[%s19135_s23 + $0x1628] sm:$0xff]  ;;  %v1062_v6 = vld [vmem:[%s19135_s23 + $0x1630] sm:$0xff] }
  0xf2   : > { %1059 = vst [vmem:[%s19140_s24 + $0xe20] sm:$0xff] %v1058_v4  ;;  %v1064_v7 = vld [vmem:[%s19135_s23 + $0x1638] sm:$0xff]  ;;  %1061 = vst [vmem:[%s19140_s24 + $0xe28] sm:$0xff] %v1060_v5  ;;  %v1066_v8 = vld [vmem:[%s19135_s23 + $0x1640] sm:$0xff] }
  0xf3   : > { %1063 = vst [vmem:[%s19140_s24 + $0xe30] sm:$0xff] %v1062_v6  ;;  %1065 = vst [vmem:[%s19140_s24 + $0xe38] sm:$0xff] %v1064_v7  ;;  %v1068_v9 = vld [vmem:[%s19135_s23 + $0x1648] sm:$0xff]  ;;  %v1070_v10 = vld [vmem:[%s19135_s23 + $0x1650] sm:$0xff] }
  0xf4   : > { %1067 = vst [vmem:[%s19140_s24 + $0xe40] sm:$0xff] %v1066_v8  ;;  %1069 = vst [vmem:[%s19140_s24 + $0xe48] sm:$0xff] %v1068_v9  ;;  %v1072_v11 = vld [vmem:[%s19135_s23 + $0x1658] sm:$0xff]  ;;  %v1074_v12 = vld [vmem:[%s19135_s23 + $0x1660] sm:$0xff] }
  0xf5   : > { %1071 = vst [vmem:[%s19140_s24 + $0xe50] sm:$0xff] %v1070_v10  ;;  %v1076_v13 = vld [vmem:[%s19135_s23 + $0x1668] sm:$0xff]  ;;  %1073 = vst [vmem:[%s19140_s24 + $0xe58] sm:$0xff] %v1072_v11  ;;  %v1078_v14 = vld [vmem:[%s19135_s23 + $0x1670] sm:$0xff] }
  0xf6   : > { %1075 = vst [vmem:[%s19140_s24 + $0xe60] sm:$0xff] %v1074_v12  ;;  %1077 = vst [vmem:[%s19140_s24 + $0xe68] sm:$0xff] %v1076_v13  ;;  %v1080_v15 = vld [vmem:[%s19135_s23 + $0x1678] sm:$0xff]  ;;  %v1082_v16 = vld [vmem:[%s19135_s23 + $0x1680] sm:$0xff] }
  0xf7   : > { %1079 = vst [vmem:[%s19140_s24 + $0xe70] sm:$0xff] %v1078_v14  ;;  %1081 = vst [vmem:[%s19140_s24 + $0xe78] sm:$0xff] %v1080_v15  ;;  %v1084_v17 = vld [vmem:[%s19135_s23 + $0x1688] sm:$0xff]  ;;  %v1086_v18 = vld [vmem:[%s19135_s23 + $0x1690] sm:$0xff] }
  0xf8   : > { %1083 = vst [vmem:[%s19140_s24 + $0xe80] sm:$0xff] %v1082_v16  ;;  %v1088_v19 = vld [vmem:[%s19135_s23 + $0x1698] sm:$0xff]  ;;  %1085 = vst [vmem:[%s19140_s24 + $0xe88] sm:$0xff] %v1084_v17  ;;  %v1090_v20 = vld [vmem:[%s19135_s23 + $0x16a0] sm:$0xff] }
  0xf9   : > { %1087 = vst [vmem:[%s19140_s24 + $0xe90] sm:$0xff] %v1086_v18  ;;  %1089 = vst [vmem:[%s19140_s24 + $0xe98] sm:$0xff] %v1088_v19  ;;  %v1092_v21 = vld [vmem:[%s19135_s23 + $0x16a8] sm:$0xff]  ;;  %v1094_v22 = vld [vmem:[%s19135_s23 + $0x16b0] sm:$0xff] }
  0xfa   : > { %1091 = vst [vmem:[%s19140_s24 + $0xea0] sm:$0xff] %v1090_v20  ;;  %1093 = vst [vmem:[%s19140_s24 + $0xea8] sm:$0xff] %v1092_v21  ;;  %v1096_v23 = vld [vmem:[%s19135_s23 + $0x16b8] sm:$0xff]  ;;  %v1098_v24 = vld [vmem:[%s19135_s23 + $0x16c0] sm:$0xff] }
  0xfb   : > { %1095 = vst [vmem:[%s19140_s24 + $0xeb0] sm:$0xff] %v1094_v22  ;;  %v1100_v25 = vld [vmem:[%s19135_s23 + $0x16c8] sm:$0xff]  ;;  %1097 = vst [vmem:[%s19140_s24 + $0xeb8] sm:$0xff] %v1096_v23  ;;  %v1102_v26 = vld [vmem:[%s19135_s23 + $0x16d0] sm:$0xff] }
  0xfc   : > { %1099 = vst [vmem:[%s19140_s24 + $0xec0] sm:$0xff] %v1098_v24  ;;  %1101 = vst [vmem:[%s19140_s24 + $0xec8] sm:$0xff] %v1100_v25  ;;  %v1104_v27 = vld [vmem:[%s19135_s23 + $0x16d8] sm:$0xff]  ;;  %v1106_v28 = vld [vmem:[%s19135_s23 + $0x16e0] sm:$0xff] }
  0xfd   : > { %1103 = vst [vmem:[%s19140_s24 + $0xed0] sm:$0xff] %v1102_v26  ;;  %1105 = vst [vmem:[%s19140_s24 + $0xed8] sm:$0xff] %v1104_v27  ;;  %v1108_v29 = vld [vmem:[%s19135_s23 + $0x16e8] sm:$0xff]  ;;  %v1110_v30 = vld [vmem:[%s19135_s23 + $0x16f0] sm:$0xff] }
  0xfe   : > { %1107 = vst [vmem:[%s19140_s24 + $0xee0] sm:$0xff] %v1106_v28  ;;  %v1112_v31 = vld [vmem:[%s19135_s23 + $0x16f8] sm:$0xff]  ;;  %1109 = vst [vmem:[%s19140_s24 + $0xee8] sm:$0xff] %v1108_v29  ;;  %v1114_v32 = vld [vmem:[%s19135_s23 + $0x1700] sm:$0xff] }
  0xff   : > { %1111 = vst [vmem:[%s19140_s24 + $0xef0] sm:$0xff] %v1110_v30  ;;  %1113 = vst [vmem:[%s19140_s24 + $0xef8] sm:$0xff] %v1112_v31  ;;  %v1116_v33 = vld [vmem:[%s19135_s23 + $0x1708] sm:$0xff]  ;;  %v1118_v34 = vld [vmem:[%s19135_s23 + $0x1710] sm:$0xff] }
 0x100   : > { %1115 = vst [vmem:[%s19140_s24 + $0xf00] sm:$0xff] %v1114_v32  ;;  %1117 = vst [vmem:[%s19140_s24 + $0xf08] sm:$0xff] %v1116_v33  ;;  %v1120_v35 = vld [vmem:[%s19135_s23 + $0x1718] sm:$0xff]  ;;  %v1122_v36 = vld [vmem:[%s19135_s23 + $0x1720] sm:$0xff] }
 0x101   : > { %1119 = vst [vmem:[%s19140_s24 + $0xf10] sm:$0xff] %v1118_v34  ;;  %v1124_v37 = vld [vmem:[%s19135_s23 + $0x1728] sm:$0xff]  ;;  %1121 = vst [vmem:[%s19140_s24 + $0xf18] sm:$0xff] %v1120_v35  ;;  %v1126_v38 = vld [vmem:[%s19135_s23 + $0x1730] sm:$0xff] }
 0x102   : > { %1123 = vst [vmem:[%s19140_s24 + $0xf20] sm:$0xff] %v1122_v36  ;;  %1125 = vst [vmem:[%s19140_s24 + $0xf28] sm:$0xff] %v1124_v37  ;;  %v1128_v39 = vld [vmem:[%s19135_s23 + $0x1738] sm:$0xff]  ;;  %v1130_v40 = vld [vmem:[%s19135_s23 + $0x1740] sm:$0xff] }
 0x103   : > { %1127 = vst [vmem:[%s19140_s24 + $0xf30] sm:$0xff] %v1126_v38  ;;  %1129 = vst [vmem:[%s19140_s24 + $0xf38] sm:$0xff] %v1128_v39  ;;  %v1132_v41 = vld [vmem:[%s19135_s23 + $0x1748] sm:$0xff]  ;;  %v1134_v42 = vld [vmem:[%s19135_s23 + $0x1750] sm:$0xff] }
 0x104   : > { %1131 = vst [vmem:[%s19140_s24 + $0xf40] sm:$0xff] %v1130_v40  ;;  %v1136_v43 = vld [vmem:[%s19135_s23 + $0x1758] sm:$0xff]  ;;  %1133 = vst [vmem:[%s19140_s24 + $0xf48] sm:$0xff] %v1132_v41  ;;  %v1138_v44 = vld [vmem:[%s19135_s23 + $0x1760] sm:$0xff] }
 0x105   : > { %1135 = vst [vmem:[%s19140_s24 + $0xf50] sm:$0xff] %v1134_v42  ;;  %1137 = vst [vmem:[%s19140_s24 + $0xf58] sm:$0xff] %v1136_v43  ;;  %v1140_v45 = vld [vmem:[%s19135_s23 + $0x1768] sm:$0xff]  ;;  %v1142_v46 = vld [vmem:[%s19135_s23 + $0x1770] sm:$0xff] }
 0x106   : > { %1139 = vst [vmem:[%s19140_s24 + $0xf60] sm:$0xff] %v1138_v44  ;;  %1141 = vst [vmem:[%s19140_s24 + $0xf68] sm:$0xff] %v1140_v45  ;;  %v1144_v47 = vld [vmem:[%s19135_s23 + $0x1778] sm:$0xff]  ;;  %v1146_v48 = vld [vmem:[%s19135_s23 + $0x1780] sm:$0xff] }
 0x107   : > { %1143 = vst [vmem:[%s19140_s24 + $0xf70] sm:$0xff] %v1142_v46  ;;  %v1148_v49 = vld [vmem:[%s19135_s23 + $0x1788] sm:$0xff]  ;;  %1145 = vst [vmem:[%s19140_s24 + $0xf78] sm:$0xff] %v1144_v47  ;;  %v1150_v50 = vld [vmem:[%s19135_s23 + $0x1790] sm:$0xff] }
 0x108   : > { %1147 = vst [vmem:[%s19140_s24 + $0xf80] sm:$0xff] %v1146_v48  ;;  %1149 = vst [vmem:[%s19140_s24 + $0xf88] sm:$0xff] %v1148_v49  ;;  %v1152_v51 = vld [vmem:[%s19135_s23 + $0x1798] sm:$0xff]  ;;  %v1154_v52 = vld [vmem:[%s19135_s23 + $0x17a0] sm:$0xff] }
 0x109   : > { %1151 = vst [vmem:[%s19140_s24 + $0xf90] sm:$0xff] %v1150_v50  ;;  %1153 = vst [vmem:[%s19140_s24 + $0xf98] sm:$0xff] %v1152_v51  ;;  %v1156_v53 = vld [vmem:[%s19135_s23 + $0x17a8] sm:$0xff]  ;;  %v1158_v54 = vld [vmem:[%s19135_s23 + $0x17b0] sm:$0xff] }
 0x10a   : > { %1155 = vst [vmem:[%s19140_s24 + $0xfa0] sm:$0xff] %v1154_v52  ;;  %v1160_v55 = vld [vmem:[%s19135_s23 + $0x17b8] sm:$0xff]  ;;  %1157 = vst [vmem:[%s19140_s24 + $0xfa8] sm:$0xff] %v1156_v53  ;;  %v1162_v56 = vld [vmem:[%s19135_s23 + $0x17c0] sm:$0xff] }
 0x10b   : > { %1159 = vst [vmem:[%s19140_s24 + $0xfb0] sm:$0xff] %v1158_v54  ;;  %1161 = vst [vmem:[%s19140_s24 + $0xfb8] sm:$0xff] %v1160_v55  ;;  %v1164_v57 = vld [vmem:[%s19135_s23 + $0x17c8] sm:$0xff]  ;;  %v1166_v58 = vld [vmem:[%s19135_s23 + $0x17d0] sm:$0xff] }
 0x10c   : > { %1163 = vst [vmem:[%s19140_s24 + $0xfc0] sm:$0xff] %v1162_v56  ;;  %1165 = vst [vmem:[%s19140_s24 + $0xfc8] sm:$0xff] %v1164_v57  ;;  %v1168_v59 = vld [vmem:[%s19135_s23 + $0x17d8] sm:$0xff]  ;;  %v1170_v60 = vld [vmem:[%s19135_s23 + $0x17e0] sm:$0xff] }
 0x10d   : > { %1167 = vst [vmem:[%s19140_s24 + $0xfd0] sm:$0xff] %v1166_v58  ;;  %v1172_v61 = vld [vmem:[%s19135_s23 + $0x17e8] sm:$0xff]  ;;  %1169 = vst [vmem:[%s19140_s24 + $0xfd8] sm:$0xff] %v1168_v59  ;;  %v1174_v62 = vld [vmem:[%s19135_s23 + $0x17f0] sm:$0xff] }
 0x10e   : > { %1171 = vst [vmem:[%s19140_s24 + $0xfe0] sm:$0xff] %v1170_v60  ;;  %1173 = vst [vmem:[%s19140_s24 + $0xfe8] sm:$0xff] %v1172_v61  ;;  %v1176_v63 = vld [vmem:[%s19135_s23 + $0x17f8] sm:$0xff] }
 0x10f   : > { %1175 = vst [vmem:[%s19140_s24 + $0xff0] sm:$0xff] %v1174_v62  ;;  %1177 = vst [vmem:[%s19140_s24 + $0xff8] sm:$0xff] %v1176_v63 }
 0x110 PF: > { %p18410_p6 = scmp.ge.s32.totalorder %s19073_s13, 1  ;;  %p1182_p7 = scmp.lt.s32.totalorder %s19073_s13, 3 }
 0x112   : > { %p1183_p8 = pnand %p18410_p6, %p1182_p7 }
 0x113   : > { %s1189_s25 = sand.u32 (!%p1183_p8), 1, %s19057_s9   ;;  %s18412_s26 = sshll.u32 (!%p1183_p8), %s19065_s11, 9 }
 0x114   : > { %1186 = sbr.rel (%p1183_p8) target bundleno = 1512 (0x5e8), region = 47  ;;  %s18411_s27 = sshll.u32 (!%p1183_p8), %s1189_s25, 12 }
 0x115   : > { %p1216_p9 = scmp.lt.s32.totalorder (!%p1183_p8), %s18412_s26, 1023  ;;  %s20167_s28 = scalar_lea.vmem (!%p1183_p8), [#allocation2], %s18411_s27 }
 0x116   : > { %p1223_p10 = scmp.lt.s32.totalorder (!%p1183_p8), %s19065_s11, 1 }
 0x119   : > { %v1879_v0 = vlaneseq  ;;  %v19075_v1 = vmov 1966171168   ;;  %v1299_v4 = vld [vmem:[%s20167_s28] sm:$0xff]  ;;  %v1300_v6 = vld [vmem:[%s20167_s28 + $0x8] sm:$0xff]  ;;  %s21173_s26 = smov (!%p1216_p9, %s18412_s26), 1023  ;;  %v1301_v11 = vld [vmem:[%s20167_s28 + $0x10] sm:$0xff] }
 0x11a   : > { %v1877_v2 = vunpack.c.l.s4 %v19075_v1  ;;  %v1555_v5 = vld [vmem:[%s20167_s28 + $0x800] sm:$0x11]  ;;  %v1556_v10 = vld [vmem:[%s20167_s28 + $0x808] sm:$0x11]  ;;  %v1557_v12 = vld [vmem:[%s20167_s28 + $0x810] sm:$0x11]  ;;  %s20178_s3 = scalar_lea.vmem %s21163_s0, %s21173_s26 }
 0x11b   : > { %v1880_v3 = vshrl.u32 %v1879_v0, 7  ;;  %v18415_v8 = vcombine.high %v1299_v4, %v1555_v5  ;;  %v18414_v9 = vcombine.low %v1299_v4, %v1555_v5  ;;  %v18417_v13 = vcombine.high %v1300_v6, %v1556_v10  ;;  %v1302_v16 = vld [vmem:[%s20167_s28 + $0x18] sm:$0xff]  ;;  %v1235_v18 = vld [vmem:[%s20178_s3] sm:$0xff]  ;;  %v1236_v23 = vld [vmem:[%s20178_s3 + $0x8] sm:$0xff]  ;;  %s21175_s11 = smov (!%p1223_p10, %s19065_s11), 1 }
 0x11c   : > { %v1878_v7 = vunpack.c.0.s8 %v1877_v2  ;;  %v18416_v14 = vcombine.low %v1300_v6, %v1556_v10  ;;  %v1558_v17 = vld [vmem:[%s20167_s28 + $0x818] sm:$0x11]  ;;  %v18419_v19 = vcombine.high %v1301_v11, %v1557_v12  ;;  %v1875_v21 = vcombine.high %v1235_v18, %v1235_v18  ;;  %v1303_v27 = vld [vmem:[%s20167_s28 + $0x20] sm:$0xff]  ;;  %v1304_v33 = vld [vmem:[%s20167_s28 + $0x28] sm:$0xff]  ;;  %s18413_s4 = sshll.u32 %s21175_s11, 1 }
 0x11d   : > { %8097 = vmatprep.subr.bf16.mxu0 %v18415_v8  ;;  %v18421_v20 = vcombine.high %v1302_v16, %v1558_v17  ;;  %8137 = vmatprep.subr.bf16.mxu1 %v18417_v13  ;;  %v1559_v28 = vld [vmem:[%s20167_s28 + $0x820] sm:$0x11]  ;;  %v18418_v31 = vcombine.low %v1301_v11, %v1557_v12  ;;  %v1560_v34 = vld [vmem:[%s20167_s28 + $0x828] sm:$0x11]  ;;  %v18420_v35 = vcombine.low %v1302_v16, %v1558_v17  ;;  %v1305_v46 = vld [vmem:[%s20167_s28 + $0x30] sm:$0xff]  ;;  %s21141_s7 = scalar_lea.vmem %s21165_s2, %s18413_s4  ;;  %vm1232_vm0 = vcmask 74752  }
 0x11e   : > { %v20180_v15 = vsub.s32 %v1878_v7, %v1880_v3  ;;  %8098 = vmatpush1.bf16.xpose.msra.mxu0 %v18414_v9  ;;  %8138 = vmatpush1.bf16.xpose.msra.mxu1 %v18416_v14  ;;  %v18423_v37 = vcombine.high %v1303_v27, %v1559_v28  ;;  %v1924_v41 = vcombine.high %v1236_v23, %v1236_v23  ;;  %v1561_v47 = vld [vmem:[%s20167_s28 + $0x830] sm:$0x11]  ;;  %v1306_v50 = vld [vmem:[%s20167_s28 + $0x38] sm:$0xff]  ;;  %v1307_v61 = vld [vmem:[%s20167_s28 + $0x40] sm:$0xff] }
 0x11f   : > { %8177 = vmatprep.subr.bf16.mxu0 %v18419_v19  ;;  %8217 = vmatprep.subr.bf16.mxu1 %v18421_v20  ;;  %v18425_v42 = vcombine.high %v1304_v33, %v1560_v34  ;;  %v18422_v49 = vcombine.low %v1303_v27, %v1559_v28  ;;  %v1562_v51 = vld [vmem:[%s20167_s28 + $0x838] sm:$0x11]  ;;  %v18427_v53 = vcombine.high %v1305_v46, %v1561_v47  ;;  %v1237_v58 = vld [vmem:[%s20178_s3 + $0x10] sm:$0xff]  ;;  %v1563_v62 = vld [vmem:[%s20167_s28 + $0x840] sm:$0x11] }
 0x120   : > { %v1882_v22 = vrot.slane %v1235_v18, %v20180_v15  ;;  %v1889_v26 = vrot.slane %v1875_v21, %v20180_v15  ;;  %v1931_v29 = vrot.slane %v1236_v23, %v20180_v15  ;;  %v1938_v48 = vrot.slane %v1924_v41, %v20180_v15  ;;  %v1308_v1 = vld [vmem:[%s20167_s28 + $0x48] sm:$0xff]  ;;  %v1309_v12 = vld [vmem:[%s20167_s28 + $0x50] sm:$0xff]  ;;  %v1310_v17 = vld [vmem:[%s20167_s28 + $0x58] sm:$0xff] }
 0x121   : > { %v18424_v54 = vcombine.low %v1304_v33, %v1560_v34  ;;  %v18429_v57 = vcombine.high %v1306_v50, %v1562_v51  ;;  %v1980_v63 = vrot.slane %v1237_v58, %v20180_v15  ;;  %v18426_v0 = vcombine.low %v1305_v46, %v1561_v47  ;;  %v1564_v2 = vld [vmem:[%s20167_s28 + $0x848] sm:$0x11]  ;;  %v1565_v13 = vld [vmem:[%s20167_s28 + $0x850] sm:$0x11]  ;;  %v1566_v18 = vld [vmem:[%s20167_s28 + $0x858] sm:$0x11] }
 0x122   : > { %v1890_v24 = vcombine.high %v1882_v22, %v1882_v22  ;;  %v1898_v25 = vrot.slane %v1882_v22, %v20180_v15  ;;  %v1891_v32 = vcombine.high %v1889_v26, %v1889_v26  ;;  %v1939_v40 = vcombine.high %v1931_v29, %v1931_v29  ;;  %v1311_v28 = vld [vmem:[%s20167_s28 + $0x60] sm:$0xff]  ;;  %v1568_v33 = vld [vmem:[%s20167_s28 + $0x868] sm:$0x11]  ;;  %v1314_v47 = vld [vmem:[%s20167_s28 + $0x78] sm:$0xff] }
 0x123   : > { %v1905_v44 = vrot.slane %v1889_v26, %v20180_v15  ;;  %v1940_v56 = vcombine.high %v1938_v48, %v1938_v48  ;;  %v1947_v59 = vrot.slane %v1931_v29, %v20180_v15  ;;  %v18431_v4 = vcombine.high %v1307_v61, %v1563_v62  ;;  %v1567_v29 = vld [vmem:[%s20167_s28 + $0x860] sm:$0x11] }
 0x124   : > { %v1912_v30 = vrot.slane %v1890_v24, %v20180_v15  ;;  %v1920_v36 = vcombine.high %v1898_v25, %v1898_v25  ;;  %v1919_v39 = vrot.slane %v1891_v32, %v20180_v15  ;;  %v1961_v45 = vrot.slane %v1939_v40, %v20180_v15  ;;  %v1312_v32 = vld [vmem:[%s20167_s28 + $0x68] sm:$0xff] }
 0x125   : > { %v1921_v52 = vcombine.high %v1905_v44, %v1905_v44  ;;  %v1968_v60 = vrot.slane %v1940_v56, %v20180_v15  ;;  %v1969_v3 = vcombine.high %v1947_v59, %v1947_v59  ;;  %v18428_v5 = vcombine.low %v1306_v50, %v1562_v51 }
 0x126   : > { %8115 = vmatprep.mubr.bf16.mxu0 %v1912_v30  ;;  %v1922_v38 = vcombine.high %v1912_v30, %v1912_v30  ;;  %v1923_v43 = vcombine.high %v1919_v39, %v1919_v39  ;;  %v1971_v55 = vcombine.high %v1961_v45, %v1961_v45  ;;  %v1988_v7 = vcombine.high %v1980_v63, %v1980_v63 }
 0x127   : > { %8116 = vmatmul.mubr.bf16.vlgmr.msra.gmra.mxu0 %v1898_v25  ;;  %v1972_v6 = vcombine.high %v1968_v60, %v1968_v60  ;;  %v1973_v8 = vcombine.high %v1237_v58, %v1237_v58  ;;  %v18433_v9 = vcombine.high %v1308_v1, %v1564_v2  ;;  %v1954_v10 = vrot.slane %v1938_v48, %v20180_v15  ;;  %v1238_v25 = vld [vmem:[%s20178_s3 + $0x18] sm:$0xff]  ;;  %v1315_v58 = vld [vmem:[%s20167_s28 + $0x80] sm:$0xff] }
 0x128   : > { %8155 = vmatprep.mubr.bf16.mxu1 %v1922_v38  ;;  %8178 = vmatpush1.bf16.xpose.msra.mxu0 %v18418_v31  ;;  %v2010_v11 = vrot.slane %v1988_v7, %v20180_v15  ;;  %v18430_v16 = vcombine.low %v1307_v61, %v1563_v62  ;;  %v18435_v20 = vcombine.high %v1309_v12, %v1565_v13  ;;  %v1570_v48 = vld [vmem:[%s20167_s28 + $0x878] sm:$0x11]  ;;  %v1316_v62 = vld [vmem:[%s20167_s28 + $0x88] sm:$0xff] }
 0x129   : > { %8156 = vmatmul.mubr.bf16.vlgmr.msra.gmra.mxu1 %v1920_v36  ;;  %8195 = vmatprep.mubr.bf16.mxu0 %v1919_v39  ;;  %v1987_v14 = vrot.slane %v1973_v8, %v20180_v15  ;;  %v1970_v19 = vcombine.high %v1954_v10, %v1954_v10  ;;  %v18432_v21 = vcombine.low %v1308_v1, %v1564_v2 }
 0x12a   : > { %8218 = vmatpush1.bf16.xpose.msra.mxu1 %v18420_v35  ;;  %8257 = vmatprep.subr.bf16.mxu0 %v18423_v37  ;;  %v2020_v22 = vcombine.high %v2010_v11, %v2010_v11  ;;  %v18437_v24 = vcombine.high %v1310_v17, %v1566_v18  ;;  %v1996_v26 = vrot.slane %v1980_v63, %v20180_v15  ;;  %v1572_v63 = vld [vmem:[%s20167_s28 + $0x888] sm:$0x11] }
 0x12b   : > { %8235 = vmatprep.mubr.bf16.mxu1 %v1923_v43  ;;  %8297 = vmatprep.subr.bf16.mxu1 %v18425_v42  ;;  %v1989_v23 = vcombine.high %v1987_v14, %v1987_v14  ;;  %v2029_v30 = vrot.slane %v1238_v25, %v20180_v15  ;;  %v18434_v31 = vcombine.low %v1309_v12, %v1565_v13  ;;  %v1313_v43 = vld [vmem:[%s20167_s28 + $0x70] sm:$0xff]  ;;  %v1318_v13 = vld [vmem:[%s20167_s28 + $0x98] sm:$0xff] }
 0x12c   : > { %v2018_v34 = vcombine.high %v1996_v26, %v1996_v26  ;;  %v18439_v35 = vcombine.high %v1311_v28, %v1567_v29  ;;  %v18436_v36 = vcombine.low %v1310_v17, %v1566_v18  ;;  %v2022_v39 = vcombine.high %v1238_v25, %v1238_v25  ;;  %v1319_v25 = vld [vmem:[%s20167_s28 + $0xa0] sm:$0xff] }
 0x12d   : > { %v2017_v27 = vrot.slane %v1989_v23, %v20180_v15  ;;  %v2037_v38 = vcombine.high %v2029_v30, %v2029_v30  ;;  %v18441_v40 = vcombine.high %v1312_v32, %v1568_v33  ;;  %v2003_v41 = vrot.slane %v1987_v14, %v20180_v15  ;;  %v1574_v14 = vld [vmem:[%s20167_s28 + $0x898] sm:$0x11] }
 0x12e   : > { %v18438_v46 = vcombine.low %v1311_v28, %v1567_v29  ;;  %v18440_v51 = vcombine.low %v1312_v32, %v1568_v33  ;;  %v2045_v56 = vrot.slane %v2029_v30, %v20180_v15  ;;  %v18444_v2 = vcombine.low %v1314_v47, %v1570_v48  ;;  %v1320_v29 = vld [vmem:[%s20167_s28 + $0xa8] sm:$0xff] }
 0x12f   : > { %8196 = vmatmul.mubr.bf16.vlgmr.msra.gmra.mxu0 %v1905_v44  ;;  %v2021_v37 = vcombine.high %v2017_v27, %v2017_v27  ;;  %v2059_v42 = vrot.slane %v2037_v38, %v20180_v15  ;;  %v1569_v44 = vld [vmem:[%s20167_s28 + $0x870] sm:$0x11]  ;;  %v18448_v18 = vcombine.low %v1316_v62, %v1572_v63  ;;  %v1576_v30 = vld [vmem:[%s20167_s28 + $0x8a8] sm:$0x11]  ;;  %v18452_v33 = vcombine.low %v1318_v13, %v1574_v14 }
 0x130   : > { %8258 = vmatpush1.bf16.xpose.msra.mxu0 %v18422_v49  ;;  %8275 = vmatprep.mubr.bf16.mxu0 %v1961_v45  ;;  %v2036_v45 = vrot.slane %v2022_v39, %v20180_v15  ;;  %v2019_v49 = vcombine.high %v2003_v41, %v2003_v41  ;;  %v18443_v50 = vcombine.high %v1313_v43, %v1569_v44 }
 0x131   : > { %8236 = vmatmul.mubr.bf16.vlgmr.msra.gmra.mxu1 %v1921_v52  ;;  %8337 = vmatprep.subr.bf16.mxu0 %v18427_v53  ;;  %v2069_v52 = vcombine.high %v2059_v42, %v2059_v42  ;;  %v18442_v61 = vcombine.low %v1313_v43, %v1569_v44  ;;  %v1322_v44 = vld [vmem:[%s20167_s28 + $0xb8] sm:$0xff] }
 0x132   : > { %8298 = vmatpush1.bf16.xpose.msra.mxu1 %v18424_v54  ;;  %8315 = vmatprep.mubr.bf16.mxu1 %v1971_v55  ;;  %v2038_v53 = vcombine.high %v2036_v45, %v2036_v45  ;;  %v18445_v54 = vcombine.high %v1314_v47, %v1570_v48  ;;  %v1239_v55 = vld [vmem:[%s20178_s3 + $0x20] sm:$0xff]  ;;  %v2052_v7 = vrot.slane %v2036_v45, %v20180_v15  ;;  %v1578_v45 = vld [vmem:[%s20167_s28 + $0x8b8] sm:$0x11] }
 0x133   : > { %8377 = vmatprep.subr.bf16.mxu1 %v18429_v57  ;;  %v18456_v48 = vcombine.low %v1320_v29, %v1576_v30 }
 0x134   : > { %v2066_v57 = vrot.slane %v2038_v53, %v20180_v15 }
 0x137   : > { %8276 = vmatmul.mubr.bf16.vlgmr.msra.gmra.mxu0 %v1947_v59  ;;  %v1571_v59 = vld [vmem:[%s20167_s28 + $0x880] sm:$0x11] }
 0x138   : > { %8338 = vmatpush1.bf16.xpose.msra.mxu0 %v18426_v0  ;;  %8355 = vmatprep.mubr.bf16.mxu0 %v1968_v60  ;;  %v2078_v60 = vrot.slane %v1239_v55, %v20180_v15  ;;  %v2067_v0 = vcombine.high %v2045_v56, %v2045_v56  ;;  %v18447_v1 = vcombine.high %v1315_v58, %v1571_v59 }
 0x139   : > { %8316 = vmatmul.mubr.bf16.vlgmr.msra.gmra.mxu1 %v1969_v3  ;;  %8417 = vmatprep.subr.bf16.mxu0 %v18431_v4  ;;  %v2070_v3 = vcombine.high %v2066_v57, %v2066_v57  ;;  %v18446_v12 = vcombine.low %v1315_v58, %v1571_v59  ;;  %v1324_v59 = vld [vmem:[%s20167_s28 + $0xc8] sm:$0xff] }
 0x13a   : > { %8378 = vmatpush1.bf16.xpose.msra.mxu1 %v18428_v5  ;;  %8395 = vmatprep.mubr.bf16.mxu1 %v1972_v6  ;;  %v2086_v4 = vcombine.high %v2078_v60, %v2078_v60  ;;  %v2071_v5 = vcombine.high %v1239_v55, %v1239_v55  ;;  %v18449_v6 = vcombine.high %v1316_v62, %v1572_v63  ;;  %v1323_v55 = vld [vmem:[%s20167_s28 + $0xc0] sm:$0xff] }
 0x13b   : > { %8457 = vmatprep.subr.bf16.mxu1 %v18433_v9  ;;  %v1317_v9 = vld [vmem:[%s20167_s28 + $0x90] sm:$0xff]  ;;  %v2094_v23 = vrot.slane %v2078_v60, %v20180_v15  ;;  %v1580_v60 = vld [vmem:[%s20167_s28 + $0x8c8] sm:$0x11]  ;;  %v18460_v63 = vcombine.low %v1322_v44, %v1578_v45 }
 0x13c   : > { %v2108_v8 = vrot.slane %v2086_v4, %v20180_v15 }
 0x13f   : > { %8356 = vmatmul.mubr.bf16.vlgmr.msra.gmra.mxu0 %v1954_v10  ;;  %v1573_v10 = vld [vmem:[%s20167_s28 + $0x890] sm:$0x11] }
 0x140   : > { %8418 = vmatpush1.bf16.xpose.msra.mxu0 %v18430_v16  ;;  %8435 = vmatprep.mubr.bf16.mxu0 %v2010_v11  ;;  %v2085_v11 = vrot.slane %v2071_v5, %v20180_v15  ;;  %v2068_v16 = vcombine.high %v2052_v7, %v2052_v7  ;;  %v18451_v17 = vcombine.high %v1317_v9, %v1573_v10 }
 0x141   : > { %8396 = vmatmul.mubr.bf16.vlgmr.msra.gmra.mxu1 %v1970_v19  ;;  %8497 = vmatprep.subr.bf16.mxu0 %v18435_v20  ;;  %v2118_v19 = vcombine.high %v2108_v8, %v2108_v8  ;;  %v18450_v28 = vcombine.low %v1317_v9, %v1573_v10  ;;  %v1326_v10 = vld [vmem:[%s20167_s28 + $0xd8] sm:$0xff] }
 0x142   : > { %8458 = vmatpush1.bf16.xpose.msra.mxu1 %v18432_v21  ;;  %8475 = vmatprep.mubr.bf16.mxu1 %v2020_v22  ;;  %v2087_v20 = vcombine.high %v2085_v11, %v2085_v11  ;;  %v18453_v21 = vcombine.high %v1318_v13, %v1574_v14  ;;  %v1240_v22 = vld [vmem:[%s20178_s3 + $0x28] sm:$0xff]  ;;  %v2101_v38 = vrot.slane %v2085_v11, %v20180_v15  ;;  %v1582_v11 = vld [vmem:[%s20167_s28 + $0x8d8] sm:$0x11] }
 0x143   : > { %8537 = vmatprep.subr.bf16.mxu1 %v18437_v24  ;;  %v18464_v14 = vcombine.low %v1324_v59, %v1580_v60 }
 0x144   : > { %v2115_v24 = vrot.slane %v2087_v20, %v20180_v15 }
 0x147   : > { %8436 = vmatmul.mubr.bf16.vlgmr.msra.gmra.mxu0 %v1996_v26  ;;  %v1575_v26 = vld [vmem:[%s20167_s28 + $0x8a0] sm:$0x11] }
 0x148   : > { %8498 = vmatpush1.bf16.xpose.msra.mxu0 %v18434_v31  ;;  %8515 = vmatprep.mubr.bf16.mxu0 %v2017_v27  ;;  %v2127_v27 = vrot.slane %v1240_v22, %v20180_v15  ;;  %v2116_v31 = vcombine.high %v2094_v23, %v2094_v23  ;;  %v18455_v32 = vcombine.high %v1319_v25, %v1575_v26 }
 0x149   : > { %8476 = vmatmul.mubr.bf16.vlgmr.msra.gmra.mxu1 %v2018_v34  ;;  %8577 = vmatprep.subr.bf16.mxu0 %v18439_v35  ;;  %v2119_v34 = vcombine.high %v2115_v24, %v2115_v24  ;;  %v18454_v43 = vcombine.low %v1319_v25, %v1575_v26  ;;  %v1328_v26 = vld [vmem:[%s20167_s28 + $0xe8] sm:$0xff] }
 0x14a   : > { %8538 = vmatpush1.bf16.xpose.msra.mxu1 %v18436_v36  ;;  %8555 = vmatprep.mubr.bf16.mxu1 %v2021_v37  ;;  %v2135_v35 = vcombine.high %v2127_v27, %v2127_v27  ;;  %v2120_v36 = vcombine.high %v1240_v22, %v1240_v22  ;;  %v18457_v37 = vcombine.high %v1320_v29, %v1576_v30  ;;  %v1327_v22 = vld [vmem:[%s20167_s28 + $0xe0] sm:$0xff] }
 0x14b   : > { %8617 = vmatprep.subr.bf16.mxu1 %v18441_v40  ;;  %v1321_v40 = vld [vmem:[%s20167_s28 + $0xb0] sm:$0xff]  ;;  %v2143_v53 = vrot.slane %v2127_v27, %v20180_v15  ;;  %v1584_v27 = vld [vmem:[%s20167_s28 + $0x8e8] sm:$0x11]  ;;  %v18468_v30 = vcombine.low %v1326_v10, %v1582_v11 }
 0x14c   : > { %v2157_v39 = vrot.slane %v2135_v35, %v20180_v15 }
 0x14f   : > { %8516 = vmatmul.mubr.bf16.vlgmr.msra.gmra.mxu0 %v2003_v41  ;;  %v1577_v41 = vld [vmem:[%s20167_s28 + $0x8b0] sm:$0x11] }
 0x150   : > { %8578 = vmatpush1.bf16.xpose.msra.mxu0 %v18438_v46  ;;  %8595 = vmatprep.mubr.bf16.mxu0 %v2059_v42  ;;  %v2134_v42 = vrot.slane %v2120_v36, %v20180_v15  ;;  %v2117_v46 = vcombine.high %v2101_v38, %v2101_v38  ;;  %v18459_v47 = vcombine.high %v1321_v40, %v1577_v41 }
 0x151   : > { %8556 = vmatmul.mubr.bf16.vlgmr.msra.gmra.mxu1 %v2019_v49  ;;  %8657 = vmatprep.subr.bf16.mxu0 %v18443_v50  ;;  %v2167_v49 = vcombine.high %v2157_v39, %v2157_v39  ;;  %v18458_v58 = vcombine.low %v1321_v40, %v1577_v41  ;;  %v1330_v41 = vld [vmem:[%s20167_s28 + $0xf8] sm:$0xff] }
 0x152   : > { %8618 = vmatpush1.bf16.xpose.msra.mxu1 %v18440_v51  ;;  %8635 = vmatprep.mubr.bf16.mxu1 %v2069_v52  ;;  %v2136_v50 = vcombine.high %v2134_v42, %v2134_v42  ;;  %v18461_v51 = vcombine.high %v1322_v44, %v1578_v45  ;;  %v1241_v52 = vld [vmem:[%s20178_s3 + $0x30] sm:$0xff]  ;;  %v2150_v4 = vrot.slane %v2134_v42, %v20180_v15  ;;  %v1586_v42 = vld [vmem:[%s20167_s28 + $0x8f8] sm:$0x11] }
 0x153   : > { %8697 = vmatprep.subr.bf16.mxu1 %v18445_v54  ;;  %v18472_v45 = vcombine.low %v1328_v26, %v1584_v27 }
 0x154   : > { %v2164_v54 = vrot.slane %v2136_v50, %v20180_v15 }
 0x157   : > { %8596 = vmatmul.mubr.bf16.vlgmr.msra.gmra.mxu0 %v2045_v56  ;;  %v1579_v56 = vld [vmem:[%s20167_s28 + $0x8c0] sm:$0x11] }
 0x158   : > { %8658 = vmatpush1.bf16.xpose.msra.mxu0 %v18442_v61  ;;  %8675 = vmatprep.mubr.bf16.mxu0 %v2066_v57  ;;  %v2176_v57 = vrot.slane %v1241_v52, %v20180_v15  ;;  %v2165_v61 = vcombine.high %v2143_v53, %v2143_v53  ;;  %v18463_v62 = vcombine.high %v1323_v55, %v1579_v56 }
 0x159   : > { %8636 = vmatmul.mubr.bf16.vlgmr.msra.gmra.mxu1 %v2067_v0  ;;  %8737 = vmatprep.subr.bf16.mxu0 %v18447_v1  ;;  %v2168_v0 = vcombine.high %v2164_v54, %v2164_v54  ;;  %v18462_v9 = vcombine.low %v1323_v55, %v1579_v56  ;;  %v1332_v56 = vld [vmem:[%s20167_s28 + $0x108] sm:$0xff] }
 0x15a   : > { %8698 = vmatpush1.bf16.xpose.msra.mxu1 %v18444_v2  ;;  %8715 = vmatprep.mubr.bf16.mxu1 %v2070_v3  ;;  %v2184_v1 = vcombine.high %v2176_v57, %v2176_v57  ;;  %v2169_v2 = vcombine.high %v1241_v52, %v1241_v52  ;;  %v18465_v3 = vcombine.high %v1324_v59, %v1580_v60  ;;  %v1331_v52 = vld [vmem:[%s20167_s28 + $0x100] sm:$0xff] }
 0x15b   : > { %8777 = vmatprep.subr.bf16.mxu1 %v18449_v6  ;;  %v1325_v6 = vld [vmem:[%s20167_s28 + $0xd0] sm:$0xff]  ;;  %v2192_v20 = vrot.slane %v2176_v57, %v20180_v15  ;;  %v1588_v57 = vld [vmem:[%s20167_s28 + $0x908] sm:$0x11]  ;;  %v18476_v60 = vcombine.low %v1330_v41, %v1586_v42 }
 0x15c   : > { %v2206_v5 = vrot.slane %v2184_v1, %v20180_v15 }
 0x15f   : > { %8676 = vmatmul.mubr.bf16.vlgmr.msra.gmra.mxu0 %v2052_v7  ;;  %v1581_v7 = vld [vmem:[%s20167_s28 + $0x8d0] sm:$0x11] }
 0x160   : > { %8738 = vmatpush1.bf16.xpose.msra.mxu0 %v18446_v12  ;;  %8755 = vmatprep.mubr.bf16.mxu0 %v2108_v8  ;;  %v2183_v8 = vrot.slane %v2169_v2, %v20180_v15  ;;  %v2166_v12 = vcombine.high %v2150_v4, %v2150_v4  ;;  %v18467_v13 = vcombine.high %v1325_v6, %v1581_v7 }
 0x161   : > { %8716 = vmatmul.mubr.bf16.vlgmr.msra.gmra.mxu1 %v2068_v16  ;;  %8817 = vmatprep.subr.bf16.mxu0 %v18451_v17  ;;  %v2216_v16 = vcombine.high %v2206_v5, %v2206_v5  ;;  %v18466_v25 = vcombine.low %v1325_v6, %v1581_v7  ;;  %v1334_v7 = vld [vmem:[%s20167_s28 + $0x118] sm:$0xff] }
 0x162   : > { %8778 = vmatpush1.bf16.xpose.msra.mxu1 %v18448_v18  ;;  %8795 = vmatprep.mubr.bf16.mxu1 %v2118_v19  ;;  %v2185_v17 = vcombine.high %v2183_v8, %v2183_v8  ;;  %v18469_v18 = vcombine.high %v1326_v10, %v1582_v11  ;;  %v1242_v19 = vld [vmem:[%s20178_s3 + $0x38] sm:$0xff]  ;;  %v2199_v35 = vrot.slane %v2183_v8, %v20180_v15 }
 0x163   : > { %8857 = vmatprep.subr.bf16.mxu1 %v18453_v21  ;;  %v1590_v8 = vld [vmem:[%s20167_s28 + $0x918] sm:$0x11]  ;;  %v18480_v11 = vcombine.low %v1332_v56, %v1588_v57 }
 0x164   : > { %v2213_v21 = vrot.slane %v2185_v17, %v20180_v15 }
 0x167   : > { %8756 = vmatmul.mubr.bf16.vlgmr.msra.gmra.mxu0 %v2094_v23  ;;  %v1583_v23 = vld [vmem:[%s20167_s28 + $0x8e0] sm:$0x11] }
 0x168   : > { %8818 = vmatpush1.bf16.xpose.msra.mxu0 %v18450_v28  ;;  %8835 = vmatprep.mubr.bf16.mxu0 %v2115_v24  ;;  %v2225_v24 = vrot.slane %v1242_v19, %v20180_v15  ;;  %v2214_v28 = vcombine.high %v2192_v20, %v2192_v20  ;;  %v18471_v29 = vcombine.high %v1327_v22, %v1583_v23 }
 0x169   : > { %8796 = vmatmul.mubr.bf16.vlgmr.msra.gmra.mxu1 %v2116_v31  ;;  %8897 = vmatprep.subr.bf16.mxu0 %v18455_v32  ;;  %v2217_v31 = vcombine.high %v2213_v21, %v2213_v21  ;;  %v18470_v40 = vcombine.low %v1327_v22, %v1583_v23  ;;  %v1336_v23 = vld [vmem:[%s20167_s28 + $0x128] sm:$0xff] }
 0x16a   : > { %8858 = vmatpush1.bf16.xpose.msra.mxu1 %v18452_v33  ;;  %8875 = vmatprep.mubr.bf16.mxu1 %v2119_v34  ;;  %v2233_v32 = vcombine.high %v2225_v24, %v2225_v24  ;;  %v2218_v33 = vcombine.high %v1242_v19, %v1242_v19  ;;  %v18473_v34 = vcombine.high %v1328_v26, %v1584_v27  ;;  %v1335_v19 = vld [vmem:[%s20167_s28 + $0x120] sm:$0xff] }
 0x16b   : > { %8937 = vmatprep.subr.bf16.mxu1 %v18457_v37  ;;  %v1329_v37 = vld [vmem:[%s20167_s28 + $0xf0] sm:$0xff]  ;;  %v2241_v50 = vrot.slane %v2225_v24, %v20180_v15  ;;  %v1592_v24 = vld [vmem:[%s20167_s28 + $0x928] sm:$0x11]  ;;  %v18484_v27 = vcombine.low %v1334_v7, %v1590_v8 }
 0x16c   : > { %v2255_v36 = vrot.slane %v2233_v32, %v20180_v15 }
 0x16f   : > { %8836 = vmatmul.mubr.bf16.vlgmr.msra.gmra.mxu0 %v2101_v38  ;;  %v1585_v38 = vld [vmem:[%s20167_s28 + $0x8f0] sm:$0x11] }
 0x170   : > { %8898 = vmatpush1.bf16.xpose.msra.mxu0 %v18454_v43  ;;  %8915 = vmatprep.mubr.bf16.mxu0 %v2157_v39  ;;  %v2232_v39 = vrot.slane %v2218_v33, %v20180_v15  ;;  %v2215_v43 = vcombine.high %v2199_v35, %v2199_v35  ;;  %v18475_v44 = vcombine.high %v1329_v37, %v1585_v38 }
 0x171   : > { %8876 = vmatmul.mubr.bf16.vlgmr.msra.gmra.mxu1 %v2117_v46  ;;  %8977 = vmatprep.subr.bf16.mxu0 %v18459_v47  ;;  %v2265_v46 = vcombine.high %v2255_v36, %v2255_v36  ;;  %v18474_v55 = vcombine.low %v1329_v37, %v1585_v38  ;;  %v1338_v38 = vld [vmem:[%s20167_s28 + $0x138] sm:$0xff] }
 0x172   : > { %8938 = vmatpush1.bf16.xpose.msra.mxu1 %v18456_v48  ;;  %8955 = vmatprep.mubr.bf16.mxu1 %v2167_v49  ;;  %v2234_v47 = vcombine.high %v2232_v39, %v2232_v39  ;;  %v18477_v48 = vcombine.high %v1330_v41, %v1586_v42  ;;  %v1243_v49 = vld [vmem:[%s20178_s3 + $0x40] sm:$0xff]  ;;  %v2248_v1 = vrot.slane %v2232_v39, %v20180_v15  ;;  %v1594_v39 = vld [vmem:[%s20167_s28 + $0x938] sm:$0x11] }
 0x173   : > { %9017 = vmatprep.subr.bf16.mxu1 %v18461_v51  ;;  %v18488_v42 = vcombine.low %v1336_v23, %v1592_v24 }
 0x174   : > { %v2262_v51 = vrot.slane %v2234_v47, %v20180_v15 }
 0x177   : > { %8916 = vmatmul.mubr.bf16.vlgmr.msra.gmra.mxu0 %v2143_v53  ;;  %v1587_v53 = vld [vmem:[%s20167_s28 + $0x900] sm:$0x11] }
 0x178   : > { %8978 = vmatpush1.bf16.xpose.msra.mxu0 %v18458_v58  ;;  %8995 = vmatprep.mubr.bf16.mxu0 %v2164_v54  ;;  %v2274_v54 = vrot.slane %v1243_v49, %v20180_v15  ;;  %v2263_v58 = vcombine.high %v2241_v50, %v2241_v50  ;;  %v18479_v59 = vcombine.high %v1331_v52, %v1587_v53 }
 0x179   : > { %8956 = vmatmul.mubr.bf16.vlgmr.msra.gmra.mxu1 %v2165_v61  ;;  %9057 = vmatprep.subr.bf16.mxu0 %v18463_v62  ;;  %v2266_v61 = vcombine.high %v2262_v51, %v2262_v51  ;;  %v18478_v6 = vcombine.low %v1331_v52, %v1587_v53  ;;  %v1340_v53 = vld [vmem:[%s20167_s28 + $0x148] sm:$0xff] }
 0x17a   : > { %9018 = vmatpush1.bf16.xpose.msra.mxu1 %v18460_v63  ;;  %9035 = vmatprep.mubr.bf16.mxu1 %v2168_v0  ;;  %v2282_v62 = vcombine.high %v2274_v54, %v2274_v54  ;;  %v2267_v63 = vcombine.high %v1243_v49, %v1243_v49  ;;  %v18481_v0 = vcombine.high %v1332_v56, %v1588_v57  ;;  %v1339_v49 = vld [vmem:[%s20167_s28 + $0x140] sm:$0xff] }
 0x17b   : > { %9097 = vmatprep.subr.bf16.mxu1 %v18465_v3  ;;  %v1333_v3 = vld [vmem:[%s20167_s28 + $0x110] sm:$0xff]  ;;  %v2290_v17 = vrot.slane %v2274_v54, %v20180_v15  ;;  %v1596_v54 = vld [vmem:[%s20167_s28 + $0x948] sm:$0x11]  ;;  %v18492_v57 = vcombine.low %v1338_v38, %v1594_v39 }
 0x17c   : > { %v2304_v2 = vrot.slane %v2282_v62, %v20180_v15 }
 0x17f   : > { %8996 = vmatmul.mubr.bf16.vlgmr.msra.gmra.mxu0 %v2150_v4  ;;  %v1589_v4 = vld [vmem:[%s20167_s28 + $0x910] sm:$0x11] }
 0x180   : > { %9058 = vmatpush1.bf16.xpose.msra.mxu0 %v18462_v9  ;;  %9075 = vmatprep.mubr.bf16.mxu0 %v2206_v5  ;;  %v2281_v5 = vrot.slane %v2267_v63, %v20180_v15  ;;  %v2264_v9 = vcombine.high %v2248_v1, %v2248_v1  ;;  %v18483_v10 = vcombine.high %v1333_v3, %v1589_v4 }
 0x181   : > { %9036 = vmatmul.mubr.bf16.vlgmr.msra.gmra.mxu1 %v2166_v12  ;;  %9137 = vmatprep.subr.bf16.mxu0 %v18467_v13  ;;  %v2314_v12 = vcombine.high %v2304_v2, %v2304_v2  ;;  %v18482_v22 = vcombine.low %v1333_v3, %v1589_v4  ;;  %v1342_v4 = vld [vmem:[%s20167_s28 + $0x158] sm:$0xff] }
 0x182   : > { %9098 = vmatpush1.bf16.xpose.msra.mxu1 %v18464_v14  ;;  %9115 = vmatprep.mubr.bf16.mxu1 %v2216_v16  ;;  %v2283_v13 = vcombine.high %v2281_v5, %v2281_v5  ;;  %v18485_v14 = vcombine.high %v1334_v7, %v1590_v8  ;;  %v1244_v16 = vld [vmem:[%s20178_s3 + $0x48] sm:$0xff]  ;;  %v2297_v32 = vrot.slane %v2281_v5, %v20180_v15  ;;  %v1598_v5 = vld [vmem:[%s20167_s28 + $0x958] sm:$0x11] }
 0x183   : > { %9177 = vmatprep.subr.bf16.mxu1 %v18469_v18  ;;  %v18496_v8 = vcombine.low %v1340_v53, %v1596_v54 }
 0x184   : > { %v2311_v18 = vrot.slane %v2283_v13, %v20180_v15 }
 0x187   : > { %9076 = vmatmul.mubr.bf16.vlgmr.msra.gmra.mxu0 %v2192_v20  ;;  %v1591_v20 = vld [vmem:[%s20167_s28 + $0x920] sm:$0x11] }
 0x188   : > { %9138 = vmatpush1.bf16.xpose.msra.mxu0 %v18466_v25  ;;  %9155 = vmatprep.mubr.bf16.mxu0 %v2213_v21  ;;  %v2323_v21 = vrot.slane %v1244_v16, %v20180_v15  ;;  %v2312_v25 = vcombine.high %v2290_v17, %v2290_v17  ;;  %v18487_v26 = vcombine.high %v1335_v19, %v1591_v20 }
 0x189   : > { %9116 = vmatmul.mubr.bf16.vlgmr.msra.gmra.mxu1 %v2214_v28  ;;  %9217 = vmatprep.subr.bf16.mxu0 %v18471_v29  ;;  %v2315_v28 = vcombine.high %v2311_v18, %v2311_v18  ;;  %v18486_v37 = vcombine.low %v1335_v19, %v1591_v20  ;;  %v1344_v20 = vld [vmem:[%s20167_s28 + $0x168] sm:$0xff] }
 0x18a   : > { %9178 = vmatpush1.bf16.xpose.msra.mxu1 %v18468_v30  ;;  %9195 = vmatprep.mubr.bf16.mxu1 %v2217_v31  ;;  %v2331_v29 = vcombine.high %v2323_v21, %v2323_v21  ;;  %v2316_v30 = vcombine.high %v1244_v16, %v1244_v16  ;;  %v18489_v31 = vcombine.high %v1336_v23, %v1592_v24  ;;  %v1343_v16 = vld [vmem:[%s20167_s28 + $0x160] sm:$0xff] }
 0x18b   : > { %9257 = vmatprep.subr.bf16.mxu1 %v18473_v34  ;;  %v1337_v34 = vld [vmem:[%s20167_s28 + $0x130] sm:$0xff]  ;;  %v2339_v47 = vrot.slane %v2323_v21, %v20180_v15  ;;  %v1600_v21 = vld [vmem:[%s20167_s28 + $0x968] sm:$0x11]  ;;  %v18500_v24 = vcombine.low %v1342_v4, %v1598_v5 }
 0x18c   : > { %v2353_v33 = vrot.slane %v2331_v29, %v20180_v15 }
 0x18f   : > { %9156 = vmatmul.mubr.bf16.vlgmr.msra.gmra.mxu0 %v2199_v35  ;;  %v1593_v35 = vld [vmem:[%s20167_s28 + $0x930] sm:$0x11] }
 0x190   : > { %9218 = vmatpush1.bf16.xpose.msra.mxu0 %v18470_v40  ;;  %9235 = vmatprep.mubr.bf16.mxu0 %v2255_v36  ;;  %v2330_v36 = vrot.slane %v2316_v30, %v20180_v15  ;;  %v2313_v40 = vcombine.high %v2297_v32, %v2297_v32  ;;  %v18491_v41 = vcombine.high %v1337_v34, %v1593_v35 }
 0x191   : > { %9196 = vmatmul.mubr.bf16.vlgmr.msra.gmra.mxu1 %v2215_v43  ;;  %9297 = vmatprep.subr.bf16.mxu0 %v18475_v44  ;;  %v2363_v43 = vcombine.high %v2353_v33, %v2353_v33  ;;  %v18490_v52 = vcombine.low %v1337_v34, %v1593_v35  ;;  %v1346_v35 = vld [vmem:[%s20167_s28 + $0x178] sm:$0xff] }
 0x192   : > { %9258 = vmatpush1.bf16.xpose.msra.mxu1 %v18472_v45  ;;  %9275 = vmatprep.mubr.bf16.mxu1 %v2265_v46  ;;  %v2332_v44 = vcombine.high %v2330_v36, %v2330_v36  ;;  %v18493_v45 = vcombine.high %v1338_v38, %v1594_v39  ;;  %v1245_v46 = vld [vmem:[%s20178_s3 + $0x50] sm:$0xff]  ;;  %v2346_v62 = vrot.slane %v2330_v36, %v20180_v15  ;;  %v1602_v36 = vld [vmem:[%s20167_s28 + $0x978] sm:$0x11] }
 0x193   : > { %9337 = vmatprep.subr.bf16.mxu1 %v18477_v48  ;;  %v18504_v39 = vcombine.low %v1344_v20, %v1600_v21 }
 0x194   : > { %v2360_v48 = vrot.slane %v2332_v44, %v20180_v15 }
 0x197   : > { %9236 = vmatmul.mubr.bf16.vlgmr.msra.gmra.mxu0 %v2241_v50  ;;  %v1595_v50 = vld [vmem:[%s20167_s28 + $0x940] sm:$0x11] }
 0x198   : > { %9298 = vmatpush1.bf16.xpose.msra.mxu0 %v18474_v55  ;;  %9315 = vmatprep.mubr.bf16.mxu0 %v2262_v51  ;;  %v2372_v51 = vrot.slane %v1245_v46, %v20180_v15  ;;  %v2361_v55 = vcombine.high %v2339_v47, %v2339_v47  ;;  %v18495_v56 = vcombine.high %v1339_v49, %v1595_v50 }
 0x199   : > { %9276 = vmatmul.mubr.bf16.vlgmr.msra.gmra.mxu1 %v2263_v58  ;;  %9377 = vmatprep.subr.bf16.mxu0 %v18479_v59  ;;  %v2364_v58 = vcombine.high %v2360_v48, %v2360_v48  ;;  %v18494_v3 = vcombine.low %v1339_v49, %v1595_v50  ;;  %v1348_v50 = vld [vmem:[%s20167_s28 + $0x188] sm:$0xff] }
 0x19a   : > { %9338 = vmatpush1.bf16.xpose.msra.mxu1 %v18476_v60  ;;  %9355 = vmatprep.mubr.bf16.mxu1 %v2266_v61  ;;  %v2380_v59 = vcombine.high %v2372_v51, %v2372_v51  ;;  %v2365_v60 = vcombine.high %v1245_v46, %v1245_v46  ;;  %v18497_v61 = vcombine.high %v1340_v53, %v1596_v54  ;;  %v1347_v46 = vld [vmem:[%s20167_s28 + $0x180] sm:$0xff] }
 0x19b   : > { %9417 = vmatprep.subr.bf16.mxu1 %v18481_v0  ;;  %v1341_v0 = vld [vmem:[%s20167_s28 + $0x150] sm:$0xff]  ;;  %v2388_v13 = vrot.slane %v2372_v51, %v20180_v15  ;;  %v1604_v51 = vld [vmem:[%s20167_s28 + $0x988] sm:$0x11]  ;;  %v18508_v54 = vcombine.low %v1346_v35, %v1602_v36 }
 0x19c   : > { %v2402_v63 = vrot.slane %v2380_v59, %v20180_v15 }
 0x19f   : > { %9316 = vmatmul.mubr.bf16.vlgmr.msra.gmra.mxu0 %v2248_v1  ;;  %v1597_v1 = vld [vmem:[%s20167_s28 + $0x950] sm:$0x11] }
 0x1a0   : > { %9378 = vmatpush1.bf16.xpose.msra.mxu0 %v18478_v6  ;;  %9395 = vmatprep.mubr.bf16.mxu0 %v2304_v2  ;;  %v2379_v2 = vrot.slane %v2365_v60, %v20180_v15  ;;  %v2362_v6 = vcombine.high %v2346_v62, %v2346_v62  ;;  %v18499_v7 = vcombine.high %v1341_v0, %v1597_v1 }
 0x1a1   : > { %9356 = vmatmul.mubr.bf16.vlgmr.msra.gmra.mxu1 %v2264_v9  ;;  %9457 = vmatprep.subr.bf16.mxu0 %v18483_v10  ;;  %v2412_v9 = vcombine.high %v2402_v63, %v2402_v63  ;;  %v18498_v19 = vcombine.low %v1341_v0, %v1597_v1  ;;  %v1350_v1 = vld [vmem:[%s20167_s28 + $0x198] sm:$0xff] }
 0x1a2   : > { %9418 = vmatpush1.bf16.xpose.msra.mxu1 %v18480_v11  ;;  %9435 = vmatprep.mubr.bf16.mxu1 %v2314_v12  ;;  %v2381_v10 = vcombine.high %v2379_v2, %v2379_v2  ;;  %v18501_v11 = vcombine.high %v1342_v4, %v1598_v5  ;;  %v1246_v12 = vld [vmem:[%s20178_s3 + $0x58] sm:$0xff]  ;;  %v2395_v29 = vrot.slane %v2379_v2, %v20180_v15 }
 0x1a3   : > { %9497 = vmatprep.subr.bf16.mxu1 %v18485_v14  ;;  %v1606_v2 = vld [vmem:[%s20167_s28 + $0x998] sm:$0x11]  ;;  %v18512_v5 = vcombine.low %v1348_v50, %v1604_v51 }
 0x1a4   : > { %v2409_v14 = vrot.slane %v2381_v10, %v20180_v15 }
 0x1a7   : > { %9396 = vmatmul.mubr.bf16.vlgmr.msra.gmra.mxu0 %v2290_v17  ;;  %v1599_v17 = vld [vmem:[%s20167_s28 + $0x960] sm:$0x11] }
 0x1a8   : > { %9458 = vmatpush1.bf16.xpose.msra.mxu0 %v18482_v22  ;;  %9475 = vmatprep.mubr.bf16.mxu0 %v2311_v18  ;;  %v2421_v18 = vrot.slane %v1246_v12, %v20180_v15  ;;  %v2410_v22 = vcombine.high %v2388_v13, %v2388_v13  ;;  %v18503_v23 = vcombine.high %v1343_v16, %v1599_v17 }
 0x1a9   : > { %9436 = vmatmul.mubr.bf16.vlgmr.msra.gmra.mxu1 %v2312_v25  ;;  %9537 = vmatprep.subr.bf16.mxu0 %v18487_v26  ;;  %v2413_v25 = vcombine.high %v2409_v14, %v2409_v14  ;;  %v18502_v34 = vcombine.low %v1343_v16, %v1599_v17  ;;  %v1352_v17 = vld [vmem:[%s20167_s28 + $0x1a8] sm:$0xff] }
 0x1aa   : > { %9498 = vmatpush1.bf16.xpose.msra.mxu1 %v18484_v27  ;;  %9515 = vmatprep.mubr.bf16.mxu1 %v2315_v28  ;;  %v2429_v26 = vcombine.high %v2421_v18, %v2421_v18  ;;  %v2414_v27 = vcombine.high %v1246_v12, %v1246_v12  ;;  %v18505_v28 = vcombine.high %v1344_v20, %v1600_v21  ;;  %v1351_v12 = vld [vmem:[%s20167_s28 + $0x1a0] sm:$0xff] }
 0x1ab   : > { %9577 = vmatprep.subr.bf16.mxu1 %v18489_v31  ;;  %v1345_v31 = vld [vmem:[%s20167_s28 + $0x170] sm:$0xff]  ;;  %v2437_v44 = vrot.slane %v2421_v18, %v20180_v15  ;;  %v1608_v18 = vld [vmem:[%s20167_s28 + $0x9a8] sm:$0x11]  ;;  %v18516_v21 = vcombine.low %v1350_v1, %v1606_v2 }
 0x1ac   : > { %v2451_v30 = vrot.slane %v2429_v26, %v20180_v15  ;;  %v18521_v26 = vcombine.high %v1352_v17, %v1608_v18 }
 0x1af   : > { %9476 = vmatmul.mubr.bf16.vlgmr.msra.gmra.mxu0 %v2297_v32  ;;  %v1601_v32 = vld [vmem:[%s20167_s28 + $0x970] sm:$0x11] }
 0x1b0   : > { %9538 = vmatpush1.bf16.xpose.msra.mxu0 %v18486_v37  ;;  %9555 = vmatprep.mubr.bf16.mxu0 %v2353_v33  ;;  %v2428_v33 = vrot.slane %v2414_v27, %v20180_v15  ;;  %v2411_v37 = vcombine.high %v2395_v29, %v2395_v29  ;;  %v18507_v38 = vcombine.high %v1345_v31, %v1601_v32 }
 0x1b1   : > { %9516 = vmatmul.mubr.bf16.vlgmr.msra.gmra.mxu1 %v2313_v40  ;;  %9617 = vmatprep.subr.bf16.mxu0 %v18491_v41  ;;  %v2461_v40 = vcombine.high %v2451_v30, %v2451_v30  ;;  %v18506_v49 = vcombine.low %v1345_v31, %v1601_v32  ;;  %v1353_v32 = vld [vmem:[%s20167_s28 + $0x1b0] sm:$0xff] }
 0x1b2   : > { %9578 = vmatpush1.bf16.xpose.msra.mxu1 %v18488_v42  ;;  %9595 = vmatprep.mubr.bf16.mxu1 %v2363_v43  ;;  %v2430_v41 = vcombine.high %v2428_v33, %v2428_v33  ;;  %v18509_v42 = vcombine.high %v1346_v35, %v1602_v36  ;;  %v1247_v43 = vld [vmem:[%s20178_s3 + $0x60] sm:$0xff]  ;;  %v2444_v59 = vrot.slane %v2428_v33, %v20180_v15  ;;  %v1609_v33 = vld [vmem:[%s20167_s28 + $0x9b0] sm:$0x11] }
 0x1b3   : > { %9657 = vmatprep.subr.bf16.mxu1 %v18493_v45 }
 0x1b4   : > { %v2458_v45 = vrot.slane %v2430_v41, %v20180_v15 }
 0x1b7   : > { %9556 = vmatmul.mubr.bf16.vlgmr.msra.gmra.mxu0 %v2339_v47  ;;  %v1603_v47 = vld [vmem:[%s20167_s28 + $0x980] sm:$0x11] }
 0x1b8   : > { %9618 = vmatpush1.bf16.xpose.msra.mxu0 %v18490_v52  ;;  %9635 = vmatprep.mubr.bf16.mxu0 %v2360_v48  ;;  %v2470_v48 = vrot.slane %v1247_v43, %v20180_v15  ;;  %v2459_v52 = vcombine.high %v2437_v44, %v2437_v44  ;;  %v18511_v53 = vcombine.high %v1347_v46, %v1603_v47 }
 0x1b9   : > { %9596 = vmatmul.mubr.bf16.vlgmr.msra.gmra.mxu1 %v2361_v55  ;;  %9697 = vmatprep.subr.bf16.mxu0 %v18495_v56  ;;  %v2462_v55 = vcombine.high %v2458_v45, %v2458_v45  ;;  %v18510_v0 = vcombine.low %v1347_v46, %v1603_v47 }
 0x1ba   : > { %9658 = vmatpush1.bf16.xpose.msra.mxu1 %v18492_v57  ;;  %9675 = vmatprep.mubr.bf16.mxu1 %v2364_v58  ;;  %v2478_v56 = vcombine.high %v2470_v48, %v2470_v48  ;;  %v2463_v57 = vcombine.high %v1247_v43, %v1247_v43  ;;  %v18513_v58 = vcombine.high %v1348_v50, %v1604_v51  ;;  %v1249_v50 = vld [vmem:[%s20178_s3 + $0x70] sm:$0xff] }
 0x1bb   : > { %9737 = vmatprep.subr.bf16.mxu1 %v18497_v61  ;;  %v1349_v61 = vld [vmem:[%s20167_s28 + $0x190] sm:$0xff]  ;;  %v2486_v10 = vrot.slane %v2470_v48, %v20180_v15  ;;  %v18523_v43 = vcombine.high %v1353_v32, %v1609_v33 }
 0x1bc   : > { %v2500_v60 = vrot.slane %v2478_v56, %v20180_v15 }
 0x1bf   : > { %9636 = vmatmul.mubr.bf16.vlgmr.msra.gmra.mxu0 %v2346_v62  ;;  %v1605_v62 = vld [vmem:[%s20167_s28 + $0x990] sm:$0x11] }
 0x1c0   : > { %9698 = vmatpush1.bf16.xpose.msra.mxu0 %v18494_v3  ;;  %9715 = vmatprep.mubr.bf16.mxu0 %v2402_v63  ;;  %v2477_v63 = vrot.slane %v2463_v57, %v20180_v15  ;;  %v2460_v3 = vcombine.high %v2444_v59, %v2444_v59  ;;  %v18515_v4 = vcombine.high %v1349_v61, %v1605_v62  ;;  %v1355_v57 = vld [vmem:[%s20167_s28 + $0x1c0] sm:$0xff] }
 0x1c1   : > { %9676 = vmatmul.mubr.bf16.vlgmr.msra.gmra.mxu1 %v2362_v6  ;;  %9777 = vmatprep.subr.bf16.mxu0 %v18499_v7  ;;  %v2510_v6 = vcombine.high %v2500_v60, %v2500_v60  ;;  %v18514_v16 = vcombine.low %v1349_v61, %v1605_v62  ;;  %v18522_v62 = vcombine.low %v1353_v32, %v1609_v33 }
 0x1c2   : > { %9738 = vmatpush1.bf16.xpose.msra.mxu1 %v18496_v8  ;;  %9755 = vmatprep.mubr.bf16.mxu1 %v2412_v9  ;;  %v2479_v7 = vcombine.high %v2477_v63, %v2477_v63  ;;  %v18517_v8 = vcombine.high %v1350_v1, %v1606_v2  ;;  %v1248_v9 = vld [vmem:[%s20178_s3 + $0x68] sm:$0xff] }
 0x1c3   : > { %9817 = vmatprep.subr.bf16.mxu1 %v18501_v11 }
 0x1c4   : > { %v2507_v11 = vrot.slane %v2479_v7, %v20180_v15 }
 0x1c7   : > { %9716 = vmatmul.mubr.bf16.vlgmr.msra.gmra.mxu0 %v2388_v13  ;;  %v1607_v13 = vld [vmem:[%s20167_s28 + $0x9a0] sm:$0x11] }
 0x1c8   : > { %9778 = vmatpush1.bf16.xpose.msra.mxu0 %v18498_v19  ;;  %9795 = vmatprep.mubr.bf16.mxu0 %v2409_v14  ;;  %v2519_v14 = vrot.slane %v1248_v9, %v20180_v15  ;;  %v2508_v19 = vcombine.high %v2486_v10, %v2486_v10  ;;  %v18519_v20 = vcombine.high %v1351_v12, %v1607_v13 }
 0x1c9   : > { %9756 = vmatmul.mubr.bf16.vlgmr.msra.gmra.mxu1 %v2410_v22  ;;  %9857 = vmatprep.subr.bf16.mxu0 %v18503_v23  ;;  %v2511_v22 = vcombine.high %v2507_v11, %v2507_v11 }
 0x1ca   : > { %9818 = vmatpush1.bf16.xpose.msra.mxu1 %v18500_v24  ;;  %9835 = vmatprep.mubr.bf16.mxu1 %v2413_v25  ;;  %v2527_v23 = vcombine.high %v2519_v14, %v2519_v14  ;;  %v2512_v24 = vcombine.high %v1248_v9, %v1248_v9 }
 0x1cb   : > { %9897 = vmatprep.subr.bf16.mxu1 %v18505_v28 }
 0x1cc   : > { %v2549_v31 = vrot.slane %v2527_v23, %v20180_v15 }
 0x1cf   : > { %9796 = vmatmul.mubr.bf16.vlgmr.msra.gmra.mxu0 %v2395_v29  ;;  %v2493_v29 = vrot.slane %v2477_v63, %v20180_v15  ;;  %v1356_v63 = vld [vmem:[%s20167_s28 + $0x1c8] sm:$0xff] }
 0x1d0   : > { %9858 = vmatpush1.bf16.xpose.msra.mxu0 %v18502_v34  ;;  %9875 = vmatprep.mubr.bf16.mxu0 %v2451_v30  ;;  %v2526_v34 = vrot.slane %v2512_v24, %v20180_v15 }
 0x1d1   : > { %9836 = vmatmul.mubr.bf16.vlgmr.msra.gmra.mxu1 %v2411_v37  ;;  %9937 = vmatprep.subr.bf16.mxu0 %v18507_v38  ;;  %v18518_v37 = vcombine.low %v1351_v12, %v1607_v13  ;;  %v1354_v38 = vld [vmem:[%s20167_s28 + $0x1b8] sm:$0xff] }
 0x1d2   : > { %9898 = vmatpush1.bf16.xpose.msra.mxu1 %v18504_v39  ;;  %9915 = vmatprep.mubr.bf16.mxu1 %v2461_v40  ;;  %v1610_v39 = vld [vmem:[%s20167_s28 + $0x9b8] sm:$0x11]  ;;  %v2528_v46 = vcombine.high %v2526_v34, %v2526_v34 }
 0x1d3   : > { %9977 = vmatprep.subr.bf16.mxu1 %v18509_v42  ;;  %v2509_v42 = vcombine.high %v2493_v29, %v2493_v29 }
 0x1d4   : > { %v2556_v56 = vrot.slane %v2528_v46, %v20180_v15 }
 0x1d7   : > { %9876 = vmatmul.mubr.bf16.vlgmr.msra.gmra.mxu0 %v2437_v44  ;;  %v18520_v44 = vcombine.low %v1352_v17, %v1608_v18 }
 0x1d8   : > { %9938 = vmatpush1.bf16.xpose.msra.mxu0 %v18506_v49  ;;  %9955 = vmatprep.mubr.bf16.mxu0 %v2458_v45  ;;  %v2559_v45 = vcombine.high %v2549_v31, %v2549_v31  ;;  %v18525_v49 = vcombine.high %v1354_v38, %v1610_v39 }
 0x1d9   : > { %9916 = vmatmul.mubr.bf16.vlgmr.msra.gmra.mxu1 %v2459_v52  ;;  %10017 = vmatprep.subr.bf16.mxu0 %v18511_v53 }
 0x1da   : > { %9978 = vmatpush1.bf16.xpose.msra.mxu1 %v18508_v54  ;;  %9995 = vmatprep.mubr.bf16.mxu1 %v2462_v55  ;;  %v2535_v54 = vrot.slane %v2519_v14, %v20180_v15 }
 0x1db   : > { %10057 = vmatprep.subr.bf16.mxu1 %v18513_v58  ;;  %v1611_v58 = vld [vmem:[%s20167_s28 + $0x9c0] sm:$0x11] }
 0x1dc   : > { %v18526_v24 = vcombine.low %v1355_v57, %v1611_v58 }
 0x1df   : > { %9956 = vmatmul.mubr.bf16.vlgmr.msra.gmra.mxu0 %v2444_v59  ;;  %v2568_v59 = vrot.slane %v1249_v50, %v20180_v15 }
 0x1e0   : > { %10018 = vmatpush1.bf16.xpose.msra.mxu0 %v18510_v0  ;;  %10035 = vmatprep.mubr.bf16.mxu0 %v2500_v60  ;;  %v1612_v0 = vld [vmem:[%s20167_s28 + $0x9c8] sm:$0x11] }
 0x1e1   : > { %9996 = vmatmul.mubr.bf16.vlgmr.msra.gmra.mxu1 %v2460_v3  ;;  %10097 = vmatprep.subr.bf16.mxu0 %v18515_v4  ;;  %v2557_v3 = vcombine.high %v2535_v54, %v2535_v54  ;;  %v18527_v4 = vcombine.high %v1355_v57, %v1611_v58  ;;  %v2576_v7 = vcombine.high %v2568_v59, %v2568_v59 }
 0x1e2   : > { %10058 = vmatpush1.bf16.xpose.msra.mxu1 %v18512_v5  ;;  %10075 = vmatprep.mubr.bf16.mxu1 %v2510_v6  ;;  %v18524_v5 = vcombine.low %v1354_v38, %v1610_v39  ;;  %v2560_v6 = vcombine.high %v2556_v56, %v2556_v56 }
 0x1e3   : > { %10137 = vmatprep.subr.bf16.mxu1 %v18517_v8  ;;  %v2561_v8 = vcombine.high %v1249_v50, %v1249_v50  ;;  %v2598_v18 = vrot.slane %v2576_v7, %v20180_v15  ;;  %v1360_v50 = vld [vmem:[%s20167_s28 + $0x1e8] sm:$0xff] }
 0x1e5   : > { %v2608_v32 = vcombine.high %v2598_v18, %v2598_v18 }
 0x1e7   : > { %v8117_v25 = vpop.f32.mrf.mxu0  ;;  %10036 = vmatmul.mubr.bf16.vlgmr.msra.gmra.mxu0 %v2486_v10 }
 0x1e8   : > { %10098 = vmatpush1.bf16.xpose.msra.mxu0 %v18514_v16  ;;  %10115 = vmatprep.mubr.bf16.mxu0 %v2507_v11  ;;  %v18529_v11 = vcombine.high %v1356_v63, %v1612_v0  ;;  %v2542_v16 = vrot.slane %v2526_v34, %v20180_v15 }
 0x1e9   : > { %v8119_v27 = vpop.f32.mrf.mxu0  ;;  %v8157_v28 = vpop.f32.mrf.mxu1  ;;  %10076 = vmatmul.mubr.bf16.vlgmr.msra.gmra.mxu1 %v2508_v19  ;;  %10177 = vmatprep.subr.bf16.mxu0 %v18519_v20  ;;  %v1357_v19 = vld [vmem:[%s20167_s28 + $0x1d0] sm:$0xff] }
 0x1ea   : > { %v8158_v30 = vadd.f32 %v8157_v28, %v8117_v25  ;;  %10138 = vmatpush1.bf16.xpose.msra.mxu1 %v18516_v21  ;;  %10155 = vmatprep.mubr.bf16.mxu1 %v2511_v22  ;;  %v1613_v20 = vld [vmem:[%s20167_s28 + $0x9d0] sm:$0x11]  ;;  %v2575_v21 = vrot.slane %v2561_v8, %v20180_v15  ;;  %v1358_v25 = vld [vmem:[%s20167_s28 + $0x1d8] sm:$0xff] }
 0x1eb   : > { %v8120_v35 = vpop.f32.mrf.mxu0  ;;  %v8159_v36 = vpop.f32.mrf.mxu1  ;;  %10217 = vmatprep.subr.bf16.mxu1 %v18521_v26  ;;  %v1614_v26 = vld [vmem:[%s20167_s28 + $0x9d8] sm:$0x11] }
 0x1ec   : > { %v2577_v33 = vcombine.high %v2575_v21, %v2575_v21  ;;  %v18533_v36 = vcombine.high %v1358_v25, %v1614_v26 }
 0x1ed   : > { %v8121_v40 = vpop.f32.mrf.mxu0  ;;  %v8160_v41 = vpop.f32.mrf.mxu1 }
 0x1ee   : > { %v2584_v41 = vrot.slane %v2568_v59, %v20180_v15 }
 0x1ef   : > { %v8161_v47 = vpop.f32.mrf.mxu1  ;;  %v8197_v48 = vpop.f32.mrf.mxu0  ;;  %10116 = vmatmul.mubr.bf16.vlgmr.msra.gmra.mxu0 %v2493_v29  ;;  %v2558_v29 = vcombine.high %v2542_v16, %v2542_v16 }
 0x1f0   : > { %v8198_v51 = vadd.f32 %v8197_v48, %v8158_v30  ;;  %10178 = vmatpush1.bf16.xpose.msra.mxu0 %v18518_v37  ;;  %10195 = vmatprep.mubr.bf16.mxu0 %v2549_v31  ;;  %v18531_v30 = vcombine.high %v1357_v19, %v1613_v20  ;;  %v18528_v31 = vcombine.low %v1356_v63, %v1612_v0  ;;  %v1250_v37 = vld [vmem:[%s20178_s3 + $0x78] sm:$0xff] }
 0x1f1   : > { %v8199_v52 = vpop.f32.mrf.mxu0  ;;  %v8237_v53 = vpop.f32.mrf.mxu1  ;;  %10156 = vmatmul.mubr.bf16.vlgmr.msra.gmra.mxu1 %v2509_v42  ;;  %10257 = vmatprep.subr.bf16.mxu0 %v18523_v43  ;;  %v2605_v43 = vrot.slane %v2577_v33, %v20180_v15  ;;  %v2617_v46 = vrot.slane %v1250_v37, %v20180_v15  ;;  %v2610_v59 = vcombine.high %v1250_v37, %v1250_v37  ;;  %v1364_v37 = vld [vmem:[%s20167_s28 + $0x208] sm:$0xff] }
 0x1f2   : > { %v8238_v55 = vadd.f32 %v8237_v53, %v8198_v51  ;;  %10218 = vmatpush1.bf16.xpose.msra.mxu1 %v18520_v44  ;;  %10235 = vmatprep.mubr.bf16.mxu1 %v2559_v45  ;;  %v1359_v44 = vld [vmem:[%s20167_s28 + $0x1e0] sm:$0xff]  ;;  %v1616_v51 = vld [vmem:[%s20167_s28 + $0x9e8] sm:$0x11] }
 0x1f3   : > { %v8200_v60 = vpop.f32.mrf.mxu0  ;;  %v8239_v61 = vpop.f32.mrf.mxu1  ;;  %10297 = vmatprep.subr.bf16.mxu1 %v18525_v49  ;;  %v1615_v45 = vld [vmem:[%s20167_s28 + $0x9e0] sm:$0x11]  ;;  %v18530_v49 = vcombine.low %v1357_v19, %v1613_v20  ;;  %v2609_v57 = vcombine.high %v2605_v43, %v2605_v43  ;;  %v2625_v58 = vcombine.high %v2617_v46, %v2617_v46  ;;  %v2624_v7 = vrot.slane %v2610_v59, %v20180_v15 }
 0x1f5   : > { %v8201_v1 = vpop.f32.mrf.mxu0  ;;  %v8240_v2 = vpop.f32.mrf.mxu1  ;;  %v2626_v20 = vcombine.high %v2624_v7, %v2624_v7 }
 0x1f6   : > { %v2591_v2 = vrot.slane %v2575_v21, %v20180_v15 }
 0x1f7   : > { %v8241_v9 = vpop.f32.mrf.mxu1  ;;  %v8277_v10 = vpop.f32.mrf.mxu0  ;;  %10196 = vmatmul.mubr.bf16.vlgmr.msra.gmra.mxu0 %v2535_v54  ;;  %v2606_v54 = vcombine.high %v2584_v41, %v2584_v41 }
 0x1f8   : > { %v8278_v12 = vadd.f32 %v8277_v10, %v8238_v55  ;;  %10258 = vmatpush1.bf16.xpose.msra.mxu0 %v18522_v62  ;;  %10275 = vmatprep.mubr.bf16.mxu0 %v2556_v56  ;;  %v18535_v55 = vcombine.high %v1359_v44, %v1615_v45  ;;  %v18532_v56 = vcombine.low %v1358_v25, %v1614_v26 }
 0x1f9   : > { %v8279_v13 = vpop.f32.mrf.mxu0  ;;  %v8317_v14 = vpop.f32.mrf.mxu1  ;;  %10236 = vmatmul.mubr.bf16.vlgmr.msra.gmra.mxu1 %v2557_v3  ;;  %10337 = vmatprep.subr.bf16.mxu0 %v18527_v4  ;;  %v18537_v62 = vcombine.high %v1360_v50, %v1616_v51  ;;  %v2647_v4 = vrot.slane %v2625_v58, %v20180_v15  ;;  %v18534_v10 = vcombine.low %v1359_v44, %v1615_v45 }
 0x1fa   : > { %v8318_v17 = vadd.f32 %v8317_v14, %v8278_v12  ;;  %10298 = vmatpush1.bf16.xpose.msra.mxu1 %v18524_v5  ;;  %10315 = vmatprep.mubr.bf16.mxu1 %v2560_v6  ;;  %v1361_v5 = vld [vmem:[%s20167_s28 + $0x1f0] sm:$0xff]  ;;  %v1618_v12 = vld [vmem:[%s20167_s28 + $0x9f8] sm:$0x11] }
 0x1fb   : > { %v8280_v22 = vpop.f32.mrf.mxu0  ;;  %v8319_v23 = vpop.f32.mrf.mxu1  ;;  %10377 = vmatprep.subr.bf16.mxu1 %v18529_v11  ;;  %v1617_v6 = vld [vmem:[%s20167_s28 + $0x9f0] sm:$0x11]  ;;  %v1362_v11 = vld [vmem:[%s20167_s28 + $0x1f8] sm:$0xff]  ;;  %v2657_v19 = vcombine.high %v2647_v4, %v2647_v4 }
 0x1fc   : > { %v18541_v23 = vcombine.high %v1362_v11, %v1618_v12 }
 0x1fd   : > { %v8281_v27 = vpop.f32.mrf.mxu0  ;;  %v8320_v28 = vpop.f32.mrf.mxu1 }
 0x1fe   : > { %v2633_v28 = vrot.slane %v2617_v46, %v20180_v15 }
 0x1ff   : > { %v8321_v34 = vpop.f32.mrf.mxu1  ;;  %v8357_v35 = vpop.f32.mrf.mxu0  ;;  %10276 = vmatmul.mubr.bf16.vlgmr.msra.gmra.mxu0 %v2542_v16  ;;  %v2607_v16 = vcombine.high %v2591_v2, %v2591_v2 }
 0x200   : > { %v8358_v38 = vadd.f32 %v8357_v35, %v8318_v17  ;;  %10338 = vmatpush1.bf16.xpose.msra.mxu0 %v18526_v24  ;;  %10355 = vmatprep.mubr.bf16.mxu0 %v2598_v18  ;;  %v18539_v17 = vcombine.high %v1361_v5, %v1617_v6  ;;  %v18536_v18 = vcombine.low %v1360_v50, %v1616_v51  ;;  %v1251_v24 = vld [vmem:[%s20178_s3 + $0x80] sm:$0xff] }
 0x201   : > { %v8359_v39 = vpop.f32.mrf.mxu0  ;;  %v8397_v40 = vpop.f32.mrf.mxu1  ;;  %10316 = vmatmul.mubr.bf16.vlgmr.msra.gmra.mxu1 %v2558_v29  ;;  %10417 = vmatprep.subr.bf16.mxu0 %v18531_v30  ;;  %v2654_v30 = vrot.slane %v2626_v20, %v20180_v15  ;;  %v2666_v33 = vrot.slane %v1251_v24, %v20180_v15  ;;  %v2659_v46 = vcombine.high %v1251_v24, %v1251_v24  ;;  %v1368_v24 = vld [vmem:[%s20167_s28 + $0x228] sm:$0xff] }
 0x202   : > { %v8398_v42 = vadd.f32 %v8397_v40, %v8358_v38  ;;  %10378 = vmatpush1.bf16.xpose.msra.mxu1 %v18528_v31  ;;  %10395 = vmatprep.mubr.bf16.mxu1 %v2608_v32  ;;  %v1363_v31 = vld [vmem:[%s20167_s28 + $0x200] sm:$0xff]  ;;  %v1620_v38 = vld [vmem:[%s20167_s28 + $0xa08] sm:$0x11] }
 0x203   : > { %v8360_v47 = vpop.f32.mrf.mxu0  ;;  %v8399_v48 = vpop.f32.mrf.mxu1  ;;  %10457 = vmatprep.subr.bf16.mxu1 %v18533_v36  ;;  %v1619_v32 = vld [vmem:[%s20167_s28 + $0xa00] sm:$0x11]  ;;  %v18538_v36 = vcombine.low %v1361_v5, %v1617_v6  ;;  %v2658_v44 = vcombine.high %v2654_v30, %v2654_v30  ;;  %v2674_v45 = vcombine.high %v2666_v33, %v2666_v33  ;;  %v2673_v58 = vrot.slane %v2659_v46, %v20180_v15 }
 0x205   : > { %v8361_v52 = vpop.f32.mrf.mxu0  ;;  %v8400_v53 = vpop.f32.mrf.mxu1  ;;  %v2675_v6 = vcombine.high %v2673_v58, %v2673_v58 }
 0x206   : > { %v2640_v53 = vrot.slane %v2624_v7, %v20180_v15 }
 0x207   : > { %v8401_v60 = vpop.f32.mrf.mxu1  ;;  %v8437_v61 = vpop.f32.mrf.mxu0  ;;  %10356 = vmatmul.mubr.bf16.vlgmr.msra.gmra.mxu0 %v2584_v41  ;;  %v2655_v41 = vcombine.high %v2633_v28, %v2633_v28 }
 0x208   : > { %v8438_v63 = vadd.f32 %v8437_v61, %v8398_v42  ;;  %10418 = vmatpush1.bf16.xpose.msra.mxu0 %v18530_v49  ;;  %10435 = vmatprep.mubr.bf16.mxu0 %v2605_v43  ;;  %v18543_v42 = vcombine.high %v1363_v31, %v1619_v32  ;;  %v18540_v43 = vcombine.low %v1362_v11, %v1618_v12 }
 0x209   : > { %v8439_v0 = vpop.f32.mrf.mxu0  ;;  %v8477_v1 = vpop.f32.mrf.mxu1  ;;  %10396 = vmatmul.mubr.bf16.vlgmr.msra.gmra.mxu1 %v2606_v54  ;;  %10497 = vmatprep.subr.bf16.mxu0 %v18535_v55  ;;  %v18545_v49 = vcombine.high %v1364_v37, %v1620_v38  ;;  %v2696_v55 = vrot.slane %v2674_v45, %v20180_v15  ;;  %v18542_v61 = vcombine.low %v1363_v31, %v1619_v32 }
 0x20a   : > { %v8478_v3 = vadd.f32 %v8477_v1, %v8438_v63  ;;  %10458 = vmatpush1.bf16.xpose.msra.mxu1 %v18532_v56  ;;  %10475 = vmatprep.mubr.bf16.mxu1 %v2609_v57  ;;  %v1365_v56 = vld [vmem:[%s20167_s28 + $0x210] sm:$0xff]  ;;  %v1622_v63 = vld [vmem:[%s20167_s28 + $0xa18] sm:$0x11] }
 0x20b   : > { %v8440_v8 = vpop.f32.mrf.mxu0  ;;  %v8479_v9 = vpop.f32.mrf.mxu1  ;;  %10537 = vmatprep.subr.bf16.mxu1 %v18537_v62  ;;  %v1621_v57 = vld [vmem:[%s20167_s28 + $0xa10] sm:$0x11]  ;;  %v1366_v62 = vld [vmem:[%s20167_s28 + $0x218] sm:$0xff]  ;;  %v2706_v5 = vcombine.high %v2696_v55, %v2696_v55 }
 0x20c   : > { %v18549_v9 = vcombine.high %v1366_v62, %v1622_v63 }
 0x20d   : > { %v8441_v13 = vpop.f32.mrf.mxu0  ;;  %v8480_v14 = vpop.f32.mrf.mxu1 }
 0x20e   : > { %v2682_v14 = vrot.slane %v2666_v33, %v20180_v15 }
 0x20f   : > { %v8481_v21 = vpop.f32.mrf.mxu1  ;;  %v8517_v22 = vpop.f32.mrf.mxu0  ;;  %10436 = vmatmul.mubr.bf16.vlgmr.msra.gmra.mxu0 %v2591_v2  ;;  %v2656_v2 = vcombine.high %v2640_v53, %v2640_v53 }
 0x210   : > { %v8518_v25 = vadd.f32 %v8517_v22, %v8478_v3  ;;  %10498 = vmatpush1.bf16.xpose.msra.mxu0 %v18534_v10  ;;  %10515 = vmatprep.mubr.bf16.mxu0 %v2647_v4  ;;  %v18547_v3 = vcombine.high %v1365_v56, %v1621_v57  ;;  %v18544_v4 = vcombine.low %v1364_v37, %v1620_v38  ;;  %v1252_v10 = vld [vmem:[%s20178_s3 + $0x88] sm:$0xff] }
 0x211   : > { %v8519_v26 = vpop.f32.mrf.mxu0  ;;  %v8557_v27 = vpop.f32.mrf.mxu1  ;;  %10476 = vmatmul.mubr.bf16.vlgmr.msra.gmra.mxu1 %v2607_v16  ;;  %10577 = vmatprep.subr.bf16.mxu0 %v18539_v17  ;;  %v2703_v17 = vrot.slane %v2675_v6, %v20180_v15  ;;  %v2715_v20 = vrot.slane %v1252_v10, %v20180_v15  ;;  %v2708_v33 = vcombine.high %v1252_v10, %v1252_v10  ;;  %v1372_v10 = vld [vmem:[%s20167_s28 + $0x248] sm:$0xff] }
 0x212   : > { %v8558_v29 = vadd.f32 %v8557_v27, %v8518_v25  ;;  %10538 = vmatpush1.bf16.xpose.msra.mxu1 %v18536_v18  ;;  %10555 = vmatprep.mubr.bf16.mxu1 %v2657_v19  ;;  %v1367_v18 = vld [vmem:[%s20167_s28 + $0x220] sm:$0xff]  ;;  %v1624_v25 = vld [vmem:[%s20167_s28 + $0xa28] sm:$0x11] }
 0x213   : > { %v8520_v34 = vpop.f32.mrf.mxu0  ;;  %v8559_v35 = vpop.f32.mrf.mxu1  ;;  %10617 = vmatprep.subr.bf16.mxu1 %v18541_v23  ;;  %v1623_v19 = vld [vmem:[%s20167_s28 + $0xa20] sm:$0x11]  ;;  %v18546_v23 = vcombine.low %v1365_v56, %v1621_v57  ;;  %v2707_v31 = vcombine.high %v2703_v17, %v2703_v17  ;;  %v2723_v32 = vcombine.high %v2715_v20, %v2715_v20  ;;  %v2722_v45 = vrot.slane %v2708_v33, %v20180_v15 }
 0x215   : > { %v8521_v39 = vpop.f32.mrf.mxu0  ;;  %v8560_v40 = vpop.f32.mrf.mxu1  ;;  %v2724_v57 = vcombine.high %v2722_v45, %v2722_v45 }
 0x216   : > { %v2689_v40 = vrot.slane %v2673_v58, %v20180_v15 }
 0x217   : > { %v8561_v47 = vpop.f32.mrf.mxu1  ;;  %v8597_v48 = vpop.f32.mrf.mxu0  ;;  %10516 = vmatmul.mubr.bf16.vlgmr.msra.gmra.mxu0 %v2633_v28  ;;  %v2704_v28 = vcombine.high %v2682_v14, %v2682_v14 }
 0x218   : > { %v8598_v50 = vadd.f32 %v8597_v48, %v8558_v29  ;;  %10578 = vmatpush1.bf16.xpose.msra.mxu0 %v18538_v36  ;;  %10595 = vmatprep.mubr.bf16.mxu0 %v2654_v30  ;;  %v18551_v29 = vcombine.high %v1367_v18, %v1623_v19  ;;  %v18548_v30 = vcombine.low %v1366_v62, %v1622_v63 }
 0x219   : > { %v8599_v51 = vpop.f32.mrf.mxu0  ;;  %v8637_v52 = vpop.f32.mrf.mxu1  ;;  %10556 = vmatmul.mubr.bf16.vlgmr.msra.gmra.mxu1 %v2655_v41  ;;  %10657 = vmatprep.subr.bf16.mxu0 %v18543_v42  ;;  %v18553_v36 = vcombine.high %v1368_v24, %v1624_v25  ;;  %v2745_v42 = vrot.slane %v2723_v32, %v20180_v15  ;;  %v18550_v48 = vcombine.low %v1367_v18, %v1623_v19 }
 0x21a   : > { %v8638_v54 = vadd.f32 %v8637_v52, %v8598_v50  ;;  %10618 = vmatpush1.bf16.xpose.msra.mxu1 %v18540_v43  ;;  %10635 = vmatprep.mubr.bf16.mxu1 %v2658_v44  ;;  %v1369_v43 = vld [vmem:[%s20167_s28 + $0x230] sm:$0xff]  ;;  %v1626_v50 = vld [vmem:[%s20167_s28 + $0xa38] sm:$0x11] }
 0x21b   : > { %v8600_v59 = vpop.f32.mrf.mxu0  ;;  %v8639_v60 = vpop.f32.mrf.mxu1  ;;  %10697 = vmatprep.subr.bf16.mxu1 %v18545_v49  ;;  %v1625_v44 = vld [vmem:[%s20167_s28 + $0xa30] sm:$0x11]  ;;  %v1370_v49 = vld [vmem:[%s20167_s28 + $0x238] sm:$0xff]  ;;  %v2755_v56 = vcombine.high %v2745_v42, %v2745_v42 }
 0x21c   : > { %v18557_v60 = vcombine.high %v1370_v49, %v1626_v50 }
 0x21d   : > { %v8601_v0 = vpop.f32.mrf.mxu0  ;;  %v8640_v1 = vpop.f32.mrf.mxu1 }
 0x21e   : > { %v2731_v1 = vrot.slane %v2715_v20, %v20180_v15 }
 0x21f   : > { %v8641_v7 = vpop.f32.mrf.mxu1  ;;  %v8677_v8 = vpop.f32.mrf.mxu0  ;;  %10596 = vmatmul.mubr.bf16.vlgmr.msra.gmra.mxu0 %v2640_v53  ;;  %v2705_v53 = vcombine.high %v2689_v40, %v2689_v40 }
 0x220   : > { %v8678_v11 = vadd.f32 %v8677_v8, %v8638_v54  ;;  %10658 = vmatpush1.bf16.xpose.msra.mxu0 %v18542_v61  ;;  %10675 = vmatprep.mubr.bf16.mxu0 %v2696_v55  ;;  %v18555_v54 = vcombine.high %v1369_v43, %v1625_v44  ;;  %v18552_v55 = vcombine.low %v1368_v24, %v1624_v25  ;;  %v1253_v61 = vld [vmem:[%s20178_s3 + $0x90] sm:$0xff] }
 0x221   : > { %v8679_v12 = vpop.f32.mrf.mxu0  ;;  %v8717_v13 = vpop.f32.mrf.mxu1  ;;  %10636 = vmatmul.mubr.bf16.vlgmr.msra.gmra.mxu1 %v2656_v2  ;;  %10737 = vmatprep.subr.bf16.mxu0 %v18547_v3  ;;  %v2752_v3 = vrot.slane %v2724_v57, %v20180_v15  ;;  %v2764_v6 = vrot.slane %v1253_v61, %v20180_v15  ;;  %v2757_v20 = vcombine.high %v1253_v61, %v1253_v61  ;;  %v1376_v61 = vld [vmem:[%s20167_s28 + $0x268] sm:$0xff] }
 0x222   : > { %v8718_v16 = vadd.f32 %v8717_v13, %v8678_v11  ;;  %10698 = vmatpush1.bf16.xpose.msra.mxu1 %v18544_v4  ;;  %10715 = vmatprep.mubr.bf16.mxu1 %v2706_v5  ;;  %v1371_v4 = vld [vmem:[%s20167_s28 + $0x240] sm:$0xff]  ;;  %v1628_v11 = vld [vmem:[%s20167_s28 + $0xa48] sm:$0x11] }
 0x223   : > { %v8680_v21 = vpop.f32.mrf.mxu0  ;;  %v8719_v22 = vpop.f32.mrf.mxu1  ;;  %10777 = vmatprep.subr.bf16.mxu1 %v18549_v9  ;;  %v1627_v5 = vld [vmem:[%s20167_s28 + $0xa40] sm:$0x11]  ;;  %v18554_v9 = vcombine.low %v1369_v43, %v1625_v44  ;;  %v2756_v18 = vcombine.high %v2752_v3, %v2752_v3  ;;  %v2772_v19 = vcombine.high %v2764_v6, %v2764_v6  ;;  %v2771_v32 = vrot.slane %v2757_v20, %v20180_v15 }
 0x225   : > { %v8681_v26 = vpop.f32.mrf.mxu0  ;;  %v8720_v27 = vpop.f32.mrf.mxu1  ;;  %v2773_v44 = vcombine.high %v2771_v32, %v2771_v32 }
 0x226   : > { %v2738_v27 = vrot.slane %v2722_v45, %v20180_v15 }
 0x227   : > { %v8721_v34 = vpop.f32.mrf.mxu1  ;;  %v8757_v35 = vpop.f32.mrf.mxu0  ;;  %10676 = vmatmul.mubr.bf16.vlgmr.msra.gmra.mxu0 %v2682_v14  ;;  %v2753_v14 = vcombine.high %v2731_v1, %v2731_v1 }
 0x228   : > { %v8758_v37 = vadd.f32 %v8757_v35, %v8718_v16  ;;  %10738 = vmatpush1.bf16.xpose.msra.mxu0 %v18546_v23  ;;  %10755 = vmatprep.mubr.bf16.mxu0 %v2703_v17  ;;  %v18559_v16 = vcombine.high %v1371_v4, %v1627_v5  ;;  %v18556_v17 = vcombine.low %v1370_v49, %v1626_v50 }
 0x229   : > { %v8759_v38 = vpop.f32.mrf.mxu0  ;;  %v8797_v39 = vpop.f32.mrf.mxu1  ;;  %10716 = vmatmul.mubr.bf16.vlgmr.msra.gmra.mxu1 %v2704_v28  ;;  %10817 = vmatprep.subr.bf16.mxu0 %v18551_v29  ;;  %v18561_v23 = vcombine.high %v1372_v10, %v1628_v11  ;;  %v2794_v29 = vrot.slane %v2772_v19, %v20180_v15  ;;  %v18558_v35 = vcombine.low %v1371_v4, %v1627_v5 }
 0x22a   : > { %v8798_v41 = vadd.f32 %v8797_v39, %v8758_v37  ;;  %10778 = vmatpush1.bf16.xpose.msra.mxu1 %v18548_v30  ;;  %10795 = vmatprep.mubr.bf16.mxu1 %v2707_v31  ;;  %v1373_v30 = vld [vmem:[%s20167_s28 + $0x250] sm:$0xff]  ;;  %v1630_v37 = vld [vmem:[%s20167_s28 + $0xa58] sm:$0x11] }
 0x22b   : > { %v8760_v46 = vpop.f32.mrf.mxu0  ;;  %v8799_v47 = vpop.f32.mrf.mxu1  ;;  %10857 = vmatprep.subr.bf16.mxu1 %v18553_v36  ;;  %v1629_v31 = vld [vmem:[%s20167_s28 + $0xa50] sm:$0x11]  ;;  %v1374_v36 = vld [vmem:[%s20167_s28 + $0x258] sm:$0xff]  ;;  %v2804_v43 = vcombine.high %v2794_v29, %v2794_v29 }
 0x22c   : > { %v18565_v47 = vcombine.high %v1374_v36, %v1630_v37 }
 0x22d   : > { %v8761_v51 = vpop.f32.mrf.mxu0  ;;  %v8800_v52 = vpop.f32.mrf.mxu1 }
 0x22e   : > { %v2780_v52 = vrot.slane %v2764_v6, %v20180_v15 }
 0x22f   : > { %v8801_v58 = vpop.f32.mrf.mxu1  ;;  %v8837_v59 = vpop.f32.mrf.mxu0  ;;  %10756 = vmatmul.mubr.bf16.vlgmr.msra.gmra.mxu0 %v2689_v40  ;;  %v2754_v40 = vcombine.high %v2738_v27, %v2738_v27 }
 0x230   : > { %v8838_v62 = vadd.f32 %v8837_v59, %v8798_v41  ;;  %10818 = vmatpush1.bf16.xpose.msra.mxu0 %v18550_v48  ;;  %10835 = vmatprep.mubr.bf16.mxu0 %v2745_v42  ;;  %v18563_v41 = vcombine.high %v1373_v30, %v1629_v31  ;;  %v18560_v42 = vcombine.low %v1372_v10, %v1628_v11  ;;  %v1254_v48 = vld [vmem:[%s20178_s3 + $0x98] sm:$0xff] }
 0x231   : > { %v8839_v63 = vpop.f32.mrf.mxu0  ;;  %v8877_v0 = vpop.f32.mrf.mxu1  ;;  %10796 = vmatmul.mubr.bf16.vlgmr.msra.gmra.mxu1 %v2705_v53  ;;  %10897 = vmatprep.subr.bf16.mxu0 %v18555_v54  ;;  %v2801_v54 = vrot.slane %v2773_v44, %v20180_v15  ;;  %v2813_v57 = vrot.slane %v1254_v48, %v20180_v15  ;;  %v2806_v6 = vcombine.high %v1254_v48, %v1254_v48  ;;  %v1380_v48 = vld [vmem:[%s20167_s28 + $0x288] sm:$0xff] }
 0x232   : > { %v8878_v2 = vadd.f32 %v8877_v0, %v8838_v62  ;;  %10858 = vmatpush1.bf16.xpose.msra.mxu1 %v18552_v55  ;;  %10875 = vmatprep.mubr.bf16.mxu1 %v2755_v56  ;;  %v1375_v55 = vld [vmem:[%s20167_s28 + $0x260] sm:$0xff]  ;;  %v1632_v62 = vld [vmem:[%s20167_s28 + $0xa68] sm:$0x11] }
 0x233   : > { %v8840_v7 = vpop.f32.mrf.mxu0  ;;  %v8879_v8 = vpop.f32.mrf.mxu1  ;;  %10937 = vmatprep.subr.bf16.mxu1 %v18557_v60  ;;  %v1631_v56 = vld [vmem:[%s20167_s28 + $0xa60] sm:$0x11]  ;;  %v18562_v60 = vcombine.low %v1373_v30, %v1629_v31  ;;  %v2805_v4 = vcombine.high %v2801_v54, %v2801_v54  ;;  %v2821_v5 = vcombine.high %v2813_v57, %v2813_v57  ;;  %v2820_v19 = vrot.slane %v2806_v6, %v20180_v15 }
 0x235   : > { %v8841_v12 = vpop.f32.mrf.mxu0  ;;  %v8880_v13 = vpop.f32.mrf.mxu1  ;;  %v2822_v31 = vcombine.high %v2820_v19, %v2820_v19 }
 0x236   : > { %v2787_v13 = vrot.slane %v2771_v32, %v20180_v15 }
 0x237   : > { %v8881_v21 = vpop.f32.mrf.mxu1  ;;  %v8917_v22 = vpop.f32.mrf.mxu0  ;;  %10836 = vmatmul.mubr.bf16.vlgmr.msra.gmra.mxu0 %v2731_v1  ;;  %v2802_v1 = vcombine.high %v2780_v52, %v2780_v52 }
 0x238   : > { %v8918_v24 = vadd.f32 %v8917_v22, %v8878_v2  ;;  %10898 = vmatpush1.bf16.xpose.msra.mxu0 %v18554_v9  ;;  %10915 = vmatprep.mubr.bf16.mxu0 %v2752_v3  ;;  %v18567_v2 = vcombine.high %v1375_v55, %v1631_v56  ;;  %v18564_v3 = vcombine.low %v1374_v36, %v1630_v37 }
 0x239   : > { %v8919_v25 = vpop.f32.mrf.mxu0  ;;  %v8957_v26 = vpop.f32.mrf.mxu1  ;;  %10876 = vmatmul.mubr.bf16.vlgmr.msra.gmra.mxu1 %v2753_v14  ;;  %10977 = vmatprep.subr.bf16.mxu0 %v18559_v16  ;;  %v18569_v9 = vcombine.high %v1376_v61, %v1632_v62  ;;  %v2843_v16 = vrot.slane %v2821_v5, %v20180_v15  ;;  %v18566_v22 = vcombine.low %v1375_v55, %v1631_v56 }
 0x23a   : > { %v8958_v28 = vadd.f32 %v8957_v26, %v8918_v24  ;;  %10938 = vmatpush1.bf16.xpose.msra.mxu1 %v18556_v17  ;;  %10955 = vmatprep.mubr.bf16.mxu1 %v2756_v18  ;;  %v1377_v17 = vld [vmem:[%s20167_s28 + $0x270] sm:$0xff]  ;;  %v1634_v24 = vld [vmem:[%s20167_s28 + $0xa78] sm:$0x11] }
 0x23b   : > { %v8920_v33 = vpop.f32.mrf.mxu0  ;;  %v8959_v34 = vpop.f32.mrf.mxu1  ;;  %11017 = vmatprep.subr.bf16.mxu1 %v18561_v23  ;;  %v1633_v18 = vld [vmem:[%s20167_s28 + $0xa70] sm:$0x11]  ;;  %v1378_v23 = vld [vmem:[%s20167_s28 + $0x278] sm:$0xff]  ;;  %v2853_v30 = vcombine.high %v2843_v16, %v2843_v16 }
 0x23c   : > { %v18573_v34 = vcombine.high %v1378_v23, %v1634_v24 }
 0x23d   : > { %v8921_v38 = vpop.f32.mrf.mxu0  ;;  %v8960_v39 = vpop.f32.mrf.mxu1 }
 0x23e   : > { %v2829_v39 = vrot.slane %v2813_v57, %v20180_v15 }
 0x23f   : > { %v8961_v45 = vpop.f32.mrf.mxu1  ;;  %v8997_v46 = vpop.f32.mrf.mxu0  ;;  %10916 = vmatmul.mubr.bf16.vlgmr.msra.gmra.mxu0 %v2738_v27  ;;  %v2803_v27 = vcombine.high %v2787_v13, %v2787_v13 }
 0x240   : > { %v8998_v49 = vadd.f32 %v8997_v46, %v8958_v28  ;;  %10978 = vmatpush1.bf16.xpose.msra.mxu0 %v18558_v35  ;;  %10995 = vmatprep.mubr.bf16.mxu0 %v2794_v29  ;;  %v18571_v28 = vcombine.high %v1377_v17, %v1633_v18  ;;  %v18568_v29 = vcombine.low %v1376_v61, %v1632_v62  ;;  %v1255_v35 = vld [vmem:[%s20178_s3 + $0xa0] sm:$0xff] }
 0x241   : > { %v8999_v50 = vpop.f32.mrf.mxu0  ;;  %v9037_v51 = vpop.f32.mrf.mxu1  ;;  %10956 = vmatmul.mubr.bf16.vlgmr.msra.gmra.mxu1 %v2754_v40  ;;  %11057 = vmatprep.subr.bf16.mxu0 %v18563_v41  ;;  %v2850_v41 = vrot.slane %v2822_v31, %v20180_v15  ;;  %v2862_v44 = vrot.slane %v1255_v35, %v20180_v15  ;;  %v2855_v57 = vcombine.high %v1255_v35, %v1255_v35  ;;  %v1384_v35 = vld [vmem:[%s20167_s28 + $0x2a8] sm:$0xff] }
 0x242   : > { %v9038_v53 = vadd.f32 %v9037_v51, %v8998_v49  ;;  %11018 = vmatpush1.bf16.xpose.msra.mxu1 %v18560_v42  ;;  %11035 = vmatprep.mubr.bf16.mxu1 %v2804_v43  ;;  %v1379_v42 = vld [vmem:[%s20167_s28 + $0x280] sm:$0xff]  ;;  %v1636_v49 = vld [vmem:[%s20167_s28 + $0xa88] sm:$0x11] }
 0x243   : > { %v9000_v58 = vpop.f32.mrf.mxu0  ;;  %v9039_v59 = vpop.f32.mrf.mxu1  ;;  %11097 = vmatprep.subr.bf16.mxu1 %v18565_v47  ;;  %v1635_v43 = vld [vmem:[%s20167_s28 + $0xa80] sm:$0x11]  ;;  %v18570_v47 = vcombine.low %v1377_v17, %v1633_v18  ;;  %v2854_v55 = vcombine.high %v2850_v41, %v2850_v41  ;;  %v2870_v56 = vcombine.high %v2862_v44, %v2862_v44  ;;  %v2869_v5 = vrot.slane %v2855_v57, %v20180_v15 }
 0x245   : > { %v9001_v63 = vpop.f32.mrf.mxu0  ;;  %v9040_v0 = vpop.f32.mrf.mxu1  ;;  %v2871_v18 = vcombine.high %v2869_v5, %v2869_v5 }
 0x246   : > { %v2836_v0 = vrot.slane %v2820_v19, %v20180_v15 }
 0x247   : > { %v9041_v7 = vpop.f32.mrf.mxu1  ;;  %v9077_v8 = vpop.f32.mrf.mxu0  ;;  %10996 = vmatmul.mubr.bf16.vlgmr.msra.gmra.mxu0 %v2780_v52  ;;  %v2851_v52 = vcombine.high %v2829_v39, %v2829_v39 }
 0x248   : > { %v9078_v10 = vadd.f32 %v9077_v8, %v9038_v53  ;;  %11058 = vmatpush1.bf16.xpose.msra.mxu0 %v18562_v60  ;;  %11075 = vmatprep.mubr.bf16.mxu0 %v2801_v54  ;;  %v18575_v53 = vcombine.high %v1379_v42, %v1635_v43  ;;  %v18572_v54 = vcombine.low %v1378_v23, %v1634_v24 }
 0x249   : > { %v9079_v11 = vpop.f32.mrf.mxu0  ;;  %v9117_v12 = vpop.f32.mrf.mxu1  ;;  %11036 = vmatmul.mubr.bf16.vlgmr.msra.gmra.mxu1 %v2802_v1  ;;  %11137 = vmatprep.subr.bf16.mxu0 %v18567_v2  ;;  %v18577_v60 = vcombine.high %v1380_v48, %v1636_v49  ;;  %v2892_v2 = vrot.slane %v2870_v56, %v20180_v15  ;;  %v18574_v8 = vcombine.low %v1379_v42, %v1635_v43 }
 0x24a   : > { %v9118_v14 = vadd.f32 %v9117_v12, %v9078_v10  ;;  %11098 = vmatpush1.bf16.xpose.msra.mxu1 %v18564_v3  ;;  %11115 = vmatprep.mubr.bf16.mxu1 %v2805_v4  ;;  %v1381_v3 = vld [vmem:[%s20167_s28 + $0x290] sm:$0xff]  ;;  %v1638_v10 = vld [vmem:[%s20167_s28 + $0xa98] sm:$0x11] }
 0x24b   : > { %v9080_v20 = vpop.f32.mrf.mxu0  ;;  %v9119_v21 = vpop.f32.mrf.mxu1  ;;  %11177 = vmatprep.subr.bf16.mxu1 %v18569_v9  ;;  %v1637_v4 = vld [vmem:[%s20167_s28 + $0xa90] sm:$0x11]  ;;  %v1382_v9 = vld [vmem:[%s20167_s28 + $0x298] sm:$0xff]  ;;  %v2902_v17 = vcombine.high %v2892_v2, %v2892_v2 }
 0x24c   : > { %v18581_v21 = vcombine.high %v1382_v9, %v1638_v10 }
 0x24d   : > { %v9081_v25 = vpop.f32.mrf.mxu0  ;;  %v9120_v26 = vpop.f32.mrf.mxu1 }
 0x24e   : > { %v2878_v26 = vrot.slane %v2862_v44, %v20180_v15 }
 0x24f   : > { %v9121_v32 = vpop.f32.mrf.mxu1  ;;  %v9157_v33 = vpop.f32.mrf.mxu0  ;;  %11076 = vmatmul.mubr.bf16.vlgmr.msra.gmra.mxu0 %v2787_v13  ;;  %v2852_v13 = vcombine.high %v2836_v0, %v2836_v0 }
 0x250   : > { %v9158_v36 = vadd.f32 %v9157_v33, %v9118_v14  ;;  %11138 = vmatpush1.bf16.xpose.msra.mxu0 %v18566_v22  ;;  %11155 = vmatprep.mubr.bf16.mxu0 %v2843_v16  ;;  %v18579_v14 = vcombine.high %v1381_v3, %v1637_v4  ;;  %v18576_v16 = vcombine.low %v1380_v48, %v1636_v49  ;;  %v1256_v22 = vld [vmem:[%s20178_s3 + $0xa8] sm:$0xff] }
 0x251   : > { %v9159_v37 = vpop.f32.mrf.mxu0  ;;  %v9197_v38 = vpop.f32.mrf.mxu1  ;;  %11116 = vmatmul.mubr.bf16.vlgmr.msra.gmra.mxu1 %v2803_v27  ;;  %11217 = vmatprep.subr.bf16.mxu0 %v18571_v28  ;;  %v2899_v28 = vrot.slane %v2871_v18, %v20180_v15  ;;  %v2911_v31 = vrot.slane %v1256_v22, %v20180_v15  ;;  %v2904_v44 = vcombine.high %v1256_v22, %v1256_v22  ;;  %v1388_v22 = vld [vmem:[%s20167_s28 + $0x2c8] sm:$0xff] }
 0x252   : > { %v9198_v40 = vadd.f32 %v9197_v38, %v9158_v36  ;;  %11178 = vmatpush1.bf16.xpose.msra.mxu1 %v18568_v29  ;;  %11195 = vmatprep.mubr.bf16.mxu1 %v2853_v30  ;;  %v1383_v29 = vld [vmem:[%s20167_s28 + $0x2a0] sm:$0xff]  ;;  %v1640_v36 = vld [vmem:[%s20167_s28 + $0xaa8] sm:$0x11] }
 0x253   : > { %v9160_v45 = vpop.f32.mrf.mxu0  ;;  %v9199_v46 = vpop.f32.mrf.mxu1  ;;  %11257 = vmatprep.subr.bf16.mxu1 %v18573_v34  ;;  %v1639_v30 = vld [vmem:[%s20167_s28 + $0xaa0] sm:$0x11]  ;;  %v18578_v34 = vcombine.low %v1381_v3, %v1637_v4  ;;  %v2903_v42 = vcombine.high %v2899_v28, %v2899_v28  ;;  %v2919_v43 = vcombine.high %v2911_v31, %v2911_v31  ;;  %v2918_v56 = vrot.slane %v2904_v44, %v20180_v15 }
 0x255   : > { %v9161_v50 = vpop.f32.mrf.mxu0  ;;  %v9200_v51 = vpop.f32.mrf.mxu1  ;;  %v2920_v4 = vcombine.high %v2918_v56, %v2918_v56 }
 0x256   : > { %v2885_v51 = vrot.slane %v2869_v5, %v20180_v15 }
 0x257   : > { %v9201_v58 = vpop.f32.mrf.mxu1  ;;  %v9237_v59 = vpop.f32.mrf.mxu0  ;;  %11156 = vmatmul.mubr.bf16.vlgmr.msra.gmra.mxu0 %v2829_v39  ;;  %v2900_v39 = vcombine.high %v2878_v26, %v2878_v26 }
 0x258   : > { %v9238_v61 = vadd.f32 %v9237_v59, %v9198_v40  ;;  %11218 = vmatpush1.bf16.xpose.msra.mxu0 %v18570_v47  ;;  %11235 = vmatprep.mubr.bf16.mxu0 %v2850_v41  ;;  %v18583_v40 = vcombine.high %v1383_v29, %v1639_v30  ;;  %v18580_v41 = vcombine.low %v1382_v9, %v1638_v10 }
 0x259   : > { %v9239_v62 = vpop.f32.mrf.mxu0  ;;  %v9277_v63 = vpop.f32.mrf.mxu1  ;;  %11196 = vmatmul.mubr.bf16.vlgmr.msra.gmra.mxu1 %v2851_v52  ;;  %11297 = vmatprep.subr.bf16.mxu0 %v18575_v53  ;;  %v18585_v47 = vcombine.high %v1384_v35, %v1640_v36  ;;  %v2941_v53 = vrot.slane %v2919_v43, %v20180_v15  ;;  %v18582_v59 = vcombine.low %v1383_v29, %v1639_v30 }
 0x25a   : > { %v9278_v1 = vadd.f32 %v9277_v63, %v9238_v61  ;;  %11258 = vmatpush1.bf16.xpose.msra.mxu1 %v18572_v54  ;;  %11275 = vmatprep.mubr.bf16.mxu1 %v2854_v55  ;;  %v1385_v54 = vld [vmem:[%s20167_s28 + $0x2b0] sm:$0xff]  ;;  %v1642_v61 = vld [vmem:[%s20167_s28 + $0xab8] sm:$0x11] }
 0x25b   : > { %v9240_v6 = vpop.f32.mrf.mxu0  ;;  %v9279_v7 = vpop.f32.mrf.mxu1  ;;  %11337 = vmatprep.subr.bf16.mxu1 %v18577_v60  ;;  %v1641_v55 = vld [vmem:[%s20167_s28 + $0xab0] sm:$0x11]  ;;  %v1386_v60 = vld [vmem:[%s20167_s28 + $0x2b8] sm:$0xff]  ;;  %v2951_v3 = vcombine.high %v2941_v53, %v2941_v53 }
 0x25c   : > { %v18589_v7 = vcombine.high %v1386_v60, %v1642_v61 }
 0x25d   : > { %v9241_v11 = vpop.f32.mrf.mxu0  ;;  %v9280_v12 = vpop.f32.mrf.mxu1 }
 0x25e   : > { %v2927_v12 = vrot.slane %v2911_v31, %v20180_v15 }
 0x25f   : > { %v9281_v19 = vpop.f32.mrf.mxu1  ;;  %v9317_v20 = vpop.f32.mrf.mxu0  ;;  %11236 = vmatmul.mubr.bf16.vlgmr.msra.gmra.mxu0 %v2836_v0  ;;  %v2901_v0 = vcombine.high %v2885_v51, %v2885_v51 }
 0x260   : > { %v9318_v23 = vadd.f32 %v9317_v20, %v9278_v1  ;;  %11298 = vmatpush1.bf16.xpose.msra.mxu0 %v18574_v8  ;;  %11315 = vmatprep.mubr.bf16.mxu0 %v2892_v2  ;;  %v18587_v1 = vcombine.high %v1385_v54, %v1641_v55  ;;  %v18584_v2 = vcombine.low %v1384_v35, %v1640_v36  ;;  %v1257_v8 = vld [vmem:[%s20178_s3 + $0xb0] sm:$0xff] }
 0x261   : > { %v9319_v24 = vpop.f32.mrf.mxu0  ;;  %v9357_v25 = vpop.f32.mrf.mxu1  ;;  %11276 = vmatmul.mubr.bf16.vlgmr.msra.gmra.mxu1 %v2852_v13  ;;  %11377 = vmatprep.subr.bf16.mxu0 %v18579_v14  ;;  %v2948_v14 = vrot.slane %v2920_v4, %v20180_v15  ;;  %v2960_v18 = vrot.slane %v1257_v8, %v20180_v15  ;;  %v2953_v31 = vcombine.high %v1257_v8, %v1257_v8  ;;  %v1392_v8 = vld [vmem:[%s20167_s28 + $0x2e8] sm:$0xff] }
 0x262   : > { %v9358_v27 = vadd.f32 %v9357_v25, %v9318_v23  ;;  %11338 = vmatpush1.bf16.xpose.msra.mxu1 %v18576_v16  ;;  %11355 = vmatprep.mubr.bf16.mxu1 %v2902_v17  ;;  %v1387_v16 = vld [vmem:[%s20167_s28 + $0x2c0] sm:$0xff]  ;;  %v1644_v23 = vld [vmem:[%s20167_s28 + $0xac8] sm:$0x11] }
 0x263   : > { %v9320_v32 = vpop.f32.mrf.mxu0  ;;  %v9359_v33 = vpop.f32.mrf.mxu1  ;;  %11417 = vmatprep.subr.bf16.mxu1 %v18581_v21  ;;  %v1643_v17 = vld [vmem:[%s20167_s28 + $0xac0] sm:$0x11]  ;;  %v18586_v21 = vcombine.low %v1385_v54, %v1641_v55  ;;  %v2952_v29 = vcombine.high %v2948_v14, %v2948_v14  ;;  %v2968_v30 = vcombine.high %v2960_v18, %v2960_v18  ;;  %v2967_v43 = vrot.slane %v2953_v31, %v20180_v15 }
 0x265   : > { %v9321_v37 = vpop.f32.mrf.mxu0  ;;  %v9360_v38 = vpop.f32.mrf.mxu1  ;;  %v2969_v55 = vcombine.high %v2967_v43, %v2967_v43 }
 0x266   : > { %v2934_v38 = vrot.slane %v2918_v56, %v20180_v15 }
 0x267   : > { %v9361_v45 = vpop.f32.mrf.mxu1  ;;  %v9397_v46 = vpop.f32.mrf.mxu0  ;;  %11316 = vmatmul.mubr.bf16.vlgmr.msra.gmra.mxu0 %v2878_v26  ;;  %v2949_v26 = vcombine.high %v2927_v12, %v2927_v12 }
 0x268   : > { %v9398_v48 = vadd.f32 %v9397_v46, %v9358_v27  ;;  %11378 = vmatpush1.bf16.xpose.msra.mxu0 %v18578_v34  ;;  %11395 = vmatprep.mubr.bf16.mxu0 %v2899_v28  ;;  %v18591_v27 = vcombine.high %v1387_v16, %v1643_v17  ;;  %v18588_v28 = vcombine.low %v1386_v60, %v1642_v61 }
 0x269   : > { %v9399_v49 = vpop.f32.mrf.mxu0  ;;  %v9437_v50 = vpop.f32.mrf.mxu1  ;;  %11356 = vmatmul.mubr.bf16.vlgmr.msra.gmra.mxu1 %v2900_v39  ;;  %11457 = vmatprep.subr.bf16.mxu0 %v18583_v40  ;;  %v18593_v34 = vcombine.high %v1388_v22, %v1644_v23  ;;  %v2990_v40 = vrot.slane %v2968_v30, %v20180_v15  ;;  %v18590_v46 = vcombine.low %v1387_v16, %v1643_v17 }
 0x26a   : > { %v9438_v52 = vadd.f32 %v9437_v50, %v9398_v48  ;;  %11418 = vmatpush1.bf16.xpose.msra.mxu1 %v18580_v41  ;;  %11435 = vmatprep.mubr.bf16.mxu1 %v2903_v42  ;;  %v1389_v41 = vld [vmem:[%s20167_s28 + $0x2d0] sm:$0xff]  ;;  %v1646_v48 = vld [vmem:[%s20167_s28 + $0xad8] sm:$0x11] }
 0x26b   : > { %v9400_v57 = vpop.f32.mrf.mxu0  ;;  %v9439_v58 = vpop.f32.mrf.mxu1  ;;  %11497 = vmatprep.subr.bf16.mxu1 %v18585_v47  ;;  %v1645_v42 = vld [vmem:[%s20167_s28 + $0xad0] sm:$0x11]  ;;  %v1390_v47 = vld [vmem:[%s20167_s28 + $0x2d8] sm:$0xff]  ;;  %v3000_v54 = vcombine.high %v2990_v40, %v2990_v40 }
 0x26c   : > { %v18597_v58 = vcombine.high %v1390_v47, %v1646_v48 }
 0x26d   : > { %v9401_v62 = vpop.f32.mrf.mxu0  ;;  %v9440_v63 = vpop.f32.mrf.mxu1 }
 0x26e   : > { %v2976_v63 = vrot.slane %v2960_v18, %v20180_v15 }
 0x26f   : > { %v9441_v5 = vpop.f32.mrf.mxu1  ;;  %v9477_v6 = vpop.f32.mrf.mxu0  ;;  %11396 = vmatmul.mubr.bf16.vlgmr.msra.gmra.mxu0 %v2885_v51  ;;  %v2950_v51 = vcombine.high %v2934_v38, %v2934_v38 }
 0x270   : > { %v9478_v9 = vadd.f32 %v9477_v6, %v9438_v52  ;;  %11458 = vmatpush1.bf16.xpose.msra.mxu0 %v18582_v59  ;;  %11475 = vmatprep.mubr.bf16.mxu0 %v2941_v53  ;;  %v18595_v52 = vcombine.high %v1389_v41, %v1645_v42  ;;  %v18592_v53 = vcombine.low %v1388_v22, %v1644_v23  ;;  %v1258_v59 = vld [vmem:[%s20178_s3 + $0xb8] sm:$0xff] }
 0x271   : > { %v9479_v10 = vpop.f32.mrf.mxu0  ;;  %v9517_v11 = vpop.f32.mrf.mxu1  ;;  %11436 = vmatmul.mubr.bf16.vlgmr.msra.gmra.mxu1 %v2901_v0  ;;  %11537 = vmatprep.subr.bf16.mxu0 %v18587_v1  ;;  %v2997_v1 = vrot.slane %v2969_v55, %v20180_v15  ;;  %v3009_v4 = vrot.slane %v1258_v59, %v20180_v15  ;;  %v3002_v18 = vcombine.high %v1258_v59, %v1258_v59  ;;  %v1396_v59 = vld [vmem:[%s20167_s28 + $0x308] sm:$0xff] }
 0x272   : > { %v9518_v13 = vadd.f32 %v9517_v11, %v9478_v9  ;;  %11498 = vmatpush1.bf16.xpose.msra.mxu1 %v18584_v2  ;;  %11515 = vmatprep.mubr.bf16.mxu1 %v2951_v3  ;;  %v1391_v2 = vld [vmem:[%s20167_s28 + $0x2e0] sm:$0xff]  ;;  %v1648_v9 = vld [vmem:[%s20167_s28 + $0xae8] sm:$0x11] }
 0x273   : > { %v9480_v19 = vpop.f32.mrf.mxu0  ;;  %v9519_v20 = vpop.f32.mrf.mxu1  ;;  %11577 = vmatprep.subr.bf16.mxu1 %v18589_v7  ;;  %v1647_v3 = vld [vmem:[%s20167_s28 + $0xae0] sm:$0x11]  ;;  %v18594_v7 = vcombine.low %v1389_v41, %v1645_v42  ;;  %v3001_v16 = vcombine.high %v2997_v1, %v2997_v1  ;;  %v3017_v17 = vcombine.high %v3009_v4, %v3009_v4  ;;  %v3016_v30 = vrot.slane %v3002_v18, %v20180_v15 }
 0x275   : > { %v9481_v24 = vpop.f32.mrf.mxu0  ;;  %v9520_v25 = vpop.f32.mrf.mxu1  ;;  %v3018_v42 = vcombine.high %v3016_v30, %v3016_v30 }
 0x276   : > { %v2983_v25 = vrot.slane %v2967_v43, %v20180_v15 }
 0x277   : > { %v9521_v32 = vpop.f32.mrf.mxu1  ;;  %v9557_v33 = vpop.f32.mrf.mxu0  ;;  %11476 = vmatmul.mubr.bf16.vlgmr.msra.gmra.mxu0 %v2927_v12  ;;  %v2998_v12 = vcombine.high %v2976_v63, %v2976_v63 }
 0x278   : > { %v9558_v35 = vadd.f32 %v9557_v33, %v9518_v13  ;;  %11538 = vmatpush1.bf16.xpose.msra.mxu0 %v18586_v21  ;;  %11555 = vmatprep.mubr.bf16.mxu0 %v2948_v14  ;;  %v18599_v13 = vcombine.high %v1391_v2, %v1647_v3  ;;  %v18596_v14 = vcombine.low %v1390_v47, %v1646_v48 }
 0x279   : > { %v9559_v36 = vpop.f32.mrf.mxu0  ;;  %v9597_v37 = vpop.f32.mrf.mxu1  ;;  %11516 = vmatmul.mubr.bf16.vlgmr.msra.gmra.mxu1 %v2949_v26  ;;  %11617 = vmatprep.subr.bf16.mxu0 %v18591_v27  ;;  %v18601_v21 = vcombine.high %v1392_v8, %v1648_v9  ;;  %v3039_v27 = vrot.slane %v3017_v17, %v20180_v15  ;;  %v18598_v33 = vcombine.low %v1391_v2, %v1647_v3 }
 0x27a   : > { %v9598_v39 = vadd.f32 %v9597_v37, %v9558_v35  ;;  %11578 = vmatpush1.bf16.xpose.msra.mxu1 %v18588_v28  ;;  %11595 = vmatprep.mubr.bf16.mxu1 %v2952_v29  ;;  %v1393_v28 = vld [vmem:[%s20167_s28 + $0x2f0] sm:$0xff]  ;;  %v1650_v35 = vld [vmem:[%s20167_s28 + $0xaf8] sm:$0x11] }
 0x27b   : > { %v9560_v44 = vpop.f32.mrf.mxu0  ;;  %v9599_v45 = vpop.f32.mrf.mxu1  ;;  %11657 = vmatprep.subr.bf16.mxu1 %v18593_v34  ;;  %v1649_v29 = vld [vmem:[%s20167_s28 + $0xaf0] sm:$0x11]  ;;  %v1394_v34 = vld [vmem:[%s20167_s28 + $0x2f8] sm:$0xff]  ;;  %v3049_v41 = vcombine.high %v3039_v27, %v3039_v27 }
 0x27c   : > { %v18605_v45 = vcombine.high %v1394_v34, %v1650_v35 }
 0x27d   : > { %v9561_v49 = vpop.f32.mrf.mxu0  ;;  %v9600_v50 = vpop.f32.mrf.mxu1 }
 0x27e   : > { %v3025_v50 = vrot.slane %v3009_v4, %v20180_v15 }
 0x27f   : > { %v9601_v56 = vpop.f32.mrf.mxu1  ;;  %v9637_v57 = vpop.f32.mrf.mxu0  ;;  %11556 = vmatmul.mubr.bf16.vlgmr.msra.gmra.mxu0 %v2934_v38  ;;  %v2999_v38 = vcombine.high %v2983_v25, %v2983_v25 }
 0x280   : > { %v9638_v60 = vadd.f32 %v9637_v57, %v9598_v39  ;;  %11618 = vmatpush1.bf16.xpose.msra.mxu0 %v18590_v46  ;;  %11635 = vmatprep.mubr.bf16.mxu0 %v2990_v40  ;;  %v18603_v39 = vcombine.high %v1393_v28, %v1649_v29  ;;  %v18600_v40 = vcombine.low %v1392_v8, %v1648_v9  ;;  %v1259_v46 = vld [vmem:[%s20178_s3 + $0xc0] sm:$0xff] }
 0x281   : > { %v9639_v61 = vpop.f32.mrf.mxu0  ;;  %v9677_v62 = vpop.f32.mrf.mxu1  ;;  %11596 = vmatmul.mubr.bf16.vlgmr.msra.gmra.mxu1 %v2950_v51  ;;  %11697 = vmatprep.subr.bf16.mxu0 %v18595_v52  ;;  %v3046_v52 = vrot.slane %v3018_v42, %v20180_v15  ;;  %v3058_v55 = vrot.slane %v1259_v46, %v20180_v15  ;;  %v3051_v4 = vcombine.high %v1259_v46, %v1259_v46  ;;  %v1400_v46 = vld [vmem:[%s20167_s28 + $0x328] sm:$0xff] }
 0x282   : > { %v9678_v0 = vadd.f32 %v9677_v62, %v9638_v60  ;;  %11658 = vmatpush1.bf16.xpose.msra.mxu1 %v18592_v53  ;;  %11675 = vmatprep.mubr.bf16.mxu1 %v3000_v54  ;;  %v1395_v53 = vld [vmem:[%s20167_s28 + $0x300] sm:$0xff]  ;;  %v1652_v60 = vld [vmem:[%s20167_s28 + $0xb08] sm:$0x11] }
 0x283   : > { %v9640_v5 = vpop.f32.mrf.mxu0  ;;  %v9679_v6 = vpop.f32.mrf.mxu1  ;;  %11737 = vmatprep.subr.bf16.mxu1 %v18597_v58  ;;  %v1651_v54 = vld [vmem:[%s20167_s28 + $0xb00] sm:$0x11]  ;;  %v18602_v58 = vcombine.low %v1393_v28, %v1649_v29  ;;  %v3050_v2 = vcombine.high %v3046_v52, %v3046_v52  ;;  %v3066_v3 = vcombine.high %v3058_v55, %v3058_v55  ;;  %v3065_v17 = vrot.slane %v3051_v4, %v20180_v15 }
 0x285   : > { %v9641_v10 = vpop.f32.mrf.mxu0  ;;  %v9680_v11 = vpop.f32.mrf.mxu1  ;;  %v3067_v29 = vcombine.high %v3065_v17, %v3065_v17 }
 0x286   : > { %v3032_v11 = vrot.slane %v3016_v30, %v20180_v15 }
 0x287   : > { %v9681_v19 = vpop.f32.mrf.mxu1  ;;  %v9717_v20 = vpop.f32.mrf.mxu0  ;;  %11636 = vmatmul.mubr.bf16.vlgmr.msra.gmra.mxu0 %v2976_v63  ;;  %v3047_v63 = vcombine.high %v3025_v50, %v3025_v50 }
 0x288   : > { %v9718_v22 = vadd.f32 %v9717_v20, %v9678_v0  ;;  %11698 = vmatpush1.bf16.xpose.msra.mxu0 %v18594_v7  ;;  %11715 = vmatprep.mubr.bf16.mxu0 %v2997_v1  ;;  %v18607_v0 = vcombine.high %v1395_v53, %v1651_v54  ;;  %v18604_v1 = vcombine.low %v1394_v34, %v1650_v35 }
 0x289   : > { %v9719_v23 = vpop.f32.mrf.mxu0  ;;  %v9757_v24 = vpop.f32.mrf.mxu1  ;;  %11676 = vmatmul.mubr.bf16.vlgmr.msra.gmra.mxu1 %v2998_v12  ;;  %11777 = vmatprep.subr.bf16.mxu0 %v18599_v13  ;;  %v18609_v7 = vcombine.high %v1396_v59, %v1652_v60  ;;  %v3088_v13 = vrot.slane %v3066_v3, %v20180_v15  ;;  %v18606_v20 = vcombine.low %v1395_v53, %v1651_v54 }
 0x28a   : > { %v9758_v26 = vadd.f32 %v9757_v24, %v9718_v22  ;;  %11738 = vmatpush1.bf16.xpose.msra.mxu1 %v18596_v14  ;;  %11755 = vmatprep.mubr.bf16.mxu1 %v3001_v16  ;;  %v1397_v14 = vld [vmem:[%s20167_s28 + $0x310] sm:$0xff]  ;;  %v1654_v22 = vld [vmem:[%s20167_s28 + $0xb18] sm:$0x11] }
 0x28b   : > { %v9720_v31 = vpop.f32.mrf.mxu0  ;;  %v9759_v32 = vpop.f32.mrf.mxu1  ;;  %11817 = vmatprep.subr.bf16.mxu1 %v18601_v21  ;;  %v1653_v16 = vld [vmem:[%s20167_s28 + $0xb10] sm:$0x11]  ;;  %v1398_v21 = vld [vmem:[%s20167_s28 + $0x318] sm:$0xff]  ;;  %v3098_v28 = vcombine.high %v3088_v13, %v3088_v13 }
 0x28c   : > { %v18613_v32 = vcombine.high %v1398_v21, %v1654_v22 }
 0x28d   : > { %v9721_v36 = vpop.f32.mrf.mxu0  ;;  %v9760_v37 = vpop.f32.mrf.mxu1 }
 0x28e   : > { %v3074_v37 = vrot.slane %v3058_v55, %v20180_v15 }
 0x28f   : > { %v9761_v43 = vpop.f32.mrf.mxu1  ;;  %v9797_v44 = vpop.f32.mrf.mxu0  ;;  %11716 = vmatmul.mubr.bf16.vlgmr.msra.gmra.mxu0 %v2983_v25  ;;  %v3048_v25 = vcombine.high %v3032_v11, %v3032_v11 }
 0x290   : > { %v9798_v47 = vadd.f32 %v9797_v44, %v9758_v26  ;;  %11778 = vmatpush1.bf16.xpose.msra.mxu0 %v18598_v33  ;;  %11795 = vmatprep.mubr.bf16.mxu0 %v3039_v27  ;;  %v18611_v26 = vcombine.high %v1397_v14, %v1653_v16  ;;  %v18608_v27 = vcombine.low %v1396_v59, %v1652_v60  ;;  %v1260_v33 = vld [vmem:[%s20178_s3 + $0xc8] sm:$0xff] }
 0x291   : > { %v9799_v48 = vpop.f32.mrf.mxu0  ;;  %v9837_v49 = vpop.f32.mrf.mxu1  ;;  %11756 = vmatmul.mubr.bf16.vlgmr.msra.gmra.mxu1 %v2999_v38  ;;  %11857 = vmatprep.subr.bf16.mxu0 %v18603_v39  ;;  %v3095_v39 = vrot.slane %v3067_v29, %v20180_v15  ;;  %v3107_v42 = vrot.slane %v1260_v33, %v20180_v15  ;;  %v3100_v55 = vcombine.high %v1260_v33, %v1260_v33  ;;  %v1404_v33 = vld [vmem:[%s20167_s28 + $0x348] sm:$0xff] }
 0x292   : > { %v9838_v51 = vadd.f32 %v9837_v49, %v9798_v47  ;;  %11818 = vmatpush1.bf16.xpose.msra.mxu1 %v18600_v40  ;;  %11835 = vmatprep.mubr.bf16.mxu1 %v3049_v41  ;;  %v1399_v40 = vld [vmem:[%s20167_s28 + $0x320] sm:$0xff]  ;;  %v1656_v47 = vld [vmem:[%s20167_s28 + $0xb28] sm:$0x11] }
 0x293   : > { %v9800_v56 = vpop.f32.mrf.mxu0  ;;  %v9839_v57 = vpop.f32.mrf.mxu1  ;;  %11897 = vmatprep.subr.bf16.mxu1 %v18605_v45  ;;  %v1655_v41 = vld [vmem:[%s20167_s28 + $0xb20] sm:$0x11]  ;;  %v18610_v45 = vcombine.low %v1397_v14, %v1653_v16  ;;  %v3099_v53 = vcombine.high %v3095_v39, %v3095_v39  ;;  %v3115_v54 = vcombine.high %v3107_v42, %v3107_v42  ;;  %v3114_v3 = vrot.slane %v3100_v55, %v20180_v15 }
 0x295   : > { %v9801_v61 = vpop.f32.mrf.mxu0  ;;  %v9840_v62 = vpop.f32.mrf.mxu1  ;;  %v3116_v16 = vcombine.high %v3114_v3, %v3114_v3 }
 0x296   : > { %v3081_v62 = vrot.slane %v3065_v17, %v20180_v15 }
 0x297   : > { %v9841_v5 = vpop.f32.mrf.mxu1  ;;  %v9877_v6 = vpop.f32.mrf.mxu0  ;;  %11796 = vmatmul.mubr.bf16.vlgmr.msra.gmra.mxu0 %v3025_v50  ;;  %v3096_v50 = vcombine.high %v3074_v37, %v3074_v37 }
 0x298   : > { %v9878_v8 = vadd.f32 %v9877_v6, %v9838_v51  ;;  %11858 = vmatpush1.bf16.xpose.msra.mxu0 %v18602_v58  ;;  %11875 = vmatprep.mubr.bf16.mxu0 %v3046_v52  ;;  %v18615_v51 = vcombine.high %v1399_v40, %v1655_v41  ;;  %v18612_v52 = vcombine.low %v1398_v21, %v1654_v22 }
 0x299   : > { %v9879_v9 = vpop.f32.mrf.mxu0  ;;  %v9917_v10 = vpop.f32.mrf.mxu1  ;;  %11836 = vmatmul.mubr.bf16.vlgmr.msra.gmra.mxu1 %v3047_v63  ;;  %11937 = vmatprep.subr.bf16.mxu0 %v18607_v0  ;;  %v18617_v58 = vcombine.high %v1400_v46, %v1656_v47  ;;  %v3137_v0 = vrot.slane %v3115_v54, %v20180_v15  ;;  %v18614_v6 = vcombine.low %v1399_v40, %v1655_v41 }
 0x29a   : > { %v9918_v12 = vadd.f32 %v9917_v10, %v9878_v8  ;;  %11898 = vmatpush1.bf16.xpose.msra.mxu1 %v18604_v1  ;;  %11915 = vmatprep.mubr.bf16.mxu1 %v3050_v2  ;;  %v1401_v1 = vld [vmem:[%s20167_s28 + $0x330] sm:$0xff]  ;;  %v1658_v8 = vld [vmem:[%s20167_s28 + $0xb38] sm:$0x11] }
 0x29b   : > { %v9880_v18 = vpop.f32.mrf.mxu0  ;;  %v9919_v19 = vpop.f32.mrf.mxu1  ;;  %11977 = vmatprep.subr.bf16.mxu1 %v18609_v7  ;;  %v1657_v2 = vld [vmem:[%s20167_s28 + $0xb30] sm:$0x11]  ;;  %v1402_v7 = vld [vmem:[%s20167_s28 + $0x338] sm:$0xff]  ;;  %v3147_v14 = vcombine.high %v3137_v0, %v3137_v0 }
 0x29c   : > { %v18621_v19 = vcombine.high %v1402_v7, %v1658_v8 }
 0x29d   : > { %v9881_v23 = vpop.f32.mrf.mxu0  ;;  %v9920_v24 = vpop.f32.mrf.mxu1 }
 0x29e   : > { %v3123_v24 = vrot.slane %v3107_v42, %v20180_v15 }
 0x29f   : > { %v9921_v30 = vpop.f32.mrf.mxu1  ;;  %v9957_v31 = vpop.f32.mrf.mxu0  ;;  %11876 = vmatmul.mubr.bf16.vlgmr.msra.gmra.mxu0 %v3032_v11  ;;  %v3097_v11 = vcombine.high %v3081_v62, %v3081_v62 }
 0x2a0   : > { %v9958_v34 = vadd.f32 %v9957_v31, %v9918_v12  ;;  %11938 = vmatpush1.bf16.xpose.msra.mxu0 %v18606_v20  ;;  %11955 = vmatprep.mubr.bf16.mxu0 %v3088_v13  ;;  %v18619_v12 = vcombine.high %v1401_v1, %v1657_v2  ;;  %v18616_v13 = vcombine.low %v1400_v46, %v1656_v47  ;;  %v1261_v20 = vld [vmem:[%s20178_s3 + $0xd0] sm:$0xff] }
 0x2a1   : > { %v9959_v35 = vpop.f32.mrf.mxu0  ;;  %v9997_v36 = vpop.f32.mrf.mxu1  ;;  %11916 = vmatmul.mubr.bf16.vlgmr.msra.gmra.mxu1 %v3048_v25  ;;  %12017 = vmatprep.subr.bf16.mxu0 %v18611_v26  ;;  %v3144_v26 = vrot.slane %v3116_v16, %v20180_v15  ;;  %v3156_v29 = vrot.slane %v1261_v20, %v20180_v15  ;;  %v3149_v42 = vcombine.high %v1261_v20, %v1261_v20  ;;  %v1408_v20 = vld [vmem:[%s20167_s28 + $0x368] sm:$0xff] }
 0x2a2   : > { %v9998_v38 = vadd.f32 %v9997_v36, %v9958_v34  ;;  %11978 = vmatpush1.bf16.xpose.msra.mxu1 %v18608_v27  ;;  %11995 = vmatprep.mubr.bf16.mxu1 %v3098_v28  ;;  %v1403_v27 = vld [vmem:[%s20167_s28 + $0x340] sm:$0xff]  ;;  %v1660_v34 = vld [vmem:[%s20167_s28 + $0xb48] sm:$0x11] }
 0x2a3   : > { %v9960_v43 = vpop.f32.mrf.mxu0  ;;  %v9999_v44 = vpop.f32.mrf.mxu1  ;;  %12057 = vmatprep.subr.bf16.mxu1 %v18613_v32  ;;  %v1659_v28 = vld [vmem:[%s20167_s28 + $0xb40] sm:$0x11]  ;;  %v18618_v32 = vcombine.low %v1401_v1, %v1657_v2  ;;  %v3148_v40 = vcombine.high %v3144_v26, %v3144_v26  ;;  %v3164_v41 = vcombine.high %v3156_v29, %v3156_v29  ;;  %v3163_v54 = vrot.slane %v3149_v42, %v20180_v15 }
 0x2a5   : > { %v9961_v48 = vpop.f32.mrf.mxu0  ;;  %v10000_v49 = vpop.f32.mrf.mxu1  ;;  %v3165_v2 = vcombine.high %v3163_v54, %v3163_v54 }
 0x2a6   : > { %v3130_v49 = vrot.slane %v3114_v3, %v20180_v15 }
 0x2a7   : > { %v10001_v56 = vpop.f32.mrf.mxu1  ;;  %v10037_v57 = vpop.f32.mrf.mxu0  ;;  %11956 = vmatmul.mubr.bf16.vlgmr.msra.gmra.mxu0 %v3074_v37  ;;  %v3145_v37 = vcombine.high %v3123_v24, %v3123_v24 }
 0x2a8   : > { %v10038_v59 = vadd.f32 %v10037_v57, %v9998_v38  ;;  %12018 = vmatpush1.bf16.xpose.msra.mxu0 %v18610_v45  ;;  %12035 = vmatprep.mubr.bf16.mxu0 %v3095_v39  ;;  %v18623_v38 = vcombine.high %v1403_v27, %v1659_v28  ;;  %v18620_v39 = vcombine.low %v1402_v7, %v1658_v8 }
 0x2a9   : > { %v10039_v60 = vpop.f32.mrf.mxu0  ;;  %v10077_v61 = vpop.f32.mrf.mxu1  ;;  %11996 = vmatmul.mubr.bf16.vlgmr.msra.gmra.mxu1 %v3096_v50  ;;  %12097 = vmatprep.subr.bf16.mxu0 %v18615_v51  ;;  %v18625_v45 = vcombine.high %v1404_v33, %v1660_v34  ;;  %v3186_v51 = vrot.slane %v3164_v41, %v20180_v15  ;;  %v18622_v57 = vcombine.low %v1403_v27, %v1659_v28 }
 0x2aa   : > { %v10078_v63 = vadd.f32 %v10077_v61, %v10038_v59  ;;  %12058 = vmatpush1.bf16.xpose.msra.mxu1 %v18612_v52  ;;  %12075 = vmatprep.mubr.bf16.mxu1 %v3099_v53  ;;  %v1405_v52 = vld [vmem:[%s20167_s28 + $0x350] sm:$0xff]  ;;  %v1662_v59 = vld [vmem:[%s20167_s28 + $0xb58] sm:$0x11] }
 0x2ab   : > { %v10040_v4 = vpop.f32.mrf.mxu0  ;;  %v10079_v5 = vpop.f32.mrf.mxu1  ;;  %12137 = vmatprep.subr.bf16.mxu1 %v18617_v58  ;;  %v1661_v53 = vld [vmem:[%s20167_s28 + $0xb50] sm:$0x11]  ;;  %v1406_v58 = vld [vmem:[%s20167_s28 + $0x358] sm:$0xff]  ;;  %v3196_v1 = vcombine.high %v3186_v51, %v3186_v51 }
 0x2ac   : > { %v18629_v5 = vcombine.high %v1406_v58, %v1662_v59 }
 0x2ad   : > { %v10041_v9 = vpop.f32.mrf.mxu0  ;;  %v10080_v10 = vpop.f32.mrf.mxu1 }
 0x2ae   : > { %v3172_v10 = vrot.slane %v3156_v29, %v20180_v15 }
 0x2af   : > { %v10081_v17 = vpop.f32.mrf.mxu1  ;;  %v10117_v18 = vpop.f32.mrf.mxu0  ;;  %12036 = vmatmul.mubr.bf16.vlgmr.msra.gmra.mxu0 %v3081_v62  ;;  %v3146_v62 = vcombine.high %v3130_v49, %v3130_v49 }
 0x2b0   : > { %v10118_v21 = vadd.f32 %v10117_v18, %v10078_v63  ;;  %12098 = vmatpush1.bf16.xpose.msra.mxu0 %v18614_v6  ;;  %12115 = vmatprep.mubr.bf16.mxu0 %v3137_v0  ;;  %v18627_v63 = vcombine.high %v1405_v52, %v1661_v53  ;;  %v18624_v0 = vcombine.low %v1404_v33, %v1660_v34  ;;  %v1262_v6 = vld [vmem:[%s20178_s3 + $0xd8] sm:$0xff] }
 0x2b1   : > { %v10119_v22 = vpop.f32.mrf.mxu0  ;;  %v10157_v23 = vpop.f32.mrf.mxu1  ;;  %12076 = vmatmul.mubr.bf16.vlgmr.msra.gmra.mxu1 %v3097_v11  ;;  %12177 = vmatprep.subr.bf16.mxu0 %v18619_v12  ;;  %v3193_v12 = vrot.slane %v3165_v2, %v20180_v15  ;;  %v3205_v16 = vrot.slane %v1262_v6, %v20180_v15  ;;  %v3198_v29 = vcombine.high %v1262_v6, %v1262_v6  ;;  %v1412_v6 = vld [vmem:[%s20167_s28 + $0x388] sm:$0xff] }
 0x2b2   : > { %v10158_v25 = vadd.f32 %v10157_v23, %v10118_v21  ;;  %12138 = vmatpush1.bf16.xpose.msra.mxu1 %v18616_v13  ;;  %12155 = vmatprep.mubr.bf16.mxu1 %v3147_v14  ;;  %v1407_v13 = vld [vmem:[%s20167_s28 + $0x360] sm:$0xff]  ;;  %v1664_v21 = vld [vmem:[%s20167_s28 + $0xb68] sm:$0x11] }
 0x2b3   : > { %v10120_v30 = vpop.f32.mrf.mxu0  ;;  %v10159_v31 = vpop.f32.mrf.mxu1  ;;  %12217 = vmatprep.subr.bf16.mxu1 %v18621_v19  ;;  %v1663_v14 = vld [vmem:[%s20167_s28 + $0xb60] sm:$0x11]  ;;  %v18626_v19 = vcombine.low %v1405_v52, %v1661_v53  ;;  %v3197_v27 = vcombine.high %v3193_v12, %v3193_v12  ;;  %v3213_v28 = vcombine.high %v3205_v16, %v3205_v16  ;;  %v3212_v41 = vrot.slane %v3198_v29, %v20180_v15 }
 0x2b5   : > { %v10121_v35 = vpop.f32.mrf.mxu0  ;;  %v10160_v36 = vpop.f32.mrf.mxu1  ;;  %v3214_v53 = vcombine.high %v3212_v41, %v3212_v41 }
 0x2b6   : > { %v3179_v36 = vrot.slane %v3163_v54, %v20180_v15 }
 0x2b7   : > { %v10161_v43 = vpop.f32.mrf.mxu1  ;;  %v10197_v44 = vpop.f32.mrf.mxu0  ;;  %12116 = vmatmul.mubr.bf16.vlgmr.msra.gmra.mxu0 %v3123_v24  ;;  %v3194_v24 = vcombine.high %v3172_v10, %v3172_v10 }
 0x2b8   : > { %v10198_v46 = vadd.f32 %v10197_v44, %v10158_v25  ;;  %12178 = vmatpush1.bf16.xpose.msra.mxu0 %v18618_v32  ;;  %12195 = vmatprep.mubr.bf16.mxu0 %v3144_v26  ;;  %v18631_v25 = vcombine.high %v1407_v13, %v1663_v14  ;;  %v18628_v26 = vcombine.low %v1406_v58, %v1662_v59 }
 0x2b9   : > { %v10199_v47 = vpop.f32.mrf.mxu0  ;;  %v10237_v48 = vpop.f32.mrf.mxu1  ;;  %12156 = vmatmul.mubr.bf16.vlgmr.msra.gmra.mxu1 %v3145_v37  ;;  %12257 = vmatprep.subr.bf16.mxu0 %v18623_v38  ;;  %v18633_v32 = vcombine.high %v1408_v20, %v1664_v21  ;;  %v3235_v38 = vrot.slane %v3213_v28, %v20180_v15  ;;  %v18630_v44 = vcombine.low %v1407_v13, %v1663_v14 }
 0x2ba   : > { %v10238_v50 = vadd.f32 %v10237_v48, %v10198_v46  ;;  %12218 = vmatpush1.bf16.xpose.msra.mxu1 %v18620_v39  ;;  %12235 = vmatprep.mubr.bf16.mxu1 %v3148_v40  ;;  %v1409_v39 = vld [vmem:[%s20167_s28 + $0x370] sm:$0xff]  ;;  %v1666_v46 = vld [vmem:[%s20167_s28 + $0xb78] sm:$0x11] }
 0x2bb   : > { %v10200_v55 = vpop.f32.mrf.mxu0  ;;  %v10239_v56 = vpop.f32.mrf.mxu1  ;;  %12297 = vmatprep.subr.bf16.mxu1 %v18625_v45  ;;  %v1665_v40 = vld [vmem:[%s20167_s28 + $0xb70] sm:$0x11]  ;;  %v1410_v45 = vld [vmem:[%s20167_s28 + $0x378] sm:$0xff]  ;;  %v3245_v52 = vcombine.high %v3235_v38, %v3235_v38 }
 0x2bc   : > { %v18637_v56 = vcombine.high %v1410_v45, %v1666_v46 }
 0x2bd   : > { %v10201_v60 = vpop.f32.mrf.mxu0  ;;  %v10240_v61 = vpop.f32.mrf.mxu1 }
 0x2be   : > { %v3221_v61 = vrot.slane %v3205_v16, %v20180_v15 }
 0x2bf   : > { %v10241_v3 = vpop.f32.mrf.mxu1  ;;  %v10277_v4 = vpop.f32.mrf.mxu0  ;;  %12196 = vmatmul.mubr.bf16.vlgmr.msra.gmra.mxu0 %v3130_v49  ;;  %v3195_v49 = vcombine.high %v3179_v36, %v3179_v36 }
 0x2c0   : > { %v10278_v7 = vadd.f32 %v10277_v4, %v10238_v50  ;;  %12258 = vmatpush1.bf16.xpose.msra.mxu0 %v18622_v57  ;;  %12275 = vmatprep.mubr.bf16.mxu0 %v3186_v51  ;;  %v18635_v50 = vcombine.high %v1409_v39, %v1665_v40  ;;  %v18632_v51 = vcombine.low %v1408_v20, %v1664_v21  ;;  %v1263_v57 = vld [vmem:[%s20178_s3 + $0xe0] sm:$0xff] }
 0x2c1   : > { %v10279_v8 = vpop.f32.mrf.mxu0  ;;  %v10317_v9 = vpop.f32.mrf.mxu1  ;;  %12236 = vmatmul.mubr.bf16.vlgmr.msra.gmra.mxu1 %v3146_v62  ;;  %12337 = vmatprep.subr.bf16.mxu0 %v18627_v63  ;;  %v3242_v63 = vrot.slane %v3214_v53, %v20180_v15  ;;  %v3254_v2 = vrot.slane %v1263_v57, %v20180_v15  ;;  %v3247_v16 = vcombine.high %v1263_v57, %v1263_v57  ;;  %v1416_v57 = vld [vmem:[%s20167_s28 + $0x3a8] sm:$0xff] }
 0x2c2   : > { %v10318_v11 = vadd.f32 %v10317_v9, %v10278_v7  ;;  %12298 = vmatpush1.bf16.xpose.msra.mxu1 %v18624_v0  ;;  %12315 = vmatprep.mubr.bf16.mxu1 %v3196_v1  ;;  %v1411_v0 = vld [vmem:[%s20167_s28 + $0x380] sm:$0xff]  ;;  %v1668_v7 = vld [vmem:[%s20167_s28 + $0xb88] sm:$0x11] }
 0x2c3   : > { %v10280_v17 = vpop.f32.mrf.mxu0  ;;  %v10319_v18 = vpop.f32.mrf.mxu1  ;;  %12377 = vmatprep.subr.bf16.mxu1 %v18629_v5  ;;  %v1667_v1 = vld [vmem:[%s20167_s28 + $0xb80] sm:$0x11]  ;;  %v18634_v5 = vcombine.low %v1409_v39, %v1665_v40  ;;  %v3246_v13 = vcombine.high %v3242_v63, %v3242_v63  ;;  %v3262_v14 = vcombine.high %v3254_v2, %v3254_v2  ;;  %v3261_v28 = vrot.slane %v3247_v16, %v20180_v15 }
 0x2c5   : > { %v10281_v22 = vpop.f32.mrf.mxu0  ;;  %v10320_v23 = vpop.f32.mrf.mxu1  ;;  %v3263_v40 = vcombine.high %v3261_v28, %v3261_v28 }
 0x2c6   : > { %v3228_v23 = vrot.slane %v3212_v41, %v20180_v15 }
 0x2c7   : > { %v10321_v30 = vpop.f32.mrf.mxu1  ;;  %v10357_v31 = vpop.f32.mrf.mxu0  ;;  %12276 = vmatmul.mubr.bf16.vlgmr.msra.gmra.mxu0 %v3172_v10  ;;  %v3243_v10 = vcombine.high %v3221_v61, %v3221_v61 }
 0x2c8   : > { %v10358_v33 = vadd.f32 %v10357_v31, %v10318_v11  ;;  %12338 = vmatpush1.bf16.xpose.msra.mxu0 %v18626_v19  ;;  %12355 = vmatprep.mubr.bf16.mxu0 %v3193_v12  ;;  %v18639_v11 = vcombine.high %v1411_v0, %v1667_v1  ;;  %v18636_v12 = vcombine.low %v1410_v45, %v1666_v46 }
 0x2c9   : > { %v10359_v34 = vpop.f32.mrf.mxu0  ;;  %v10397_v35 = vpop.f32.mrf.mxu1  ;;  %12316 = vmatmul.mubr.bf16.vlgmr.msra.gmra.mxu1 %v3194_v24  ;;  %12417 = vmatprep.subr.bf16.mxu0 %v18631_v25  ;;  %v18641_v19 = vcombine.high %v1412_v6, %v1668_v7  ;;  %v3284_v25 = vrot.slane %v3262_v14, %v20180_v15  ;;  %v18638_v31 = vcombine.low %v1411_v0, %v1667_v1 }
 0x2ca   : > { %v10398_v37 = vadd.f32 %v10397_v35, %v10358_v33  ;;  %12378 = vmatpush1.bf16.xpose.msra.mxu1 %v18628_v26  ;;  %12395 = vmatprep.mubr.bf16.mxu1 %v3197_v27  ;;  %v1413_v26 = vld [vmem:[%s20167_s28 + $0x390] sm:$0xff]  ;;  %v1670_v33 = vld [vmem:[%s20167_s28 + $0xb98] sm:$0x11] }
 0x2cb   : > { %v10360_v42 = vpop.f32.mrf.mxu0  ;;  %v10399_v43 = vpop.f32.mrf.mxu1  ;;  %12457 = vmatprep.subr.bf16.mxu1 %v18633_v32  ;;  %v1669_v27 = vld [vmem:[%s20167_s28 + $0xb90] sm:$0x11]  ;;  %v1414_v32 = vld [vmem:[%s20167_s28 + $0x398] sm:$0xff]  ;;  %v3294_v39 = vcombine.high %v3284_v25, %v3284_v25 }
 0x2cc   : > { %v18645_v43 = vcombine.high %v1414_v32, %v1670_v33 }
 0x2cd   : > { %v10361_v47 = vpop.f32.mrf.mxu0  ;;  %v10400_v48 = vpop.f32.mrf.mxu1 }
 0x2ce   : > { %v3270_v48 = vrot.slane %v3254_v2, %v20180_v15 }
 0x2cf   : > { %v10401_v54 = vpop.f32.mrf.mxu1  ;;  %v10437_v55 = vpop.f32.mrf.mxu0  ;;  %12356 = vmatmul.mubr.bf16.vlgmr.msra.gmra.mxu0 %v3179_v36  ;;  %v3244_v36 = vcombine.high %v3228_v23, %v3228_v23 }
 0x2d0   : > { %v10438_v58 = vadd.f32 %v10437_v55, %v10398_v37  ;;  %12418 = vmatpush1.bf16.xpose.msra.mxu0 %v18630_v44  ;;  %12435 = vmatprep.mubr.bf16.mxu0 %v3235_v38  ;;  %v18643_v37 = vcombine.high %v1413_v26, %v1669_v27  ;;  %v18640_v38 = vcombine.low %v1412_v6, %v1668_v7  ;;  %v1264_v44 = vld [vmem:[%s20178_s3 + $0xe8] sm:$0xff] }
 0x2d1   : > { %v10439_v59 = vpop.f32.mrf.mxu0  ;;  %v10477_v60 = vpop.f32.mrf.mxu1  ;;  %12396 = vmatmul.mubr.bf16.vlgmr.msra.gmra.mxu1 %v3195_v49  ;;  %12497 = vmatprep.subr.bf16.mxu0 %v18635_v50  ;;  %v3291_v50 = vrot.slane %v3263_v40, %v20180_v15  ;;  %v3303_v53 = vrot.slane %v1264_v44, %v20180_v15  ;;  %v3296_v2 = vcombine.high %v1264_v44, %v1264_v44  ;;  %v1420_v44 = vld [vmem:[%s20167_s28 + $0x3c8] sm:$0xff] }
 0x2d2   : > { %v10478_v62 = vadd.f32 %v10477_v60, %v10438_v58  ;;  %12458 = vmatpush1.bf16.xpose.msra.mxu1 %v18632_v51  ;;  %12475 = vmatprep.mubr.bf16.mxu1 %v3245_v52  ;;  %v1415_v51 = vld [vmem:[%s20167_s28 + $0x3a0] sm:$0xff]  ;;  %v1672_v58 = vld [vmem:[%s20167_s28 + $0xba8] sm:$0x11] }
 0x2d3   : > { %v10440_v3 = vpop.f32.mrf.mxu0  ;;  %v10479_v4 = vpop.f32.mrf.mxu1  ;;  %12537 = vmatprep.subr.bf16.mxu1 %v18637_v56  ;;  %v1671_v52 = vld [vmem:[%s20167_s28 + $0xba0] sm:$0x11]  ;;  %v18642_v56 = vcombine.low %v1413_v26, %v1669_v27  ;;  %v3295_v0 = vcombine.high %v3291_v50, %v3291_v50  ;;  %v3311_v1 = vcombine.high %v3303_v53, %v3303_v53  ;;  %v3310_v14 = vrot.slane %v3296_v2, %v20180_v15 }
 0x2d5   : > { %v10441_v8 = vpop.f32.mrf.mxu0  ;;  %v10480_v9 = vpop.f32.mrf.mxu1  ;;  %v3312_v27 = vcombine.high %v3310_v14, %v3310_v14 }
 0x2d6   : > { %v3277_v9 = vrot.slane %v3261_v28, %v20180_v15 }
 0x2d7   : > { %v10481_v17 = vpop.f32.mrf.mxu1  ;;  %v10517_v18 = vpop.f32.mrf.mxu0  ;;  %12436 = vmatmul.mubr.bf16.vlgmr.msra.gmra.mxu0 %v3221_v61  ;;  %v3292_v61 = vcombine.high %v3270_v48, %v3270_v48 }
 0x2d8   : > { %v10518_v20 = vadd.f32 %v10517_v18, %v10478_v62  ;;  %12498 = vmatpush1.bf16.xpose.msra.mxu0 %v18634_v5  ;;  %12515 = vmatprep.mubr.bf16.mxu0 %v3242_v63  ;;  %v18647_v62 = vcombine.high %v1415_v51, %v1671_v52  ;;  %v18644_v63 = vcombine.low %v1414_v32, %v1670_v33 }
 0x2d9   : > { %v10519_v21 = vpop.f32.mrf.mxu0  ;;  %v10557_v22 = vpop.f32.mrf.mxu1  ;;  %12476 = vmatmul.mubr.bf16.vlgmr.msra.gmra.mxu1 %v3243_v10  ;;  %12577 = vmatprep.subr.bf16.mxu0 %v18639_v11  ;;  %v18649_v5 = vcombine.high %v1416_v57, %v1672_v58  ;;  %v3333_v11 = vrot.slane %v3311_v1, %v20180_v15  ;;  %v18646_v18 = vcombine.low %v1415_v51, %v1671_v52 }
 0x2da   : > { %v10558_v24 = vadd.f32 %v10557_v22, %v10518_v20  ;;  %12538 = vmatpush1.bf16.xpose.msra.mxu1 %v18636_v12  ;;  %12555 = vmatprep.mubr.bf16.mxu1 %v3246_v13  ;;  %v1417_v12 = vld [vmem:[%s20167_s28 + $0x3b0] sm:$0xff]  ;;  %v1674_v20 = vld [vmem:[%s20167_s28 + $0xbb8] sm:$0x11] }
 0x2db   : > { %v10520_v29 = vpop.f32.mrf.mxu0  ;;  %v10559_v30 = vpop.f32.mrf.mxu1  ;;  %12617 = vmatprep.subr.bf16.mxu1 %v18641_v19  ;;  %v1673_v13 = vld [vmem:[%s20167_s28 + $0xbb0] sm:$0x11]  ;;  %v1418_v19 = vld [vmem:[%s20167_s28 + $0x3b8] sm:$0xff]  ;;  %v3343_v26 = vcombine.high %v3333_v11, %v3333_v11 }
 0x2dc   : > { %v18653_v30 = vcombine.high %v1418_v19, %v1674_v20 }
 0x2dd   : > { %v10521_v34 = vpop.f32.mrf.mxu0  ;;  %v10560_v35 = vpop.f32.mrf.mxu1 }
 0x2de   : > { %v3319_v35 = vrot.slane %v3303_v53, %v20180_v15 }
 0x2df   : > { %v10561_v41 = vpop.f32.mrf.mxu1  ;;  %v10597_v42 = vpop.f32.mrf.mxu0  ;;  %12516 = vmatmul.mubr.bf16.vlgmr.msra.gmra.mxu0 %v3228_v23  ;;  %v3293_v23 = vcombine.high %v3277_v9, %v3277_v9 }
 0x2e0   : > { %v10598_v45 = vadd.f32 %v10597_v42, %v10558_v24  ;;  %12578 = vmatpush1.bf16.xpose.msra.mxu0 %v18638_v31  ;;  %12595 = vmatprep.mubr.bf16.mxu0 %v3284_v25  ;;  %v18651_v24 = vcombine.high %v1417_v12, %v1673_v13  ;;  %v18648_v25 = vcombine.low %v1416_v57, %v1672_v58  ;;  %v1265_v31 = vld [vmem:[%s20178_s3 + $0xf0] sm:$0xff] }
 0x2e1   : > { %v10599_v46 = vpop.f32.mrf.mxu0  ;;  %v10637_v47 = vpop.f32.mrf.mxu1  ;;  %12556 = vmatmul.mubr.bf16.vlgmr.msra.gmra.mxu1 %v3244_v36  ;;  %12657 = vmatprep.subr.bf16.mxu0 %v18643_v37  ;;  %v3340_v37 = vrot.slane %v3312_v27, %v20180_v15  ;;  %v3352_v40 = vrot.slane %v1265_v31, %v20180_v15  ;;  %v3345_v53 = vcombine.high %v1265_v31, %v1265_v31  ;;  %v1424_v31 = vld [vmem:[%s20167_s28 + $0x3e8] sm:$0xff] }
 0x2e2   : > { %v10638_v49 = vadd.f32 %v10637_v47, %v10598_v45  ;;  %12618 = vmatpush1.bf16.xpose.msra.mxu1 %v18640_v38  ;;  %12635 = vmatprep.mubr.bf16.mxu1 %v3294_v39  ;;  %v1419_v38 = vld [vmem:[%s20167_s28 + $0x3c0] sm:$0xff]  ;;  %v1676_v45 = vld [vmem:[%s20167_s28 + $0xbc8] sm:$0x11] }
 0x2e3   : > { %v10600_v54 = vpop.f32.mrf.mxu0  ;;  %v10639_v55 = vpop.f32.mrf.mxu1  ;;  %12697 = vmatprep.subr.bf16.mxu1 %v18645_v43  ;;  %v1675_v39 = vld [vmem:[%s20167_s28 + $0xbc0] sm:$0x11]  ;;  %v18650_v43 = vcombine.low %v1417_v12, %v1673_v13  ;;  %v3344_v51 = vcombine.high %v3340_v37, %v3340_v37  ;;  %v3360_v52 = vcombine.high %v3352_v40, %v3352_v40  ;;  %v3359_v1 = vrot.slane %v3345_v53, %v20180_v15 }
 0x2e5   : > { %v10601_v59 = vpop.f32.mrf.mxu0  ;;  %v10640_v60 = vpop.f32.mrf.mxu1  ;;  %v3361_v13 = vcombine.high %v3359_v1, %v3359_v1 }
 0x2e6   : > { %v3326_v60 = vrot.slane %v3310_v14, %v20180_v15 }
 0x2e7   : > { %v10641_v3 = vpop.f32.mrf.mxu1  ;;  %v10677_v4 = vpop.f32.mrf.mxu0  ;;  %12596 = vmatmul.mubr.bf16.vlgmr.msra.gmra.mxu0 %v3270_v48  ;;  %v3341_v48 = vcombine.high %v3319_v35, %v3319_v35 }
 0x2e8   : > { %v10678_v6 = vadd.f32 %v10677_v4, %v10638_v49  ;;  %12658 = vmatpush1.bf16.xpose.msra.mxu0 %v18642_v56  ;;  %12675 = vmatprep.mubr.bf16.mxu0 %v3291_v50  ;;  %v18655_v49 = vcombine.high %v1419_v38, %v1675_v39  ;;  %v18652_v50 = vcombine.low %v1418_v19, %v1674_v20 }
 0x2e9   : > { %v10679_v7 = vpop.f32.mrf.mxu0  ;;  %v10717_v8 = vpop.f32.mrf.mxu1  ;;  %12636 = vmatmul.mubr.bf16.vlgmr.msra.gmra.mxu1 %v3292_v61  ;;  %12737 = vmatprep.subr.bf16.mxu0 %v18647_v62  ;;  %v18657_v56 = vcombine.high %v1420_v44, %v1676_v45  ;;  %v3382_v62 = vrot.slane %v3360_v52, %v20180_v15  ;;  %v18654_v4 = vcombine.low %v1419_v38, %v1675_v39 }
 0x2ea   : > { %v10718_v10 = vadd.f32 %v10717_v8, %v10678_v6  ;;  %12698 = vmatpush1.bf16.xpose.msra.mxu1 %v18644_v63  ;;  %12715 = vmatprep.mubr.bf16.mxu1 %v3295_v0  ;;  %v1421_v63 = vld [vmem:[%s20167_s28 + $0x3d0] sm:$0xff]  ;;  %v1678_v6 = vld [vmem:[%s20167_s28 + $0xbd8] sm:$0x11] }
 0x2eb   : > { %v10680_v16 = vpop.f32.mrf.mxu0  ;;  %v10719_v17 = vpop.f32.mrf.mxu1  ;;  %12777 = vmatprep.subr.bf16.mxu1 %v18649_v5  ;;  %v1677_v0 = vld [vmem:[%s20167_s28 + $0xbd0] sm:$0x11]  ;;  %v1422_v5 = vld [vmem:[%s20167_s28 + $0x3d8] sm:$0xff]  ;;  %v3392_v12 = vcombine.high %v3382_v62, %v3382_v62 }
 0x2ec   : > { %v18661_v17 = vcombine.high %v1422_v5, %v1678_v6 }
 0x2ed   : > { %v10681_v21 = vpop.f32.mrf.mxu0  ;;  %v10720_v22 = vpop.f32.mrf.mxu1 }
 0x2ee   : > { %v3368_v22 = vrot.slane %v3352_v40, %v20180_v15 }
 0x2ef   : > { %v10721_v28 = vpop.f32.mrf.mxu1  ;;  %v10757_v29 = vpop.f32.mrf.mxu0  ;;  %12676 = vmatmul.mubr.bf16.vlgmr.msra.gmra.mxu0 %v3277_v9  ;;  %v3342_v9 = vcombine.high %v3326_v60, %v3326_v60 }
 0x2f0   : > { %v10758_v32 = vadd.f32 %v10757_v29, %v10718_v10  ;;  %12738 = vmatpush1.bf16.xpose.msra.mxu0 %v18646_v18  ;;  %12755 = vmatprep.mubr.bf16.mxu0 %v3333_v11  ;;  %v18659_v10 = vcombine.high %v1421_v63, %v1677_v0  ;;  %v18656_v11 = vcombine.low %v1420_v44, %v1676_v45  ;;  %v1266_v18 = vld [vmem:[%s20178_s3 + $0xf8] sm:$0xff] }
 0x2f1   : > { %v10759_v33 = vpop.f32.mrf.mxu0  ;;  %v10797_v34 = vpop.f32.mrf.mxu1  ;;  %12716 = vmatmul.mubr.bf16.vlgmr.msra.gmra.mxu1 %v3293_v23  ;;  %12817 = vmatprep.subr.bf16.mxu0 %v18651_v24  ;;  %v3389_v24 = vrot.slane %v3361_v13, %v20180_v15  ;;  %v3401_v27 = vrot.slane %v1266_v18, %v20180_v15  ;;  %v3394_v40 = vcombine.high %v1266_v18, %v1266_v18  ;;  %v1428_v18 = vld [vmem:[%s20167_s28 + $0x408] sm:$0xff] }
 0x2f2   : > { %v10798_v36 = vadd.f32 %v10797_v34, %v10758_v32  ;;  %12778 = vmatpush1.bf16.xpose.msra.mxu1 %v18648_v25  ;;  %12795 = vmatprep.mubr.bf16.mxu1 %v3343_v26  ;;  %v1423_v25 = vld [vmem:[%s20167_s28 + $0x3e0] sm:$0xff]  ;;  %v1680_v32 = vld [vmem:[%s20167_s28 + $0xbe8] sm:$0x11] }
 0x2f3   : > { %v10760_v41 = vpop.f32.mrf.mxu0  ;;  %v10799_v42 = vpop.f32.mrf.mxu1  ;;  %12857 = vmatprep.subr.bf16.mxu1 %v18653_v30  ;;  %v1679_v26 = vld [vmem:[%s20167_s28 + $0xbe0] sm:$0x11]  ;;  %v18658_v30 = vcombine.low %v1421_v63, %v1677_v0  ;;  %v3393_v38 = vcombine.high %v3389_v24, %v3389_v24  ;;  %v3409_v39 = vcombine.high %v3401_v27, %v3401_v27  ;;  %v3408_v52 = vrot.slane %v3394_v40, %v20180_v15 }
 0x2f5   : > { %v10761_v46 = vpop.f32.mrf.mxu0  ;;  %v10800_v47 = vpop.f32.mrf.mxu1  ;;  %v3410_v0 = vcombine.high %v3408_v52, %v3408_v52 }
 0x2f6   : > { %v3375_v47 = vrot.slane %v3359_v1, %v20180_v15 }
 0x2f7   : > { %v10801_v54 = vpop.f32.mrf.mxu1  ;;  %v10837_v55 = vpop.f32.mrf.mxu0  ;;  %12756 = vmatmul.mubr.bf16.vlgmr.msra.gmra.mxu0 %v3319_v35  ;;  %v3390_v35 = vcombine.high %v3368_v22, %v3368_v22 }
 0x2f8   : > { %v10838_v57 = vadd.f32 %v10837_v55, %v10798_v36  ;;  %12818 = vmatpush1.bf16.xpose.msra.mxu0 %v18650_v43  ;;  %12835 = vmatprep.mubr.bf16.mxu0 %v3340_v37  ;;  %v18663_v36 = vcombine.high %v1423_v25, %v1679_v26  ;;  %v18660_v37 = vcombine.low %v1422_v5, %v1678_v6 }
 0x2f9   : > { %v10839_v58 = vpop.f32.mrf.mxu0  ;;  %v10877_v59 = vpop.f32.mrf.mxu1  ;;  %12796 = vmatmul.mubr.bf16.vlgmr.msra.gmra.mxu1 %v3341_v48  ;;  %12897 = vmatprep.subr.bf16.mxu0 %v18655_v49  ;;  %v18665_v43 = vcombine.high %v1424_v31, %v1680_v32  ;;  %v3431_v49 = vrot.slane %v3409_v39, %v20180_v15  ;;  %v18662_v55 = vcombine.low %v1423_v25, %v1679_v26 }
 0x2fa   : > { %v10878_v61 = vadd.f32 %v10877_v59, %v10838_v57  ;;  %12858 = vmatpush1.bf16.xpose.msra.mxu1 %v18652_v50  ;;  %12875 = vmatprep.mubr.bf16.mxu1 %v3344_v51  ;;  %v1425_v50 = vld [vmem:[%s20167_s28 + $0x3f0] sm:$0xff]  ;;  %v1682_v57 = vld [vmem:[%s20167_s28 + $0xbf8] sm:$0x11] }
 0x2fb   : > { %v10840_v2 = vpop.f32.mrf.mxu0  ;;  %v10879_v3 = vpop.f32.mrf.mxu1  ;;  %12937 = vmatprep.subr.bf16.mxu1 %v18657_v56  ;;  %v1681_v51 = vld [vmem:[%s20167_s28 + $0xbf0] sm:$0x11]  ;;  %v1426_v56 = vld [vmem:[%s20167_s28 + $0x3f8] sm:$0xff]  ;;  %v3441_v63 = vcombine.high %v3431_v49, %v3431_v49 }
 0x2fc   : > { %v18669_v3 = vcombine.high %v1426_v56, %v1682_v57 }
 0x2fd   : > { %v10841_v7 = vpop.f32.mrf.mxu0  ;;  %v10880_v8 = vpop.f32.mrf.mxu1 }
 0x2fe   : > { %v3417_v8 = vrot.slane %v3401_v27, %v20180_v15 }
 0x2ff   : > { %v10881_v14 = vpop.f32.mrf.mxu1  ;;  %v10917_v16 = vpop.f32.mrf.mxu0  ;;  %12836 = vmatmul.mubr.bf16.vlgmr.msra.gmra.mxu0 %v3326_v60  ;;  %v3391_v60 = vcombine.high %v3375_v47, %v3375_v47 }
 0x300   : > { %v10918_v19 = vadd.f32 %v10917_v16, %v10878_v61  ;;  %12898 = vmatpush1.bf16.xpose.msra.mxu0 %v18654_v4  ;;  %12915 = vmatprep.mubr.bf16.mxu0 %v3382_v62  ;;  %v18667_v61 = vcombine.high %v1425_v50, %v1681_v51  ;;  %v18664_v62 = vcombine.low %v1424_v31, %v1680_v32  ;;  %v1267_v4 = vld [vmem:[%s20178_s3 + $0x100] sm:$0xff] }
 0x301   : > { %v10919_v20 = vpop.f32.mrf.mxu0  ;;  %v10957_v21 = vpop.f32.mrf.mxu1  ;;  %12876 = vmatmul.mubr.bf16.vlgmr.msra.gmra.mxu1 %v3342_v9  ;;  %12977 = vmatprep.subr.bf16.mxu0 %v18659_v10  ;;  %v3438_v10 = vrot.slane %v3410_v0, %v20180_v15  ;;  %v3450_v13 = vrot.slane %v1267_v4, %v20180_v15  ;;  %v3443_v27 = vcombine.high %v1267_v4, %v1267_v4  ;;  %v1432_v4 = vld [vmem:[%s20167_s28 + $0x428] sm:$0xff] }
 0x302   : > { %v10958_v23 = vadd.f32 %v10957_v21, %v10918_v19  ;;  %12938 = vmatpush1.bf16.xpose.msra.mxu1 %v18656_v11  ;;  %12955 = vmatprep.mubr.bf16.mxu1 %v3392_v12  ;;  %v1427_v11 = vld [vmem:[%s20167_s28 + $0x400] sm:$0xff]  ;;  %v1684_v19 = vld [vmem:[%s20167_s28 + $0xc08] sm:$0x11] }
 0x303   : > { %v10920_v28 = vpop.f32.mrf.mxu0  ;;  %v10959_v29 = vpop.f32.mrf.mxu1  ;;  %13017 = vmatprep.subr.bf16.mxu1 %v18661_v17  ;;  %v1683_v12 = vld [vmem:[%s20167_s28 + $0xc00] sm:$0x11]  ;;  %v18666_v17 = vcombine.low %v1425_v50, %v1681_v51  ;;  %v3442_v25 = vcombine.high %v3438_v10, %v3438_v10  ;;  %v3458_v26 = vcombine.high %v3450_v13, %v3450_v13  ;;  %v3457_v39 = vrot.slane %v3443_v27, %v20180_v15 }
 0x305   : > { %v10921_v33 = vpop.f32.mrf.mxu0  ;;  %v10960_v34 = vpop.f32.mrf.mxu1  ;;  %v3459_v51 = vcombine.high %v3457_v39, %v3457_v39 }
 0x306   : > { %v3424_v34 = vrot.slane %v3408_v52, %v20180_v15 }
 0x307   : > { %v10961_v41 = vpop.f32.mrf.mxu1  ;;  %v10997_v42 = vpop.f32.mrf.mxu0  ;;  %12916 = vmatmul.mubr.bf16.vlgmr.msra.gmra.mxu0 %v3368_v22  ;;  %v3439_v22 = vcombine.high %v3417_v8, %v3417_v8 }
 0x308   : > { %v10998_v44 = vadd.f32 %v10997_v42, %v10958_v23  ;;  %12978 = vmatpush1.bf16.xpose.msra.mxu0 %v18658_v30  ;;  %12995 = vmatprep.mubr.bf16.mxu0 %v3389_v24  ;;  %v18671_v23 = vcombine.high %v1427_v11, %v1683_v12  ;;  %v18668_v24 = vcombine.low %v1426_v56, %v1682_v57 }
 0x309   : > { %v10999_v45 = vpop.f32.mrf.mxu0  ;;  %v11037_v46 = vpop.f32.mrf.mxu1  ;;  %12956 = vmatmul.mubr.bf16.vlgmr.msra.gmra.mxu1 %v3390_v35  ;;  %13057 = vmatprep.subr.bf16.mxu0 %v18663_v36  ;;  %v18673_v30 = vcombine.high %v1428_v18, %v1684_v19  ;;  %v3480_v36 = vrot.slane %v3458_v26, %v20180_v15  ;;  %v18670_v42 = vcombine.low %v1427_v11, %v1683_v12 }
 0x30a   : > { %v11038_v48 = vadd.f32 %v11037_v46, %v10998_v44  ;;  %13018 = vmatpush1.bf16.xpose.msra.mxu1 %v18660_v37  ;;  %13035 = vmatprep.mubr.bf16.mxu1 %v3393_v38  ;;  %v1429_v37 = vld [vmem:[%s20167_s28 + $0x410] sm:$0xff]  ;;  %v1686_v44 = vld [vmem:[%s20167_s28 + $0xc18] sm:$0x11] }
 0x30b   : > { %v11000_v53 = vpop.f32.mrf.mxu0  ;;  %v11039_v54 = vpop.f32.mrf.mxu1  ;;  %13097 = vmatprep.subr.bf16.mxu1 %v18665_v43  ;;  %v1685_v38 = vld [vmem:[%s20167_s28 + $0xc10] sm:$0x11]  ;;  %v1430_v43 = vld [vmem:[%s20167_s28 + $0x418] sm:$0xff]  ;;  %v3490_v50 = vcombine.high %v3480_v36, %v3480_v36 }
 0x30c   : > { %v18677_v54 = vcombine.high %v1430_v43, %v1686_v44 }
 0x30d   : > { %v11001_v58 = vpop.f32.mrf.mxu0  ;;  %v11040_v59 = vpop.f32.mrf.mxu1 }
 0x30e   : > { %v3466_v59 = vrot.slane %v3450_v13, %v20180_v15 }
 0x30f   : > { %v11041_v1 = vpop.f32.mrf.mxu1  ;;  %v11077_v2 = vpop.f32.mrf.mxu0  ;;  %12996 = vmatmul.mubr.bf16.vlgmr.msra.gmra.mxu0 %v3375_v47  ;;  %v3440_v47 = vcombine.high %v3424_v34, %v3424_v34 }
 0x310   : > { %v11078_v5 = vadd.f32 %v11077_v2, %v11038_v48  ;;  %13058 = vmatpush1.bf16.xpose.msra.mxu0 %v18662_v55  ;;  %13075 = vmatprep.mubr.bf16.mxu0 %v3431_v49  ;;  %v18675_v48 = vcombine.high %v1429_v37, %v1685_v38  ;;  %v18672_v49 = vcombine.low %v1428_v18, %v1684_v19  ;;  %v1268_v55 = vld [vmem:[%s20178_s3 + $0x108] sm:$0xff] }
 0x311   : > { %v11079_v6 = vpop.f32.mrf.mxu0  ;;  %v11117_v7 = vpop.f32.mrf.mxu1  ;;  %13036 = vmatmul.mubr.bf16.vlgmr.msra.gmra.mxu1 %v3391_v60  ;;  %13137 = vmatprep.subr.bf16.mxu0 %v18667_v61  ;;  %v3487_v61 = vrot.slane %v3459_v51, %v20180_v15  ;;  %v3499_v0 = vrot.slane %v1268_v55, %v20180_v15  ;;  %v3492_v13 = vcombine.high %v1268_v55, %v1268_v55  ;;  %v1436_v55 = vld [vmem:[%s20167_s28 + $0x448] sm:$0xff] }
 0x312   : > { %v11118_v9 = vadd.f32 %v11117_v7, %v11078_v5  ;;  %13098 = vmatpush1.bf16.xpose.msra.mxu1 %v18664_v62  ;;  %13115 = vmatprep.mubr.bf16.mxu1 %v3441_v63  ;;  %v1431_v62 = vld [vmem:[%s20167_s28 + $0x420] sm:$0xff]  ;;  %v1688_v5 = vld [vmem:[%s20167_s28 + $0xc28] sm:$0x11] }
 0x313   : > { %v11080_v14 = vpop.f32.mrf.mxu0  ;;  %v11119_v16 = vpop.f32.mrf.mxu1  ;;  %13177 = vmatprep.subr.bf16.mxu1 %v18669_v3  ;;  %v1687_v63 = vld [vmem:[%s20167_s28 + $0xc20] sm:$0x11]  ;;  %v18674_v3 = vcombine.low %v1429_v37, %v1685_v38  ;;  %v3491_v11 = vcombine.high %v3487_v61, %v3487_v61  ;;  %v3507_v12 = vcombine.high %v3499_v0, %v3499_v0  ;;  %v3506_v26 = vrot.slane %v3492_v13, %v20180_v15 }
 0x315   : > { %v11081_v20 = vpop.f32.mrf.mxu0  ;;  %v11120_v21 = vpop.f32.mrf.mxu1  ;;  %v3508_v38 = vcombine.high %v3506_v26, %v3506_v26 }
 0x316   : > { %v3473_v21 = vrot.slane %v3457_v39, %v20180_v15 }
 0x317   : > { %v11121_v28 = vpop.f32.mrf.mxu1  ;;  %v11157_v29 = vpop.f32.mrf.mxu0  ;;  %13076 = vmatmul.mubr.bf16.vlgmr.msra.gmra.mxu0 %v3417_v8  ;;  %v3488_v8 = vcombine.high %v3466_v59, %v3466_v59 }
 0x318   : > { %v11158_v31 = vadd.f32 %v11157_v29, %v11118_v9  ;;  %13138 = vmatpush1.bf16.xpose.msra.mxu0 %v18666_v17  ;;  %13155 = vmatprep.mubr.bf16.mxu0 %v3438_v10  ;;  %v18679_v9 = vcombine.high %v1431_v62, %v1687_v63  ;;  %v18676_v10 = vcombine.low %v1430_v43, %v1686_v44 }
 0x319   : > { %v11159_v32 = vpop.f32.mrf.mxu0  ;;  %v11197_v33 = vpop.f32.mrf.mxu1  ;;  %13116 = vmatmul.mubr.bf16.vlgmr.msra.gmra.mxu1 %v3439_v22  ;;  %13217 = vmatprep.subr.bf16.mxu0 %v18671_v23  ;;  %v18681_v17 = vcombine.high %v1432_v4, %v1688_v5  ;;  %v3529_v23 = vrot.slane %v3507_v12, %v20180_v15  ;;  %v18678_v29 = vcombine.low %v1431_v62, %v1687_v63 }
 0x31a   : > { %v11198_v35 = vadd.f32 %v11197_v33, %v11158_v31  ;;  %13178 = vmatpush1.bf16.xpose.msra.mxu1 %v18668_v24  ;;  %13195 = vmatprep.mubr.bf16.mxu1 %v3442_v25  ;;  %v1433_v24 = vld [vmem:[%s20167_s28 + $0x430] sm:$0xff]  ;;  %v1690_v31 = vld [vmem:[%s20167_s28 + $0xc38] sm:$0x11] }
 0x31b   : > { %v11160_v40 = vpop.f32.mrf.mxu0  ;;  %v11199_v41 = vpop.f32.mrf.mxu1  ;;  %13257 = vmatprep.subr.bf16.mxu1 %v18673_v30  ;;  %v1689_v25 = vld [vmem:[%s20167_s28 + $0xc30] sm:$0x11]  ;;  %v1434_v30 = vld [vmem:[%s20167_s28 + $0x438] sm:$0xff]  ;;  %v3539_v37 = vcombine.high %v3529_v23, %v3529_v23 }
 0x31c   : > { %v18685_v41 = vcombine.high %v1434_v30, %v1690_v31 }
 0x31d   : > { %v11161_v45 = vpop.f32.mrf.mxu0  ;;  %v11200_v46 = vpop.f32.mrf.mxu1 }
 0x31e   : > { %v3515_v46 = vrot.slane %v3499_v0, %v20180_v15 }
 0x31f   : > { %v11201_v52 = vpop.f32.mrf.mxu1  ;;  %v11237_v53 = vpop.f32.mrf.mxu0  ;;  %13156 = vmatmul.mubr.bf16.vlgmr.msra.gmra.mxu0 %v3424_v34  ;;  %v3489_v34 = vcombine.high %v3473_v21, %v3473_v21 }
 0x320   : > { %v11238_v56 = vadd.f32 %v11237_v53, %v11198_v35  ;;  %13218 = vmatpush1.bf16.xpose.msra.mxu0 %v18670_v42  ;;  %13235 = vmatprep.mubr.bf16.mxu0 %v3480_v36  ;;  %v18683_v35 = vcombine.high %v1433_v24, %v1689_v25  ;;  %v18680_v36 = vcombine.low %v1432_v4, %v1688_v5  ;;  %v1269_v42 = vld [vmem:[%s20178_s3 + $0x110] sm:$0xff] }
 0x321   : > { %v11239_v57 = vpop.f32.mrf.mxu0  ;;  %v11277_v58 = vpop.f32.mrf.mxu1  ;;  %13196 = vmatmul.mubr.bf16.vlgmr.msra.gmra.mxu1 %v3440_v47  ;;  %13297 = vmatprep.subr.bf16.mxu0 %v18675_v48  ;;  %v3536_v48 = vrot.slane %v3508_v38, %v20180_v15  ;;  %v3548_v51 = vrot.slane %v1269_v42, %v20180_v15  ;;  %v3541_v0 = vcombine.high %v1269_v42, %v1269_v42  ;;  %v1440_v42 = vld [vmem:[%s20167_s28 + $0x468] sm:$0xff] }
 0x322   : > { %v11278_v60 = vadd.f32 %v11277_v58, %v11238_v56  ;;  %13258 = vmatpush1.bf16.xpose.msra.mxu1 %v18672_v49  ;;  %13275 = vmatprep.mubr.bf16.mxu1 %v3490_v50  ;;  %v1435_v49 = vld [vmem:[%s20167_s28 + $0x440] sm:$0xff]  ;;  %v1692_v56 = vld [vmem:[%s20167_s28 + $0xc48] sm:$0x11] }
 0x323   : > { %v11240_v1 = vpop.f32.mrf.mxu0  ;;  %v11279_v2 = vpop.f32.mrf.mxu1  ;;  %13337 = vmatprep.subr.bf16.mxu1 %v18677_v54  ;;  %v1691_v50 = vld [vmem:[%s20167_s28 + $0xc40] sm:$0x11]  ;;  %v18682_v54 = vcombine.low %v1433_v24, %v1689_v25  ;;  %v3540_v62 = vcombine.high %v3536_v48, %v3536_v48  ;;  %v3556_v63 = vcombine.high %v3548_v51, %v3548_v51  ;;  %v3555_v12 = vrot.slane %v3541_v0, %v20180_v15 }
 0x325   : > { %v11241_v6 = vpop.f32.mrf.mxu0  ;;  %v11280_v7 = vpop.f32.mrf.mxu1  ;;  %v3557_v25 = vcombine.high %v3555_v12, %v3555_v12 }
 0x326   : > { %v3522_v7 = vrot.slane %v3506_v26, %v20180_v15 }
 0x327   : > { %v11281_v14 = vpop.f32.mrf.mxu1  ;;  %v11317_v16 = vpop.f32.mrf.mxu0  ;;  %13236 = vmatmul.mubr.bf16.vlgmr.msra.gmra.mxu0 %v3466_v59  ;;  %v3537_v59 = vcombine.high %v3515_v46, %v3515_v46 }
 0x328   : > { %v11318_v18 = vadd.f32 %v11317_v16, %v11278_v60  ;;  %13298 = vmatpush1.bf16.xpose.msra.mxu0 %v18674_v3  ;;  %13315 = vmatprep.mubr.bf16.mxu0 %v3487_v61  ;;  %v18687_v60 = vcombine.high %v1435_v49, %v1691_v50  ;;  %v18684_v61 = vcombine.low %v1434_v30, %v1690_v31 }
 0x329   : > { %v11319_v19 = vpop.f32.mrf.mxu0  ;;  %v11357_v20 = vpop.f32.mrf.mxu1  ;;  %13276 = vmatmul.mubr.bf16.vlgmr.msra.gmra.mxu1 %v3488_v8  ;;  %13377 = vmatprep.subr.bf16.mxu0 %v18679_v9  ;;  %v18689_v3 = vcombine.high %v1436_v55, %v1692_v56  ;;  %v3578_v9 = vrot.slane %v3556_v63, %v20180_v15  ;;  %v18686_v16 = vcombine.low %v1435_v49, %v1691_v50 }
 0x32a   : > { %v11358_v22 = vadd.f32 %v11357_v20, %v11318_v18  ;;  %13338 = vmatpush1.bf16.xpose.msra.mxu1 %v18676_v10  ;;  %13355 = vmatprep.mubr.bf16.mxu1 %v3491_v11  ;;  %v1437_v10 = vld [vmem:[%s20167_s28 + $0x450] sm:$0xff]  ;;  %v1694_v18 = vld [vmem:[%s20167_s28 + $0xc58] sm:$0x11] }
 0x32b   : > { %v11320_v27 = vpop.f32.mrf.mxu0  ;;  %v11359_v28 = vpop.f32.mrf.mxu1  ;;  %13417 = vmatprep.subr.bf16.mxu1 %v18681_v17  ;;  %v1693_v11 = vld [vmem:[%s20167_s28 + $0xc50] sm:$0x11]  ;;  %v1438_v17 = vld [vmem:[%s20167_s28 + $0x458] sm:$0xff]  ;;  %v3588_v24 = vcombine.high %v3578_v9, %v3578_v9 }
 0x32c   : > { %v18693_v28 = vcombine.high %v1438_v17, %v1694_v18 }
 0x32d   : > { %v11321_v32 = vpop.f32.mrf.mxu0  ;;  %v11360_v33 = vpop.f32.mrf.mxu1 }
 0x32e   : > { %v3564_v33 = vrot.slane %v3548_v51, %v20180_v15 }
 0x32f   : > { %v11361_v39 = vpop.f32.mrf.mxu1  ;;  %v11397_v40 = vpop.f32.mrf.mxu0  ;;  %13316 = vmatmul.mubr.bf16.vlgmr.msra.gmra.mxu0 %v3473_v21  ;;  %v3538_v21 = vcombine.high %v3522_v7, %v3522_v7 }
 0x330   : > { %v11398_v43 = vadd.f32 %v11397_v40, %v11358_v22  ;;  %13378 = vmatpush1.bf16.xpose.msra.mxu0 %v18678_v29  ;;  %13395 = vmatprep.mubr.bf16.mxu0 %v3529_v23  ;;  %v18691_v22 = vcombine.high %v1437_v10, %v1693_v11  ;;  %v18688_v23 = vcombine.low %v1436_v55, %v1692_v56  ;;  %v1270_v29 = vld [vmem:[%s20178_s3 + $0x118] sm:$0xff] }
 0x331   : > { %v11399_v44 = vpop.f32.mrf.mxu0  ;;  %v11437_v45 = vpop.f32.mrf.mxu1  ;;  %13356 = vmatmul.mubr.bf16.vlgmr.msra.gmra.mxu1 %v3489_v34  ;;  %13457 = vmatprep.subr.bf16.mxu0 %v18683_v35  ;;  %v3585_v35 = vrot.slane %v3557_v25, %v20180_v15  ;;  %v3597_v38 = vrot.slane %v1270_v29, %v20180_v15  ;;  %v3590_v51 = vcombine.high %v1270_v29, %v1270_v29  ;;  %v1444_v29 = vld [vmem:[%s20167_s28 + $0x488] sm:$0xff] }
 0x332   : > { %v11438_v47 = vadd.f32 %v11437_v45, %v11398_v43  ;;  %13418 = vmatpush1.bf16.xpose.msra.mxu1 %v18680_v36  ;;  %13435 = vmatprep.mubr.bf16.mxu1 %v3539_v37  ;;  %v1439_v36 = vld [vmem:[%s20167_s28 + $0x460] sm:$0xff]  ;;  %v1696_v43 = vld [vmem:[%s20167_s28 + $0xc68] sm:$0x11] }
 0x333   : > { %v11400_v52 = vpop.f32.mrf.mxu0  ;;  %v11439_v53 = vpop.f32.mrf.mxu1  ;;  %13497 = vmatprep.subr.bf16.mxu1 %v18685_v41  ;;  %v1695_v37 = vld [vmem:[%s20167_s28 + $0xc60] sm:$0x11]  ;;  %v18690_v41 = vcombine.low %v1437_v10, %v1693_v11  ;;  %v3589_v49 = vcombine.high %v3585_v35, %v3585_v35  ;;  %v3605_v50 = vcombine.high %v3597_v38, %v3597_v38  ;;  %v3604_v63 = vrot.slane %v3590_v51, %v20180_v15 }
 0x335   : > { %v11401_v57 = vpop.f32.mrf.mxu0  ;;  %v11440_v58 = vpop.f32.mrf.mxu1  ;;  %v3606_v11 = vcombine.high %v3604_v63, %v3604_v63 }
 0x336   : > { %v3571_v58 = vrot.slane %v3555_v12, %v20180_v15 }
 0x337   : > { %v11441_v1 = vpop.f32.mrf.mxu1  ;;  %v11477_v2 = vpop.f32.mrf.mxu0  ;;  %13396 = vmatmul.mubr.bf16.vlgmr.msra.gmra.mxu0 %v3515_v46  ;;  %v3586_v46 = vcombine.high %v3564_v33, %v3564_v33 }
 0x338   : > { %v11478_v4 = vadd.f32 %v11477_v2, %v11438_v47  ;;  %13458 = vmatpush1.bf16.xpose.msra.mxu0 %v18682_v54  ;;  %13475 = vmatprep.mubr.bf16.mxu0 %v3536_v48  ;;  %v18695_v47 = vcombine.high %v1439_v36, %v1695_v37  ;;  %v18692_v48 = vcombine.low %v1438_v17, %v1694_v18 }
 0x339   : > { %v11479_v5 = vpop.f32.mrf.mxu0  ;;  %v11517_v6 = vpop.f32.mrf.mxu1  ;;  %13436 = vmatmul.mubr.bf16.vlgmr.msra.gmra.mxu1 %v3537_v59  ;;  %13537 = vmatprep.subr.bf16.mxu0 %v18687_v60  ;;  %v18697_v54 = vcombine.high %v1440_v42, %v1696_v43  ;;  %v3627_v60 = vrot.slane %v3605_v50, %v20180_v15  ;;  %v18694_v2 = vcombine.low %v1439_v36, %v1695_v37 }
 0x33a   : > { %v11518_v8 = vadd.f32 %v11517_v6, %v11478_v4  ;;  %13498 = vmatpush1.bf16.xpose.msra.mxu1 %v18684_v61  ;;  %13515 = vmatprep.mubr.bf16.mxu1 %v3540_v62  ;;  %v1441_v61 = vld [vmem:[%s20167_s28 + $0x470] sm:$0xff]  ;;  %v1698_v4 = vld [vmem:[%s20167_s28 + $0xc78] sm:$0x11] }
 0x33b   : > { %v11480_v13 = vpop.f32.mrf.mxu0  ;;  %v11519_v14 = vpop.f32.mrf.mxu1  ;;  %13577 = vmatprep.subr.bf16.mxu1 %v18689_v3  ;;  %v1697_v62 = vld [vmem:[%s20167_s28 + $0xc70] sm:$0x11]  ;;  %v1442_v3 = vld [vmem:[%s20167_s28 + $0x478] sm:$0xff]  ;;  %v3637_v10 = vcombine.high %v3627_v60, %v3627_v60 }
 0x33c   : > { %v18701_v14 = vcombine.high %v1442_v3, %v1698_v4 }
 0x33d   : > { %v11481_v19 = vpop.f32.mrf.mxu0  ;;  %v11520_v20 = vpop.f32.mrf.mxu1 }
 0x33e   : > { %v3613_v20 = vrot.slane %v3597_v38, %v20180_v15 }
 0x33f   : > { %v11521_v26 = vpop.f32.mrf.mxu1  ;;  %v11557_v27 = vpop.f32.mrf.mxu0  ;;  %13476 = vmatmul.mubr.bf16.vlgmr.msra.gmra.mxu0 %v3522_v7  ;;  %v3587_v7 = vcombine.high %v3571_v58, %v3571_v58 }
 0x340   : > { %v11558_v30 = vadd.f32 %v11557_v27, %v11518_v8  ;;  %13538 = vmatpush1.bf16.xpose.msra.mxu0 %v18686_v16  ;;  %13555 = vmatprep.mubr.bf16.mxu0 %v3578_v9  ;;  %v18699_v8 = vcombine.high %v1441_v61, %v1697_v62  ;;  %v18696_v9 = vcombine.low %v1440_v42, %v1696_v43  ;;  %v1271_v16 = vld [vmem:[%s20178_s3 + $0x120] sm:$0xff] }
 0x341   : > { %v11559_v31 = vpop.f32.mrf.mxu0  ;;  %v11597_v32 = vpop.f32.mrf.mxu1  ;;  %13516 = vmatmul.mubr.bf16.vlgmr.msra.gmra.mxu1 %v3538_v21  ;;  %13617 = vmatprep.subr.bf16.mxu0 %v18691_v22  ;;  %v3634_v22 = vrot.slane %v3606_v11, %v20180_v15  ;;  %v3646_v25 = vrot.slane %v1271_v16, %v20180_v15  ;;  %v3639_v38 = vcombine.high %v1271_v16, %v1271_v16  ;;  %v1448_v16 = vld [vmem:[%s20167_s28 + $0x4a8] sm:$0xff] }
 0x342   : > { %v11598_v34 = vadd.f32 %v11597_v32, %v11558_v30  ;;  %13578 = vmatpush1.bf16.xpose.msra.mxu1 %v18688_v23  ;;  %13595 = vmatprep.mubr.bf16.mxu1 %v3588_v24  ;;  %v1443_v23 = vld [vmem:[%s20167_s28 + $0x480] sm:$0xff]  ;;  %v1700_v30 = vld [vmem:[%s20167_s28 + $0xc88] sm:$0x11] }
 0x343   : > { %v11560_v39 = vpop.f32.mrf.mxu0  ;;  %v11599_v40 = vpop.f32.mrf.mxu1  ;;  %13657 = vmatprep.subr.bf16.mxu1 %v18693_v28  ;;  %v1699_v24 = vld [vmem:[%s20167_s28 + $0xc80] sm:$0x11]  ;;  %v18698_v28 = vcombine.low %v1441_v61, %v1697_v62  ;;  %v3638_v36 = vcombine.high %v3634_v22, %v3634_v22  ;;  %v3654_v37 = vcombine.high %v3646_v25, %v3646_v25  ;;  %v3653_v50 = vrot.slane %v3639_v38, %v20180_v15 }
 0x345   : > { %v11561_v44 = vpop.f32.mrf.mxu0  ;;  %v11600_v45 = vpop.f32.mrf.mxu1  ;;  %v3655_v62 = vcombine.high %v3653_v50, %v3653_v50 }
 0x346   : > { %v3620_v45 = vrot.slane %v3604_v63, %v20180_v15 }
 0x347   : > { %v11601_v52 = vpop.f32.mrf.mxu1  ;;  %v11637_v53 = vpop.f32.mrf.mxu0  ;;  %13556 = vmatmul.mubr.bf16.vlgmr.msra.gmra.mxu0 %v3564_v33  ;;  %v3635_v33 = vcombine.high %v3613_v20, %v3613_v20 }
 0x348   : > { %v11638_v55 = vadd.f32 %v11637_v53, %v11598_v34  ;;  %13618 = vmatpush1.bf16.xpose.msra.mxu0 %v18690_v41  ;;  %13635 = vmatprep.mubr.bf16.mxu0 %v3585_v35  ;;  %v18703_v34 = vcombine.high %v1443_v23, %v1699_v24  ;;  %v18700_v35 = vcombine.low %v1442_v3, %v1698_v4 }
 0x349   : > { %v11639_v56 = vpop.f32.mrf.mxu0  ;;  %v11677_v57 = vpop.f32.mrf.mxu1  ;;  %13596 = vmatmul.mubr.bf16.vlgmr.msra.gmra.mxu1 %v3586_v46  ;;  %13697 = vmatprep.subr.bf16.mxu0 %v18695_v47  ;;  %v18705_v41 = vcombine.high %v1444_v29, %v1700_v30  ;;  %v3676_v47 = vrot.slane %v3654_v37, %v20180_v15  ;;  %v18702_v53 = vcombine.low %v1443_v23, %v1699_v24 }
 0x34a   : > { %v11678_v59 = vadd.f32 %v11677_v57, %v11638_v55  ;;  %13658 = vmatpush1.bf16.xpose.msra.mxu1 %v18692_v48  ;;  %13675 = vmatprep.mubr.bf16.mxu1 %v3589_v49  ;;  %v1445_v48 = vld [vmem:[%s20167_s28 + $0x490] sm:$0xff]  ;;  %v1702_v55 = vld [vmem:[%s20167_s28 + $0xc98] sm:$0x11] }
 0x34b   : > { %v11640_v0 = vpop.f32.mrf.mxu0  ;;  %v11679_v1 = vpop.f32.mrf.mxu1  ;;  %13737 = vmatprep.subr.bf16.mxu1 %v18697_v54  ;;  %v1701_v49 = vld [vmem:[%s20167_s28 + $0xc90] sm:$0x11]  ;;  %v1446_v54 = vld [vmem:[%s20167_s28 + $0x498] sm:$0xff]  ;;  %v3686_v61 = vcombine.high %v3676_v47, %v3676_v47 }
 0x34c   : > { %v18709_v1 = vcombine.high %v1446_v54, %v1702_v55 }
 0x34d   : > { %v11641_v5 = vpop.f32.mrf.mxu0  ;;  %v11680_v6 = vpop.f32.mrf.mxu1 }
 0x34e   : > { %v3662_v6 = vrot.slane %v3646_v25, %v20180_v15 }
 0x34f   : > { %v11681_v12 = vpop.f32.mrf.mxu1  ;;  %v11717_v13 = vpop.f32.mrf.mxu0  ;;  %13636 = vmatmul.mubr.bf16.vlgmr.msra.gmra.mxu0 %v3571_v58  ;;  %v3636_v58 = vcombine.high %v3620_v45, %v3620_v45 }
 0x350   : > { %v11718_v17 = vadd.f32 %v11717_v13, %v11678_v59  ;;  %13698 = vmatpush1.bf16.xpose.msra.mxu0 %v18694_v2  ;;  %13715 = vmatprep.mubr.bf16.mxu0 %v3627_v60  ;;  %v18707_v59 = vcombine.high %v1445_v48, %v1701_v49  ;;  %v18704_v60 = vcombine.low %v1444_v29, %v1700_v30  ;;  %v1272_v2 = vld [vmem:[%s20178_s3 + $0x128] sm:$0xff] }
 0x351   : > { %v11719_v18 = vpop.f32.mrf.mxu0  ;;  %v11757_v19 = vpop.f32.mrf.mxu1  ;;  %13676 = vmatmul.mubr.bf16.vlgmr.msra.gmra.mxu1 %v3587_v7  ;;  %13777 = vmatprep.subr.bf16.mxu0 %v18699_v8  ;;  %v3683_v8 = vrot.slane %v3655_v62, %v20180_v15  ;;  %v3695_v11 = vrot.slane %v1272_v2, %v20180_v15  ;;  %v3688_v25 = vcombine.high %v1272_v2, %v1272_v2  ;;  %v1452_v2 = vld [vmem:[%s20167_s28 + $0x4c8] sm:$0xff] }
 0x352   : > { %v11758_v21 = vadd.f32 %v11757_v19, %v11718_v17  ;;  %13738 = vmatpush1.bf16.xpose.msra.mxu1 %v18696_v9  ;;  %13755 = vmatprep.mubr.bf16.mxu1 %v3637_v10  ;;  %v1447_v9 = vld [vmem:[%s20167_s28 + $0x4a0] sm:$0xff]  ;;  %v1704_v17 = vld [vmem:[%s20167_s28 + $0xca8] sm:$0x11] }
 0x353   : > { %v11720_v26 = vpop.f32.mrf.mxu0  ;;  %v11759_v27 = vpop.f32.mrf.mxu1  ;;  %13817 = vmatprep.subr.bf16.mxu1 %v18701_v14  ;;  %v1703_v10 = vld [vmem:[%s20167_s28 + $0xca0] sm:$0x11]  ;;  %v18706_v14 = vcombine.low %v1445_v48, %v1701_v49  ;;  %v3687_v23 = vcombine.high %v3683_v8, %v3683_v8  ;;  %v3703_v24 = vcombine.high %v3695_v11, %v3695_v11  ;;  %v3702_v37 = vrot.slane %v3688_v25, %v20180_v15 }
 0x355   : > { %v11721_v31 = vpop.f32.mrf.mxu0  ;;  %v11760_v32 = vpop.f32.mrf.mxu1  ;;  %v3704_v49 = vcombine.high %v3702_v37, %v3702_v37 }
 0x356   : > { %v3669_v32 = vrot.slane %v3653_v50, %v20180_v15 }
 0x357   : > { %v11761_v39 = vpop.f32.mrf.mxu1  ;;  %v11797_v40 = vpop.f32.mrf.mxu0  ;;  %13716 = vmatmul.mubr.bf16.vlgmr.msra.gmra.mxu0 %v3613_v20  ;;  %v3684_v20 = vcombine.high %v3662_v6, %v3662_v6 }
 0x358   : > { %v11798_v42 = vadd.f32 %v11797_v40, %v11758_v21  ;;  %13778 = vmatpush1.bf16.xpose.msra.mxu0 %v18698_v28  ;;  %13795 = vmatprep.mubr.bf16.mxu0 %v3634_v22  ;;  %v18711_v21 = vcombine.high %v1447_v9, %v1703_v10  ;;  %v18708_v22 = vcombine.low %v1446_v54, %v1702_v55 }
 0x359   : > { %v11799_v43 = vpop.f32.mrf.mxu0  ;;  %v11837_v44 = vpop.f32.mrf.mxu1  ;;  %13756 = vmatmul.mubr.bf16.vlgmr.msra.gmra.mxu1 %v3635_v33  ;;  %13857 = vmatprep.subr.bf16.mxu0 %v18703_v34  ;;  %v18713_v28 = vcombine.high %v1448_v16, %v1704_v17  ;;  %v3725_v34 = vrot.slane %v3703_v24, %v20180_v15  ;;  %v18710_v40 = vcombine.low %v1447_v9, %v1703_v10 }
 0x35a   : > { %v11838_v46 = vadd.f32 %v11837_v44, %v11798_v42  ;;  %13818 = vmatpush1.bf16.xpose.msra.mxu1 %v18700_v35  ;;  %13835 = vmatprep.mubr.bf16.mxu1 %v3638_v36  ;;  %v1449_v35 = vld [vmem:[%s20167_s28 + $0x4b0] sm:$0xff]  ;;  %v1706_v42 = vld [vmem:[%s20167_s28 + $0xcb8] sm:$0x11] }
 0x35b   : > { %v11800_v51 = vpop.f32.mrf.mxu0  ;;  %v11839_v52 = vpop.f32.mrf.mxu1  ;;  %13897 = vmatprep.subr.bf16.mxu1 %v18705_v41  ;;  %v1705_v36 = vld [vmem:[%s20167_s28 + $0xcb0] sm:$0x11]  ;;  %v1450_v41 = vld [vmem:[%s20167_s28 + $0x4b8] sm:$0xff]  ;;  %v3735_v48 = vcombine.high %v3725_v34, %v3725_v34 }
 0x35c   : > { %v18717_v52 = vcombine.high %v1450_v41, %v1706_v42 }
 0x35d   : > { %v11801_v56 = vpop.f32.mrf.mxu0  ;;  %v11840_v57 = vpop.f32.mrf.mxu1 }
 0x35e   : > { %v3711_v57 = vrot.slane %v3695_v11, %v20180_v15 }
 0x35f   : > { %v11841_v63 = vpop.f32.mrf.mxu1  ;;  %v11877_v0 = vpop.f32.mrf.mxu0  ;;  %13796 = vmatmul.mubr.bf16.vlgmr.msra.gmra.mxu0 %v3620_v45  ;;  %v3685_v45 = vcombine.high %v3669_v32, %v3669_v32 }
 0x360   : > { %v11878_v3 = vadd.f32 %v11877_v0, %v11838_v46  ;;  %13858 = vmatpush1.bf16.xpose.msra.mxu0 %v18702_v53  ;;  %13875 = vmatprep.mubr.bf16.mxu0 %v3676_v47  ;;  %v18715_v46 = vcombine.high %v1449_v35, %v1705_v36  ;;  %v18712_v47 = vcombine.low %v1448_v16, %v1704_v17  ;;  %v1273_v53 = vld [vmem:[%s20178_s3 + $0x130] sm:$0xff] }
 0x361   : > { %v11879_v4 = vpop.f32.mrf.mxu0  ;;  %v11917_v5 = vpop.f32.mrf.mxu1  ;;  %13836 = vmatmul.mubr.bf16.vlgmr.msra.gmra.mxu1 %v3636_v58  ;;  %13937 = vmatprep.subr.bf16.mxu0 %v18707_v59  ;;  %v3732_v59 = vrot.slane %v3704_v49, %v20180_v15  ;;  %v3744_v62 = vrot.slane %v1273_v53, %v20180_v15  ;;  %v3737_v11 = vcombine.high %v1273_v53, %v1273_v53  ;;  %v1456_v53 = vld [vmem:[%s20167_s28 + $0x4e8] sm:$0xff] }
 0x362   : > { %v11918_v7 = vadd.f32 %v11917_v5, %v11878_v3  ;;  %13898 = vmatpush1.bf16.xpose.msra.mxu1 %v18704_v60  ;;  %13915 = vmatprep.mubr.bf16.mxu1 %v3686_v61  ;;  %v1451_v60 = vld [vmem:[%s20167_s28 + $0x4c0] sm:$0xff]  ;;  %v1708_v3 = vld [vmem:[%s20167_s28 + $0xcc8] sm:$0x11] }
 0x363   : > { %v11880_v12 = vpop.f32.mrf.mxu0  ;;  %v11919_v13 = vpop.f32.mrf.mxu1  ;;  %13977 = vmatprep.subr.bf16.mxu1 %v18709_v1  ;;  %v1707_v61 = vld [vmem:[%s20167_s28 + $0xcc0] sm:$0x11]  ;;  %v18714_v1 = vcombine.low %v1449_v35, %v1705_v36  ;;  %v3736_v9 = vcombine.high %v3732_v59, %v3732_v59  ;;  %v3752_v10 = vcombine.high %v3744_v62, %v3744_v62  ;;  %v3751_v24 = vrot.slane %v3737_v11, %v20180_v15 }
 0x365   : > { %v11881_v18 = vpop.f32.mrf.mxu0  ;;  %v11920_v19 = vpop.f32.mrf.mxu1  ;;  %v3753_v36 = vcombine.high %v3751_v24, %v3751_v24 }
 0x366   : > { %v3718_v19 = vrot.slane %v3702_v37, %v20180_v15 }
 0x367   : > { %v11921_v26 = vpop.f32.mrf.mxu1  ;;  %v11957_v27 = vpop.f32.mrf.mxu0  ;;  %13876 = vmatmul.mubr.bf16.vlgmr.msra.gmra.mxu0 %v3662_v6  ;;  %v3733_v6 = vcombine.high %v3711_v57, %v3711_v57 }
 0x368   : > { %v11958_v29 = vadd.f32 %v11957_v27, %v11918_v7  ;;  %13938 = vmatpush1.bf16.xpose.msra.mxu0 %v18706_v14  ;;  %13955 = vmatprep.mubr.bf16.mxu0 %v3683_v8  ;;  %v18719_v7 = vcombine.high %v1451_v60, %v1707_v61  ;;  %v18716_v8 = vcombine.low %v1450_v41, %v1706_v42 }
 0x369   : > { %v11959_v30 = vpop.f32.mrf.mxu0  ;;  %v11997_v31 = vpop.f32.mrf.mxu1  ;;  %13916 = vmatmul.mubr.bf16.vlgmr.msra.gmra.mxu1 %v3684_v20  ;;  %14017 = vmatprep.subr.bf16.mxu0 %v18711_v21  ;;  %v18721_v14 = vcombine.high %v1452_v2, %v1708_v3  ;;  %v3774_v21 = vrot.slane %v3752_v10, %v20180_v15  ;;  %v18718_v27 = vcombine.low %v1451_v60, %v1707_v61 }
 0x36a   : > { %v11998_v33 = vadd.f32 %v11997_v31, %v11958_v29  ;;  %13978 = vmatpush1.bf16.xpose.msra.mxu1 %v18708_v22  ;;  %13995 = vmatprep.mubr.bf16.mxu1 %v3687_v23  ;;  %v1453_v22 = vld [vmem:[%s20167_s28 + $0x4d0] sm:$0xff]  ;;  %v1710_v29 = vld [vmem:[%s20167_s28 + $0xcd8] sm:$0x11] }
 0x36b   : > { %v11960_v38 = vpop.f32.mrf.mxu0  ;;  %v11999_v39 = vpop.f32.mrf.mxu1  ;;  %14057 = vmatprep.subr.bf16.mxu1 %v18713_v28  ;;  %v1709_v23 = vld [vmem:[%s20167_s28 + $0xcd0] sm:$0x11]  ;;  %v1454_v28 = vld [vmem:[%s20167_s28 + $0x4d8] sm:$0xff]  ;;  %v3784_v35 = vcombine.high %v3774_v21, %v3774_v21 }
 0x36c   : > { %v18725_v39 = vcombine.high %v1454_v28, %v1710_v29 }
 0x36d   : > { %v11961_v43 = vpop.f32.mrf.mxu0  ;;  %v12000_v44 = vpop.f32.mrf.mxu1 }
 0x36e   : > { %v3760_v44 = vrot.slane %v3744_v62, %v20180_v15 }
 0x36f   : > { %v12001_v50 = vpop.f32.mrf.mxu1  ;;  %v12037_v51 = vpop.f32.mrf.mxu0  ;;  %13956 = vmatmul.mubr.bf16.vlgmr.msra.gmra.mxu0 %v3669_v32  ;;  %v3734_v32 = vcombine.high %v3718_v19, %v3718_v19 }
 0x370   : > { %v12038_v54 = vadd.f32 %v12037_v51, %v11998_v33  ;;  %14018 = vmatpush1.bf16.xpose.msra.mxu0 %v18710_v40  ;;  %14035 = vmatprep.mubr.bf16.mxu0 %v3725_v34  ;;  %v18723_v33 = vcombine.high %v1453_v22, %v1709_v23  ;;  %v18720_v34 = vcombine.low %v1452_v2, %v1708_v3  ;;  %v1274_v40 = vld [vmem:[%s20178_s3 + $0x138] sm:$0xff] }
 0x371   : > { %v12039_v55 = vpop.f32.mrf.mxu0  ;;  %v12077_v56 = vpop.f32.mrf.mxu1  ;;  %13996 = vmatmul.mubr.bf16.vlgmr.msra.gmra.mxu1 %v3685_v45  ;;  %14097 = vmatprep.subr.bf16.mxu0 %v18715_v46  ;;  %v3781_v46 = vrot.slane %v3753_v36, %v20180_v15  ;;  %v3793_v49 = vrot.slane %v1274_v40, %v20180_v15  ;;  %v3786_v62 = vcombine.high %v1274_v40, %v1274_v40  ;;  %v1460_v40 = vld [vmem:[%s20167_s28 + $0x508] sm:$0xff] }
 0x372   : > { %v12078_v58 = vadd.f32 %v12077_v56, %v12038_v54  ;;  %14058 = vmatpush1.bf16.xpose.msra.mxu1 %v18712_v47  ;;  %14075 = vmatprep.mubr.bf16.mxu1 %v3735_v48  ;;  %v1455_v47 = vld [vmem:[%s20167_s28 + $0x4e0] sm:$0xff]  ;;  %v1712_v54 = vld [vmem:[%s20167_s28 + $0xce8] sm:$0x11] }
 0x373   : > { %v12040_v63 = vpop.f32.mrf.mxu0  ;;  %v12079_v0 = vpop.f32.mrf.mxu1  ;;  %14137 = vmatprep.subr.bf16.mxu1 %v18717_v52  ;;  %v1711_v48 = vld [vmem:[%s20167_s28 + $0xce0] sm:$0x11]  ;;  %v18722_v52 = vcombine.low %v1453_v22, %v1709_v23  ;;  %v3785_v60 = vcombine.high %v3781_v46, %v3781_v46  ;;  %v3801_v61 = vcombine.high %v3793_v49, %v3793_v49  ;;  %v3800_v10 = vrot.slane %v3786_v62, %v20180_v15 }
 0x375   : > { %v12041_v4 = vpop.f32.mrf.mxu0  ;;  %v12080_v5 = vpop.f32.mrf.mxu1  ;;  %v3802_v23 = vcombine.high %v3800_v10, %v3800_v10 }
 0x376   : > { %v3767_v5 = vrot.slane %v3751_v24, %v20180_v15 }
 0x377   : > { %v12081_v12 = vpop.f32.mrf.mxu1  ;;  %v12117_v13 = vpop.f32.mrf.mxu0  ;;  %14036 = vmatmul.mubr.bf16.vlgmr.msra.gmra.mxu0 %v3711_v57  ;;  %v3782_v57 = vcombine.high %v3760_v44, %v3760_v44 }
 0x378   : > { %v12118_v16 = vadd.f32 %v12117_v13, %v12078_v58  ;;  %14098 = vmatpush1.bf16.xpose.msra.mxu0 %v18714_v1  ;;  %14115 = vmatprep.mubr.bf16.mxu0 %v3732_v59  ;;  %v18727_v58 = vcombine.high %v1455_v47, %v1711_v48  ;;  %v18724_v59 = vcombine.low %v1454_v28, %v1710_v29 }
 0x379   : > { %v12119_v17 = vpop.f32.mrf.mxu0  ;;  %v12157_v18 = vpop.f32.mrf.mxu1  ;;  %14076 = vmatmul.mubr.bf16.vlgmr.msra.gmra.mxu1 %v3733_v6  ;;  %14177 = vmatprep.subr.bf16.mxu0 %v18719_v7  ;;  %v18729_v1 = vcombine.high %v1456_v53, %v1712_v54  ;;  %v3823_v7 = vrot.slane %v3801_v61, %v20180_v15  ;;  %v18726_v13 = vcombine.low %v1455_v47, %v1711_v48 }
 0x37a   : > { %v12158_v20 = vadd.f32 %v12157_v18, %v12118_v16  ;;  %14138 = vmatpush1.bf16.xpose.msra.mxu1 %v18716_v8  ;;  %14155 = vmatprep.mubr.bf16.mxu1 %v3736_v9  ;;  %v1457_v8 = vld [vmem:[%s20167_s28 + $0x4f0] sm:$0xff]  ;;  %v1714_v16 = vld [vmem:[%s20167_s28 + $0xcf8] sm:$0x11] }
 0x37b   : > { %v12120_v25 = vpop.f32.mrf.mxu0  ;;  %v12159_v26 = vpop.f32.mrf.mxu1  ;;  %14217 = vmatprep.subr.bf16.mxu1 %v18721_v14  ;;  %v1713_v9 = vld [vmem:[%s20167_s28 + $0xcf0] sm:$0x11]  ;;  %v1458_v14 = vld [vmem:[%s20167_s28 + $0x4f8] sm:$0xff]  ;;  %v3833_v22 = vcombine.high %v3823_v7, %v3823_v7 }
 0x37c   : > { %v18733_v26 = vcombine.high %v1458_v14, %v1714_v16 }
 0x37d   : > { %v12121_v30 = vpop.f32.mrf.mxu0  ;;  %v12160_v31 = vpop.f32.mrf.mxu1 }
 0x37e   : > { %v3809_v31 = vrot.slane %v3793_v49, %v20180_v15 }
 0x37f   : > { %v12161_v37 = vpop.f32.mrf.mxu1  ;;  %v12197_v38 = vpop.f32.mrf.mxu0  ;;  %14116 = vmatmul.mubr.bf16.vlgmr.msra.gmra.mxu0 %v3718_v19  ;;  %v3783_v19 = vcombine.high %v3767_v5, %v3767_v5 }
 0x380   : > { %v12198_v41 = vadd.f32 %v12197_v38, %v12158_v20  ;;  %14178 = vmatpush1.bf16.xpose.msra.mxu0 %v18718_v27  ;;  %14195 = vmatprep.mubr.bf16.mxu0 %v3774_v21  ;;  %v18731_v20 = vcombine.high %v1457_v8, %v1713_v9  ;;  %v18728_v21 = vcombine.low %v1456_v53, %v1712_v54  ;;  %v1275_v27 = vld [vmem:[%s20178_s3 + $0x140] sm:$0xff] }
 0x381   : > { %v12199_v42 = vpop.f32.mrf.mxu0  ;;  %v12237_v43 = vpop.f32.mrf.mxu1  ;;  %14156 = vmatmul.mubr.bf16.vlgmr.msra.gmra.mxu1 %v3734_v32  ;;  %14257 = vmatprep.subr.bf16.mxu0 %v18723_v33  ;;  %v3830_v33 = vrot.slane %v3802_v23, %v20180_v15  ;;  %v3842_v36 = vrot.slane %v1275_v27, %v20180_v15  ;;  %v3835_v49 = vcombine.high %v1275_v27, %v1275_v27  ;;  %v1464_v27 = vld [vmem:[%s20167_s28 + $0x528] sm:$0xff] }
 0x382   : > { %v12238_v45 = vadd.f32 %v12237_v43, %v12198_v41  ;;  %14218 = vmatpush1.bf16.xpose.msra.mxu1 %v18720_v34  ;;  %14235 = vmatprep.mubr.bf16.mxu1 %v3784_v35  ;;  %v1459_v34 = vld [vmem:[%s20167_s28 + $0x500] sm:$0xff]  ;;  %v1716_v41 = vld [vmem:[%s20167_s28 + $0xd08] sm:$0x11] }
 0x383   : > { %v12200_v50 = vpop.f32.mrf.mxu0  ;;  %v12239_v51 = vpop.f32.mrf.mxu1  ;;  %14297 = vmatprep.subr.bf16.mxu1 %v18725_v39  ;;  %v1715_v35 = vld [vmem:[%s20167_s28 + $0xd00] sm:$0x11]  ;;  %v18730_v39 = vcombine.low %v1457_v8, %v1713_v9  ;;  %v3834_v47 = vcombine.high %v3830_v33, %v3830_v33  ;;  %v3850_v48 = vcombine.high %v3842_v36, %v3842_v36  ;;  %v3849_v61 = vrot.slane %v3835_v49, %v20180_v15 }
 0x385   : > { %v12201_v55 = vpop.f32.mrf.mxu0  ;;  %v12240_v56 = vpop.f32.mrf.mxu1  ;;  %v3851_v9 = vcombine.high %v3849_v61, %v3849_v61 }
 0x386   : > { %v3816_v56 = vrot.slane %v3800_v10, %v20180_v15 }
 0x387   : > { %v12241_v63 = vpop.f32.mrf.mxu1  ;;  %v12277_v0 = vpop.f32.mrf.mxu0  ;;  %14196 = vmatmul.mubr.bf16.vlgmr.msra.gmra.mxu0 %v3760_v44  ;;  %v3831_v44 = vcombine.high %v3809_v31, %v3809_v31 }
 0x388   : > { %v12278_v2 = vadd.f32 %v12277_v0, %v12238_v45  ;;  %14258 = vmatpush1.bf16.xpose.msra.mxu0 %v18722_v52  ;;  %14275 = vmatprep.mubr.bf16.mxu0 %v3781_v46  ;;  %v18735_v45 = vcombine.high %v1459_v34, %v1715_v35  ;;  %v18732_v46 = vcombine.low %v1458_v14, %v1714_v16 }
 0x389   : > { %v12279_v3 = vpop.f32.mrf.mxu0  ;;  %v12317_v4 = vpop.f32.mrf.mxu1  ;;  %14236 = vmatmul.mubr.bf16.vlgmr.msra.gmra.mxu1 %v3782_v57  ;;  %14337 = vmatprep.subr.bf16.mxu0 %v18727_v58  ;;  %v18737_v52 = vcombine.high %v1460_v40, %v1716_v41  ;;  %v3872_v58 = vrot.slane %v3850_v48, %v20180_v15  ;;  %v18734_v0 = vcombine.low %v1459_v34, %v1715_v35 }
 0x38a   : > { %v12318_v6 = vadd.f32 %v12317_v4, %v12278_v2  ;;  %14298 = vmatpush1.bf16.xpose.msra.mxu1 %v18724_v59  ;;  %14315 = vmatprep.mubr.bf16.mxu1 %v3785_v60  ;;  %v1461_v59 = vld [vmem:[%s20167_s28 + $0x510] sm:$0xff]  ;;  %v1718_v2 = vld [vmem:[%s20167_s28 + $0xd18] sm:$0x11] }
 0x38b   : > { %v12280_v11 = vpop.f32.mrf.mxu0  ;;  %v12319_v12 = vpop.f32.mrf.mxu1  ;;  %14377 = vmatprep.subr.bf16.mxu1 %v18729_v1  ;;  %v1717_v60 = vld [vmem:[%s20167_s28 + $0xd10] sm:$0x11]  ;;  %v1462_v1 = vld [vmem:[%s20167_s28 + $0x518] sm:$0xff]  ;;  %v3882_v8 = vcombine.high %v3872_v58, %v3872_v58 }
 0x38c   : > { %v18741_v12 = vcombine.high %v1462_v1, %v1718_v2 }
 0x38d   : > { %v12281_v17 = vpop.f32.mrf.mxu0  ;;  %v12320_v18 = vpop.f32.mrf.mxu1 }
 0x38e   : > { %v3858_v18 = vrot.slane %v3842_v36, %v20180_v15 }
 0x38f   : > { %v12321_v24 = vpop.f32.mrf.mxu1  ;;  %v12357_v25 = vpop.f32.mrf.mxu0  ;;  %14276 = vmatmul.mubr.bf16.vlgmr.msra.gmra.mxu0 %v3767_v5  ;;  %v3832_v5 = vcombine.high %v3816_v56, %v3816_v56 }
 0x390   : > { %v12358_v28 = vadd.f32 %v12357_v25, %v12318_v6  ;;  %14338 = vmatpush1.bf16.xpose.msra.mxu0 %v18726_v13  ;;  %14355 = vmatprep.mubr.bf16.mxu0 %v3823_v7  ;;  %v18739_v6 = vcombine.high %v1461_v59, %v1717_v60  ;;  %v18736_v7 = vcombine.low %v1460_v40, %v1716_v41  ;;  %v1276_v13 = vld [vmem:[%s20178_s3 + $0x148] sm:$0xff] }
 0x391   : > { %v12359_v29 = vpop.f32.mrf.mxu0  ;;  %v12397_v30 = vpop.f32.mrf.mxu1  ;;  %14316 = vmatmul.mubr.bf16.vlgmr.msra.gmra.mxu1 %v3783_v19  ;;  %14417 = vmatprep.subr.bf16.mxu0 %v18731_v20  ;;  %v3879_v20 = vrot.slane %v3851_v9, %v20180_v15  ;;  %v3891_v23 = vrot.slane %v1276_v13, %v20180_v15  ;;  %v3884_v36 = vcombine.high %v1276_v13, %v1276_v13  ;;  %v1468_v13 = vld [vmem:[%s20167_s28 + $0x548] sm:$0xff] }
 0x392   : > { %v12398_v32 = vadd.f32 %v12397_v30, %v12358_v28  ;;  %14378 = vmatpush1.bf16.xpose.msra.mxu1 %v18728_v21  ;;  %14395 = vmatprep.mubr.bf16.mxu1 %v3833_v22  ;;  %v1463_v21 = vld [vmem:[%s20167_s28 + $0x520] sm:$0xff]  ;;  %v1720_v28 = vld [vmem:[%s20167_s28 + $0xd28] sm:$0x11] }
 0x393   : > { %v12360_v37 = vpop.f32.mrf.mxu0  ;;  %v12399_v38 = vpop.f32.mrf.mxu1  ;;  %14457 = vmatprep.subr.bf16.mxu1 %v18733_v26  ;;  %v1719_v22 = vld [vmem:[%s20167_s28 + $0xd20] sm:$0x11]  ;;  %v18738_v26 = vcombine.low %v1461_v59, %v1717_v60  ;;  %v3883_v34 = vcombine.high %v3879_v20, %v3879_v20  ;;  %v3899_v35 = vcombine.high %v3891_v23, %v3891_v23  ;;  %v3898_v48 = vrot.slane %v3884_v36, %v20180_v15 }
 0x395   : > { %v12361_v42 = vpop.f32.mrf.mxu0  ;;  %v12400_v43 = vpop.f32.mrf.mxu1  ;;  %v3900_v60 = vcombine.high %v3898_v48, %v3898_v48 }
 0x396   : > { %v3865_v43 = vrot.slane %v3849_v61, %v20180_v15 }
 0x397   : > { %v12401_v50 = vpop.f32.mrf.mxu1  ;;  %v12437_v51 = vpop.f32.mrf.mxu0  ;;  %14356 = vmatmul.mubr.bf16.vlgmr.msra.gmra.mxu0 %v3809_v31  ;;  %v3880_v31 = vcombine.high %v3858_v18, %v3858_v18 }
 0x398   : > { %v12438_v53 = vadd.f32 %v12437_v51, %v12398_v32  ;;  %14418 = vmatpush1.bf16.xpose.msra.mxu0 %v18730_v39  ;;  %14435 = vmatprep.mubr.bf16.mxu0 %v3830_v33  ;;  %v18743_v32 = vcombine.high %v1463_v21, %v1719_v22  ;;  %v18740_v33 = vcombine.low %v1462_v1, %v1718_v2 }
 0x399   : > { %v12439_v54 = vpop.f32.mrf.mxu0  ;;  %v12477_v55 = vpop.f32.mrf.mxu1  ;;  %14396 = vmatmul.mubr.bf16.vlgmr.msra.gmra.mxu1 %v3831_v44  ;;  %14497 = vmatprep.subr.bf16.mxu0 %v18735_v45  ;;  %v18745_v39 = vcombine.high %v1464_v27, %v1720_v28  ;;  %v3921_v45 = vrot.slane %v3899_v35, %v20180_v15  ;;  %v18742_v51 = vcombine.low %v1463_v21, %v1719_v22 }
 0x39a   : > { %v12478_v57 = vadd.f32 %v12477_v55, %v12438_v53  ;;  %14458 = vmatpush1.bf16.xpose.msra.mxu1 %v18732_v46  ;;  %14475 = vmatprep.mubr.bf16.mxu1 %v3834_v47  ;;  %v1465_v46 = vld [vmem:[%s20167_s28 + $0x530] sm:$0xff]  ;;  %v1722_v53 = vld [vmem:[%s20167_s28 + $0xd38] sm:$0x11] }
 0x39b   : > { %v12440_v62 = vpop.f32.mrf.mxu0  ;;  %v12479_v63 = vpop.f32.mrf.mxu1  ;;  %14537 = vmatprep.subr.bf16.mxu1 %v18737_v52  ;;  %v1721_v47 = vld [vmem:[%s20167_s28 + $0xd30] sm:$0x11]  ;;  %v1466_v52 = vld [vmem:[%s20167_s28 + $0x538] sm:$0xff]  ;;  %v3931_v59 = vcombine.high %v3921_v45, %v3921_v45 }
 0x39c   : > { %v18749_v63 = vcombine.high %v1466_v52, %v1722_v53 }
 0x39d   : > { %v12441_v3 = vpop.f32.mrf.mxu0  ;;  %v12480_v4 = vpop.f32.mrf.mxu1 }
 0x39e   : > { %v3907_v4 = vrot.slane %v3891_v23, %v20180_v15 }
 0x39f   : > { %v12481_v10 = vpop.f32.mrf.mxu1  ;;  %v12517_v11 = vpop.f32.mrf.mxu0  ;;  %14436 = vmatmul.mubr.bf16.vlgmr.msra.gmra.mxu0 %v3816_v56  ;;  %v3881_v56 = vcombine.high %v3865_v43, %v3865_v43 }
 0x3a0   : > { %v12518_v14 = vadd.f32 %v12517_v11, %v12478_v57  ;;  %14498 = vmatpush1.bf16.xpose.msra.mxu0 %v18734_v0  ;;  %14515 = vmatprep.mubr.bf16.mxu0 %v3872_v58  ;;  %v18747_v57 = vcombine.high %v1465_v46, %v1721_v47  ;;  %v18744_v58 = vcombine.low %v1464_v27, %v1720_v28  ;;  %v1277_v0 = vld [vmem:[%s20178_s3 + $0x150] sm:$0xff] }
 0x3a1   : > { %v12519_v16 = vpop.f32.mrf.mxu0  ;;  %v12557_v17 = vpop.f32.mrf.mxu1  ;;  %14476 = vmatmul.mubr.bf16.vlgmr.msra.gmra.mxu1 %v3832_v5  ;;  %14577 = vmatprep.subr.bf16.mxu0 %v18739_v6  ;;  %v3928_v6 = vrot.slane %v3900_v60, %v20180_v15  ;;  %v3940_v9 = vrot.slane %v1277_v0, %v20180_v15  ;;  %v3933_v23 = vcombine.high %v1277_v0, %v1277_v0  ;;  %v1472_v0 = vld [vmem:[%s20167_s28 + $0x568] sm:$0xff] }
 0x3a2   : > { %v12558_v19 = vadd.f32 %v12557_v17, %v12518_v14  ;;  %14538 = vmatpush1.bf16.xpose.msra.mxu1 %v18736_v7  ;;  %14555 = vmatprep.mubr.bf16.mxu1 %v3882_v8  ;;  %v1467_v7 = vld [vmem:[%s20167_s28 + $0x540] sm:$0xff]  ;;  %v1724_v14 = vld [vmem:[%s20167_s28 + $0xd48] sm:$0x11] }
 0x3a3   : > { %v12520_v24 = vpop.f32.mrf.mxu0  ;;  %v12559_v25 = vpop.f32.mrf.mxu1  ;;  %14617 = vmatprep.subr.bf16.mxu1 %v18741_v12  ;;  %v1723_v8 = vld [vmem:[%s20167_s28 + $0xd40] sm:$0x11]  ;;  %v18746_v12 = vcombine.low %v1465_v46, %v1721_v47  ;;  %v3932_v21 = vcombine.high %v3928_v6, %v3928_v6  ;;  %v3948_v22 = vcombine.high %v3940_v9, %v3940_v9  ;;  %v3947_v35 = vrot.slane %v3933_v23, %v20180_v15 }
 0x3a5   : > { %v12521_v29 = vpop.f32.mrf.mxu0  ;;  %v12560_v30 = vpop.f32.mrf.mxu1  ;;  %v3949_v47 = vcombine.high %v3947_v35, %v3947_v35 }
 0x3a6   : > { %v3914_v30 = vrot.slane %v3898_v48, %v20180_v15 }
 0x3a7   : > { %v12561_v37 = vpop.f32.mrf.mxu1  ;;  %v12597_v38 = vpop.f32.mrf.mxu0  ;;  %14516 = vmatmul.mubr.bf16.vlgmr.msra.gmra.mxu0 %v3858_v18  ;;  %v3929_v18 = vcombine.high %v3907_v4, %v3907_v4 }
 0x3a8   : > { %v12598_v40 = vadd.f32 %v12597_v38, %v12558_v19  ;;  %14578 = vmatpush1.bf16.xpose.msra.mxu0 %v18738_v26  ;;  %14595 = vmatprep.mubr.bf16.mxu0 %v3879_v20  ;;  %v18751_v19 = vcombine.high %v1467_v7, %v1723_v8  ;;  %v18748_v20 = vcombine.low %v1466_v52, %v1722_v53 }
 0x3a9   : > { %v12599_v41 = vpop.f32.mrf.mxu0  ;;  %v12637_v42 = vpop.f32.mrf.mxu1  ;;  %14556 = vmatmul.mubr.bf16.vlgmr.msra.gmra.mxu1 %v3880_v31  ;;  %14657 = vmatprep.subr.bf16.mxu0 %v18743_v32  ;;  %v18753_v26 = vcombine.high %v1468_v13, %v1724_v14  ;;  %v3970_v32 = vrot.slane %v3948_v22, %v20180_v15  ;;  %v18750_v38 = vcombine.low %v1467_v7, %v1723_v8 }
 0x3aa   : > { %v12638_v44 = vadd.f32 %v12637_v42, %v12598_v40  ;;  %14618 = vmatpush1.bf16.xpose.msra.mxu1 %v18740_v33  ;;  %14635 = vmatprep.mubr.bf16.mxu1 %v3883_v34  ;;  %v1469_v33 = vld [vmem:[%s20167_s28 + $0x550] sm:$0xff]  ;;  %v1726_v40 = vld [vmem:[%s20167_s28 + $0xd58] sm:$0x11] }
 0x3ab   : > { %v12600_v49 = vpop.f32.mrf.mxu0  ;;  %v12639_v50 = vpop.f32.mrf.mxu1  ;;  %14697 = vmatprep.subr.bf16.mxu1 %v18745_v39  ;;  %v1725_v34 = vld [vmem:[%s20167_s28 + $0xd50] sm:$0x11]  ;;  %v1470_v39 = vld [vmem:[%s20167_s28 + $0x558] sm:$0xff]  ;;  %v3980_v46 = vcombine.high %v3970_v32, %v3970_v32 }
 0x3ac   : > { %v18757_v50 = vcombine.high %v1470_v39, %v1726_v40 }
 0x3ad   : > { %v12601_v54 = vpop.f32.mrf.mxu0  ;;  %v12640_v55 = vpop.f32.mrf.mxu1 }
 0x3ae   : > { %v3956_v55 = vrot.slane %v3940_v9, %v20180_v15 }
 0x3af   : > { %v12641_v61 = vpop.f32.mrf.mxu1  ;;  %v12677_v62 = vpop.f32.mrf.mxu0  ;;  %14596 = vmatmul.mubr.bf16.vlgmr.msra.gmra.mxu0 %v3865_v43  ;;  %v3930_v43 = vcombine.high %v3914_v30, %v3914_v30 }
 0x3b0   : > { %v12678_v1 = vadd.f32 %v12677_v62, %v12638_v44  ;;  %14658 = vmatpush1.bf16.xpose.msra.mxu0 %v18742_v51  ;;  %14675 = vmatprep.mubr.bf16.mxu0 %v3921_v45  ;;  %v18755_v44 = vcombine.high %v1469_v33, %v1725_v34  ;;  %v18752_v45 = vcombine.low %v1468_v13, %v1724_v14  ;;  %v1278_v51 = vld [vmem:[%s20178_s3 + $0x158] sm:$0xff] }
 0x3b1   : > { %v12679_v2 = vpop.f32.mrf.mxu0  ;;  %v12717_v3 = vpop.f32.mrf.mxu1  ;;  %14636 = vmatmul.mubr.bf16.vlgmr.msra.gmra.mxu1 %v3881_v56  ;;  %14737 = vmatprep.subr.bf16.mxu0 %v18747_v57  ;;  %v3977_v57 = vrot.slane %v3949_v47, %v20180_v15  ;;  %v3989_v60 = vrot.slane %v1278_v51, %v20180_v15  ;;  %v3982_v9 = vcombine.high %v1278_v51, %v1278_v51  ;;  %v1476_v51 = vld [vmem:[%s20167_s28 + $0x588] sm:$0xff] }
 0x3b2   : > { %v12718_v5 = vadd.f32 %v12717_v3, %v12678_v1  ;;  %14698 = vmatpush1.bf16.xpose.msra.mxu1 %v18744_v58  ;;  %14715 = vmatprep.mubr.bf16.mxu1 %v3931_v59  ;;  %v1471_v58 = vld [vmem:[%s20167_s28 + $0x560] sm:$0xff]  ;;  %v1728_v1 = vld [vmem:[%s20167_s28 + $0xd68] sm:$0x11] }
 0x3b3   : > { %v12680_v10 = vpop.f32.mrf.mxu0  ;;  %v12719_v11 = vpop.f32.mrf.mxu1  ;;  %14777 = vmatprep.subr.bf16.mxu1 %v18749_v63  ;;  %v1727_v59 = vld [vmem:[%s20167_s28 + $0xd60] sm:$0x11]  ;;  %v18754_v63 = vcombine.low %v1469_v33, %v1725_v34  ;;  %v3981_v7 = vcombine.high %v3977_v57, %v3977_v57  ;;  %v3997_v8 = vcombine.high %v3989_v60, %v3989_v60  ;;  %v3996_v22 = vrot.slane %v3982_v9, %v20180_v15 }
 0x3b5   : > { %v12681_v16 = vpop.f32.mrf.mxu0  ;;  %v12720_v17 = vpop.f32.mrf.mxu1  ;;  %v3998_v34 = vcombine.high %v3996_v22, %v3996_v22 }
 0x3b6   : > { %v3963_v17 = vrot.slane %v3947_v35, %v20180_v15 }
 0x3b7   : > { %v12721_v24 = vpop.f32.mrf.mxu1  ;;  %v12757_v25 = vpop.f32.mrf.mxu0  ;;  %14676 = vmatmul.mubr.bf16.vlgmr.msra.gmra.mxu0 %v3907_v4  ;;  %v3978_v4 = vcombine.high %v3956_v55, %v3956_v55 }
 0x3b8   : > { %v12758_v27 = vadd.f32 %v12757_v25, %v12718_v5  ;;  %14738 = vmatpush1.bf16.xpose.msra.mxu0 %v18746_v12  ;;  %14755 = vmatprep.mubr.bf16.mxu0 %v3928_v6  ;;  %v18759_v5 = vcombine.high %v1471_v58, %v1727_v59  ;;  %v18756_v6 = vcombine.low %v1470_v39, %v1726_v40 }
 0x3b9   : > { %v12759_v28 = vpop.f32.mrf.mxu0  ;;  %v12797_v29 = vpop.f32.mrf.mxu1  ;;  %14716 = vmatmul.mubr.bf16.vlgmr.msra.gmra.mxu1 %v3929_v18  ;;  %14817 = vmatprep.subr.bf16.mxu0 %v18751_v19  ;;  %v18761_v12 = vcombine.high %v1472_v0, %v1728_v1  ;;  %v4019_v19 = vrot.slane %v3997_v8, %v20180_v15  ;;  %v18758_v25 = vcombine.low %v1471_v58, %v1727_v59 }
 0x3ba   : > { %v12798_v31 = vadd.f32 %v12797_v29, %v12758_v27  ;;  %14778 = vmatpush1.bf16.xpose.msra.mxu1 %v18748_v20  ;;  %14795 = vmatprep.mubr.bf16.mxu1 %v3932_v21  ;;  %v1473_v20 = vld [vmem:[%s20167_s28 + $0x570] sm:$0xff]  ;;  %v1730_v27 = vld [vmem:[%s20167_s28 + $0xd78] sm:$0x11] }
 0x3bb   : > { %v12760_v36 = vpop.f32.mrf.mxu0  ;;  %v12799_v37 = vpop.f32.mrf.mxu1  ;;  %14857 = vmatprep.subr.bf16.mxu1 %v18753_v26  ;;  %v1729_v21 = vld [vmem:[%s20167_s28 + $0xd70] sm:$0x11]  ;;  %v1474_v26 = vld [vmem:[%s20167_s28 + $0x578] sm:$0xff]  ;;  %v4029_v33 = vcombine.high %v4019_v19, %v4019_v19 }
 0x3bc   : > { %v18765_v37 = vcombine.high %v1474_v26, %v1730_v27 }
 0x3bd   : > { %v12761_v41 = vpop.f32.mrf.mxu0  ;;  %v12800_v42 = vpop.f32.mrf.mxu1 }
 0x3be   : > { %v4005_v42 = vrot.slane %v3989_v60, %v20180_v15 }
 0x3bf   : > { %v12801_v48 = vpop.f32.mrf.mxu1  ;;  %v12837_v49 = vpop.f32.mrf.mxu0  ;;  %14756 = vmatmul.mubr.bf16.vlgmr.msra.gmra.mxu0 %v3914_v30  ;;  %v3979_v30 = vcombine.high %v3963_v17, %v3963_v17 }
 0x3c0   : > { %v12838_v52 = vadd.f32 %v12837_v49, %v12798_v31  ;;  %14818 = vmatpush1.bf16.xpose.msra.mxu0 %v18750_v38  ;;  %14835 = vmatprep.mubr.bf16.mxu0 %v3970_v32  ;;  %v18763_v31 = vcombine.high %v1473_v20, %v1729_v21  ;;  %v18760_v32 = vcombine.low %v1472_v0, %v1728_v1  ;;  %v1279_v38 = vld [vmem:[%s20178_s3 + $0x160] sm:$0xff] }
 0x3c1   : > { %v12839_v53 = vpop.f32.mrf.mxu0  ;;  %v12877_v54 = vpop.f32.mrf.mxu1  ;;  %14796 = vmatmul.mubr.bf16.vlgmr.msra.gmra.mxu1 %v3930_v43  ;;  %14897 = vmatprep.subr.bf16.mxu0 %v18755_v44  ;;  %v4026_v44 = vrot.slane %v3998_v34, %v20180_v15  ;;  %v4038_v47 = vrot.slane %v1279_v38, %v20180_v15  ;;  %v4031_v60 = vcombine.high %v1279_v38, %v1279_v38  ;;  %v1480_v38 = vld [vmem:[%s20167_s28 + $0x5a8] sm:$0xff] }
 0x3c2   : > { %v12878_v56 = vadd.f32 %v12877_v54, %v12838_v52  ;;  %14858 = vmatpush1.bf16.xpose.msra.mxu1 %v18752_v45  ;;  %14875 = vmatprep.mubr.bf16.mxu1 %v3980_v46  ;;  %v1475_v45 = vld [vmem:[%s20167_s28 + $0x580] sm:$0xff]  ;;  %v1732_v52 = vld [vmem:[%s20167_s28 + $0xd88] sm:$0x11] }
 0x3c3   : > { %v12840_v61 = vpop.f32.mrf.mxu0  ;;  %v12879_v62 = vpop.f32.mrf.mxu1  ;;  %14937 = vmatprep.subr.bf16.mxu1 %v18757_v50  ;;  %v1731_v46 = vld [vmem:[%s20167_s28 + $0xd80] sm:$0x11]  ;;  %v18762_v50 = vcombine.low %v1473_v20, %v1729_v21  ;;  %v4030_v58 = vcombine.high %v4026_v44, %v4026_v44  ;;  %v4046_v59 = vcombine.high %v4038_v47, %v4038_v47  ;;  %v4045_v8 = vrot.slane %v4031_v60, %v20180_v15 }
 0x3c5   : > { %v12841_v2 = vpop.f32.mrf.mxu0  ;;  %v12880_v3 = vpop.f32.mrf.mxu1  ;;  %v4047_v21 = vcombine.high %v4045_v8, %v4045_v8 }
 0x3c6   : > { %v4012_v3 = vrot.slane %v3996_v22, %v20180_v15 }
 0x3c7   : > { %v12881_v10 = vpop.f32.mrf.mxu1  ;;  %v12917_v11 = vpop.f32.mrf.mxu0  ;;  %14836 = vmatmul.mubr.bf16.vlgmr.msra.gmra.mxu0 %v3956_v55  ;;  %v4027_v55 = vcombine.high %v4005_v42, %v4005_v42 }
 0x3c8   : > { %v12918_v13 = vadd.f32 %v12917_v11, %v12878_v56  ;;  %14898 = vmatpush1.bf16.xpose.msra.mxu0 %v18754_v63  ;;  %14915 = vmatprep.mubr.bf16.mxu0 %v3977_v57  ;;  %v18767_v56 = vcombine.high %v1475_v45, %v1731_v46  ;;  %v18764_v57 = vcombine.low %v1474_v26, %v1730_v27 }
 0x3c9   : > { %v12919_v14 = vpop.f32.mrf.mxu0  ;;  %v12957_v16 = vpop.f32.mrf.mxu1  ;;  %14876 = vmatmul.mubr.bf16.vlgmr.msra.gmra.mxu1 %v3978_v4  ;;  %14977 = vmatprep.subr.bf16.mxu0 %v18759_v5  ;;  %v18769_v63 = vcombine.high %v1476_v51, %v1732_v52  ;;  %v4068_v5 = vrot.slane %v4046_v59, %v20180_v15  ;;  %v18766_v11 = vcombine.low %v1475_v45, %v1731_v46 }
 0x3ca   : > { %v12958_v18 = vadd.f32 %v12957_v16, %v12918_v13  ;;  %14938 = vmatpush1.bf16.xpose.msra.mxu1 %v18756_v6  ;;  %14955 = vmatprep.mubr.bf16.mxu1 %v3981_v7  ;;  %v1477_v6 = vld [vmem:[%s20167_s28 + $0x590] sm:$0xff]  ;;  %v1734_v13 = vld [vmem:[%s20167_s28 + $0xd98] sm:$0x11] }
 0x3cb   : > { %v12920_v23 = vpop.f32.mrf.mxu0  ;;  %v12959_v24 = vpop.f32.mrf.mxu1  ;;  %15017 = vmatprep.subr.bf16.mxu1 %v18761_v12  ;;  %v1733_v7 = vld [vmem:[%s20167_s28 + $0xd90] sm:$0x11]  ;;  %v1478_v12 = vld [vmem:[%s20167_s28 + $0x598] sm:$0xff]  ;;  %v4078_v20 = vcombine.high %v4068_v5, %v4068_v5 }
 0x3cc   : > { %v18773_v24 = vcombine.high %v1478_v12, %v1734_v13 }
 0x3cd   : > { %v12921_v28 = vpop.f32.mrf.mxu0  ;;  %v12960_v29 = vpop.f32.mrf.mxu1 }
 0x3ce   : > { %v4054_v29 = vrot.slane %v4038_v47, %v20180_v15 }
 0x3cf   : > { %v12961_v35 = vpop.f32.mrf.mxu1  ;;  %v12997_v36 = vpop.f32.mrf.mxu0  ;;  %14916 = vmatmul.mubr.bf16.vlgmr.msra.gmra.mxu0 %v3963_v17  ;;  %v4028_v17 = vcombine.high %v4012_v3, %v4012_v3 }
 0x3d0   : > { %v12998_v39 = vadd.f32 %v12997_v36, %v12958_v18  ;;  %14978 = vmatpush1.bf16.xpose.msra.mxu0 %v18758_v25  ;;  %14995 = vmatprep.mubr.bf16.mxu0 %v4019_v19  ;;  %v18771_v18 = vcombine.high %v1477_v6, %v1733_v7  ;;  %v18768_v19 = vcombine.low %v1476_v51, %v1732_v52  ;;  %v1280_v25 = vld [vmem:[%s20178_s3 + $0x168] sm:$0xff] }
 0x3d1   : > { %v12999_v40 = vpop.f32.mrf.mxu0  ;;  %v13037_v41 = vpop.f32.mrf.mxu1  ;;  %14956 = vmatmul.mubr.bf16.vlgmr.msra.gmra.mxu1 %v3979_v30  ;;  %15057 = vmatprep.subr.bf16.mxu0 %v18763_v31  ;;  %v4075_v31 = vrot.slane %v4047_v21, %v20180_v15  ;;  %v4087_v34 = vrot.slane %v1280_v25, %v20180_v15  ;;  %v4080_v47 = vcombine.high %v1280_v25, %v1280_v25  ;;  %v1484_v25 = vld [vmem:[%s20167_s28 + $0x5c8] sm:$0xff] }
 0x3d2   : > { %v13038_v43 = vadd.f32 %v13037_v41, %v12998_v39  ;;  %15018 = vmatpush1.bf16.xpose.msra.mxu1 %v18760_v32  ;;  %15035 = vmatprep.mubr.bf16.mxu1 %v4029_v33  ;;  %v1479_v32 = vld [vmem:[%s20167_s28 + $0x5a0] sm:$0xff]  ;;  %v1736_v39 = vld [vmem:[%s20167_s28 + $0xda8] sm:$0x11] }
 0x3d3   : > { %v13000_v48 = vpop.f32.mrf.mxu0  ;;  %v13039_v49 = vpop.f32.mrf.mxu1  ;;  %15097 = vmatprep.subr.bf16.mxu1 %v18765_v37  ;;  %v1735_v33 = vld [vmem:[%s20167_s28 + $0xda0] sm:$0x11]  ;;  %v18770_v37 = vcombine.low %v1477_v6, %v1733_v7  ;;  %v4079_v45 = vcombine.high %v4075_v31, %v4075_v31  ;;  %v4095_v46 = vcombine.high %v4087_v34, %v4087_v34  ;;  %v4094_v59 = vrot.slane %v4080_v47, %v20180_v15 }
 0x3d5   : > { %v13001_v53 = vpop.f32.mrf.mxu0  ;;  %v13040_v54 = vpop.f32.mrf.mxu1  ;;  %v4096_v7 = vcombine.high %v4094_v59, %v4094_v59 }
 0x3d6   : > { %v4061_v54 = vrot.slane %v4045_v8, %v20180_v15 }
 0x3d7   : > { %v13041_v61 = vpop.f32.mrf.mxu1  ;;  %v13077_v62 = vpop.f32.mrf.mxu0  ;;  %14996 = vmatmul.mubr.bf16.vlgmr.msra.gmra.mxu0 %v4005_v42  ;;  %v4076_v42 = vcombine.high %v4054_v29, %v4054_v29 }
 0x3d8   : > { %v13078_v0 = vadd.f32 %v13077_v62, %v13038_v43  ;;  %15058 = vmatpush1.bf16.xpose.msra.mxu0 %v18762_v50  ;;  %15075 = vmatprep.mubr.bf16.mxu0 %v4026_v44  ;;  %v18775_v43 = vcombine.high %v1479_v32, %v1735_v33  ;;  %v18772_v44 = vcombine.low %v1478_v12, %v1734_v13 }
 0x3d9   : > { %v13079_v1 = vpop.f32.mrf.mxu0  ;;  %v13117_v2 = vpop.f32.mrf.mxu1  ;;  %15036 = vmatmul.mubr.bf16.vlgmr.msra.gmra.mxu1 %v4027_v55  ;;  %15137 = vmatprep.subr.bf16.mxu0 %v18767_v56  ;;  %v18777_v50 = vcombine.high %v1480_v38, %v1736_v39  ;;  %v4117_v56 = vrot.slane %v4095_v46, %v20180_v15  ;;  %v18774_v62 = vcombine.low %v1479_v32, %v1735_v33 }
 0x3da   : > { %v13118_v4 = vadd.f32 %v13117_v2, %v13078_v0  ;;  %15098 = vmatpush1.bf16.xpose.msra.mxu1 %v18764_v57  ;;  %15115 = vmatprep.mubr.bf16.mxu1 %v4030_v58  ;;  %v1481_v57 = vld [vmem:[%s20167_s28 + $0x5b0] sm:$0xff]  ;;  %v1738_v0 = vld [vmem:[%s20167_s28 + $0xdb8] sm:$0x11] }
 0x3db   : > { %v13080_v9 = vpop.f32.mrf.mxu0  ;;  %v13119_v10 = vpop.f32.mrf.mxu1  ;;  %15177 = vmatprep.subr.bf16.mxu1 %v18769_v63  ;;  %v1737_v58 = vld [vmem:[%s20167_s28 + $0xdb0] sm:$0x11]  ;;  %v1482_v63 = vld [vmem:[%s20167_s28 + $0x5b8] sm:$0xff]  ;;  %v4127_v6 = vcombine.high %v4117_v56, %v4117_v56 }
 0x3dc   : > { %v18781_v10 = vcombine.high %v1482_v63, %v1738_v0 }
 0x3dd   : > { %v13081_v14 = vpop.f32.mrf.mxu0  ;;  %v13120_v16 = vpop.f32.mrf.mxu1 }
 0x3de   : > { %v4103_v16 = vrot.slane %v4087_v34, %v20180_v15 }
 0x3df   : > { %v13121_v22 = vpop.f32.mrf.mxu1  ;;  %v13157_v23 = vpop.f32.mrf.mxu0  ;;  %15076 = vmatmul.mubr.bf16.vlgmr.msra.gmra.mxu0 %v4012_v3  ;;  %v4077_v3 = vcombine.high %v4061_v54, %v4061_v54 }
 0x3e0   : > { %v13158_v26 = vadd.f32 %v13157_v23, %v13118_v4  ;;  %15138 = vmatpush1.bf16.xpose.msra.mxu0 %v18766_v11  ;;  %15155 = vmatprep.mubr.bf16.mxu0 %v4068_v5  ;;  %v18779_v4 = vcombine.high %v1481_v57, %v1737_v58  ;;  %v18776_v5 = vcombine.low %v1480_v38, %v1736_v39  ;;  %v1281_v11 = vld [vmem:[%s20178_s3 + $0x170] sm:$0xff] }
 0x3e1   : > { %v13159_v27 = vpop.f32.mrf.mxu0  ;;  %v13197_v28 = vpop.f32.mrf.mxu1  ;;  %15116 = vmatmul.mubr.bf16.vlgmr.msra.gmra.mxu1 %v4028_v17  ;;  %15217 = vmatprep.subr.bf16.mxu0 %v18771_v18  ;;  %v4124_v18 = vrot.slane %v4096_v7, %v20180_v15  ;;  %v4136_v21 = vrot.slane %v1281_v11, %v20180_v15  ;;  %v4129_v34 = vcombine.high %v1281_v11, %v1281_v11  ;;  %v1488_v11 = vld [vmem:[%s20167_s28 + $0x5e8] sm:$0xff] }
 0x3e2   : > { %v13198_v30 = vadd.f32 %v13197_v28, %v13158_v26  ;;  %15178 = vmatpush1.bf16.xpose.msra.mxu1 %v18768_v19  ;;  %15195 = vmatprep.mubr.bf16.mxu1 %v4078_v20  ;;  %v1483_v19 = vld [vmem:[%s20167_s28 + $0x5c0] sm:$0xff]  ;;  %v1740_v26 = vld [vmem:[%s20167_s28 + $0xdc8] sm:$0x11] }
 0x3e3   : > { %v13160_v35 = vpop.f32.mrf.mxu0  ;;  %v13199_v36 = vpop.f32.mrf.mxu1  ;;  %15257 = vmatprep.subr.bf16.mxu1 %v18773_v24  ;;  %v1739_v20 = vld [vmem:[%s20167_s28 + $0xdc0] sm:$0x11]  ;;  %v18778_v24 = vcombine.low %v1481_v57, %v1737_v58  ;;  %v4128_v32 = vcombine.high %v4124_v18, %v4124_v18  ;;  %v4144_v33 = vcombine.high %v4136_v21, %v4136_v21  ;;  %v4143_v46 = vrot.slane %v4129_v34, %v20180_v15 }
 0x3e5   : > { %v13161_v40 = vpop.f32.mrf.mxu0  ;;  %v13200_v41 = vpop.f32.mrf.mxu1  ;;  %v4145_v58 = vcombine.high %v4143_v46, %v4143_v46 }
 0x3e6   : > { %v4110_v41 = vrot.slane %v4094_v59, %v20180_v15 }
 0x3e7   : > { %v13201_v48 = vpop.f32.mrf.mxu1  ;;  %v13237_v49 = vpop.f32.mrf.mxu0  ;;  %15156 = vmatmul.mubr.bf16.vlgmr.msra.gmra.mxu0 %v4054_v29  ;;  %v4125_v29 = vcombine.high %v4103_v16, %v4103_v16 }
 0x3e8   : > { %v13238_v51 = vadd.f32 %v13237_v49, %v13198_v30  ;;  %15218 = vmatpush1.bf16.xpose.msra.mxu0 %v18770_v37  ;;  %15235 = vmatprep.mubr.bf16.mxu0 %v4075_v31  ;;  %v18783_v30 = vcombine.high %v1483_v19, %v1739_v20  ;;  %v18780_v31 = vcombine.low %v1482_v63, %v1738_v0 }
 0x3e9   : > { %v13239_v52 = vpop.f32.mrf.mxu0  ;;  %v13277_v53 = vpop.f32.mrf.mxu1  ;;  %15196 = vmatmul.mubr.bf16.vlgmr.msra.gmra.mxu1 %v4076_v42  ;;  %15297 = vmatprep.subr.bf16.mxu0 %v18775_v43  ;;  %v18785_v37 = vcombine.high %v1484_v25, %v1740_v26  ;;  %v4166_v43 = vrot.slane %v4144_v33, %v20180_v15  ;;  %v18782_v49 = vcombine.low %v1483_v19, %v1739_v20 }
 0x3ea   : > { %v13278_v55 = vadd.f32 %v13277_v53, %v13238_v51  ;;  %15258 = vmatpush1.bf16.xpose.msra.mxu1 %v18772_v44  ;;  %15275 = vmatprep.mubr.bf16.mxu1 %v4079_v45  ;;  %v1485_v44 = vld [vmem:[%s20167_s28 + $0x5d0] sm:$0xff]  ;;  %v1742_v51 = vld [vmem:[%s20167_s28 + $0xdd8] sm:$0x11] }
 0x3eb   : > { %v13240_v60 = vpop.f32.mrf.mxu0  ;;  %v13279_v61 = vpop.f32.mrf.mxu1  ;;  %15337 = vmatprep.subr.bf16.mxu1 %v18777_v50  ;;  %v1741_v45 = vld [vmem:[%s20167_s28 + $0xdd0] sm:$0x11]  ;;  %v1486_v50 = vld [vmem:[%s20167_s28 + $0x5d8] sm:$0xff]  ;;  %v4176_v57 = vcombine.high %v4166_v43, %v4166_v43 }
 0x3ec   : > { %v18789_v61 = vcombine.high %v1486_v50, %v1742_v51 }
 0x3ed   : > { %v13241_v1 = vpop.f32.mrf.mxu0  ;;  %v13280_v2 = vpop.f32.mrf.mxu1 }
 0x3ee   : > { %v4152_v2 = vrot.slane %v4136_v21, %v20180_v15 }
 0x3ef   : > { %v13281_v8 = vpop.f32.mrf.mxu1  ;;  %v13317_v9 = vpop.f32.mrf.mxu0  ;;  %15236 = vmatmul.mubr.bf16.vlgmr.msra.gmra.mxu0 %v4061_v54  ;;  %v4126_v54 = vcombine.high %v4110_v41, %v4110_v41 }
 0x3f0   : > { %v13318_v12 = vadd.f32 %v13317_v9, %v13278_v55  ;;  %15298 = vmatpush1.bf16.xpose.msra.mxu0 %v18774_v62  ;;  %15315 = vmatprep.mubr.bf16.mxu0 %v4117_v56  ;;  %v18787_v55 = vcombine.high %v1485_v44, %v1741_v45  ;;  %v18784_v56 = vcombine.low %v1484_v25, %v1740_v26  ;;  %v1282_v62 = vld [vmem:[%s20178_s3 + $0x178] sm:$0xff] }
 0x3f1   : > { %v13319_v13 = vpop.f32.mrf.mxu0  ;;  %v13357_v14 = vpop.f32.mrf.mxu1  ;;  %15276 = vmatmul.mubr.bf16.vlgmr.msra.gmra.mxu1 %v4077_v3  ;;  %15377 = vmatprep.subr.bf16.mxu0 %v18779_v4  ;;  %v4173_v4 = vrot.slane %v4145_v58, %v20180_v15  ;;  %v4185_v7 = vrot.slane %v1282_v62, %v20180_v15  ;;  %v4178_v21 = vcombine.high %v1282_v62, %v1282_v62  ;;  %v1492_v62 = vld [vmem:[%s20167_s28 + $0x608] sm:$0xff] }
 0x3f2   : > { %v13358_v17 = vadd.f32 %v13357_v14, %v13318_v12  ;;  %15338 = vmatpush1.bf16.xpose.msra.mxu1 %v18776_v5  ;;  %15355 = vmatprep.mubr.bf16.mxu1 %v4127_v6  ;;  %v1487_v5 = vld [vmem:[%s20167_s28 + $0x5e0] sm:$0xff]  ;;  %v1744_v12 = vld [vmem:[%s20167_s28 + $0xde8] sm:$0x11] }
 0x3f3   : > { %v13320_v22 = vpop.f32.mrf.mxu0  ;;  %v13359_v23 = vpop.f32.mrf.mxu1  ;;  %15417 = vmatprep.subr.bf16.mxu1 %v18781_v10  ;;  %v1743_v6 = vld [vmem:[%s20167_s28 + $0xde0] sm:$0x11]  ;;  %v18786_v10 = vcombine.low %v1485_v44, %v1741_v45  ;;  %v4177_v19 = vcombine.high %v4173_v4, %v4173_v4  ;;  %v4193_v20 = vcombine.high %v4185_v7, %v4185_v7  ;;  %v4192_v33 = vrot.slane %v4178_v21, %v20180_v15 }
 0x3f5   : > { %v13321_v27 = vpop.f32.mrf.mxu0  ;;  %v13360_v28 = vpop.f32.mrf.mxu1  ;;  %v4194_v45 = vcombine.high %v4192_v33, %v4192_v33 }
 0x3f6   : > { %v4159_v28 = vrot.slane %v4143_v46, %v20180_v15 }
 0x3f7   : > { %v13361_v35 = vpop.f32.mrf.mxu1  ;;  %v13397_v36 = vpop.f32.mrf.mxu0  ;;  %15316 = vmatmul.mubr.bf16.vlgmr.msra.gmra.mxu0 %v4103_v16  ;;  %v4174_v16 = vcombine.high %v4152_v2, %v4152_v2 }
 0x3f8   : > { %v13398_v38 = vadd.f32 %v13397_v36, %v13358_v17  ;;  %15378 = vmatpush1.bf16.xpose.msra.mxu0 %v18778_v24  ;;  %15395 = vmatprep.mubr.bf16.mxu0 %v4124_v18  ;;  %v18791_v17 = vcombine.high %v1487_v5, %v1743_v6  ;;  %v18788_v18 = vcombine.low %v1486_v50, %v1742_v51 }
 0x3f9   : > { %v13399_v39 = vpop.f32.mrf.mxu0  ;;  %v13437_v40 = vpop.f32.mrf.mxu1  ;;  %15356 = vmatmul.mubr.bf16.vlgmr.msra.gmra.mxu1 %v4125_v29  ;;  %15457 = vmatprep.subr.bf16.mxu0 %v18783_v30  ;;  %v18793_v24 = vcombine.high %v1488_v11, %v1744_v12  ;;  %v4215_v30 = vrot.slane %v4193_v20, %v20180_v15  ;;  %v18790_v36 = vcombine.low %v1487_v5, %v1743_v6 }
 0x3fa   : > { %v13438_v42 = vadd.f32 %v13437_v40, %v13398_v38  ;;  %15418 = vmatpush1.bf16.xpose.msra.mxu1 %v18780_v31  ;;  %15435 = vmatprep.mubr.bf16.mxu1 %v4128_v32  ;;  %v1489_v31 = vld [vmem:[%s20167_s28 + $0x5f0] sm:$0xff]  ;;  %v1746_v38 = vld [vmem:[%s20167_s28 + $0xdf8] sm:$0x11] }
 0x3fb   : > { %v13400_v47 = vpop.f32.mrf.mxu0  ;;  %v13439_v48 = vpop.f32.mrf.mxu1  ;;  %15497 = vmatprep.subr.bf16.mxu1 %v18785_v37  ;;  %v1745_v32 = vld [vmem:[%s20167_s28 + $0xdf0] sm:$0x11]  ;;  %v1490_v37 = vld [vmem:[%s20167_s28 + $0x5f8] sm:$0xff]  ;;  %v4225_v44 = vcombine.high %v4215_v30, %v4215_v30 }
 0x3fc   : > { %v18797_v48 = vcombine.high %v1490_v37, %v1746_v38 }
 0x3fd   : > { %v13401_v52 = vpop.f32.mrf.mxu0  ;;  %v13440_v53 = vpop.f32.mrf.mxu1 }
 0x3fe   : > { %v4201_v53 = vrot.slane %v4185_v7, %v20180_v15 }
 0x3ff   : > { %v13441_v59 = vpop.f32.mrf.mxu1  ;;  %v13477_v60 = vpop.f32.mrf.mxu0  ;;  %15396 = vmatmul.mubr.bf16.vlgmr.msra.gmra.mxu0 %v4110_v41  ;;  %v4175_v41 = vcombine.high %v4159_v28, %v4159_v28 }
 0x400   : > { %v13478_v63 = vadd.f32 %v13477_v60, %v13438_v42  ;;  %15458 = vmatpush1.bf16.xpose.msra.mxu0 %v18782_v49  ;;  %15475 = vmatprep.mubr.bf16.mxu0 %v4166_v43  ;;  %v18795_v42 = vcombine.high %v1489_v31, %v1745_v32  ;;  %v18792_v43 = vcombine.low %v1488_v11, %v1744_v12  ;;  %v1283_v49 = vld [vmem:[%s20178_s3 + $0x180] sm:$0xff] }
 0x401   : > { %v13479_v0 = vpop.f32.mrf.mxu0  ;;  %v13517_v1 = vpop.f32.mrf.mxu1  ;;  %15436 = vmatmul.mubr.bf16.vlgmr.msra.gmra.mxu1 %v4126_v54  ;;  %15537 = vmatprep.subr.bf16.mxu0 %v18787_v55  ;;  %v4222_v55 = vrot.slane %v4194_v45, %v20180_v15  ;;  %v4234_v58 = vrot.slane %v1283_v49, %v20180_v15  ;;  %v4227_v7 = vcombine.high %v1283_v49, %v1283_v49  ;;  %v1496_v49 = vld [vmem:[%s20167_s28 + $0x628] sm:$0xff] }
 0x402   : > { %v13518_v3 = vadd.f32 %v13517_v1, %v13478_v63  ;;  %15498 = vmatpush1.bf16.xpose.msra.mxu1 %v18784_v56  ;;  %15515 = vmatprep.mubr.bf16.mxu1 %v4176_v57  ;;  %v1491_v56 = vld [vmem:[%s20167_s28 + $0x600] sm:$0xff]  ;;  %v1748_v63 = vld [vmem:[%s20167_s28 + $0xe08] sm:$0x11] }
 0x403   : > { %v13480_v8 = vpop.f32.mrf.mxu0  ;;  %v13519_v9 = vpop.f32.mrf.mxu1  ;;  %15577 = vmatprep.subr.bf16.mxu1 %v18789_v61  ;;  %v1747_v57 = vld [vmem:[%s20167_s28 + $0xe00] sm:$0x11]  ;;  %v18794_v61 = vcombine.low %v1489_v31, %v1745_v32  ;;  %v4226_v5 = vcombine.high %v4222_v55, %v4222_v55  ;;  %v4242_v6 = vcombine.high %v4234_v58, %v4234_v58  ;;  %v4241_v20 = vrot.slane %v4227_v7, %v20180_v15 }
 0x405   : > { %v13481_v13 = vpop.f32.mrf.mxu0  ;;  %v13520_v14 = vpop.f32.mrf.mxu1  ;;  %v4243_v32 = vcombine.high %v4241_v20, %v4241_v20 }
 0x406   : > { %v4208_v14 = vrot.slane %v4192_v33, %v20180_v15 }
 0x407   : > { %v13521_v22 = vpop.f32.mrf.mxu1  ;;  %v13557_v23 = vpop.f32.mrf.mxu0  ;;  %15476 = vmatmul.mubr.bf16.vlgmr.msra.gmra.mxu0 %v4152_v2  ;;  %v4223_v2 = vcombine.high %v4201_v53, %v4201_v53 }
 0x408   : > { %v13558_v25 = vadd.f32 %v13557_v23, %v13518_v3  ;;  %15538 = vmatpush1.bf16.xpose.msra.mxu0 %v18786_v10  ;;  %15555 = vmatprep.mubr.bf16.mxu0 %v4173_v4  ;;  %v18799_v3 = vcombine.high %v1491_v56, %v1747_v57  ;;  %v18796_v4 = vcombine.low %v1490_v37, %v1746_v38 }
 0x409   : > { %v13559_v26 = vpop.f32.mrf.mxu0  ;;  %v13597_v27 = vpop.f32.mrf.mxu1  ;;  %15516 = vmatmul.mubr.bf16.vlgmr.msra.gmra.mxu1 %v4174_v16  ;;  %15617 = vmatprep.subr.bf16.mxu0 %v18791_v17  ;;  %v18801_v10 = vcombine.high %v1492_v62, %v1748_v63  ;;  %v4264_v17 = vrot.slane %v4242_v6, %v20180_v15  ;;  %v18798_v23 = vcombine.low %v1491_v56, %v1747_v57 }
 0x40a   : > { %v13598_v29 = vadd.f32 %v13597_v27, %v13558_v25  ;;  %15578 = vmatpush1.bf16.xpose.msra.mxu1 %v18788_v18  ;;  %15595 = vmatprep.mubr.bf16.mxu1 %v4177_v19  ;;  %v1493_v18 = vld [vmem:[%s20167_s28 + $0x610] sm:$0xff]  ;;  %v1750_v25 = vld [vmem:[%s20167_s28 + $0xe18] sm:$0x11] }
 0x40b   : > { %v13560_v34 = vpop.f32.mrf.mxu0  ;;  %v13599_v35 = vpop.f32.mrf.mxu1  ;;  %15657 = vmatprep.subr.bf16.mxu1 %v18793_v24  ;;  %v1749_v19 = vld [vmem:[%s20167_s28 + $0xe10] sm:$0x11]  ;;  %v1494_v24 = vld [vmem:[%s20167_s28 + $0x618] sm:$0xff]  ;;  %v4274_v31 = vcombine.high %v4264_v17, %v4264_v17 }
 0x40c   : > { %v18805_v35 = vcombine.high %v1494_v24, %v1750_v25 }
 0x40d   : > { %v13561_v39 = vpop.f32.mrf.mxu0  ;;  %v13600_v40 = vpop.f32.mrf.mxu1 }
 0x40e   : > { %v4250_v40 = vrot.slane %v4234_v58, %v20180_v15 }
 0x40f   : > { %v13601_v46 = vpop.f32.mrf.mxu1  ;;  %v13637_v47 = vpop.f32.mrf.mxu0  ;;  %15556 = vmatmul.mubr.bf16.vlgmr.msra.gmra.mxu0 %v4159_v28  ;;  %v4224_v28 = vcombine.high %v4208_v14, %v4208_v14 }
 0x410   : > { %v13638_v50 = vadd.f32 %v13637_v47, %v13598_v29  ;;  %15618 = vmatpush1.bf16.xpose.msra.mxu0 %v18790_v36  ;;  %15635 = vmatprep.mubr.bf16.mxu0 %v4215_v30  ;;  %v18803_v29 = vcombine.high %v1493_v18, %v1749_v19  ;;  %v18800_v30 = vcombine.low %v1492_v62, %v1748_v63  ;;  %v1284_v36 = vld [vmem:[%s20178_s3 + $0x188] sm:$0xff] }
 0x411   : > { %v13639_v51 = vpop.f32.mrf.mxu0  ;;  %v13677_v52 = vpop.f32.mrf.mxu1  ;;  %15596 = vmatmul.mubr.bf16.vlgmr.msra.gmra.mxu1 %v4175_v41  ;;  %15697 = vmatprep.subr.bf16.mxu0 %v18795_v42  ;;  %v4271_v42 = vrot.slane %v4243_v32, %v20180_v15  ;;  %v4283_v45 = vrot.slane %v1284_v36, %v20180_v15  ;;  %v4276_v58 = vcombine.high %v1284_v36, %v1284_v36  ;;  %v1500_v36 = vld [vmem:[%s20167_s28 + $0x648] sm:$0xff] }
 0x412   : > { %v13678_v54 = vadd.f32 %v13677_v52, %v13638_v50  ;;  %15658 = vmatpush1.bf16.xpose.msra.mxu1 %v18792_v43  ;;  %15675 = vmatprep.mubr.bf16.mxu1 %v4225_v44  ;;  %v1495_v43 = vld [vmem:[%s20167_s28 + $0x620] sm:$0xff]  ;;  %v1752_v50 = vld [vmem:[%s20167_s28 + $0xe28] sm:$0x11] }
 0x413   : > { %v13640_v59 = vpop.f32.mrf.mxu0  ;;  %v13679_v60 = vpop.f32.mrf.mxu1  ;;  %15737 = vmatprep.subr.bf16.mxu1 %v18797_v48  ;;  %v1751_v44 = vld [vmem:[%s20167_s28 + $0xe20] sm:$0x11]  ;;  %v18802_v48 = vcombine.low %v1493_v18, %v1749_v19  ;;  %v4275_v56 = vcombine.high %v4271_v42, %v4271_v42  ;;  %v4291_v57 = vcombine.high %v4283_v45, %v4283_v45  ;;  %v4290_v6 = vrot.slane %v4276_v58, %v20180_v15 }
 0x415   : > { %v13641_v0 = vpop.f32.mrf.mxu0  ;;  %v13680_v1 = vpop.f32.mrf.mxu1  ;;  %v4292_v19 = vcombine.high %v4290_v6, %v4290_v6 }
 0x416   : > { %v4257_v1 = vrot.slane %v4241_v20, %v20180_v15 }
 0x417   : > { %v13681_v8 = vpop.f32.mrf.mxu1  ;;  %v13717_v9 = vpop.f32.mrf.mxu0  ;;  %15636 = vmatmul.mubr.bf16.vlgmr.msra.gmra.mxu0 %v4201_v53  ;;  %v4272_v53 = vcombine.high %v4250_v40, %v4250_v40 }
 0x418   : > { %v13718_v11 = vadd.f32 %v13717_v9, %v13678_v54  ;;  %15698 = vmatpush1.bf16.xpose.msra.mxu0 %v18794_v61  ;;  %15715 = vmatprep.mubr.bf16.mxu0 %v4222_v55  ;;  %v18807_v54 = vcombine.high %v1495_v43, %v1751_v44  ;;  %v18804_v55 = vcombine.low %v1494_v24, %v1750_v25 }
 0x419   : > { %v13719_v12 = vpop.f32.mrf.mxu0  ;;  %v13757_v13 = vpop.f32.mrf.mxu1  ;;  %15676 = vmatmul.mubr.bf16.vlgmr.msra.gmra.mxu1 %v4223_v2  ;;  %15777 = vmatprep.subr.bf16.mxu0 %v18799_v3  ;;  %v18809_v61 = vcombine.high %v1496_v49, %v1752_v50  ;;  %v4313_v3 = vrot.slane %v4291_v57, %v20180_v15  ;;  %v18806_v9 = vcombine.low %v1495_v43, %v1751_v44 }
 0x41a   : > { %v13758_v16 = vadd.f32 %v13757_v13, %v13718_v11  ;;  %15738 = vmatpush1.bf16.xpose.msra.mxu1 %v18796_v4  ;;  %15755 = vmatprep.mubr.bf16.mxu1 %v4226_v5  ;;  %v1497_v4 = vld [vmem:[%s20167_s28 + $0x630] sm:$0xff]  ;;  %v1754_v11 = vld [vmem:[%s20167_s28 + $0xe38] sm:$0x11] }
 0x41b   : > { %v13720_v21 = vpop.f32.mrf.mxu0  ;;  %v13759_v22 = vpop.f32.mrf.mxu1  ;;  %15817 = vmatprep.subr.bf16.mxu1 %v18801_v10  ;;  %v1753_v5 = vld [vmem:[%s20167_s28 + $0xe30] sm:$0x11]  ;;  %v1498_v10 = vld [vmem:[%s20167_s28 + $0x638] sm:$0xff]  ;;  %v4323_v18 = vcombine.high %v4313_v3, %v4313_v3 }
 0x41c   : > { %v18813_v22 = vcombine.high %v1498_v10, %v1754_v11 }
 0x41d   : > { %v13721_v26 = vpop.f32.mrf.mxu0  ;;  %v13760_v27 = vpop.f32.mrf.mxu1 }
 0x41e   : > { %v4299_v27 = vrot.slane %v4283_v45, %v20180_v15 }
 0x41f   : > { %v13761_v33 = vpop.f32.mrf.mxu1  ;;  %v13797_v34 = vpop.f32.mrf.mxu0  ;;  %15716 = vmatmul.mubr.bf16.vlgmr.msra.gmra.mxu0 %v4208_v14  ;;  %v4273_v14 = vcombine.high %v4257_v1, %v4257_v1 }
 0x420   : > { %v13798_v37 = vadd.f32 %v13797_v34, %v13758_v16  ;;  %15778 = vmatpush1.bf16.xpose.msra.mxu0 %v18798_v23  ;;  %15795 = vmatprep.mubr.bf16.mxu0 %v4264_v17  ;;  %v18811_v16 = vcombine.high %v1497_v4, %v1753_v5  ;;  %v18808_v17 = vcombine.low %v1496_v49, %v1752_v50  ;;  %v1285_v23 = vld [vmem:[%s20178_s3 + $0x190] sm:$0xff] }
 0x421   : > { %v13799_v38 = vpop.f32.mrf.mxu0  ;;  %v13837_v39 = vpop.f32.mrf.mxu1  ;;  %15756 = vmatmul.mubr.bf16.vlgmr.msra.gmra.mxu1 %v4224_v28  ;;  %15857 = vmatprep.subr.bf16.mxu0 %v18803_v29  ;;  %v4320_v29 = vrot.slane %v4292_v19, %v20180_v15  ;;  %v4332_v32 = vrot.slane %v1285_v23, %v20180_v15  ;;  %v4325_v45 = vcombine.high %v1285_v23, %v1285_v23  ;;  %v1504_v23 = vld [vmem:[%s20167_s28 + $0x668] sm:$0xff] }
 0x422   : > { %v13838_v41 = vadd.f32 %v13837_v39, %v13798_v37  ;;  %15818 = vmatpush1.bf16.xpose.msra.mxu1 %v18800_v30  ;;  %15835 = vmatprep.mubr.bf16.mxu1 %v4274_v31  ;;  %v1499_v30 = vld [vmem:[%s20167_s28 + $0x640] sm:$0xff]  ;;  %v1756_v37 = vld [vmem:[%s20167_s28 + $0xe48] sm:$0x11] }
 0x423   : > { %v13800_v46 = vpop.f32.mrf.mxu0  ;;  %v13839_v47 = vpop.f32.mrf.mxu1  ;;  %15897 = vmatprep.subr.bf16.mxu1 %v18805_v35  ;;  %v1755_v31 = vld [vmem:[%s20167_s28 + $0xe40] sm:$0x11]  ;;  %v18810_v35 = vcombine.low %v1497_v4, %v1753_v5  ;;  %v4324_v43 = vcombine.high %v4320_v29, %v4320_v29  ;;  %v4340_v44 = vcombine.high %v4332_v32, %v4332_v32  ;;  %v4339_v57 = vrot.slane %v4325_v45, %v20180_v15 }
 0x425   : > { %v13801_v51 = vpop.f32.mrf.mxu0  ;;  %v13840_v52 = vpop.f32.mrf.mxu1  ;;  %v4341_v5 = vcombine.high %v4339_v57, %v4339_v57 }
 0x426   : > { %v4306_v52 = vrot.slane %v4290_v6, %v20180_v15 }
 0x427   : > { %v13841_v59 = vpop.f32.mrf.mxu1  ;;  %v13877_v60 = vpop.f32.mrf.mxu0  ;;  %15796 = vmatmul.mubr.bf16.vlgmr.msra.gmra.mxu0 %v4250_v40  ;;  %v4321_v40 = vcombine.high %v4299_v27, %v4299_v27 }
 0x428   : > { %v13878_v62 = vadd.f32 %v13877_v60, %v13838_v41  ;;  %15858 = vmatpush1.bf16.xpose.msra.mxu0 %v18802_v48  ;;  %15875 = vmatprep.mubr.bf16.mxu0 %v4271_v42  ;;  %v18815_v41 = vcombine.high %v1499_v30, %v1755_v31  ;;  %v18812_v42 = vcombine.low %v1498_v10, %v1754_v11 }
 0x429   : > { %v13879_v63 = vpop.f32.mrf.mxu0  ;;  %v13917_v0 = vpop.f32.mrf.mxu1  ;;  %15836 = vmatmul.mubr.bf16.vlgmr.msra.gmra.mxu1 %v4272_v53  ;;  %15937 = vmatprep.subr.bf16.mxu0 %v18807_v54  ;;  %v18817_v48 = vcombine.high %v1500_v36, %v1756_v37  ;;  %v4362_v54 = vrot.slane %v4340_v44, %v20180_v15  ;;  %v18814_v60 = vcombine.low %v1499_v30, %v1755_v31 }
 0x42a   : > { %v13918_v2 = vadd.f32 %v13917_v0, %v13878_v62  ;;  %15898 = vmatpush1.bf16.xpose.msra.mxu1 %v18804_v55  ;;  %15915 = vmatprep.mubr.bf16.mxu1 %v4275_v56  ;;  %v1501_v55 = vld [vmem:[%s20167_s28 + $0x650] sm:$0xff]  ;;  %v1758_v62 = vld [vmem:[%s20167_s28 + $0xe58] sm:$0x11] }
 0x42b   : > { %v13880_v7 = vpop.f32.mrf.mxu0  ;;  %v13919_v8 = vpop.f32.mrf.mxu1  ;;  %15977 = vmatprep.subr.bf16.mxu1 %v18809_v61  ;;  %v1757_v56 = vld [vmem:[%s20167_s28 + $0xe50] sm:$0x11]  ;;  %v1502_v61 = vld [vmem:[%s20167_s28 + $0x658] sm:$0xff]  ;;  %v4372_v4 = vcombine.high %v4362_v54, %v4362_v54 }
 0x42c   : > { %v18821_v8 = vcombine.high %v1502_v61, %v1758_v62 }
 0x42d   : > { %v13881_v12 = vpop.f32.mrf.mxu0  ;;  %v13920_v13 = vpop.f32.mrf.mxu1 }
 0x42e   : > { %v4348_v13 = vrot.slane %v4332_v32, %v20180_v15 }
 0x42f   : > { %v13921_v20 = vpop.f32.mrf.mxu1  ;;  %v13957_v21 = vpop.f32.mrf.mxu0  ;;  %15876 = vmatmul.mubr.bf16.vlgmr.msra.gmra.mxu0 %v4257_v1  ;;  %v4322_v1 = vcombine.high %v4306_v52, %v4306_v52 }
 0x430   : > { %v13958_v24 = vadd.f32 %v13957_v21, %v13918_v2  ;;  %15938 = vmatpush1.bf16.xpose.msra.mxu0 %v18806_v9  ;;  %15955 = vmatprep.mubr.bf16.mxu0 %v4313_v3  ;;  %v18819_v2 = vcombine.high %v1501_v55, %v1757_v56  ;;  %v18816_v3 = vcombine.low %v1500_v36, %v1756_v37  ;;  %v1286_v9 = vld [vmem:[%s20178_s3 + $0x198] sm:$0xff] }
 0x431   : > { %v13959_v25 = vpop.f32.mrf.mxu0  ;;  %v13997_v26 = vpop.f32.mrf.mxu1  ;;  %15916 = vmatmul.mubr.bf16.vlgmr.msra.gmra.mxu1 %v4273_v14  ;;  %16017 = vmatprep.subr.bf16.mxu0 %v18811_v16  ;;  %v4369_v16 = vrot.slane %v4341_v5, %v20180_v15  ;;  %v4381_v19 = vrot.slane %v1286_v9, %v20180_v15  ;;  %v4374_v32 = vcombine.high %v1286_v9, %v1286_v9  ;;  %v1508_v9 = vld [vmem:[%s20167_s28 + $0x688] sm:$0xff] }
 0x432   : > { %v13998_v28 = vadd.f32 %v13997_v26, %v13958_v24  ;;  %15978 = vmatpush1.bf16.xpose.msra.mxu1 %v18808_v17  ;;  %15995 = vmatprep.mubr.bf16.mxu1 %v4323_v18  ;;  %v1503_v17 = vld [vmem:[%s20167_s28 + $0x660] sm:$0xff]  ;;  %v1760_v24 = vld [vmem:[%s20167_s28 + $0xe68] sm:$0x11] }
 0x433   : > { %v13960_v33 = vpop.f32.mrf.mxu0  ;;  %v13999_v34 = vpop.f32.mrf.mxu1  ;;  %16057 = vmatprep.subr.bf16.mxu1 %v18813_v22  ;;  %v1759_v18 = vld [vmem:[%s20167_s28 + $0xe60] sm:$0x11]  ;;  %v18818_v22 = vcombine.low %v1501_v55, %v1757_v56  ;;  %v4373_v30 = vcombine.high %v4369_v16, %v4369_v16  ;;  %v4389_v31 = vcombine.high %v4381_v19, %v4381_v19  ;;  %v4388_v44 = vrot.slane %v4374_v32, %v20180_v15 }
 0x435   : > { %v13961_v38 = vpop.f32.mrf.mxu0  ;;  %v14000_v39 = vpop.f32.mrf.mxu1  ;;  %v4390_v56 = vcombine.high %v4388_v44, %v4388_v44 }
 0x436   : > { %v4355_v39 = vrot.slane %v4339_v57, %v20180_v15 }
 0x437   : > { %v14001_v46 = vpop.f32.mrf.mxu1  ;;  %v14037_v47 = vpop.f32.mrf.mxu0  ;;  %15956 = vmatmul.mubr.bf16.vlgmr.msra.gmra.mxu0 %v4299_v27  ;;  %v4370_v27 = vcombine.high %v4348_v13, %v4348_v13 }
 0x438   : > { %v14038_v49 = vadd.f32 %v14037_v47, %v13998_v28  ;;  %16018 = vmatpush1.bf16.xpose.msra.mxu0 %v18810_v35  ;;  %16035 = vmatprep.mubr.bf16.mxu0 %v4320_v29  ;;  %v18823_v28 = vcombine.high %v1503_v17, %v1759_v18  ;;  %v18820_v29 = vcombine.low %v1502_v61, %v1758_v62 }
 0x439   : > { %v14039_v50 = vpop.f32.mrf.mxu0  ;;  %v14077_v51 = vpop.f32.mrf.mxu1  ;;  %15996 = vmatmul.mubr.bf16.vlgmr.msra.gmra.mxu1 %v4321_v40  ;;  %16097 = vmatprep.subr.bf16.mxu0 %v18815_v41  ;;  %v18825_v35 = vcombine.high %v1504_v23, %v1760_v24  ;;  %v4411_v41 = vrot.slane %v4389_v31, %v20180_v15  ;;  %v18822_v47 = vcombine.low %v1503_v17, %v1759_v18 }
 0x43a   : > { %v14078_v53 = vadd.f32 %v14077_v51, %v14038_v49  ;;  %16058 = vmatpush1.bf16.xpose.msra.mxu1 %v18812_v42  ;;  %16075 = vmatprep.mubr.bf16.mxu1 %v4324_v43  ;;  %v1505_v42 = vld [vmem:[%s20167_s28 + $0x670] sm:$0xff]  ;;  %v1762_v49 = vld [vmem:[%s20167_s28 + $0xe78] sm:$0x11] }
 0x43b   : > { %v14040_v58 = vpop.f32.mrf.mxu0  ;;  %v14079_v59 = vpop.f32.mrf.mxu1  ;;  %16137 = vmatprep.subr.bf16.mxu1 %v18817_v48  ;;  %v1761_v43 = vld [vmem:[%s20167_s28 + $0xe70] sm:$0x11]  ;;  %v1506_v48 = vld [vmem:[%s20167_s28 + $0x678] sm:$0xff]  ;;  %v4421_v55 = vcombine.high %v4411_v41, %v4411_v41 }
 0x43c   : > { %v18829_v59 = vcombine.high %v1506_v48, %v1762_v49 }
 0x43d   : > { %v14041_v63 = vpop.f32.mrf.mxu0  ;;  %v14080_v0 = vpop.f32.mrf.mxu1 }
 0x43e   : > { %v4397_v0 = vrot.slane %v4381_v19, %v20180_v15 }
 0x43f   : > { %v14081_v6 = vpop.f32.mrf.mxu1  ;;  %v14117_v7 = vpop.f32.mrf.mxu0  ;;  %16036 = vmatmul.mubr.bf16.vlgmr.msra.gmra.mxu0 %v4306_v52  ;;  %v4371_v52 = vcombine.high %v4355_v39, %v4355_v39 }
 0x440   : > { %v14118_v10 = vadd.f32 %v14117_v7, %v14078_v53  ;;  %16098 = vmatpush1.bf16.xpose.msra.mxu0 %v18814_v60  ;;  %16115 = vmatprep.mubr.bf16.mxu0 %v4362_v54  ;;  %v18827_v53 = vcombine.high %v1505_v42, %v1761_v43  ;;  %v18824_v54 = vcombine.low %v1504_v23, %v1760_v24  ;;  %v1287_v60 = vld [vmem:[%s20178_s3 + $0x1a0] sm:$0xff] }
 0x441   : > { %v14119_v11 = vpop.f32.mrf.mxu0  ;;  %v14157_v12 = vpop.f32.mrf.mxu1  ;;  %16076 = vmatmul.mubr.bf16.vlgmr.msra.gmra.mxu1 %v4322_v1  ;;  %16177 = vmatprep.subr.bf16.mxu0 %v18819_v2  ;;  %v4418_v2 = vrot.slane %v4390_v56, %v20180_v15  ;;  %v4430_v5 = vrot.slane %v1287_v60, %v20180_v15  ;;  %v4423_v19 = vcombine.high %v1287_v60, %v1287_v60  ;;  %v1512_v60 = vld [vmem:[%s20167_s28 + $0x6a8] sm:$0xff] }
 0x442   : > { %v14158_v14 = vadd.f32 %v14157_v12, %v14118_v10  ;;  %16138 = vmatpush1.bf16.xpose.msra.mxu1 %v18816_v3  ;;  %16155 = vmatprep.mubr.bf16.mxu1 %v4372_v4  ;;  %v1507_v3 = vld [vmem:[%s20167_s28 + $0x680] sm:$0xff]  ;;  %v1764_v10 = vld [vmem:[%s20167_s28 + $0xe88] sm:$0x11] }
 0x443   : > { %v14120_v20 = vpop.f32.mrf.mxu0  ;;  %v14159_v21 = vpop.f32.mrf.mxu1  ;;  %16217 = vmatprep.subr.bf16.mxu1 %v18821_v8  ;;  %v1763_v4 = vld [vmem:[%s20167_s28 + $0xe80] sm:$0x11]  ;;  %v18826_v8 = vcombine.low %v1505_v42, %v1761_v43  ;;  %v4422_v17 = vcombine.high %v4418_v2, %v4418_v2  ;;  %v4438_v18 = vcombine.high %v4430_v5, %v4430_v5  ;;  %v4437_v31 = vrot.slane %v4423_v19, %v20180_v15 }
 0x445   : > { %v14121_v25 = vpop.f32.mrf.mxu0  ;;  %v14160_v26 = vpop.f32.mrf.mxu1  ;;  %v4439_v43 = vcombine.high %v4437_v31, %v4437_v31 }
 0x446   : > { %v4404_v26 = vrot.slane %v4388_v44, %v20180_v15 }
 0x447   : > { %v14161_v33 = vpop.f32.mrf.mxu1  ;;  %v14197_v34 = vpop.f32.mrf.mxu0  ;;  %16116 = vmatmul.mubr.bf16.vlgmr.msra.gmra.mxu0 %v4348_v13  ;;  %v4419_v13 = vcombine.high %v4397_v0, %v4397_v0 }
 0x448   : > { %v14198_v36 = vadd.f32 %v14197_v34, %v14158_v14  ;;  %16178 = vmatpush1.bf16.xpose.msra.mxu0 %v18818_v22  ;;  %16195 = vmatprep.mubr.bf16.mxu0 %v4369_v16  ;;  %v18831_v14 = vcombine.high %v1507_v3, %v1763_v4  ;;  %v18828_v16 = vcombine.low %v1506_v48, %v1762_v49 }
 0x449   : > { %v14199_v37 = vpop.f32.mrf.mxu0  ;;  %v14237_v38 = vpop.f32.mrf.mxu1  ;;  %16156 = vmatmul.mubr.bf16.vlgmr.msra.gmra.mxu1 %v4370_v27  ;;  %16257 = vmatprep.subr.bf16.mxu0 %v18823_v28  ;;  %v18833_v22 = vcombine.high %v1508_v9, %v1764_v10  ;;  %v4460_v28 = vrot.slane %v4438_v18, %v20180_v15  ;;  %v18830_v34 = vcombine.low %v1507_v3, %v1763_v4 }
 0x44a   : > { %v14238_v40 = vadd.f32 %v14237_v38, %v14198_v36  ;;  %16218 = vmatpush1.bf16.xpose.msra.mxu1 %v18820_v29  ;;  %16235 = vmatprep.mubr.bf16.mxu1 %v4373_v30  ;;  %v1509_v29 = vld [vmem:[%s20167_s28 + $0x690] sm:$0xff]  ;;  %v1766_v36 = vld [vmem:[%s20167_s28 + $0xe98] sm:$0x11] }
 0x44b   : > { %v14200_v45 = vpop.f32.mrf.mxu0  ;;  %v14239_v46 = vpop.f32.mrf.mxu1  ;;  %16297 = vmatprep.subr.bf16.mxu1 %v18825_v35  ;;  %v1765_v30 = vld [vmem:[%s20167_s28 + $0xe90] sm:$0x11]  ;;  %v1510_v35 = vld [vmem:[%s20167_s28 + $0x698] sm:$0xff]  ;;  %v4470_v42 = vcombine.high %v4460_v28, %v4460_v28 }
 0x44c   : > { %v18837_v46 = vcombine.high %v1510_v35, %v1766_v36 }
 0x44d   : > { %v14201_v50 = vpop.f32.mrf.mxu0  ;;  %v14240_v51 = vpop.f32.mrf.mxu1 }
 0x44e   : > { %v4446_v51 = vrot.slane %v4430_v5, %v20180_v15 }
 0x44f   : > { %v14241_v57 = vpop.f32.mrf.mxu1  ;;  %v14277_v58 = vpop.f32.mrf.mxu0  ;;  %16196 = vmatmul.mubr.bf16.vlgmr.msra.gmra.mxu0 %v4355_v39  ;;  %v4420_v39 = vcombine.high %v4404_v26, %v4404_v26 }
 0x450   : > { %v14278_v61 = vadd.f32 %v14277_v58, %v14238_v40  ;;  %16258 = vmatpush1.bf16.xpose.msra.mxu0 %v18822_v47  ;;  %16275 = vmatprep.mubr.bf16.mxu0 %v4411_v41  ;;  %v18835_v40 = vcombine.high %v1509_v29, %v1765_v30  ;;  %v18832_v41 = vcombine.low %v1508_v9, %v1764_v10  ;;  %v1288_v47 = vld [vmem:[%s20178_s3 + $0x1a8] sm:$0xff] }
 0x451   : > { %v14279_v62 = vpop.f32.mrf.mxu0  ;;  %v14317_v63 = vpop.f32.mrf.mxu1  ;;  %16236 = vmatmul.mubr.bf16.vlgmr.msra.gmra.mxu1 %v4371_v52  ;;  %16337 = vmatprep.subr.bf16.mxu0 %v18827_v53  ;;  %v4467_v53 = vrot.slane %v4439_v43, %v20180_v15  ;;  %v4479_v56 = vrot.slane %v1288_v47, %v20180_v15  ;;  %v4472_v5 = vcombine.high %v1288_v47, %v1288_v47  ;;  %v1516_v47 = vld [vmem:[%s20167_s28 + $0x6c8] sm:$0xff] }
 0x452   : > { %v14318_v1 = vadd.f32 %v14317_v63, %v14278_v61  ;;  %16298 = vmatpush1.bf16.xpose.msra.mxu1 %v18824_v54  ;;  %16315 = vmatprep.mubr.bf16.mxu1 %v4421_v55  ;;  %v1511_v54 = vld [vmem:[%s20167_s28 + $0x6a0] sm:$0xff]  ;;  %v1768_v61 = vld [vmem:[%s20167_s28 + $0xea8] sm:$0x11] }
 0x453   : > { %v14280_v6 = vpop.f32.mrf.mxu0  ;;  %v14319_v7 = vpop.f32.mrf.mxu1  ;;  %16377 = vmatprep.subr.bf16.mxu1 %v18829_v59  ;;  %v1767_v55 = vld [vmem:[%s20167_s28 + $0xea0] sm:$0x11]  ;;  %v18834_v59 = vcombine.low %v1509_v29, %v1765_v30  ;;  %v4471_v3 = vcombine.high %v4467_v53, %v4467_v53  ;;  %v4487_v4 = vcombine.high %v4479_v56, %v4479_v56  ;;  %v4486_v18 = vrot.slane %v4472_v5, %v20180_v15 }
 0x455   : > { %v14281_v11 = vpop.f32.mrf.mxu0  ;;  %v14320_v12 = vpop.f32.mrf.mxu1  ;;  %v4488_v30 = vcombine.high %v4486_v18, %v4486_v18 }
 0x456   : > { %v4453_v12 = vrot.slane %v4437_v31, %v20180_v15 }
 0x457   : > { %v14321_v20 = vpop.f32.mrf.mxu1  ;;  %v14357_v21 = vpop.f32.mrf.mxu0  ;;  %16276 = vmatmul.mubr.bf16.vlgmr.msra.gmra.mxu0 %v4397_v0  ;;  %v4468_v0 = vcombine.high %v4446_v51, %v4446_v51 }
 0x458   : > { %v14358_v23 = vadd.f32 %v14357_v21, %v14318_v1  ;;  %16338 = vmatpush1.bf16.xpose.msra.mxu0 %v18826_v8  ;;  %16355 = vmatprep.mubr.bf16.mxu0 %v4418_v2  ;;  %v18839_v1 = vcombine.high %v1511_v54, %v1767_v55  ;;  %v18836_v2 = vcombine.low %v1510_v35, %v1766_v36 }
 0x459   : > { %v14359_v24 = vpop.f32.mrf.mxu0  ;;  %v14397_v25 = vpop.f32.mrf.mxu1  ;;  %16316 = vmatmul.mubr.bf16.vlgmr.msra.gmra.mxu1 %v4419_v13  ;;  %16417 = vmatprep.subr.bf16.mxu0 %v18831_v14  ;;  %v18841_v8 = vcombine.high %v1512_v60, %v1768_v61  ;;  %v4509_v14 = vrot.slane %v4487_v4, %v20180_v15  ;;  %v18838_v21 = vcombine.low %v1511_v54, %v1767_v55 }
 0x45a   : > { %v14398_v27 = vadd.f32 %v14397_v25, %v14358_v23  ;;  %16378 = vmatpush1.bf16.xpose.msra.mxu1 %v18828_v16  ;;  %16395 = vmatprep.mubr.bf16.mxu1 %v4422_v17  ;;  %v1513_v16 = vld [vmem:[%s20167_s28 + $0x6b0] sm:$0xff]  ;;  %v1770_v23 = vld [vmem:[%s20167_s28 + $0xeb8] sm:$0x11] }
 0x45b   : > { %v14360_v32 = vpop.f32.mrf.mxu0  ;;  %v14399_v33 = vpop.f32.mrf.mxu1  ;;  %16457 = vmatprep.subr.bf16.mxu1 %v18833_v22  ;;  %v1769_v17 = vld [vmem:[%s20167_s28 + $0xeb0] sm:$0x11]  ;;  %v1514_v22 = vld [vmem:[%s20167_s28 + $0x6b8] sm:$0xff]  ;;  %v4519_v29 = vcombine.high %v4509_v14, %v4509_v14 }
 0x45c   : > { %v18845_v33 = vcombine.high %v1514_v22, %v1770_v23 }
 0x45d   : > { %v14361_v37 = vpop.f32.mrf.mxu0  ;;  %v14400_v38 = vpop.f32.mrf.mxu1 }
 0x45e   : > { %v4495_v38 = vrot.slane %v4479_v56, %v20180_v15 }
 0x45f   : > { %v14401_v44 = vpop.f32.mrf.mxu1  ;;  %v14437_v45 = vpop.f32.mrf.mxu0  ;;  %16356 = vmatmul.mubr.bf16.vlgmr.msra.gmra.mxu0 %v4404_v26  ;;  %v4469_v26 = vcombine.high %v4453_v12, %v4453_v12 }
 0x460   : > { %v14438_v48 = vadd.f32 %v14437_v45, %v14398_v27  ;;  %16418 = vmatpush1.bf16.xpose.msra.mxu0 %v18830_v34  ;;  %16435 = vmatprep.mubr.bf16.mxu0 %v4460_v28  ;;  %v18843_v27 = vcombine.high %v1513_v16, %v1769_v17  ;;  %v18840_v28 = vcombine.low %v1512_v60, %v1768_v61  ;;  %v1289_v34 = vld [vmem:[%s20178_s3 + $0x1b0] sm:$0xff] }
 0x461   : > { %v14439_v49 = vpop.f32.mrf.mxu0  ;;  %v14477_v50 = vpop.f32.mrf.mxu1  ;;  %16396 = vmatmul.mubr.bf16.vlgmr.msra.gmra.mxu1 %v4420_v39  ;;  %16497 = vmatprep.subr.bf16.mxu0 %v18835_v40  ;;  %v4516_v40 = vrot.slane %v4488_v30, %v20180_v15  ;;  %v4528_v43 = vrot.slane %v1289_v34, %v20180_v15  ;;  %v4521_v56 = vcombine.high %v1289_v34, %v1289_v34  ;;  %v1520_v34 = vld [vmem:[%s20167_s28 + $0x6e8] sm:$0xff] }
 0x462   : > { %v14478_v52 = vadd.f32 %v14477_v50, %v14438_v48  ;;  %16458 = vmatpush1.bf16.xpose.msra.mxu1 %v18832_v41  ;;  %16475 = vmatprep.mubr.bf16.mxu1 %v4470_v42  ;;  %v1515_v41 = vld [vmem:[%s20167_s28 + $0x6c0] sm:$0xff]  ;;  %v1772_v48 = vld [vmem:[%s20167_s28 + $0xec8] sm:$0x11] }
 0x463   : > { %v14440_v57 = vpop.f32.mrf.mxu0  ;;  %v14479_v58 = vpop.f32.mrf.mxu1  ;;  %16537 = vmatprep.subr.bf16.mxu1 %v18837_v46  ;;  %v1771_v42 = vld [vmem:[%s20167_s28 + $0xec0] sm:$0x11]  ;;  %v18842_v46 = vcombine.low %v1513_v16, %v1769_v17  ;;  %v4520_v54 = vcombine.high %v4516_v40, %v4516_v40  ;;  %v4536_v55 = vcombine.high %v4528_v43, %v4528_v43  ;;  %v4535_v4 = vrot.slane %v4521_v56, %v20180_v15 }
 0x465   : > { %v14441_v62 = vpop.f32.mrf.mxu0  ;;  %v14480_v63 = vpop.f32.mrf.mxu1  ;;  %v4537_v17 = vcombine.high %v4535_v4, %v4535_v4 }
 0x466   : > { %v4502_v63 = vrot.slane %v4486_v18, %v20180_v15 }
 0x467   : > { %v14481_v6 = vpop.f32.mrf.mxu1  ;;  %v14517_v7 = vpop.f32.mrf.mxu0  ;;  %16436 = vmatmul.mubr.bf16.vlgmr.msra.gmra.mxu0 %v4446_v51  ;;  %v4517_v51 = vcombine.high %v4495_v38, %v4495_v38 }
 0x468   : > { %v14518_v9 = vadd.f32 %v14517_v7, %v14478_v52  ;;  %16498 = vmatpush1.bf16.xpose.msra.mxu0 %v18834_v59  ;;  %16515 = vmatprep.mubr.bf16.mxu0 %v4467_v53  ;;  %v18847_v52 = vcombine.high %v1515_v41, %v1771_v42  ;;  %v18844_v53 = vcombine.low %v1514_v22, %v1770_v23 }
 0x469   : > { %v14519_v10 = vpop.f32.mrf.mxu0  ;;  %v14557_v11 = vpop.f32.mrf.mxu1  ;;  %16476 = vmatmul.mubr.bf16.vlgmr.msra.gmra.mxu1 %v4468_v0  ;;  %16577 = vmatprep.subr.bf16.mxu0 %v18839_v1  ;;  %v18849_v59 = vcombine.high %v1516_v47, %v1772_v48  ;;  %v4558_v1 = vrot.slane %v4536_v55, %v20180_v15  ;;  %v18846_v7 = vcombine.low %v1515_v41, %v1771_v42 }
 0x46a   : > { %v14558_v13 = vadd.f32 %v14557_v11, %v14518_v9  ;;  %16538 = vmatpush1.bf16.xpose.msra.mxu1 %v18836_v2  ;;  %16555 = vmatprep.mubr.bf16.mxu1 %v4471_v3  ;;  %v1517_v2 = vld [vmem:[%s20167_s28 + $0x6d0] sm:$0xff]  ;;  %v1774_v9 = vld [vmem:[%s20167_s28 + $0xed8] sm:$0x11] }
 0x46b   : > { %v14520_v19 = vpop.f32.mrf.mxu0  ;;  %v14559_v20 = vpop.f32.mrf.mxu1  ;;  %16617 = vmatprep.subr.bf16.mxu1 %v18841_v8  ;;  %v1773_v3 = vld [vmem:[%s20167_s28 + $0xed0] sm:$0x11]  ;;  %v1518_v8 = vld [vmem:[%s20167_s28 + $0x6d8] sm:$0xff]  ;;  %v4568_v16 = vcombine.high %v4558_v1, %v4558_v1 }
 0x46c   : > { %v18853_v20 = vcombine.high %v1518_v8, %v1774_v9 }
 0x46d   : > { %v14521_v24 = vpop.f32.mrf.mxu0  ;;  %v14560_v25 = vpop.f32.mrf.mxu1 }
 0x46e   : > { %v4544_v25 = vrot.slane %v4528_v43, %v20180_v15 }
 0x46f   : > { %v14561_v31 = vpop.f32.mrf.mxu1  ;;  %v14597_v32 = vpop.f32.mrf.mxu0  ;;  %16516 = vmatmul.mubr.bf16.vlgmr.msra.gmra.mxu0 %v4453_v12  ;;  %v4518_v12 = vcombine.high %v4502_v63, %v4502_v63 }
 0x470   : > { %v14598_v35 = vadd.f32 %v14597_v32, %v14558_v13  ;;  %16578 = vmatpush1.bf16.xpose.msra.mxu0 %v18838_v21  ;;  %16595 = vmatprep.mubr.bf16.mxu0 %v4509_v14  ;;  %v18851_v13 = vcombine.high %v1517_v2, %v1773_v3  ;;  %v18848_v14 = vcombine.low %v1516_v47, %v1772_v48  ;;  %v1290_v21 = vld [vmem:[%s20178_s3 + $0x1b8] sm:$0xff] }
 0x471   : > { %v14599_v36 = vpop.f32.mrf.mxu0  ;;  %v14637_v37 = vpop.f32.mrf.mxu1  ;;  %16556 = vmatmul.mubr.bf16.vlgmr.msra.gmra.mxu1 %v4469_v26  ;;  %16657 = vmatprep.subr.bf16.mxu0 %v18843_v27  ;;  %v4565_v27 = vrot.slane %v4537_v17, %v20180_v15  ;;  %v4577_v30 = vrot.slane %v1290_v21, %v20180_v15  ;;  %v4570_v43 = vcombine.high %v1290_v21, %v1290_v21  ;;  %v1524_v21 = vld [vmem:[%s20167_s28 + $0x708] sm:$0xff] }
 0x472   : > { %v14638_v39 = vadd.f32 %v14637_v37, %v14598_v35  ;;  %16618 = vmatpush1.bf16.xpose.msra.mxu1 %v18840_v28  ;;  %16635 = vmatprep.mubr.bf16.mxu1 %v4519_v29  ;;  %v1519_v28 = vld [vmem:[%s20167_s28 + $0x6e0] sm:$0xff]  ;;  %v1776_v35 = vld [vmem:[%s20167_s28 + $0xee8] sm:$0x11] }
 0x473   : > { %v14600_v44 = vpop.f32.mrf.mxu0  ;;  %v14639_v45 = vpop.f32.mrf.mxu1  ;;  %16697 = vmatprep.subr.bf16.mxu1 %v18845_v33  ;;  %v1775_v29 = vld [vmem:[%s20167_s28 + $0xee0] sm:$0x11]  ;;  %v18850_v33 = vcombine.low %v1517_v2, %v1773_v3  ;;  %v4569_v41 = vcombine.high %v4565_v27, %v4565_v27  ;;  %v4585_v42 = vcombine.high %v4577_v30, %v4577_v30  ;;  %v4584_v55 = vrot.slane %v4570_v43, %v20180_v15 }
 0x475   : > { %v14601_v49 = vpop.f32.mrf.mxu0  ;;  %v14640_v50 = vpop.f32.mrf.mxu1  ;;  %v4586_v3 = vcombine.high %v4584_v55, %v4584_v55 }
 0x476   : > { %v4551_v50 = vrot.slane %v4535_v4, %v20180_v15 }
 0x477   : > { %v14641_v57 = vpop.f32.mrf.mxu1  ;;  %v14677_v58 = vpop.f32.mrf.mxu0  ;;  %16596 = vmatmul.mubr.bf16.vlgmr.msra.gmra.mxu0 %v4495_v38  ;;  %v4566_v38 = vcombine.high %v4544_v25, %v4544_v25 }
 0x478   : > { %v14678_v60 = vadd.f32 %v14677_v58, %v14638_v39  ;;  %16658 = vmatpush1.bf16.xpose.msra.mxu0 %v18842_v46  ;;  %16675 = vmatprep.mubr.bf16.mxu0 %v4516_v40  ;;  %v18855_v39 = vcombine.high %v1519_v28, %v1775_v29  ;;  %v18852_v40 = vcombine.low %v1518_v8, %v1774_v9 }
 0x479   : > { %v14679_v61 = vpop.f32.mrf.mxu0  ;;  %v14717_v62 = vpop.f32.mrf.mxu1  ;;  %16636 = vmatmul.mubr.bf16.vlgmr.msra.gmra.mxu1 %v4517_v51  ;;  %16737 = vmatprep.subr.bf16.mxu0 %v18847_v52  ;;  %v18857_v46 = vcombine.high %v1520_v34, %v1776_v35  ;;  %v4607_v52 = vrot.slane %v4585_v42, %v20180_v15  ;;  %v18854_v58 = vcombine.low %v1519_v28, %v1775_v29 }
 0x47a   : > { %v14718_v0 = vadd.f32 %v14717_v62, %v14678_v60  ;;  %16698 = vmatpush1.bf16.xpose.msra.mxu1 %v18844_v53  ;;  %16715 = vmatprep.mubr.bf16.mxu1 %v4520_v54  ;;  %v1521_v53 = vld [vmem:[%s20167_s28 + $0x6f0] sm:$0xff]  ;;  %v1778_v60 = vld [vmem:[%s20167_s28 + $0xef8] sm:$0x11] }
 0x47b   : > { %v14680_v5 = vpop.f32.mrf.mxu0  ;;  %v14719_v6 = vpop.f32.mrf.mxu1  ;;  %16777 = vmatprep.subr.bf16.mxu1 %v18849_v59  ;;  %v1777_v54 = vld [vmem:[%s20167_s28 + $0xef0] sm:$0x11]  ;;  %v1522_v59 = vld [vmem:[%s20167_s28 + $0x6f8] sm:$0xff]  ;;  %v4617_v2 = vcombine.high %v4607_v52, %v4607_v52 }
 0x47c   : > { %v18861_v6 = vcombine.high %v1522_v59, %v1778_v60 }
 0x47d   : > { %v14681_v10 = vpop.f32.mrf.mxu0  ;;  %v14720_v11 = vpop.f32.mrf.mxu1 }
 0x47e   : > { %v4593_v11 = vrot.slane %v4577_v30, %v20180_v15 }
 0x47f   : > { %v14721_v18 = vpop.f32.mrf.mxu1  ;;  %v14757_v19 = vpop.f32.mrf.mxu0  ;;  %16676 = vmatmul.mubr.bf16.vlgmr.msra.gmra.mxu0 %v4502_v63  ;;  %v4567_v63 = vcombine.high %v4551_v50, %v4551_v50 }
 0x480   : > { %v14758_v22 = vadd.f32 %v14757_v19, %v14718_v0  ;;  %16738 = vmatpush1.bf16.xpose.msra.mxu0 %v18846_v7  ;;  %16755 = vmatprep.mubr.bf16.mxu0 %v4558_v1  ;;  %v18859_v0 = vcombine.high %v1521_v53, %v1777_v54  ;;  %v18856_v1 = vcombine.low %v1520_v34, %v1776_v35  ;;  %v1291_v7 = vld [vmem:[%s20178_s3 + $0x1c0] sm:$0xff] }
 0x481   : > { %v14759_v23 = vpop.f32.mrf.mxu0  ;;  %v14797_v24 = vpop.f32.mrf.mxu1  ;;  %16716 = vmatmul.mubr.bf16.vlgmr.msra.gmra.mxu1 %v4518_v12  ;;  %16817 = vmatprep.subr.bf16.mxu0 %v18851_v13  ;;  %v4614_v13 = vrot.slane %v4586_v3, %v20180_v15  ;;  %v4626_v17 = vrot.slane %v1291_v7, %v20180_v15  ;;  %v4619_v30 = vcombine.high %v1291_v7, %v1291_v7  ;;  %v1528_v7 = vld [vmem:[%s20167_s28 + $0x728] sm:$0xff] }
 0x482   : > { %v14798_v26 = vadd.f32 %v14797_v24, %v14758_v22  ;;  %16778 = vmatpush1.bf16.xpose.msra.mxu1 %v18848_v14  ;;  %16795 = vmatprep.mubr.bf16.mxu1 %v4568_v16  ;;  %v1523_v14 = vld [vmem:[%s20167_s28 + $0x700] sm:$0xff]  ;;  %v1780_v22 = vld [vmem:[%s20167_s28 + $0xf08] sm:$0x11] }
 0x483   : > { %v14760_v31 = vpop.f32.mrf.mxu0  ;;  %v14799_v32 = vpop.f32.mrf.mxu1  ;;  %16857 = vmatprep.subr.bf16.mxu1 %v18853_v20  ;;  %v1779_v16 = vld [vmem:[%s20167_s28 + $0xf00] sm:$0x11]  ;;  %v18858_v20 = vcombine.low %v1521_v53, %v1777_v54  ;;  %v4618_v28 = vcombine.high %v4614_v13, %v4614_v13  ;;  %v4634_v29 = vcombine.high %v4626_v17, %v4626_v17  ;;  %v4633_v42 = vrot.slane %v4619_v30, %v20180_v15 }
 0x485   : > { %v14761_v36 = vpop.f32.mrf.mxu0  ;;  %v14800_v37 = vpop.f32.mrf.mxu1  ;;  %v4635_v54 = vcombine.high %v4633_v42, %v4633_v42 }
 0x486   : > { %v4600_v37 = vrot.slane %v4584_v55, %v20180_v15 }
 0x487   : > { %v14801_v44 = vpop.f32.mrf.mxu1  ;;  %v14837_v45 = vpop.f32.mrf.mxu0  ;;  %16756 = vmatmul.mubr.bf16.vlgmr.msra.gmra.mxu0 %v4544_v25  ;;  %v4615_v25 = vcombine.high %v4593_v11, %v4593_v11 }
 0x488   : > { %v14838_v47 = vadd.f32 %v14837_v45, %v14798_v26  ;;  %16818 = vmatpush1.bf16.xpose.msra.mxu0 %v18850_v33  ;;  %16835 = vmatprep.mubr.bf16.mxu0 %v4565_v27  ;;  %v18863_v26 = vcombine.high %v1523_v14, %v1779_v16  ;;  %v18860_v27 = vcombine.low %v1522_v59, %v1778_v60 }
 0x489   : > { %v14839_v48 = vpop.f32.mrf.mxu0  ;;  %v14877_v49 = vpop.f32.mrf.mxu1  ;;  %16796 = vmatmul.mubr.bf16.vlgmr.msra.gmra.mxu1 %v4566_v38  ;;  %16897 = vmatprep.subr.bf16.mxu0 %v18855_v39  ;;  %v18865_v33 = vcombine.high %v1524_v21, %v1780_v22  ;;  %v4656_v39 = vrot.slane %v4634_v29, %v20180_v15  ;;  %v18862_v45 = vcombine.low %v1523_v14, %v1779_v16 }
 0x48a   : > { %v14878_v51 = vadd.f32 %v14877_v49, %v14838_v47  ;;  %16858 = vmatpush1.bf16.xpose.msra.mxu1 %v18852_v40  ;;  %16875 = vmatprep.mubr.bf16.mxu1 %v4569_v41  ;;  %v1525_v40 = vld [vmem:[%s20167_s28 + $0x710] sm:$0xff]  ;;  %v1782_v47 = vld [vmem:[%s20167_s28 + $0xf18] sm:$0x11] }
 0x48b   : > { %v14840_v56 = vpop.f32.mrf.mxu0  ;;  %v14879_v57 = vpop.f32.mrf.mxu1  ;;  %16937 = vmatprep.subr.bf16.mxu1 %v18857_v46  ;;  %v1781_v41 = vld [vmem:[%s20167_s28 + $0xf10] sm:$0x11]  ;;  %v1526_v46 = vld [vmem:[%s20167_s28 + $0x718] sm:$0xff]  ;;  %v4666_v53 = vcombine.high %v4656_v39, %v4656_v39 }
 0x48c   : > { %v18869_v57 = vcombine.high %v1526_v46, %v1782_v47 }
 0x48d   : > { %v14841_v61 = vpop.f32.mrf.mxu0  ;;  %v14880_v62 = vpop.f32.mrf.mxu1 }
 0x48e   : > { %v4642_v62 = vrot.slane %v4626_v17, %v20180_v15 }
 0x48f   : > { %v14881_v4 = vpop.f32.mrf.mxu1  ;;  %v14917_v5 = vpop.f32.mrf.mxu0  ;;  %16836 = vmatmul.mubr.bf16.vlgmr.msra.gmra.mxu0 %v4551_v50  ;;  %v4616_v50 = vcombine.high %v4600_v37, %v4600_v37 }
 0x490   : > { %v14918_v8 = vadd.f32 %v14917_v5, %v14878_v51  ;;  %16898 = vmatpush1.bf16.xpose.msra.mxu0 %v18854_v58  ;;  %16915 = vmatprep.mubr.bf16.mxu0 %v4607_v52  ;;  %v18867_v51 = vcombine.high %v1525_v40, %v1781_v41  ;;  %v18864_v52 = vcombine.low %v1524_v21, %v1780_v22  ;;  %v1292_v58 = vld [vmem:[%s20178_s3 + $0x1c8] sm:$0xff] }
 0x491   : > { %v14919_v9 = vpop.f32.mrf.mxu0  ;;  %v14957_v10 = vpop.f32.mrf.mxu1  ;;  %16876 = vmatmul.mubr.bf16.vlgmr.msra.gmra.mxu1 %v4567_v63  ;;  %16977 = vmatprep.subr.bf16.mxu0 %v18859_v0  ;;  %v4663_v0 = vrot.slane %v4635_v54, %v20180_v15  ;;  %v4675_v3 = vrot.slane %v1292_v58, %v20180_v15  ;;  %v4668_v17 = vcombine.high %v1292_v58, %v1292_v58  ;;  %v1532_v58 = vld [vmem:[%s20167_s28 + $0x748] sm:$0xff] }
 0x492   : > { %v14958_v12 = vadd.f32 %v14957_v10, %v14918_v8  ;;  %16938 = vmatpush1.bf16.xpose.msra.mxu1 %v18856_v1  ;;  %16955 = vmatprep.mubr.bf16.mxu1 %v4617_v2  ;;  %v1527_v1 = vld [vmem:[%s20167_s28 + $0x720] sm:$0xff]  ;;  %v1784_v8 = vld [vmem:[%s20167_s28 + $0xf28] sm:$0x11] }
 0x493   : > { %v14920_v18 = vpop.f32.mrf.mxu0  ;;  %v14959_v19 = vpop.f32.mrf.mxu1  ;;  %17017 = vmatprep.subr.bf16.mxu1 %v18861_v6  ;;  %v1783_v2 = vld [vmem:[%s20167_s28 + $0xf20] sm:$0x11]  ;;  %v18866_v6 = vcombine.low %v1525_v40, %v1781_v41  ;;  %v4667_v14 = vcombine.high %v4663_v0, %v4663_v0  ;;  %v4683_v16 = vcombine.high %v4675_v3, %v4675_v3  ;;  %v4682_v29 = vrot.slane %v4668_v17, %v20180_v15 }
 0x495   : > { %v14921_v23 = vpop.f32.mrf.mxu0  ;;  %v14960_v24 = vpop.f32.mrf.mxu1  ;;  %v4684_v41 = vcombine.high %v4682_v29, %v4682_v29 }
 0x496   : > { %v4649_v24 = vrot.slane %v4633_v42, %v20180_v15 }
 0x497   : > { %v14961_v31 = vpop.f32.mrf.mxu1  ;;  %v14997_v32 = vpop.f32.mrf.mxu0  ;;  %16916 = vmatmul.mubr.bf16.vlgmr.msra.gmra.mxu0 %v4593_v11  ;;  %v4664_v11 = vcombine.high %v4642_v62, %v4642_v62 }
 0x498   : > { %v14998_v34 = vadd.f32 %v14997_v32, %v14958_v12  ;;  %16978 = vmatpush1.bf16.xpose.msra.mxu0 %v18858_v20  ;;  %16995 = vmatprep.mubr.bf16.mxu0 %v4614_v13  ;;  %v18871_v12 = vcombine.high %v1527_v1, %v1783_v2  ;;  %v18868_v13 = vcombine.low %v1526_v46, %v1782_v47 }
 0x499   : > { %v14999_v35 = vpop.f32.mrf.mxu0  ;;  %v15037_v36 = vpop.f32.mrf.mxu1  ;;  %16956 = vmatmul.mubr.bf16.vlgmr.msra.gmra.mxu1 %v4615_v25  ;;  %17057 = vmatprep.subr.bf16.mxu0 %v18863_v26  ;;  %v18873_v20 = vcombine.high %v1528_v7, %v1784_v8  ;;  %v4705_v26 = vrot.slane %v4683_v16, %v20180_v15  ;;  %v18870_v32 = vcombine.low %v1527_v1, %v1783_v2 }
 0x49a   : > { %v15038_v38 = vadd.f32 %v15037_v36, %v14998_v34  ;;  %17018 = vmatpush1.bf16.xpose.msra.mxu1 %v18860_v27  ;;  %17035 = vmatprep.mubr.bf16.mxu1 %v4618_v28  ;;  %v1529_v27 = vld [vmem:[%s20167_s28 + $0x730] sm:$0xff]  ;;  %v1786_v34 = vld [vmem:[%s20167_s28 + $0xf38] sm:$0x11] }
 0x49b   : > { %v15000_v43 = vpop.f32.mrf.mxu0  ;;  %v15039_v44 = vpop.f32.mrf.mxu1  ;;  %17097 = vmatprep.subr.bf16.mxu1 %v18865_v33  ;;  %v1785_v28 = vld [vmem:[%s20167_s28 + $0xf30] sm:$0x11]  ;;  %v1530_v33 = vld [vmem:[%s20167_s28 + $0x738] sm:$0xff]  ;;  %v4715_v40 = vcombine.high %v4705_v26, %v4705_v26 }
 0x49c   : > { %v18877_v44 = vcombine.high %v1530_v33, %v1786_v34 }
 0x49d   : > { %v15001_v48 = vpop.f32.mrf.mxu0  ;;  %v15040_v49 = vpop.f32.mrf.mxu1 }
 0x49e   : > { %v4691_v49 = vrot.slane %v4675_v3, %v20180_v15 }
 0x49f   : > { %v15041_v55 = vpop.f32.mrf.mxu1  ;;  %v15077_v56 = vpop.f32.mrf.mxu0  ;;  %16996 = vmatmul.mubr.bf16.vlgmr.msra.gmra.mxu0 %v4600_v37  ;;  %v4665_v37 = vcombine.high %v4649_v24, %v4649_v24 }
 0x4a0   : > { %v15078_v59 = vadd.f32 %v15077_v56, %v15038_v38  ;;  %17058 = vmatpush1.bf16.xpose.msra.mxu0 %v18862_v45  ;;  %17075 = vmatprep.mubr.bf16.mxu0 %v4656_v39  ;;  %v18875_v38 = vcombine.high %v1529_v27, %v1785_v28  ;;  %v18872_v39 = vcombine.low %v1528_v7, %v1784_v8  ;;  %v1293_v45 = vld [vmem:[%s20178_s3 + $0x1d0] sm:$0xff] }
 0x4a1   : > { %v15079_v60 = vpop.f32.mrf.mxu0  ;;  %v15117_v61 = vpop.f32.mrf.mxu1  ;;  %17036 = vmatmul.mubr.bf16.vlgmr.msra.gmra.mxu1 %v4616_v50  ;;  %17137 = vmatprep.subr.bf16.mxu0 %v18867_v51  ;;  %v4712_v51 = vrot.slane %v4684_v41, %v20180_v15  ;;  %v4724_v54 = vrot.slane %v1293_v45, %v20180_v15  ;;  %v4717_v3 = vcombine.high %v1293_v45, %v1293_v45  ;;  %v1536_v45 = vld [vmem:[%s20167_s28 + $0x768] sm:$0xff] }
 0x4a2   : > { %v15118_v63 = vadd.f32 %v15117_v61, %v15078_v59  ;;  %17098 = vmatpush1.bf16.xpose.msra.mxu1 %v18864_v52  ;;  %17115 = vmatprep.mubr.bf16.mxu1 %v4666_v53  ;;  %v1531_v52 = vld [vmem:[%s20167_s28 + $0x740] sm:$0xff]  ;;  %v1788_v59 = vld [vmem:[%s20167_s28 + $0xf48] sm:$0x11] }
 0x4a3   : > { %v15080_v4 = vpop.f32.mrf.mxu0  ;;  %v15119_v5 = vpop.f32.mrf.mxu1  ;;  %17177 = vmatprep.subr.bf16.mxu1 %v18869_v57  ;;  %v1787_v53 = vld [vmem:[%s20167_s28 + $0xf40] sm:$0x11]  ;;  %v18874_v57 = vcombine.low %v1529_v27, %v1785_v28  ;;  %v4716_v1 = vcombine.high %v4712_v51, %v4712_v51  ;;  %v4732_v2 = vcombine.high %v4724_v54, %v4724_v54  ;;  %v4731_v16 = vrot.slane %v4717_v3, %v20180_v15 }
 0x4a5   : > { %v15081_v9 = vpop.f32.mrf.mxu0  ;;  %v15120_v10 = vpop.f32.mrf.mxu1  ;;  %v4733_v28 = vcombine.high %v4731_v16, %v4731_v16 }
 0x4a6   : > { %v4698_v10 = vrot.slane %v4682_v29, %v20180_v15 }
 0x4a7   : > { %v15121_v18 = vpop.f32.mrf.mxu1  ;;  %v15157_v19 = vpop.f32.mrf.mxu0  ;;  %17076 = vmatmul.mubr.bf16.vlgmr.msra.gmra.mxu0 %v4642_v62  ;;  %v4713_v62 = vcombine.high %v4691_v49, %v4691_v49 }
 0x4a8   : > { %v15158_v21 = vadd.f32 %v15157_v19, %v15118_v63  ;;  %17138 = vmatpush1.bf16.xpose.msra.mxu0 %v18866_v6  ;;  %17155 = vmatprep.mubr.bf16.mxu0 %v4663_v0  ;;  %v18879_v63 = vcombine.high %v1531_v52, %v1787_v53  ;;  %v18876_v0 = vcombine.low %v1530_v33, %v1786_v34 }
 0x4a9   : > { %v15159_v22 = vpop.f32.mrf.mxu0  ;;  %v15197_v23 = vpop.f32.mrf.mxu1  ;;  %17116 = vmatmul.mubr.bf16.vlgmr.msra.gmra.mxu1 %v4664_v11  ;;  %17217 = vmatprep.subr.bf16.mxu0 %v18871_v12  ;;  %v18881_v6 = vcombine.high %v1532_v58, %v1788_v59  ;;  %v4754_v12 = vrot.slane %v4732_v2, %v20180_v15  ;;  %v18878_v19 = vcombine.low %v1531_v52, %v1787_v53 }
 0x4aa   : > { %v15198_v25 = vadd.f32 %v15197_v23, %v15158_v21  ;;  %17178 = vmatpush1.bf16.xpose.msra.mxu1 %v18868_v13  ;;  %17195 = vmatprep.mubr.bf16.mxu1 %v4667_v14  ;;  %v1533_v13 = vld [vmem:[%s20167_s28 + $0x750] sm:$0xff]  ;;  %v1790_v21 = vld [vmem:[%s20167_s28 + $0xf58] sm:$0x11] }
 0x4ab   : > { %v15160_v30 = vpop.f32.mrf.mxu0  ;;  %v15199_v31 = vpop.f32.mrf.mxu1  ;;  %17257 = vmatprep.subr.bf16.mxu1 %v18873_v20  ;;  %v1789_v14 = vld [vmem:[%s20167_s28 + $0xf50] sm:$0x11]  ;;  %v1534_v20 = vld [vmem:[%s20167_s28 + $0x758] sm:$0xff]  ;;  %v4764_v27 = vcombine.high %v4754_v12, %v4754_v12 }
 0x4ac   : > { %v18885_v31 = vcombine.high %v1534_v20, %v1790_v21 }
 0x4ad   : > { %v15161_v35 = vpop.f32.mrf.mxu0  ;;  %v15200_v36 = vpop.f32.mrf.mxu1 }
 0x4ae   : > { %v4740_v36 = vrot.slane %v4724_v54, %v20180_v15 }
 0x4af   : > { %v15201_v42 = vpop.f32.mrf.mxu1  ;;  %v15237_v43 = vpop.f32.mrf.mxu0  ;;  %17156 = vmatmul.mubr.bf16.vlgmr.msra.gmra.mxu0 %v4649_v24  ;;  %v4714_v24 = vcombine.high %v4698_v10, %v4698_v10 }
 0x4b0   : > { %v15238_v46 = vadd.f32 %v15237_v43, %v15198_v25  ;;  %17218 = vmatpush1.bf16.xpose.msra.mxu0 %v18870_v32  ;;  %17235 = vmatprep.mubr.bf16.mxu0 %v4705_v26  ;;  %v18883_v25 = vcombine.high %v1533_v13, %v1789_v14  ;;  %v18880_v26 = vcombine.low %v1532_v58, %v1788_v59  ;;  %v1294_v32 = vld [vmem:[%s20178_s3 + $0x1d8] sm:$0xff] }
 0x4b1   : > { %v15239_v47 = vpop.f32.mrf.mxu0  ;;  %v15277_v48 = vpop.f32.mrf.mxu1  ;;  %17196 = vmatmul.mubr.bf16.vlgmr.msra.gmra.mxu1 %v4665_v37  ;;  %17297 = vmatprep.subr.bf16.mxu0 %v18875_v38  ;;  %v4761_v38 = vrot.slane %v4733_v28, %v20180_v15  ;;  %v4773_v41 = vrot.slane %v1294_v32, %v20180_v15  ;;  %v4766_v54 = vcombine.high %v1294_v32, %v1294_v32  ;;  %v1540_v32 = vld [vmem:[%s20167_s28 + $0x788] sm:$0xff] }
 0x4b2   : > { %v15278_v50 = vadd.f32 %v15277_v48, %v15238_v46  ;;  %17258 = vmatpush1.bf16.xpose.msra.mxu1 %v18872_v39  ;;  %17275 = vmatprep.mubr.bf16.mxu1 %v4715_v40  ;;  %v1535_v39 = vld [vmem:[%s20167_s28 + $0x760] sm:$0xff]  ;;  %v1792_v46 = vld [vmem:[%s20167_s28 + $0xf68] sm:$0x11] }
 0x4b3   : > { %v15240_v55 = vpop.f32.mrf.mxu0  ;;  %v15279_v56 = vpop.f32.mrf.mxu1  ;;  %17337 = vmatprep.subr.bf16.mxu1 %v18877_v44  ;;  %v1791_v40 = vld [vmem:[%s20167_s28 + $0xf60] sm:$0x11]  ;;  %v18882_v44 = vcombine.low %v1533_v13, %v1789_v14  ;;  %v4765_v52 = vcombine.high %v4761_v38, %v4761_v38  ;;  %v4781_v53 = vcombine.high %v4773_v41, %v4773_v41  ;;  %v4780_v2 = vrot.slane %v4766_v54, %v20180_v15 }
 0x4b5   : > { %v15241_v60 = vpop.f32.mrf.mxu0  ;;  %v15280_v61 = vpop.f32.mrf.mxu1  ;;  %v4782_v14 = vcombine.high %v4780_v2, %v4780_v2 }
 0x4b6   : > { %v4747_v61 = vrot.slane %v4731_v16, %v20180_v15 }
 0x4b7   : > { %v15281_v4 = vpop.f32.mrf.mxu1  ;;  %v15317_v5 = vpop.f32.mrf.mxu0  ;;  %17236 = vmatmul.mubr.bf16.vlgmr.msra.gmra.mxu0 %v4691_v49  ;;  %v4762_v49 = vcombine.high %v4740_v36, %v4740_v36 }
 0x4b8   : > { %v15318_v7 = vadd.f32 %v15317_v5, %v15278_v50  ;;  %17298 = vmatpush1.bf16.xpose.msra.mxu0 %v18874_v57  ;;  %17315 = vmatprep.mubr.bf16.mxu0 %v4712_v51  ;;  %v18887_v50 = vcombine.high %v1535_v39, %v1791_v40  ;;  %v18884_v51 = vcombine.low %v1534_v20, %v1790_v21 }
 0x4b9   : > { %v15319_v8 = vpop.f32.mrf.mxu0  ;;  %v15357_v9 = vpop.f32.mrf.mxu1  ;;  %17276 = vmatmul.mubr.bf16.vlgmr.msra.gmra.mxu1 %v4713_v62  ;;  %17377 = vmatprep.subr.bf16.mxu0 %v18879_v63  ;;  %v18889_v57 = vcombine.high %v1536_v45, %v1792_v46  ;;  %v4803_v63 = vrot.slane %v4781_v53, %v20180_v15  ;;  %v18886_v5 = vcombine.low %v1535_v39, %v1791_v40 }
 0x4ba   : > { %v15358_v11 = vadd.f32 %v15357_v9, %v15318_v7  ;;  %17338 = vmatpush1.bf16.xpose.msra.mxu1 %v18876_v0  ;;  %17355 = vmatprep.mubr.bf16.mxu1 %v4716_v1  ;;  %v1537_v0 = vld [vmem:[%s20167_s28 + $0x770] sm:$0xff]  ;;  %v1794_v7 = vld [vmem:[%s20167_s28 + $0xf78] sm:$0x11] }
 0x4bb   : > { %v15320_v17 = vpop.f32.mrf.mxu0  ;;  %v15359_v18 = vpop.f32.mrf.mxu1  ;;  %17417 = vmatprep.subr.bf16.mxu1 %v18881_v6  ;;  %v1793_v1 = vld [vmem:[%s20167_s28 + $0xf70] sm:$0x11]  ;;  %v1538_v6 = vld [vmem:[%s20167_s28 + $0x778] sm:$0xff]  ;;  %v4813_v13 = vcombine.high %v4803_v63, %v4803_v63 }
 0x4bc   : > { %v18893_v18 = vcombine.high %v1538_v6, %v1794_v7 }
 0x4bd   : > { %v15321_v22 = vpop.f32.mrf.mxu0  ;;  %v15360_v23 = vpop.f32.mrf.mxu1 }
 0x4be   : > { %v4789_v23 = vrot.slane %v4773_v41, %v20180_v15 }
 0x4bf   : > { %v15361_v29 = vpop.f32.mrf.mxu1  ;;  %v15397_v30 = vpop.f32.mrf.mxu0  ;;  %17316 = vmatmul.mubr.bf16.vlgmr.msra.gmra.mxu0 %v4698_v10  ;;  %v4763_v10 = vcombine.high %v4747_v61, %v4747_v61 }
 0x4c0   : > { %v15398_v33 = vadd.f32 %v15397_v30, %v15358_v11  ;;  %17378 = vmatpush1.bf16.xpose.msra.mxu0 %v18878_v19  ;;  %17395 = vmatprep.mubr.bf16.mxu0 %v4754_v12  ;;  %v18891_v11 = vcombine.high %v1537_v0, %v1793_v1  ;;  %v18888_v12 = vcombine.low %v1536_v45, %v1792_v46  ;;  %v1295_v19 = vld [vmem:[%s20178_s3 + $0x1e0] sm:$0xff] }
 0x4c1   : > { %v15399_v34 = vpop.f32.mrf.mxu0  ;;  %v15437_v35 = vpop.f32.mrf.mxu1  ;;  %17356 = vmatmul.mubr.bf16.vlgmr.msra.gmra.mxu1 %v4714_v24  ;;  %17457 = vmatprep.subr.bf16.mxu0 %v18883_v25  ;;  %v4810_v25 = vrot.slane %v4782_v14, %v20180_v15  ;;  %v4822_v28 = vrot.slane %v1295_v19, %v20180_v15  ;;  %v4815_v41 = vcombine.high %v1295_v19, %v1295_v19  ;;  %v1544_v19 = vld [vmem:[%s20167_s28 + $0x7a8] sm:$0xff] }
 0x4c2   : > { %v15438_v37 = vadd.f32 %v15437_v35, %v15398_v33  ;;  %17418 = vmatpush1.bf16.xpose.msra.mxu1 %v18880_v26  ;;  %17435 = vmatprep.mubr.bf16.mxu1 %v4764_v27  ;;  %v1539_v26 = vld [vmem:[%s20167_s28 + $0x780] sm:$0xff]  ;;  %v1796_v33 = vld [vmem:[%s20167_s28 + $0xf88] sm:$0x11] }
 0x4c3   : > { %v15400_v42 = vpop.f32.mrf.mxu0  ;;  %v15439_v43 = vpop.f32.mrf.mxu1  ;;  %17497 = vmatprep.subr.bf16.mxu1 %v18885_v31  ;;  %v1795_v27 = vld [vmem:[%s20167_s28 + $0xf80] sm:$0x11]  ;;  %v18890_v31 = vcombine.low %v1537_v0, %v1793_v1  ;;  %v4814_v39 = vcombine.high %v4810_v25, %v4810_v25  ;;  %v4830_v40 = vcombine.high %v4822_v28, %v4822_v28  ;;  %v4829_v53 = vrot.slane %v4815_v41, %v20180_v15 }
 0x4c5   : > { %v15401_v47 = vpop.f32.mrf.mxu0  ;;  %v15440_v48 = vpop.f32.mrf.mxu1  ;;  %v4831_v1 = vcombine.high %v4829_v53, %v4829_v53 }
 0x4c6   : > { %v4796_v48 = vrot.slane %v4780_v2, %v20180_v15 }
 0x4c7   : > { %v15441_v55 = vpop.f32.mrf.mxu1  ;;  %v15477_v56 = vpop.f32.mrf.mxu0  ;;  %17396 = vmatmul.mubr.bf16.vlgmr.msra.gmra.mxu0 %v4740_v36  ;;  %v4811_v36 = vcombine.high %v4789_v23, %v4789_v23 }
 0x4c8   : > { %v15478_v58 = vadd.f32 %v15477_v56, %v15438_v37  ;;  %17458 = vmatpush1.bf16.xpose.msra.mxu0 %v18882_v44  ;;  %17475 = vmatprep.mubr.bf16.mxu0 %v4761_v38  ;;  %v18895_v37 = vcombine.high %v1539_v26, %v1795_v27  ;;  %v18892_v38 = vcombine.low %v1538_v6, %v1794_v7 }
 0x4c9   : > { %v15479_v59 = vpop.f32.mrf.mxu0  ;;  %v15517_v60 = vpop.f32.mrf.mxu1  ;;  %17436 = vmatmul.mubr.bf16.vlgmr.msra.gmra.mxu1 %v4762_v49  ;;  %17537 = vmatprep.subr.bf16.mxu0 %v18887_v50  ;;  %v18897_v44 = vcombine.high %v1540_v32, %v1796_v33  ;;  %v4852_v50 = vrot.slane %v4830_v40, %v20180_v15  ;;  %v18894_v56 = vcombine.low %v1539_v26, %v1795_v27 }
 0x4ca   : > { %v15518_v62 = vadd.f32 %v15517_v60, %v15478_v58  ;;  %17498 = vmatpush1.bf16.xpose.msra.mxu1 %v18884_v51  ;;  %17515 = vmatprep.mubr.bf16.mxu1 %v4765_v52  ;;  %v1541_v51 = vld [vmem:[%s20167_s28 + $0x790] sm:$0xff]  ;;  %v1798_v58 = vld [vmem:[%s20167_s28 + $0xf98] sm:$0x11] }
 0x4cb   : > { %v15480_v3 = vpop.f32.mrf.mxu0  ;;  %v15519_v4 = vpop.f32.mrf.mxu1  ;;  %17577 = vmatprep.subr.bf16.mxu1 %v18889_v57  ;;  %v1797_v52 = vld [vmem:[%s20167_s28 + $0xf90] sm:$0x11]  ;;  %v1542_v57 = vld [vmem:[%s20167_s28 + $0x798] sm:$0xff]  ;;  %v4862_v0 = vcombine.high %v4852_v50, %v4852_v50 }
 0x4cc   : > { %v18901_v4 = vcombine.high %v1542_v57, %v1798_v58 }
 0x4cd   : > { %v15481_v8 = vpop.f32.mrf.mxu0  ;;  %v15520_v9 = vpop.f32.mrf.mxu1 }
 0x4ce   : > { %v4838_v9 = vrot.slane %v4822_v28, %v20180_v15 }
 0x4cf   : > { %v15521_v16 = vpop.f32.mrf.mxu1  ;;  %v15557_v17 = vpop.f32.mrf.mxu0  ;;  %17476 = vmatmul.mubr.bf16.vlgmr.msra.gmra.mxu0 %v4747_v61  ;;  %v4812_v61 = vcombine.high %v4796_v48, %v4796_v48 }
 0x4d0   : > { %v15558_v20 = vadd.f32 %v15557_v17, %v15518_v62  ;;  %17538 = vmatpush1.bf16.xpose.msra.mxu0 %v18886_v5  ;;  %17555 = vmatprep.mubr.bf16.mxu0 %v4803_v63  ;;  %v18899_v62 = vcombine.high %v1541_v51, %v1797_v52  ;;  %v18896_v63 = vcombine.low %v1540_v32, %v1796_v33  ;;  %v1296_v5 = vld [vmem:[%s20178_s3 + $0x1e8] sm:$0xff] }
 0x4d1   : > { %v15559_v21 = vpop.f32.mrf.mxu0  ;;  %v15597_v22 = vpop.f32.mrf.mxu1  ;;  %17516 = vmatmul.mubr.bf16.vlgmr.msra.gmra.mxu1 %v4763_v10  ;;  %17617 = vmatprep.subr.bf16.mxu0 %v18891_v11  ;;  %v4859_v11 = vrot.slane %v4831_v1, %v20180_v15  ;;  %v4871_v14 = vrot.slane %v1296_v5, %v20180_v15  ;;  %v4864_v28 = vcombine.high %v1296_v5, %v1296_v5  ;;  %v1548_v5 = vld [vmem:[%s20167_s28 + $0x7c8] sm:$0xff] }
 0x4d2   : > { %v15598_v24 = vadd.f32 %v15597_v22, %v15558_v20  ;;  %17578 = vmatpush1.bf16.xpose.msra.mxu1 %v18888_v12  ;;  %17595 = vmatprep.mubr.bf16.mxu1 %v4813_v13  ;;  %v1543_v12 = vld [vmem:[%s20167_s28 + $0x7a0] sm:$0xff]  ;;  %v1800_v20 = vld [vmem:[%s20167_s28 + $0xfa8] sm:$0x11] }
 0x4d3   : > { %v15560_v29 = vpop.f32.mrf.mxu0  ;;  %v15599_v30 = vpop.f32.mrf.mxu1  ;;  %17657 = vmatprep.subr.bf16.mxu1 %v18893_v18  ;;  %v1799_v13 = vld [vmem:[%s20167_s28 + $0xfa0] sm:$0x11]  ;;  %v18898_v18 = vcombine.low %v1541_v51, %v1797_v52  ;;  %v4863_v26 = vcombine.high %v4859_v11, %v4859_v11  ;;  %v4879_v27 = vcombine.high %v4871_v14, %v4871_v14  ;;  %v4878_v40 = vrot.slane %v4864_v28, %v20180_v15 }
 0x4d5   : > { %v15561_v34 = vpop.f32.mrf.mxu0  ;;  %v15600_v35 = vpop.f32.mrf.mxu1  ;;  %v4880_v52 = vcombine.high %v4878_v40, %v4878_v40 }
 0x4d6   : > { %v4845_v35 = vrot.slane %v4829_v53, %v20180_v15 }
 0x4d7   : > { %v15601_v42 = vpop.f32.mrf.mxu1  ;;  %v15637_v43 = vpop.f32.mrf.mxu0  ;;  %17556 = vmatmul.mubr.bf16.vlgmr.msra.gmra.mxu0 %v4789_v23  ;;  %v4860_v23 = vcombine.high %v4838_v9, %v4838_v9 }
 0x4d8   : > { %v15638_v45 = vadd.f32 %v15637_v43, %v15598_v24  ;;  %17618 = vmatpush1.bf16.xpose.msra.mxu0 %v18890_v31  ;;  %17635 = vmatprep.mubr.bf16.mxu0 %v4810_v25  ;;  %v18903_v24 = vcombine.high %v1543_v12, %v1799_v13  ;;  %v18900_v25 = vcombine.low %v1542_v57, %v1798_v58 }
 0x4d9   : > { %v15639_v46 = vpop.f32.mrf.mxu0  ;;  %v15677_v47 = vpop.f32.mrf.mxu1  ;;  %17596 = vmatmul.mubr.bf16.vlgmr.msra.gmra.mxu1 %v4811_v36  ;;  %17697 = vmatprep.subr.bf16.mxu0 %v18895_v37  ;;  %v18905_v31 = vcombine.high %v1544_v19, %v1800_v20  ;;  %v4901_v37 = vrot.slane %v4879_v27, %v20180_v15  ;;  %v18902_v43 = vcombine.low %v1543_v12, %v1799_v13 }
 0x4da   : > { %v15678_v49 = vadd.f32 %v15677_v47, %v15638_v45  ;;  %17658 = vmatpush1.bf16.xpose.msra.mxu1 %v18892_v38  ;;  %17675 = vmatprep.mubr.bf16.mxu1 %v4814_v39  ;;  %v1545_v38 = vld [vmem:[%s20167_s28 + $0x7b0] sm:$0xff]  ;;  %v1802_v45 = vld [vmem:[%s20167_s28 + $0xfb8] sm:$0x11] }
 0x4db   : > { %v15640_v54 = vpop.f32.mrf.mxu0  ;;  %v15679_v55 = vpop.f32.mrf.mxu1  ;;  %17737 = vmatprep.subr.bf16.mxu1 %v18897_v44  ;;  %v1801_v39 = vld [vmem:[%s20167_s28 + $0xfb0] sm:$0x11]  ;;  %v1546_v44 = vld [vmem:[%s20167_s28 + $0x7b8] sm:$0xff]  ;;  %v4911_v51 = vcombine.high %v4901_v37, %v4901_v37 }
 0x4dc   : > { %v18909_v55 = vcombine.high %v1546_v44, %v1802_v45 }
 0x4dd   : > { %v15641_v59 = vpop.f32.mrf.mxu0  ;;  %v15680_v60 = vpop.f32.mrf.mxu1 }
 0x4de   : > { %v4887_v60 = vrot.slane %v4871_v14, %v20180_v15 }
 0x4df   : > { %v15681_v2 = vpop.f32.mrf.mxu1  ;;  %v15717_v3 = vpop.f32.mrf.mxu0  ;;  %17636 = vmatmul.mubr.bf16.vlgmr.msra.gmra.mxu0 %v4796_v48  ;;  %v4861_v48 = vcombine.high %v4845_v35, %v4845_v35 }
 0x4e0   : > { %v15718_v6 = vadd.f32 %v15717_v3, %v15678_v49  ;;  %17698 = vmatpush1.bf16.xpose.msra.mxu0 %v18894_v56  ;;  %17715 = vmatprep.mubr.bf16.mxu0 %v4852_v50  ;;  %v18907_v49 = vcombine.high %v1545_v38, %v1801_v39  ;;  %v18904_v50 = vcombine.low %v1544_v19, %v1800_v20  ;;  %v1297_v56 = vld [vmem:[%s20178_s3 + $0x1f0] sm:$0xff] }
 0x4e1   : > { %v15719_v7 = vpop.f32.mrf.mxu0  ;;  %v15757_v8 = vpop.f32.mrf.mxu1  ;;  %17676 = vmatmul.mubr.bf16.vlgmr.msra.gmra.mxu1 %v4812_v61  ;;  %17777 = vmatprep.subr.bf16.mxu0 %v18899_v62  ;;  %v4908_v62 = vrot.slane %v4880_v52, %v20180_v15  ;;  %v4920_v1 = vrot.slane %v1297_v56, %v20180_v15  ;;  %v4913_v14 = vcombine.high %v1297_v56, %v1297_v56  ;;  %v1552_v56 = vld [vmem:[%s20167_s28 + $0x7e8] sm:$0xff] }
 0x4e2   : > { %v15758_v10 = vadd.f32 %v15757_v8, %v15718_v6  ;;  %17738 = vmatpush1.bf16.xpose.msra.mxu1 %v18896_v63  ;;  %17755 = vmatprep.mubr.bf16.mxu1 %v4862_v0  ;;  %v1547_v63 = vld [vmem:[%s20167_s28 + $0x7c0] sm:$0xff]  ;;  %v1804_v6 = vld [vmem:[%s20167_s28 + $0xfc8] sm:$0x11] }
 0x4e3   : > { %v15720_v16 = vpop.f32.mrf.mxu0  ;;  %v15759_v17 = vpop.f32.mrf.mxu1  ;;  %17817 = vmatprep.subr.bf16.mxu1 %v18901_v4  ;;  %v1803_v0 = vld [vmem:[%s20167_s28 + $0xfc0] sm:$0x11]  ;;  %v18906_v4 = vcombine.low %v1545_v38, %v1801_v39  ;;  %v4912_v12 = vcombine.high %v4908_v62, %v4908_v62  ;;  %v4928_v13 = vcombine.high %v4920_v1, %v4920_v1  ;;  %v4927_v27 = vrot.slane %v4913_v14, %v20180_v15 }
 0x4e5   : > { %v15721_v21 = vpop.f32.mrf.mxu0  ;;  %v15760_v22 = vpop.f32.mrf.mxu1  ;;  %v4929_v39 = vcombine.high %v4927_v27, %v4927_v27 }
 0x4e6   : > { %v4894_v22 = vrot.slane %v4878_v40, %v20180_v15 }
 0x4e7   : > { %v15761_v29 = vpop.f32.mrf.mxu1  ;;  %v15797_v30 = vpop.f32.mrf.mxu0  ;;  %17716 = vmatmul.mubr.bf16.vlgmr.msra.gmra.mxu0 %v4838_v9  ;;  %v4909_v9 = vcombine.high %v4887_v60, %v4887_v60 }
 0x4e8   : > { %v15798_v32 = vadd.f32 %v15797_v30, %v15758_v10  ;;  %17778 = vmatpush1.bf16.xpose.msra.mxu0 %v18898_v18  ;;  %17795 = vmatprep.mubr.bf16.mxu0 %v4859_v11  ;;  %v18911_v10 = vcombine.high %v1547_v63, %v1803_v0  ;;  %v18908_v11 = vcombine.low %v1546_v44, %v1802_v45 }
 0x4e9   : > { %v15799_v33 = vpop.f32.mrf.mxu0  ;;  %v15837_v34 = vpop.f32.mrf.mxu1  ;;  %17756 = vmatmul.mubr.bf16.vlgmr.msra.gmra.mxu1 %v4860_v23  ;;  %17857 = vmatprep.subr.bf16.mxu0 %v18903_v24  ;;  %v18913_v18 = vcombine.high %v1548_v5, %v1804_v6  ;;  %v4950_v24 = vrot.slane %v4928_v13, %v20180_v15  ;;  %v18910_v30 = vcombine.low %v1547_v63, %v1803_v0 }
 0x4ea   : > { %v15838_v36 = vadd.f32 %v15837_v34, %v15798_v32  ;;  %17818 = vmatpush1.bf16.xpose.msra.mxu1 %v18900_v25  ;;  %17835 = vmatprep.mubr.bf16.mxu1 %v4863_v26  ;;  %v1549_v25 = vld [vmem:[%s20167_s28 + $0x7d0] sm:$0xff]  ;;  %v1806_v32 = vld [vmem:[%s20167_s28 + $0xfd8] sm:$0x11] }
 0x4eb   : > { %v15800_v41 = vpop.f32.mrf.mxu0  ;;  %v15839_v42 = vpop.f32.mrf.mxu1  ;;  %17897 = vmatprep.subr.bf16.mxu1 %v18905_v31  ;;  %v1805_v26 = vld [vmem:[%s20167_s28 + $0xfd0] sm:$0x11]  ;;  %v1550_v31 = vld [vmem:[%s20167_s28 + $0x7d8] sm:$0xff]  ;;  %v4960_v38 = vcombine.high %v4950_v24, %v4950_v24 }
 0x4ec   : > { %v18917_v42 = vcombine.high %v1550_v31, %v1806_v32 }
 0x4ed   : > { %v15801_v46 = vpop.f32.mrf.mxu0  ;;  %v15840_v47 = vpop.f32.mrf.mxu1 }
 0x4ee   : > { %v4936_v47 = vrot.slane %v4920_v1, %v20180_v15 }
 0x4ef   : > { %v15841_v53 = vpop.f32.mrf.mxu1  ;;  %v15877_v54 = vpop.f32.mrf.mxu0  ;;  %17796 = vmatmul.mubr.bf16.vlgmr.msra.gmra.mxu0 %v4845_v35  ;;  %v4910_v35 = vcombine.high %v4894_v22, %v4894_v22 }
 0x4f0   : > { %v15878_v57 = vadd.f32 %v15877_v54, %v15838_v36  ;;  %17858 = vmatpush1.bf16.xpose.msra.mxu0 %v18902_v43  ;;  %17875 = vmatprep.mubr.bf16.mxu0 %v4901_v37  ;;  %v18915_v36 = vcombine.high %v1549_v25, %v1805_v26  ;;  %v18912_v37 = vcombine.low %v1548_v5, %v1804_v6  ;;  %v1298_v43 = vld [vmem:[%s20178_s3 + $0x1f8] sm:$0xff] }
 0x4f1   : > { %v15879_v58 = vpop.f32.mrf.mxu0  ;;  %v15917_v59 = vpop.f32.mrf.mxu1  ;;  %17836 = vmatmul.mubr.bf16.vlgmr.msra.gmra.mxu1 %v4861_v48  ;;  %17937 = vmatprep.subr.bf16.mxu0 %v18907_v49  ;;  %v4957_v49 = vrot.slane %v4929_v39, %v20180_v15  ;;  %v4969_v52 = vrot.slane %v1298_v43, %v20180_v15  ;;  %v4962_v1 = vcombine.high %v1298_v43, %v1298_v43 }
 0x4f2   : > { %v15918_v61 = vadd.f32 %v15917_v59, %v15878_v57  ;;  %17898 = vmatpush1.bf16.xpose.msra.mxu1 %v18904_v50  ;;  %17915 = vmatprep.mubr.bf16.mxu1 %v4911_v51  ;;  %v1551_v50 = vld [vmem:[%s20167_s28 + $0x7e0] sm:$0xff]  ;;  %v1808_v57 = vld [vmem:[%s20167_s28 + $0xfe8] sm:$0x11] }
 0x4f3   : > { %v15880_v2 = vpop.f32.mrf.mxu0  ;;  %v15919_v3 = vpop.f32.mrf.mxu1  ;;  %17977 = vmatprep.subr.bf16.mxu1 %v18909_v55  ;;  %v1807_v51 = vld [vmem:[%s20167_s28 + $0xfe0] sm:$0x11]  ;;  %v18914_v55 = vcombine.low %v1549_v25, %v1805_v26  ;;  %v4961_v63 = vcombine.high %v4957_v49, %v4957_v49  ;;  %v4977_v0 = vcombine.high %v4969_v52, %v4969_v52  ;;  %v4976_v13 = vrot.slane %v4962_v1, %v20180_v15 }
 0x4f5   : > { %v15881_v7 = vpop.f32.mrf.mxu0  ;;  %v15920_v8 = vpop.f32.mrf.mxu1  ;;  %v4978_v26 = vcombine.high %v4976_v13, %v4976_v13 }
 0x4f6   : > { %v4943_v8 = vrot.slane %v4927_v27, %v20180_v15 }
 0x4f7   : > { %v15921_v16 = vpop.f32.mrf.mxu1  ;;  %v15957_v17 = vpop.f32.mrf.mxu0  ;;  %17876 = vmatmul.mubr.bf16.vlgmr.msra.gmra.mxu0 %v4887_v60  ;;  %v4958_v60 = vcombine.high %v4936_v47, %v4936_v47 }
 0x4f8   : > { %v15958_v19 = vadd.f32 %v15957_v17, %v15918_v61  ;;  %17938 = vmatpush1.bf16.xpose.msra.mxu0 %v18906_v4  ;;  %17955 = vmatprep.mubr.bf16.mxu0 %v4908_v62  ;;  %v18919_v61 = vcombine.high %v1551_v50, %v1807_v51  ;;  %v18916_v62 = vcombine.low %v1550_v31, %v1806_v32 }
 0x4f9   : > { %v15959_v20 = vpop.f32.mrf.mxu0  ;;  %v15997_v21 = vpop.f32.mrf.mxu1  ;;  %17916 = vmatmul.mubr.bf16.vlgmr.msra.gmra.mxu1 %v4909_v9  ;;  %18017 = vmatprep.subr.bf16.mxu0 %v18911_v10  ;;  %v18921_v4 = vcombine.high %v1552_v56, %v1808_v57  ;;  %v4999_v10 = vrot.slane %v4977_v0, %v20180_v15  ;;  %v18918_v17 = vcombine.low %v1551_v50, %v1807_v51 }
 0x4fa   : > { %v15998_v23 = vadd.f32 %v15997_v21, %v15958_v19  ;;  %17978 = vmatpush1.bf16.xpose.msra.mxu1 %v18908_v11  ;;  %17995 = vmatprep.mubr.bf16.mxu1 %v4912_v12  ;;  %v1553_v11 = vld [vmem:[%s20167_s28 + $0x7f0] sm:$0xff]  ;;  %v1810_v19 = vld [vmem:[%s20167_s28 + $0xff8] sm:$0x11] }
 0x4fb   : > { %v15960_v28 = vpop.f32.mrf.mxu0  ;;  %v15999_v29 = vpop.f32.mrf.mxu1  ;;  %18057 = vmatprep.subr.bf16.mxu1 %v18913_v18  ;;  %v1809_v12 = vld [vmem:[%s20167_s28 + $0xff0] sm:$0x11]  ;;  %v1554_v18 = vld [vmem:[%s20167_s28 + $0x7f8] sm:$0xff]  ;;  %v5009_v25 = vcombine.high %v4999_v10, %v4999_v10 }
 0x4fc   : > { %v18925_v29 = vcombine.high %v1554_v18, %v1810_v19 }
 0x4fd   : > { %v15961_v33 = vpop.f32.mrf.mxu0  ;;  %v16000_v34 = vpop.f32.mrf.mxu1 }
 0x4fe   : > { %v4985_v33 = vrot.slane %v4969_v52, %v20180_v15 }
 0x4ff   : > { %v16001_v40 = vpop.f32.mrf.mxu1  ;;  %v16037_v41 = vpop.f32.mrf.mxu0  ;;  %17956 = vmatmul.mubr.bf16.vlgmr.msra.gmra.mxu0 %v4894_v22  ;;  %v4959_v22 = vcombine.high %v4943_v8, %v4943_v8 }
 0x500   : > { %v16038_v44 = vadd.f32 %v16037_v41, %v15998_v23  ;;  %18018 = vmatpush1.bf16.xpose.msra.mxu0 %v18910_v30  ;;  %18035 = vmatprep.mubr.bf16.mxu0 %v4950_v24  ;;  %v18923_v23 = vcombine.high %v1553_v11, %v1809_v12  ;;  %v18920_v24 = vcombine.low %v1552_v56, %v1808_v57 }
 0x501   : > { %v16039_v45 = vpop.f32.mrf.mxu0  ;;  %v16077_v46 = vpop.f32.mrf.mxu1  ;;  %17996 = vmatmul.mubr.bf16.vlgmr.msra.gmra.mxu1 %v4910_v35  ;;  %18097 = vmatprep.subr.bf16.mxu0 %v18915_v36  ;;  %v5006_v35 = vrot.slane %v4978_v26, %v20180_v15  ;;  %v5007_v41 = vcombine.high %v4985_v33, %v4985_v33 }
 0x502   : > { %v16078_v48 = vadd.f32 %v16077_v46, %v16038_v44  ;;  %18058 = vmatpush1.bf16.xpose.msra.mxu1 %v18912_v37  ;;  %18075 = vmatprep.mubr.bf16.mxu1 %v4960_v38  ;;  %v18922_v38 = vcombine.low %v1553_v11, %v1809_v12 }
 0x503   : > { %v16040_v53 = vpop.f32.mrf.mxu0  ;;  %v16079_v54 = vpop.f32.mrf.mxu1  ;;  %18137 = vmatprep.subr.bf16.mxu1 %v18917_v42  ;;  %v18924_v42 = vcombine.low %v1554_v18, %v1810_v19  ;;  %v5010_v43 = vcombine.high %v5006_v35, %v5006_v35 }
 0x505   : > { %v16041_v58 = vpop.f32.mrf.mxu0  ;;  %v16080_v59 = vpop.f32.mrf.mxu1 }
 0x507   : > { %v16081_v2 = vpop.f32.mrf.mxu1  ;;  %v16117_v3 = vpop.f32.mrf.mxu0  ;;  %18036 = vmatmul.mubr.bf16.vlgmr.msra.gmra.mxu0 %v4936_v47 }
 0x508   : > { %v16118_v5 = vadd.f32 %v16117_v3, %v16078_v48  ;;  %18098 = vmatpush1.bf16.xpose.msra.mxu0 %v18914_v55  ;;  %18115 = vmatprep.mubr.bf16.mxu0 %v4957_v49  ;;  %v4992_v49 = vrot.slane %v4976_v13, %v20180_v15 }
 0x509   : > { %v16119_v6 = vpop.f32.mrf.mxu0  ;;  %v16157_v7 = vpop.f32.mrf.mxu1  ;;  %18076 = vmatmul.mubr.bf16.vlgmr.msra.gmra.mxu1 %v4958_v60  ;;  %18177 = vmatprep.subr.bf16.mxu0 %v18919_v61 }
 0x50a   : > { %v16158_v9 = vadd.f32 %v16157_v7, %v16118_v5  ;;  %18138 = vmatpush1.bf16.xpose.msra.mxu1 %v18916_v62  ;;  %18155 = vmatprep.mubr.bf16.mxu1 %v4961_v63  ;;  %v5008_v55 = vcombine.high %v4992_v49, %v4992_v49 }
 0x50b   : > { %v16120_v14 = vpop.f32.mrf.mxu0  ;;  %v16159_v16 = vpop.f32.mrf.mxu1  ;;  %18217 = vmatprep.subr.bf16.mxu1 %v18921_v4 }
 0x50d   : > { %v16121_v20 = vpop.f32.mrf.mxu0  ;;  %v16160_v21 = vpop.f32.mrf.mxu1 }
 0x50f   : > { %v16161_v27 = vpop.f32.mrf.mxu1  ;;  %v16197_v28 = vpop.f32.mrf.mxu0  ;;  %18116 = vmatmul.mubr.bf16.vlgmr.msra.gmra.mxu0 %v4943_v8 }
 0x510   : > { %v16198_v30 = vadd.f32 %v16197_v28, %v16158_v9  ;;  %18178 = vmatpush1.bf16.xpose.msra.mxu0 %v18918_v17  ;;  %18195 = vmatprep.mubr.bf16.mxu0 %v4999_v10 }
 0x511   : > { %v16199_v31 = vpop.f32.mrf.mxu0  ;;  %v16237_v32 = vpop.f32.mrf.mxu1  ;;  %18156 = vmatmul.mubr.bf16.vlgmr.msra.gmra.mxu1 %v4959_v22  ;;  %18257 = vmatprep.subr.bf16.mxu0 %v18923_v23 }
 0x512   : > { %v16238_v34 = vadd.f32 %v16237_v32, %v16198_v30  ;;  %18218 = vmatpush1.bf16.xpose.msra.mxu1 %v18920_v24  ;;  %18235 = vmatprep.mubr.bf16.mxu1 %v5009_v25 }
 0x513   : > { %v16200_v36 = vpop.f32.mrf.mxu0  ;;  %v16239_v37 = vpop.f32.mrf.mxu1  ;;  %18297 = vmatprep.subr.bf16.mxu1 %v18925_v29 }
 0x515   : > { %v16201_v39 = vpop.f32.mrf.mxu0  ;;  %v16240_v40 = vpop.f32.mrf.mxu1 }
 0x517   : > { %v16241_v44 = vpop.f32.mrf.mxu1  ;;  %v16277_v45 = vpop.f32.mrf.mxu0  ;;  %18196 = vmatmul.mubr.bf16.vlgmr.msra.gmra.mxu0 %v4985_v33 }
 0x518   : > { %v16278_v46 = vadd.f32 %v16277_v45, %v16238_v34  ;;  %18258 = vmatpush1.bf16.xpose.msra.mxu0 %v18922_v38  ;;  %18275 = vmatprep.mubr.bf16.mxu0 %v5006_v35 }
 0x519   : > { %v16279_v47 = vpop.f32.mrf.mxu0  ;;  %v16317_v48 = vpop.f32.mrf.mxu1  ;;  %18236 = vmatmul.mubr.bf16.vlgmr.msra.gmra.mxu1 %v5007_v41 }
 0x51a   : > { %v16318_v50 = vadd.f32 %v16317_v48, %v16278_v46  ;;  %18298 = vmatpush1.bf16.xpose.msra.mxu1 %v18924_v42  ;;  %18315 = vmatprep.mubr.bf16.mxu1 %v5010_v43 }
 0x51b   : > { %v16280_v51 = vpop.f32.mrf.mxu0  ;;  %v16319_v52 = vpop.f32.mrf.mxu1 }
 0x51d   : > { %v16281_v53 = vpop.f32.mrf.mxu0  ;;  %v16320_v54 = vpop.f32.mrf.mxu1 }
 0x51f   : > { %v16321_v56 = vpop.f32.mrf.mxu1  ;;  %v16357_v57 = vpop.f32.mrf.mxu0  ;;  %18276 = vmatmul.mubr.bf16.vlgmr.msra.gmra.mxu0 %v4992_v49 }
 0x520   : > { %v16358_v58 = vadd.f32 %v16357_v57, %v16318_v50 }
 0x521   : > { %v16359_v59 = vpop.f32.mrf.mxu0  ;;  %v16397_v60 = vpop.f32.mrf.mxu1  ;;  %18316 = vmatmul.mubr.bf16.vlgmr.msra.gmra.mxu1 %v5008_v55 }
 0x522   : > { %v16398_v61 = vadd.f32 %v16397_v60, %v16358_v58 }
 0x523   : > { %v16360_v62 = vpop.f32.mrf.mxu0  ;;  %v16399_v63 = vpop.f32.mrf.mxu1 }
 0x525   : > { %v16361_v0 = vpop.f32.mrf.mxu0  ;;  %v16400_v15 = vpop.f32.mrf.mxu1 }
 0x527   : > { %v16401_v1 = vpop.f32.mrf.mxu1  ;;  %v16437_v2 = vpop.f32.mrf.mxu0 }
 0x528   : > { %v16438_v3 = vadd.f32 %v16437_v2, %v16398_v61 }
 0x529   : > { %v16439_v4 = vpop.f32.mrf.mxu0  ;;  %v16477_v5 = vpop.f32.mrf.mxu1 }
 0x52a   : > { %v16478_v6 = vadd.f32 %v16477_v5, %v16438_v3  ;;  %v19076_v5 = vmov 0.0  }
 0x52b   : > { %v16440_v7 = vpop.f32.mrf.mxu0  ;;  %v16479_v8 = vpop.f32.mrf.mxu1  ;;  %1233 = vst.msk [vmem:[%s21141_s7] sm:$0x3] %vm1232_vm0, %v19076_v5 }
 0x52d   : > { %v16441_v9 = vpop.f32.mrf.mxu0  ;;  %v16480_v10 = vpop.f32.mrf.mxu1 }
 0x52f   : > { %v16481_v11 = vpop.f32.mrf.mxu1  ;;  %v16517_v12 = vpop.f32.mrf.mxu0 }
 0x530   : > { %v16518_v13 = vadd.f32 %v16517_v12, %v16478_v6 }
 0x531   : > { %v16519_v14 = vpop.f32.mrf.mxu0  ;;  %v16557_v16 = vpop.f32.mrf.mxu1 }
 0x532   : > { %v16558_v17 = vadd.f32 %v16557_v16, %v16518_v13 }
 0x533   : > { %v16520_v18 = vpop.f32.mrf.mxu0  ;;  %v16559_v19 = vpop.f32.mrf.mxu1 }
 0x535   : > { %v16521_v20 = vpop.f32.mrf.mxu0  ;;  %v16560_v21 = vpop.f32.mrf.mxu1 }
 0x537   : > { %v16561_v22 = vpop.f32.mrf.mxu1  ;;  %v16597_v23 = vpop.f32.mrf.mxu0 }
 0x538   : > { %v16598_v24 = vadd.f32 %v16597_v23, %v16558_v17 }
 0x539   : > { %v16599_v25 = vpop.f32.mrf.mxu0  ;;  %v16637_v26 = vpop.f32.mrf.mxu1 }
 0x53a   : > { %v16638_v27 = vadd.f32 %v16637_v26, %v16598_v24 }
 0x53b   : > { %v16600_v28 = vpop.f32.mrf.mxu0  ;;  %v16639_v29 = vpop.f32.mrf.mxu1 }
 0x53d   : > { %v16601_v30 = vpop.f32.mrf.mxu0  ;;  %v16640_v31 = vpop.f32.mrf.mxu1 }
 0x53f   : > { %v16641_v32 = vpop.f32.mrf.mxu1  ;;  %v16677_v33 = vpop.f32.mrf.mxu0 }
 0x540   : > { %v16678_v34 = vadd.f32 %v16677_v33, %v16638_v27 }
 0x541   : > { %v16679_v35 = vpop.f32.mrf.mxu0  ;;  %v16717_v36 = vpop.f32.mrf.mxu1 }
 0x542   : > { %v16718_v37 = vadd.f32 %v16717_v36, %v16678_v34 }
 0x543   : > { %v16680_v38 = vpop.f32.mrf.mxu0  ;;  %v16719_v39 = vpop.f32.mrf.mxu1 }
 0x545   : > { %v16681_v40 = vpop.f32.mrf.mxu0  ;;  %v16720_v41 = vpop.f32.mrf.mxu1 }
 0x547   : > { %v16721_v42 = vpop.f32.mrf.mxu1  ;;  %v16757_v43 = vpop.f32.mrf.mxu0 }
 0x548   : > { %v16758_v44 = vadd.f32 %v16757_v43, %v16718_v37 }
 0x549   : > { %v16759_v45 = vpop.f32.mrf.mxu0  ;;  %v16797_v46 = vpop.f32.mrf.mxu1 }
 0x54a   : > { %v16798_v47 = vadd.f32 %v16797_v46, %v16758_v44 }
 0x54b   : > { %v16760_v48 = vpop.f32.mrf.mxu0  ;;  %v16799_v49 = vpop.f32.mrf.mxu1 }
 0x54d   : > { %v16761_v50 = vpop.f32.mrf.mxu0  ;;  %v16800_v51 = vpop.f32.mrf.mxu1 }
 0x54f   : > { %v16801_v52 = vpop.f32.mrf.mxu1  ;;  %v16837_v53 = vpop.f32.mrf.mxu0 }
 0x550   : > { %v16838_v54 = vadd.f32 %v16837_v53, %v16798_v47 }
 0x551   : > { %v16839_v55 = vpop.f32.mrf.mxu0  ;;  %v16877_v56 = vpop.f32.mrf.mxu1 }
 0x552   : > { %v16878_v57 = vadd.f32 %v16877_v56, %v16838_v54 }
 0x553   : > { %v16840_v58 = vpop.f32.mrf.mxu0  ;;  %v16879_v59 = vpop.f32.mrf.mxu1 }
 0x555   : > { %v16841_v60 = vpop.f32.mrf.mxu0  ;;  %v16880_v61 = vpop.f32.mrf.mxu1 }
 0x557   : > { %v16881_v62 = vpop.f32.mrf.mxu1  ;;  %v16917_v63 = vpop.f32.mrf.mxu0 }
 0x558   : > { %v16918_v0 = vadd.f32 %v16917_v63, %v16878_v57 }
 0x559   : > { %v16919_v15 = vpop.f32.mrf.mxu0  ;;  %v16957_v1 = vpop.f32.mrf.mxu1 }
 0x55a   : > { %v16958_v2 = vadd.f32 %v16957_v1, %v16918_v0 }
 0x55b   : > { %v16920_v3 = vpop.f32.mrf.mxu0  ;;  %v16959_v4 = vpop.f32.mrf.mxu1 }
 0x55d   : > { %v16921_v6 = vpop.f32.mrf.mxu0  ;;  %v16960_v7 = vpop.f32.mrf.mxu1 }
 0x55f   : > { %v16961_v8 = vpop.f32.mrf.mxu1  ;;  %v16997_v9 = vpop.f32.mrf.mxu0 }
 0x560   : > { %v16998_v10 = vadd.f32 %v16997_v9, %v16958_v2 }
 0x561   : > { %v16999_v11 = vpop.f32.mrf.mxu0  ;;  %v17037_v12 = vpop.f32.mrf.mxu1 }
 0x562   : > { %v17038_v13 = vadd.f32 %v17037_v12, %v16998_v10 }
 0x563   : > { %v17000_v14 = vpop.f32.mrf.mxu0  ;;  %v17039_v16 = vpop.f32.mrf.mxu1 }
 0x565   : > { %v17001_v17 = vpop.f32.mrf.mxu0  ;;  %v17040_v18 = vpop.f32.mrf.mxu1 }
 0x567   : > { %v17041_v19 = vpop.f32.mrf.mxu1  ;;  %v17077_v20 = vpop.f32.mrf.mxu0 }
 0x568   : > { %v17078_v51 = vadd.f32 %v17077_v20, %v17038_v13 }
 0x569   : > { %v17079_v21 = vpop.f32.mrf.mxu0  ;;  %v17117_v22 = vpop.f32.mrf.mxu1 }
 0x56a   : > { %v17118_v56 = vadd.f32 %v17117_v22, %v17078_v51 }
 0x56b   : > { %v17080_v23 = vpop.f32.mrf.mxu0  ;;  %v17119_v24 = vpop.f32.mrf.mxu1 }
 0x56d   : > { %v17081_v25 = vpop.f32.mrf.mxu0  ;;  %v17120_v26 = vpop.f32.mrf.mxu1 }
 0x56f   : > { %v17121_v27 = vpop.f32.mrf.mxu1  ;;  %v17157_v28 = vpop.f32.mrf.mxu0 }
 0x570   : > { %v17158_v59 = vadd.f32 %v17157_v28, %v17118_v56 }
 0x571   : > { %v17159_v29 = vpop.f32.mrf.mxu0  ;;  %v17197_v30 = vpop.f32.mrf.mxu1 }
 0x572   : > { %v17198_v0 = vadd.f32 %v17197_v30, %v17158_v59 }
 0x573   : > { %v17160_v31 = vpop.f32.mrf.mxu0  ;;  %v17199_v32 = vpop.f32.mrf.mxu1 }
 0x575   : > { %v17161_v33 = vpop.f32.mrf.mxu0  ;;  %v17200_v34 = vpop.f32.mrf.mxu1 }
 0x577   : > { %v17201_v35 = vpop.f32.mrf.mxu1  ;;  %v17237_v36 = vpop.f32.mrf.mxu0 }
 0x578   : > { %v17238_v2 = vadd.f32 %v17237_v36, %v17198_v0 }
 0x579   : > { %v17239_v37 = vpop.f32.mrf.mxu0  ;;  %v17277_v38 = vpop.f32.mrf.mxu1 }
 0x57a   : > { %v17278_v7 = vadd.f32 %v17277_v38, %v17238_v2 }
 0x57b   : > { %v17240_v39 = vpop.f32.mrf.mxu0  ;;  %v17279_v40 = vpop.f32.mrf.mxu1 }
 0x57d   : > { %v17241_v41 = vpop.f32.mrf.mxu0  ;;  %v17280_v42 = vpop.f32.mrf.mxu1 }
 0x57f   : > { %v17281_v43 = vpop.f32.mrf.mxu1  ;;  %v17317_v44 = vpop.f32.mrf.mxu0 }
 0x580   : > { %v17318_v10 = vadd.f32 %v17317_v44, %v17278_v7 }
 0x581   : > { %v17319_v45 = vpop.f32.mrf.mxu0  ;;  %v17357_v46 = vpop.f32.mrf.mxu1 }
 0x582   : > { %v17358_v16 = vadd.f32 %v17357_v46, %v17318_v10 }
 0x583   : > { %v17320_v47 = vpop.f32.mrf.mxu0  ;;  %v17359_v48 = vpop.f32.mrf.mxu1 }
 0x585   : > { %v17321_v49 = vpop.f32.mrf.mxu0  ;;  %v17360_v50 = vpop.f32.mrf.mxu1 }
 0x587   : > { %v17361_v52 = vpop.f32.mrf.mxu1  ;;  %v17397_v53 = vpop.f32.mrf.mxu0 }
 0x588   : > { %v17398_v19 = vadd.f32 %v17397_v53, %v17358_v16 }
 0x589   : > { %v17399_v54 = vpop.f32.mrf.mxu0  ;;  %v17437_v55 = vpop.f32.mrf.mxu1 }
 0x58a   : > { %v17438_v24 = vadd.f32 %v17437_v55, %v17398_v19 }
 0x58b   : > { %v17400_v57 = vpop.f32.mrf.mxu0  ;;  %v17439_v58 = vpop.f32.mrf.mxu1 }
 0x58d   : > { %v17401_v60 = vpop.f32.mrf.mxu0  ;;  %v17440_v61 = vpop.f32.mrf.mxu1 }
 0x58f   : > { %v17441_v62 = vpop.f32.mrf.mxu1  ;;  %v17477_v63 = vpop.f32.mrf.mxu0 }
 0x590   : > { %v17478_v27 = vadd.f32 %v17477_v63, %v17438_v24 }
 0x591   : > { %v17479_v15 = vpop.f32.mrf.mxu0  ;;  %v17517_v1 = vpop.f32.mrf.mxu1 }
 0x592   : > { %v17518_v32 = vadd.f32 %v17517_v1, %v17478_v27 }
 0x593   : > { %v17480_v3 = vpop.f32.mrf.mxu0  ;;  %v17519_v4 = vpop.f32.mrf.mxu1 }
 0x595   : > { %v17481_v5 = vpop.f32.mrf.mxu0  ;;  %v17520_v6 = vpop.f32.mrf.mxu1 }
 0x597   : > { %v17521_v8 = vpop.f32.mrf.mxu1  ;;  %v17557_v9 = vpop.f32.mrf.mxu0 }
 0x598   : > { %v17558_v35 = vadd.f32 %v17557_v9, %v17518_v32 }
 0x599   : > { %v17559_v11 = vpop.f32.mrf.mxu0  ;;  %v17597_v12 = vpop.f32.mrf.mxu1 }
 0x59a   : > { %v17598_v40 = vadd.f32 %v17597_v12, %v17558_v35 }
 0x59b   : > { %v17560_v13 = vpop.f32.mrf.mxu0  ;;  %v17599_v14 = vpop.f32.mrf.mxu1 }
 0x59d   : > { %v17561_v17 = vpop.f32.mrf.mxu0  ;;  %v17600_v18 = vpop.f32.mrf.mxu1 }
 0x59f   : > { %v17601_v20 = vpop.f32.mrf.mxu1  ;;  %v17637_v21 = vpop.f32.mrf.mxu0 }
 0x5a0   : > { %v17638_v43 = vadd.f32 %v17637_v21, %v17598_v40 }
 0x5a1   : > { %v17639_v22 = vpop.f32.mrf.mxu0  ;;  %v17677_v23 = vpop.f32.mrf.mxu1 }
 0x5a2   : > { %v17678_v48 = vadd.f32 %v17677_v23, %v17638_v43 }
 0x5a3   : > { %v17640_v25 = vpop.f32.mrf.mxu0  ;;  %v17679_v26 = vpop.f32.mrf.mxu1 }
 0x5a5   : > { %v17641_v28 = vpop.f32.mrf.mxu0  ;;  %v17680_v29 = vpop.f32.mrf.mxu1 }
 0x5a7   : > { %v17681_v30 = vpop.f32.mrf.mxu1  ;;  %v17717_v31 = vpop.f32.mrf.mxu0 }
 0x5a8   : > { %v17718_v51 = vadd.f32 %v17717_v31, %v17678_v48 }
 0x5a9   : > { %v17719_v33 = vpop.f32.mrf.mxu0  ;;  %v17757_v34 = vpop.f32.mrf.mxu1 }
 0x5aa   : > { %v17758_v56 = vadd.f32 %v17757_v34, %v17718_v51 }
 0x5ab   : > { %v17720_v36 = vpop.f32.mrf.mxu0  ;;  %v17759_v37 = vpop.f32.mrf.mxu1 }
 0x5ad   : > { %v17721_v38 = vpop.f32.mrf.mxu0  ;;  %v17760_v39 = vpop.f32.mrf.mxu1 }
 0x5af   : > { %v17761_v41 = vpop.f32.mrf.mxu1  ;;  %v17797_v42 = vpop.f32.mrf.mxu0 }
 0x5b0   : > { %v17798_v59 = vadd.f32 %v17797_v42, %v17758_v56 }
 0x5b1   : > { %v17799_v44 = vpop.f32.mrf.mxu0  ;;  %v17837_v45 = vpop.f32.mrf.mxu1 }
 0x5b2   : > { %v17838_v0 = vadd.f32 %v17837_v45, %v17798_v59  ;;  %v1234_v45 = vld [vmem:[%s21141_s7] sm:$0x3] }
 0x5b3   : > { %v17800_v46 = vpop.f32.mrf.mxu0  ;;  %v17839_v47 = vpop.f32.mrf.mxu1 }
 0x5b5   : > { %v17801_v49 = vpop.f32.mrf.mxu0  ;;  %v17840_v50 = vpop.f32.mrf.mxu1 }
 0x5b7   : > { %v17841_v52 = vpop.f32.mrf.mxu1  ;;  %v17877_v53 = vpop.f32.mrf.mxu0 }
 0x5b8   : > { %v17878_v2 = vadd.f32 %v17877_v53, %v17838_v0 }
 0x5b9   : > { %v17879_v54 = vpop.f32.mrf.mxu0  ;;  %v17917_v55 = vpop.f32.mrf.mxu1 }
 0x5ba   : > { %v17918_v7 = vadd.f32 %v17917_v55, %v17878_v2 }
 0x5bb   : > { %v17880_v57 = vpop.f32.mrf.mxu0  ;;  %v17919_v58 = vpop.f32.mrf.mxu1 }
 0x5bd   : > { %v17881_v60 = vpop.f32.mrf.mxu0  ;;  %v17920_v61 = vpop.f32.mrf.mxu1 }
 0x5bf   : > { %v17921_v62 = vpop.f32.mrf.mxu1  ;;  %v17957_v63 = vpop.f32.mrf.mxu0 }
 0x5c0   : > { %v17958_v10 = vadd.f32 %v17957_v63, %v17918_v7 }
 0x5c1   : > { %v17959_v15 = vpop.f32.mrf.mxu0  ;;  %v17997_v1 = vpop.f32.mrf.mxu1 }
 0x5c2   : > { %v17998_v16 = vadd.f32 %v17997_v1, %v17958_v10 }
 0x5c3   : > { %v17960_v3 = vpop.f32.mrf.mxu0  ;;  %v17999_v4 = vpop.f32.mrf.mxu1 }
 0x5c5   : > { %v17961_v5 = vpop.f32.mrf.mxu0  ;;  %v18000_v6 = vpop.f32.mrf.mxu1 }
 0x5c7   : > { %v18001_v8 = vpop.f32.mrf.mxu1  ;;  %v18037_v9 = vpop.f32.mrf.mxu0 }
 0x5c8   : > { %v18038_v19 = vadd.f32 %v18037_v9, %v17998_v16 }
 0x5c9   : > { %v18039_v11 = vpop.f32.mrf.mxu0  ;;  %v18077_v12 = vpop.f32.mrf.mxu1 }
 0x5ca   : > { %v18078_v24 = vadd.f32 %v18077_v12, %v18038_v19 }
 0x5cb   : > { %v18040_v13 = vpop.f32.mrf.mxu0  ;;  %v18079_v14 = vpop.f32.mrf.mxu1 }
 0x5cd   : > { %v18041_v17 = vpop.f32.mrf.mxu0  ;;  %v18080_v18 = vpop.f32.mrf.mxu1 }
 0x5cf   : > { %v18081_v20 = vpop.f32.mrf.mxu1  ;;  %v18117_v21 = vpop.f32.mrf.mxu0 }
 0x5d0   : > { %v18118_v27 = vadd.f32 %v18117_v21, %v18078_v24 }
 0x5d1   : > { %v18119_v22 = vpop.f32.mrf.mxu0  ;;  %v18157_v23 = vpop.f32.mrf.mxu1 }
 0x5d2   : > { %v18158_v32 = vadd.f32 %v18157_v23, %v18118_v27 }
 0x5d3   : > { %v18120_v25 = vpop.f32.mrf.mxu0  ;;  %v18159_v26 = vpop.f32.mrf.mxu1 }
 0x5d5   : > { %v18121_v28 = vpop.f32.mrf.mxu0  ;;  %v18160_v29 = vpop.f32.mrf.mxu1 }
 0x5d7   : > { %v18161_v30 = vpop.f32.mrf.mxu1  ;;  %v18197_v31 = vpop.f32.mrf.mxu0 }
 0x5d8   : > { %v18198_v35 = vadd.f32 %v18197_v31, %v18158_v32 }
 0x5d9   : > { %v18199_v33 = vpop.f32.mrf.mxu0  ;;  %v18237_v34 = vpop.f32.mrf.mxu1 }
 0x5da   : > { %v18238_v40 = vadd.f32 %v18237_v34, %v18198_v35 }
 0x5db   : > { %v18200_v36 = vpop.f32.mrf.mxu0  ;;  %v18239_v37 = vpop.f32.mrf.mxu1 }
 0x5dd   : > { %v18201_v38 = vpop.f32.mrf.mxu0  ;;  %v18240_v39 = vpop.f32.mrf.mxu1 }
 0x5df   : > { %v18241_v41 = vpop.f32.mrf.mxu1  ;;  %v18277_v42 = vpop.f32.mrf.mxu0 }
 0x5e0   : > { %v18278_v43 = vadd.f32 %v18277_v42, %v18238_v40 }
 0x5e1   : > { %v18279_v44 = vpop.f32.mrf.mxu0  ;;  %v18317_v46 = vpop.f32.mrf.mxu1 }
 0x5e2   : > { %v18318_v47 = vadd.f32 %v18317_v46, %v18278_v43 }
 0x5e3   : > { %v18280_v48 = vpop.f32.mrf.mxu0  ;;  %v18319_v49 = vpop.f32.mrf.mxu1 }
 0x5e4   : > { %v18323_v50 = vadd.f32 %v18318_v47, %v1234_v45 }
 0x5e5   : > { %v18281_v51 = vpop.f32.mrf.mxu0  ;;  %v18320_v52 = vpop.f32.mrf.mxu1 }
 0x5e6   : > { %18325 = vst.msk [vmem:[%s21141_s7] sm:$0x3] %vm1232_vm0, %v18323_v50 }
 0x5e7   : > { %v18321_v53 = vpop.f32.mrf.mxu1 }
 0x5e8 PF: > { %s12_s13 = sadd.s32 1, %s19073_s13   ;;  %s21166_s9 = smov %s19061_s10 }
 0x5e9   : > { %p9_p11 = scmp.ge.s32.totalorder %s12_s13, 4   ;;  %s21167_s10 = smov %s19127_s17 }
 0x5ea   : > { %s21168_s11 = smov %s19069_s12  ;;  %s21169_s12 = smov %s21171_s14 }
 0x5eb   :  { %11 = sbr.rel (!%p9_p11) target bundleno = 3 (0x3), region = 93 }

</bundles_post_ra>
